<compile_context>
chip_gen: v7x
topology: tpu7x:2x2x1
jax: 0.10.0
libtpu: 0.0.40
codegen_flags: <defaults>
</compile_context>

<pallas_src>
import math
from functools import partial

import numpy as np
import jax
import jax.numpy as jnp
from jax.experimental import pallas as pl
from jax.experimental.pallas import tpu as pltpu

# ----------------------------- small config ----------------------------------
IMG_SIZE = 16
PATCH = 4
IN_CHANS = 3
EMBED_DIM = 32
DEPTH = 2
NUM_HEADS = 4
DEC_EMBED_DIM = 32
DEC_DEPTH = 1
DEC_NUM_HEADS = 4
MLP_RATIO = 4.0
MASK_RATIO = 0.75
NORM_PIX_LOSS = False

NUM_PATCHES = (IMG_SIZE // PATCH) ** 2
LN_EPS = 1e-6  # MixLayerNorm eps

IMAGENET_DEFAULT_MEAN = (0.485, 0.456, 0.406)
IMAGENET_DEFAULT_STD = (0.229, 0.224, 0.225)

EPS_ADV = 2.0 / 255.0
NUM_ITER = 2
STEP_SIZE = EPS_ADV / NUM_ITER
PROB_START_FROM_CLEAN = 0.1
T_CONTRAST = 0.2


# ----------------------------- shared math helpers ----------------------------
def _erf_f32(x):
    # Abramowitz & Stegun 7.1.26, |abs err| <= 1.5e-7 (f32-exact in practice).
    # Only mul/add/div/exp/select -> lowers both in Mosaic and plain XLA.
    p = 0.3275911
    a1, a2, a3, a4, a5 = 0.254829592, -0.284496736, 1.421413741, -1.453152027, 1.061405429
    ax = jnp.abs(x)
    t = 1.0 / (1.0 + p * ax)
    poly = ((((a5 * t + a4) * t + a3) * t + a2) * t + a1) * t
    y = 1.0 - poly * jnp.exp(-ax * ax)
    return jnp.where(x >= 0, y, -y)


def _gelu_exact(x):
    return 0.5 * x * (1.0 + _erf_f32(x * 0.7071067811865476))


# ----------------------------- fused transformer block kernel -----------------
def _block_kernel(x_ref, sel_ref, msk_ref,
                  g1_ref, b1_ref, qkvw_ref, qkvb_ref, projw_ref, projb_ref,
                  g2_ref, b2_ref, fc1w_ref, fc1b_ref, fc2w_ref, fc2b_ref,
                  o_ref, *, num_heads, scale):
    x = x_ref[...]                                  # (rows, D) = whole batch's tokens
    rows, D = x.shape
    Dh = D // num_heads
    sel = sel_ref[...]                              # (rows, 1): 0 -> main LN, 1 -> aux LN

    def mixln(v, g2d, b2d):
        # per-row MixLayerNorm select between main (row 0) and aux (row 1) params
        g = g2d[0:1, :] + sel * (g2d[1:2, :] - g2d[0:1, :])
        b = b2d[0:1, :] + sel * (b2d[1:2, :] - b2d[0:1, :])
        mu = jnp.mean(v, axis=-1, keepdims=True)
        vc = v - mu
        var = jnp.mean(vc * vc, axis=-1, keepdims=True)
        return vc * jax.lax.rsqrt(var + LN_EPS) * g + b

    # ---- attention branch: LN1 -> qkv -> masked per-head softmax -> proj ----
    h = mixln(x, g1_ref[...], b1_ref[...])
    qkv = jnp.dot(h, qkvw_ref[...], preferred_element_type=jnp.float32) + qkvb_ref[...]
    neg = msk_ref[...]                              # (rows, rows): 0 same image, -1e30 cross image
    projw = projw_ref[...]
    acc = None
    for hd in range(num_heads):                     # static unroll (4 heads)
        q = qkv[:, hd * Dh:(hd + 1) * Dh]
        k = qkv[:, D + hd * Dh:D + (hd + 1) * Dh]
        v = qkv[:, 2 * D + hd * Dh:2 * D + (hd + 1) * Dh]
        s = jax.lax.dot_general(q, k, (((1,), (1,)), ((), ())),
                                preferred_element_type=jnp.float32) * scale + neg
        s = s - jnp.max(s, axis=-1, keepdims=True)
        pexp = jnp.exp(s)
        pexp = pexp * pl.reciprocal(jnp.sum(pexp, axis=-1, keepdims=True), approx=True)
        ho = jnp.dot(pexp, v, preferred_element_type=jnp.float32)            # (rows, Dh)
        contrib = jnp.dot(ho, projw[hd * Dh:(hd + 1) * Dh, :],
                          preferred_element_type=jnp.float32)                # (rows, D)
        acc = contrib if acc is None else acc + contrib
    y = x + acc + projb_ref[...]

    # ---- MLP branch: LN2 -> fc1 -> exact GELU -> fc2 ----
    h2 = mixln(y, g2_ref[...], b2_ref[...])
    z = jnp.dot(h2, fc1w_ref[...], preferred_element_type=jnp.float32) + fc1b_ref[...]
    z = _gelu_exact(z)
    o_ref[...] = y + jnp.dot(z, fc2w_ref[...], preferred_element_type=jnp.float32) + fc2b_ref[...]


def _block_call(x2, meta, p, num_heads):
    rows, D = x2.shape
    sel, neg = meta
    hidden = p[8].shape[1]
    Dh = D // num_heads
    scale = Dh ** -0.5
    flops = (2 * rows * D * 3 * D
             + num_heads * (4 * rows * rows * Dh + 2 * rows * Dh * D)
             + 4 * rows * D * hidden)
    trans = num_heads * rows * (rows + 1) + rows * hidden
    nbytes = 4 * (2 * rows * D + rows + rows * rows
                  + sum(int(np.prod(a.shape)) for a in p))
    # No grid: the whole batch, all weights and the mask live in VMEM (<1 MiB total,
    # far below the 64 MiB (v7x) / 128 MiB (v5e/v6e) capacity).
    return pl.pallas_call(
        partial(_block_kernel, num_heads=num_heads, scale=scale),
        out_shape=jax.ShapeDtypeStruct((rows, D), jnp.float32),
        compiler_params=pltpu.CompilerParams(vmem_limit_bytes=32 * 1024 * 1024),
        cost_estimate=pl.CostEstimate(flops=flops, transcendentals=trans,
                                      bytes_accessed=nbytes),
    )(x2, sel, neg, *p)


def _block_ref(x2, meta, p, num_heads):
    # plain-JAX reference, used only inside the custom_vjp backward (recompute).
    sel, neg = meta
    (g1, b1, qkvw, qkvb, projw, projb, g2, b2, fc1w, fc1b, fc2w, fc2b) = p
    rows, D = x2.shape
    Dh = D // num_heads
    scale = Dh ** -0.5

    def mixln(v, g2d, b2d):
        g = g2d[0:1] + sel * (g2d[1:2] - g2d[0:1])
        b = b2d[0:1] + sel * (b2d[1:2] - b2d[0:1])
        mu = v.mean(-1, keepdims=True)
        vc = v - mu
        var = (vc * vc).mean(-1, keepdims=True)
        return vc * jax.lax.rsqrt(var + LN_EPS) * g + b

    h = mixln(x2, g1, b1)
    qkv = h @ qkvw + qkvb
    acc = None
    for hd in range(num_heads):
        q = qkv[:, hd * Dh:(hd + 1) * Dh]
        k = qkv[:, D + hd * Dh:D + (hd + 1) * Dh]
        v = qkv[:, 2 * D + hd * Dh:2 * D + (hd + 1) * Dh]
        s = (q @ k.T) * scale + neg
        pr = jax.nn.softmax(s, axis=-1)
        contrib = (pr @ v) @ projw[hd * Dh:(hd + 1) * Dh, :]
        acc = contrib if acc is None else acc + contrib
    y = x2 + acc + projb
    h2 = mixln(y, g2, b2)
    z = _gelu_exact(h2 @ fc1w + fc1b)
    return y + z @ fc2w + fc2b


@partial(jax.custom_vjp, nondiff_argnums=(3,))
def block_op(x2, meta, p, num_heads):
    return _block_call(x2, meta, p, num_heads)


def _block_fwd(x2, meta, p, num_heads):
    return _block_call(x2, meta, p, num_heads), (x2, meta, p)


def _block_bwd(num_heads, res, g):
    # TODO(synk): residual-reusing fused Pallas backward (currently a plain-JAX
    # recompute that XLA fuses).
    x2, meta, p = res
    _, vjp = jax.vjp(lambda xx, mm, pp: _block_ref(xx, mm, pp, num_heads),
                     x2, meta, p)
    return vjp(g)


block_op.defvjp(_block_fwd, _block_bwd)


# ----------------------------- wrappers / model pieces -------------------------
def _pack_block_params(bp):
    n1, n2 = bp["norm1"], bp["norm2"]
    ap, mp = bp["attn"], bp["mlp"]
    g1 = jnp.stack([n1["main_g"], n1["aux_g"]])      # (2, D): row0=main/clean, row1=aux/adv
    b1 = jnp.stack([n1["main_b"], n1["aux_b"]])
    g2 = jnp.stack([n2["main_g"], n2["aux_g"]])
    b2 = jnp.stack([n2["main_b"], n2["aux_b"]])
    r = lambda v: v.reshape(1, -1)
    return (g1, b1, ap["qkv_w"], r(ap["qkv_b"]), ap["proj_w"], r(ap["proj_b"]),
            g2, b2, mp["fc1_w"], r(mp["fc1_b"]), mp["fc2_w"], r(mp["fc2_b"]))


def block_seq(x, blocks_params, status, num_heads):
    # x: (NB, T, D).  Flatten to (NB*T, D), run the whole stack of fused block
    # kernels on the full batch in a single invocation each (no grid).
    NB, T, D = x.shape
    rows = NB * T
    # static cross-image block-diagonal additive mask (numpy -> baked constant)
    img_of_row = np.repeat(np.arange(NB), T)
    neg = jnp.asarray(np.where(img_of_row[:, None] == img_of_row[None, :],
                               0.0, -1e30).astype(np.float32))
    if status == "clean":
        sel_np = np.zeros((rows, 1), np.float32)
    elif status == "adv":
        sel_np = np.ones((rows, 1), np.float32)
    else:  # "mix": first half of the batch = clean (main LN), second half = adv (aux LN)
        sel_img = np.concatenate([np.zeros(NB // 2), np.ones(NB - NB // 2)])
        sel_np = np.repeat(sel_img, T).reshape(rows, 1).astype(np.float32)
    meta = (jnp.asarray(sel_np), neg)
    x2 = x.reshape(rows, D)
    for bp in blocks_params:
        x2 = block_op(x2, meta, _pack_block_params(bp), num_heads)
    return x2.reshape(NB, T, D)


def mix_layernorm(x, lnp, status):
    # final MixLayerNorm: left as plain jnp so XLA fuses it with surrounding ops
    def ln(v, g, b):
        mu = v.mean(-1, keepdims=True)
        vc = v - mu
        var = (vc * vc).mean(-1, keepdims=True)
        return vc * jax.lax.rsqrt(var + LN_EPS) * g + b
    if status == "mix":
        half = x.shape[0] // 2
        return jnp.concatenate([ln(x[:half], lnp["main_g"], lnp["main_b"]),
                                ln(x[half:], lnp["aux_g"], lnp["aux_b"])], axis=0)
    if status == "adv":
        return ln(x, lnp["aux_g"], lnp["aux_b"])
    return ln(x, lnp["main_g"], lnp["main_b"])


def patchify(imgs, p):
    N, C, H, W = imgs.shape
    h = w = H // p
    x = imgs.reshape(N, C, h, p, w, p)
    x = jnp.transpose(x, (0, 2, 4, 3, 5, 1))   # nchpwq -> nhwpqc
    return x.reshape(N, h * w, p * p * C)


def patch_embed(imgs, pep, p):
    # Conv2d(C, D, kernel=p, stride=p) == per-patch linear on (c,i,j)-flattened pixels.
    # Plain jnp: XLA fuses this tiny op with the surrounding gathers/concats.
    N, C, H, W = imgs.shape
    h = w = H // p
    x = imgs.reshape(N, C, h, p, w, p)
    x = jnp.transpose(x, (0, 2, 4, 1, 3, 5))   # (n, h, w, c, p, q)
    x = x.reshape(N, h * w, C * p * p)
    return x @ pep["w"] + pep["b"]


def random_masking_w_noise(x, mask_ratio, noise):
    N, L, D = x.shape
    len_keep = int(L * (1 - mask_ratio))
    ids_shuffle = jnp.argsort(noise, axis=1)
    ids_restore = jnp.argsort(ids_shuffle, axis=1)
    ids_keep = ids_shuffle[:, :len_keep]
    x_masked = jnp.take_along_axis(x, ids_keep[:, :, None], axis=1)
    mask = jnp.ones((N, L), dtype=x.dtype)
    mask = mask.at[:, :len_keep].set(0.0)
    mask = jnp.take_along_axis(mask, ids_restore, axis=1)
    return x_masked, mask, ids_restore


def forward_encoder_with_fixed_mask(params, imgs, mask_ratio, noise, status):
    x = patch_embed(imgs, params["patch_embed"], PATCH)
    x = x + params["pos_embed"][:, 1:, :]
    x, mask, ids_restore = random_masking_w_noise(x, mask_ratio, noise)
    NB = x.shape[0]
    pos_cls = params["pos_embed"][:, :1, :]
    if status == "clean":
        cls_tokens = jnp.broadcast_to(params["cls_token"] + pos_cls, (NB, 1, EMBED_DIM))
    elif status == "adv":
        cls_tokens = jnp.broadcast_to(params["adv_cls_token"] + pos_cls, (NB, 1, EMBED_DIM))
    else:  # "mix": first half uses clean cls_token, second half adv_cls_token
        half = NB // 2
        c0 = jnp.broadcast_to(params["cls_token"] + pos_cls, (half, 1, EMBED_DIM))
        c1 = jnp.broadcast_to(params["adv_cls_token"] + pos_cls, (NB - half, 1, EMBED_DIM))
        cls_tokens = jnp.concatenate([c0, c1], axis=0)
    x = jnp.concatenate([cls_tokens, x], axis=1)
    x = block_seq(x, params["blocks"], status, NUM_HEADS)
    x = mix_layernorm(x, params["norm"], status)
    return x, mask, ids_restore


def forward_decoder(params, x, ids_restore, status):
    NB = x.shape[0]
    L = ids_restore.shape[1]
    x = x @ params["decoder_embed_w"] + params["decoder_embed_b"]
    Dd = x.shape[-1]
    n_mask = L + 1 - x.shape[1]
    mask_tokens = jnp.broadcast_to(params["mask_token"], (NB, n_mask, Dd))
    x_ = jnp.concatenate([x[:, 1:, :], mask_tokens], axis=1)
    x_ = jnp.take_along_axis(x_, ids_restore[:, :, None], axis=1)
    x = jnp.concatenate([x[:, :1, :], x_], axis=1)
    x = x + params["decoder_pos_embed"]
    x = block_seq(x, params["decoder_blocks"], status, DEC_NUM_HEADS)
    x = mix_layernorm(x, params["decoder_norm"], status)
    x = x @ params["decoder_pred_w"] + params["decoder_pred_b"]
    return x[:, 1:, :]


def forward_loss(imgs, pred, mask):
    target = patchify(imgs, PATCH)
    if NORM_PIX_LOSS:
        mean = target.mean(axis=-1, keepdims=True)
        var = target.var(axis=-1, keepdims=True)
        target = (target - mean) / (var + 1e-6) ** 0.5
    loss = (pred - target) ** 2
    loss = loss.mean(axis=-1)
    return (loss * mask).sum() / mask.sum()


def contrastive_loss(q, k, temperature):
    # torch.distributed specialized to world_size == 1, rank == 0
    q = q / jnp.maximum(jnp.linalg.norm(q, axis=1, keepdims=True), 1e-12)
    k = k / jnp.maximum(jnp.linalg.norm(k, axis=1, keepdims=True), 1e-12)
    logits = (q @ k.T) / temperature
    N = logits.shape[0]
    logp = jax.nn.log_softmax(logits, axis=1)
    ce = -logp[jnp.arange(N), jnp.arange(N)].mean()
    return ce * (2.0 * temperature)


# ----------------------------- full forward ----------------------------------
def adv_mae_forward(params, imgs, rng, mask_ratio=MASK_RATIO):
    N = imgs.shape[0]
    L = NUM_PATCHES
    k_init, k_gauss, k_noise = jax.random.split(rng, 3)

    mean_t = jnp.array(IMAGENET_DEFAULT_MEAN, jnp.float32).reshape(1, 3, 1, 1)
    std_t = jnp.array(IMAGENET_DEFAULT_STD, jnp.float32).reshape(1, 3, 1, 1)
    clean_img = imgs * std_t + mean_t
    lower_bound = jnp.clip(clean_img - EPS_ADV, 0.0, 1.0)
    upper_bound = jnp.clip(clean_img + EPS_ADV, 0.0, 1.0)
    init_start = jax.random.uniform(k_init, clean_img.shape, jnp.float32,
                                    -EPS_ADV, EPS_ADV)
    # matches PyTorch: (torch.randn([]) > prob_start_from_clean).float()
    start_from_noise_index = (jax.random.normal(k_gauss, ()) >
                              PROB_START_FROM_CLEAN).astype(jnp.float32)
    start_adv = clean_img + start_from_noise_index * init_start
    noise = jax.random.uniform(k_noise, (N, L), jnp.float32)
    adv_output = start_adv

    # clean latent target (detached) -- clean status on the de-normalized clean_img
    latent_clean, _, _ = forward_encoder_with_fixed_mask(
        params, clean_img, mask_ratio, noise, "clean")
    latent_clean_sg = jax.lax.stop_gradient(latent_clean)
    tgt = jax.nn.softmax(latent_clean_sg, axis=2)
    log_tgt = jax.nn.log_softmax(latent_clean_sg, axis=2)

    def kl_loss(adv_x):
        latent, _, _ = forward_encoder_with_fixed_mask(
            params, adv_x, mask_ratio, noise, "adv")
        ipt = jax.nn.log_softmax(latent, axis=2)
        # F.kl_div(ipt, tgt, reduction='batchmean')
        return (tgt * (log_tgt - ipt)).sum() / latent.shape[0]

    grad_fn = jax.grad(kl_loss)
    for _ in range(NUM_ITER):
        g = grad_fn(adv_output)
        adv_output = jnp.clip(adv_output + STEP_SIZE * jnp.sign(g), 0.0, 1.0)
        adv_output = jnp.where(adv_output > lower_bound, adv_output, lower_bound)
        adv_output = jnp.where(adv_output < upper_bound, adv_output, upper_bound)

    adv_img = jax.lax.stop_gradient((adv_output - mean_t) / std_t)

    # fused clean + adv final pass: one 2N-batched encoder + decoder
    # (first half = clean status, second half = adv status; same noise/mask).
    imgs2 = jnp.concatenate([imgs, adv_img], axis=0)
    noise2 = jnp.concatenate([noise, noise], axis=0)
    latent2, mask2, ids_restore2 = forward_encoder_with_fixed_mask(
        params, imgs2, mask_ratio, noise2, "mix")
    pred2 = forward_decoder(params, latent2, ids_restore2, "mix")

    latent_ori, latent_adv = latent2[:N], latent2[N:]
    pred_ori, pred_adv = pred2[:N], pred2[N:]
    mask_ori, mask_adv = mask2[:N], mask2[N:]

    loss_adv = forward_loss(imgs, pred_adv, mask_adv)
    loss_ori = forward_loss(imgs, pred_ori, mask_ori)
    loss_cos = contrastive_loss(latent_ori.reshape(N, -1),
                                latent_adv.reshape(N, -1), T_CONTRAST)
    loss = (loss_ori + loss_adv) / 2.0 + 0.05 * loss_cos
    return loss, loss_ori, loss_adv, loss_cos


# ----------------------------- parameter init --------------------------------
def xavier_uniform(key, fan_in, fan_out):
    a = math.sqrt(6.0 / (fan_in + fan_out))
    return jax.random.uniform(key, (fan_in, fan_out), jnp.float32, -a, a)


def init_mix_ln(dim):
    return {"main_g": jnp.ones(dim, jnp.float32), "main_b": jnp.zeros(dim, jnp.float32),
            "aux_g": jnp.ones(dim, jnp.float32), "aux_b": jnp.zeros(dim, jnp.float32)}


def init_block(key, dim, mlp_ratio):
    hidden = int(dim * mlp_ratio)
    k1, k2, k3, k4 = jax.random.split(key, 4)
    return {
        "norm1": init_mix_ln(dim),
        "attn": {"qkv_w": xavier_uniform(k1, dim, 3 * dim),
                 "qkv_b": jnp.zeros(3 * dim, jnp.float32),
                 "proj_w": xavier_uniform(k2, dim, dim),
                 "proj_b": jnp.zeros(dim, jnp.float32)},
        "norm2": init_mix_ln(dim),
        "mlp": {"fc1_w": xavier_uniform(k3, dim, hidden),
                "fc1_b": jnp.zeros(hidden, jnp.float32),
                "fc2_w": xavier_uniform(k4, hidden, dim),
                "fc2_b": jnp.zeros(dim, jnp.float32)},
    }


def get_1d_sincos_pos_embed_from_grid(embed_dim, pos):
    omega = np.arange(embed_dim // 2, dtype=np.float64)
    omega /= embed_dim / 2.0
    omega = 1.0 / 10000 ** omega
    pos = pos.reshape(-1)
    out = np.einsum("m,d->md", pos, omega)
    return np.concatenate([np.sin(out), np.cos(out)], axis=1)


def get_2d_sincos_pos_embed(embed_dim, grid_size, cls_token=False):
    grid_h = np.arange(grid_size, dtype=np.float32)
    grid_w = np.arange(grid_size, dtype=np.float32)
    grid = np.meshgrid(grid_w, grid_h)
    grid = np.stack(grid, axis=0).reshape([2, 1, grid_size, grid_size])
    emb_h = get_1d_sincos_pos_embed_from_grid(embed_dim // 2, grid[0])
    emb_w = get_1d_sincos_pos_embed_from_grid(embed_dim // 2, grid[1])
    pos_embed = np.concatenate([emb_h, emb_w], axis=1)
    if cls_token:
        pos_embed = np.concatenate([np.zeros([1, embed_dim]), pos_embed], axis=0)
    return pos_embed.astype(np.float32)


def init_params(key):
    keys = jax.random.split(key, 8 + DEPTH + DEC_DEPTH)
    cls_token = 0.02 * jax.random.normal(keys[0], (1, 1, EMBED_DIM), jnp.float32)
    mask_token = 0.02 * jax.random.normal(keys[1], (1, 1, DEC_EMBED_DIM), jnp.float32)
    return {
        "patch_embed": {
            "w": xavier_uniform(keys[2], IN_CHANS * PATCH * PATCH, EMBED_DIM),
            "b": jnp.zeros(EMBED_DIM, jnp.float32),
        },
        "cls_token": cls_token,
        "adv_cls_token": cls_token,  # adv_cls_token initialized as a clone of cls_token
        "pos_embed": jnp.asarray(get_2d_sincos_pos_embed(
            EMBED_DIM, IMG_SIZE // PATCH, cls_token=True))[None],
        "blocks": [init_block(keys[8 + i], EMBED_DIM, MLP_RATIO)
                   for i in range(DEPTH)],
        "norm": init_mix_ln(EMBED_DIM),
        "decoder_embed_w": xavier_uniform(keys[3], EMBED_DIM, DEC_EMBED_DIM),
        "decoder_embed_b": jnp.zeros(DEC_EMBED_DIM, jnp.float32),
        "mask_token": mask_token,
        "decoder_pos_embed": jnp.asarray(get_2d_sincos_pos_embed(
            DEC_EMBED_DIM, IMG_SIZE // PATCH, cls_token=True))[None],
        "decoder_blocks": [init_block(keys[8 + DEPTH + i], DEC_EMBED_DIM, MLP_RATIO)
                           for i in range(DEC_DEPTH)],
        "decoder_norm": init_mix_ln(DEC_EMBED_DIM),
        "decoder_pred_w": xavier_uniform(keys[4], DEC_EMBED_DIM,
                                         PATCH * PATCH * IN_CHANS),
        "decoder_pred_b": jnp.zeros(PATCH * PATCH * IN_CHANS, jnp.float32),
    }


# ----------------------------- main -------------------------------------------
if __name__ == "__main__":
    root = jax.random.PRNGKey(0)
    k_param, k_img, k_fwd = jax.random.split(root, 3)
    params = init_params(k_param)
    imgs = jax.random.normal(k_img, (2, IN_CHANS, IMG_SIZE, IMG_SIZE), jnp.float32)

    fwd = jax.jit(partial(adv_mae_forward, mask_ratio=MASK_RATIO))
    loss, loss_ori, loss_adv, loss_cos = fwd(params, imgs, k_fwd)
    jax.block_until_ready((loss, loss_ori, loss_adv, loss_cos))
    assert np.isfinite(float(loss)) and np.isfinite(float(loss_ori))
    assert np.isfinite(float(loss_adv)) and np.isfinite(float(loss_cos))
    print("KERNEL_OK")
</pallas_src>

<mosaic_0001>
module attributes {stable_mosaic.version = 11 : i64} {
  func.func @_block_kernel(%arg0: memref<10x32xf32, #tpu.memory_space<vmem>>, %arg1: memref<10x1xf32, #tpu.memory_space<vmem>>, %arg2: memref<10x10xf32, #tpu.memory_space<vmem>>, %arg3: memref<2x32xf32, #tpu.memory_space<vmem>>, %arg4: memref<2x32xf32, #tpu.memory_space<vmem>>, %arg5: memref<32x96xf32, #tpu.memory_space<vmem>>, %arg6: memref<1x96xf32, #tpu.memory_space<vmem>>, %arg7: memref<32x32xf32, #tpu.memory_space<vmem>>, %arg8: memref<1x32xf32, #tpu.memory_space<vmem>>, %arg9: memref<2x32xf32, #tpu.memory_space<vmem>>, %arg10: memref<2x32xf32, #tpu.memory_space<vmem>>, %arg11: memref<32x128xf32, #tpu.memory_space<vmem>>, %arg12: memref<1x128xf32, #tpu.memory_space<vmem>>, %arg13: memref<128x32xf32, #tpu.memory_space<vmem>>, %arg14: memref<1x32xf32, #tpu.memory_space<vmem>>, %arg15: memref<10x32xf32, #tpu.memory_space<vmem>>) attributes {dimension_semantics = [], scalar_prefetch = 0 : i64, scratch_operands = 0 : i64, tpu.core_type = #tpu.core_type<tc>} {
    %c0 = arith.constant 0 : index
    %c0_0 = arith.constant 0 : index
    %0 = vector.load %arg0[%c0, %c0_0] : memref<10x32xf32, #tpu.memory_space<vmem>>, vector<10x32xf32>
    %c0_1 = arith.constant 0 : index
    %c0_2 = arith.constant 0 : index
    %1 = vector.load %arg1[%c0_1, %c0_2] : memref<10x1xf32, #tpu.memory_space<vmem>>, vector<10x1xf32>
    %c0_3 = arith.constant 0 : index
    %c0_4 = arith.constant 0 : index
    %2 = vector.load %arg3[%c0_3, %c0_4] : memref<2x32xf32, #tpu.memory_space<vmem>>, vector<2x32xf32>
    %c0_5 = arith.constant 0 : index
    %c0_6 = arith.constant 0 : index
    %3 = vector.load %arg4[%c0_5, %c0_6] : memref<2x32xf32, #tpu.memory_space<vmem>>, vector<2x32xf32>
    %4 = vector.extract_strided_slice %2 {offsets = [0, 0], sizes = [1, 32], strides = [1, 1]} : vector<2x32xf32> to vector<1x32xf32>
    %5 = vector.extract_strided_slice %2 {offsets = [1, 0], sizes = [1, 32], strides = [1, 1]} : vector<2x32xf32> to vector<1x32xf32>
    %6 = vector.extract_strided_slice %2 {offsets = [0, 0], sizes = [1, 32], strides = [1, 1]} : vector<2x32xf32> to vector<1x32xf32>
    %7 = arith.subf %5, %6 : vector<1x32xf32>
    %8 = vector.broadcast %1 : vector<10x1xf32> to vector<10x32xf32>
    %9 = vector.broadcast %7 : vector<1x32xf32> to vector<10x32xf32>
    %10 = arith.mulf %8, %9 : vector<10x32xf32>
    %11 = vector.broadcast %4 : vector<1x32xf32> to vector<10x32xf32>
    %12 = arith.addf %11, %10 : vector<10x32xf32>
    %13 = vector.extract_strided_slice %3 {offsets = [0, 0], sizes = [1, 32], strides = [1, 1]} : vector<2x32xf32> to vector<1x32xf32>
    %14 = vector.extract_strided_slice %3 {offsets = [1, 0], sizes = [1, 32], strides = [1, 1]} : vector<2x32xf32> to vector<1x32xf32>
    %15 = vector.extract_strided_slice %3 {offsets = [0, 0], sizes = [1, 32], strides = [1, 1]} : vector<2x32xf32> to vector<1x32xf32>
    %16 = arith.subf %14, %15 : vector<1x32xf32>
    %17 = vector.broadcast %1 : vector<10x1xf32> to vector<10x32xf32>
    %18 = vector.broadcast %16 : vector<1x32xf32> to vector<10x32xf32>
    %19 = arith.mulf %17, %18 : vector<10x32xf32>
    %20 = vector.broadcast %13 : vector<1x32xf32> to vector<10x32xf32>
    %21 = arith.addf %20, %19 : vector<10x32xf32>
    %cst = arith.constant dense<0.000000e+00> : vector<10xf32>
    %22 = vector.multi_reduction <add>, %0, %cst [1] : vector<10x32xf32> to vector<10xf32>
    %23 = vector.shape_cast %22 : vector<10xf32> to vector<10x1xf32>
    %cst_7 = arith.constant 3.200000e+01 : f32
    %24 = vector.broadcast %cst_7 : f32 to vector<10x1xf32>
    %25 = arith.divf %23, %24 : vector<10x1xf32>
    %26 = vector.broadcast %25 : vector<10x1xf32> to vector<10x32xf32>
    %27 = arith.subf %0, %26 : vector<10x32xf32>
    %28 = arith.mulf %27, %27 : vector<10x32xf32>
    %cst_8 = arith.constant dense<0.000000e+00> : vector<10xf32>
    %29 = vector.multi_reduction <add>, %28, %cst_8 [1] : vector<10x32xf32> to vector<10xf32>
    %30 = vector.shape_cast %29 : vector<10xf32> to vector<10x1xf32>
    %cst_9 = arith.constant 3.200000e+01 : f32
    %31 = vector.broadcast %cst_9 : f32 to vector<10x1xf32>
    %32 = arith.divf %30, %31 : vector<10x1xf32>
    %cst_10 = arith.constant 9.99999997E-7 : f32
    %33 = vector.broadcast %cst_10 : f32 to vector<10x1xf32>
    %34 = arith.addf %32, %33 : vector<10x1xf32>
    %35 = math.rsqrt %34 : vector<10x1xf32>
    %36 = vector.broadcast %35 : vector<10x1xf32> to vector<10x32xf32>
    %37 = arith.mulf %27, %36 : vector<10x32xf32>
    %38 = arith.mulf %37, %12 : vector<10x32xf32>
    %39 = arith.addf %38, %21 : vector<10x32xf32>
    %c0_11 = arith.constant 0 : index
    %c0_12 = arith.constant 0 : index
    %40 = vector.load %arg5[%c0_11, %c0_12] : memref<32x96xf32, #tpu.memory_space<vmem>>, vector<32x96xf32>
    %cst_13 = arith.constant dense<0.000000e+00> : vector<10x96xf32>
    %41 = tpu.matmul %39, %40, %cst_13 {dimension_numbers = #tpu.dot_dimension_numbers<[1], [0], [0], [1], [0, 0, 1, 1], [], []>} : vector<10x32xf32>, vector<32x96xf32>, vector<10x96xf32> -> vector<10x96xf32>
    %c0_14 = arith.constant 0 : index
    %c0_15 = arith.constant 0 : index
    %42 = vector.load %arg6[%c0_14, %c0_15] : memref<1x96xf32, #tpu.memory_space<vmem>>, vector<1x96xf32>
    %43 = vector.broadcast %42 : vector<1x96xf32> to vector<10x96xf32>
    %44 = arith.addf %41, %43 : vector<10x96xf32>
    %c0_16 = arith.constant 0 : index
    %c0_17 = arith.constant 0 : index
    %45 = vector.load %arg2[%c0_16, %c0_17] : memref<10x10xf32, #tpu.memory_space<vmem>>, vector<10x10xf32>
    %c0_18 = arith.constant 0 : index
    %c0_19 = arith.constant 0 : index
    %46 = vector.load %arg7[%c0_18, %c0_19] : memref<32x32xf32, #tpu.memory_space<vmem>>, vector<32x32xf32>
    %47 = vector.extract_strided_slice %44 {offsets = [0, 0], sizes = [10, 8], strides = [1, 1]} : vector<10x96xf32> to vector<10x8xf32>
    %48 = vector.extract_strided_slice %44 {offsets = [0, 32], sizes = [10, 8], strides = [1, 1]} : vector<10x96xf32> to vector<10x8xf32>
    %49 = vector.extract_strided_slice %44 {offsets = [0, 64], sizes = [10, 8], strides = [1, 1]} : vector<10x96xf32> to vector<10x8xf32>
    %cst_20 = arith.constant dense<0.000000e+00> : vector<10x10xf32>
    %50 = tpu.matmul %47, %48, %cst_20 {dimension_numbers = #tpu.dot_dimension_numbers<[1], [1], [0], [0], [0, 0, 1, 0], [], []>} : vector<10x8xf32>, vector<10x8xf32>, vector<10x10xf32> -> vector<10x10xf32>
    %cst_21 = arith.constant 0.353553385 : f32
    %51 = vector.broadcast %cst_21 : f32 to vector<10x10xf32>
    %52 = arith.mulf %50, %51 : vector<10x10xf32>
    %53 = arith.addf %52, %45 : vector<10x10xf32>
    %cst_22 = arith.constant dense<0xFF800000> : vector<10xf32>
    %54 = vector.multi_reduction <maximumf>, %53, %cst_22 [1] : vector<10x10xf32> to vector<10xf32>
    %55 = vector.shape_cast %54 : vector<10xf32> to vector<10x1xf32>
    %56 = vector.broadcast %55 : vector<10x1xf32> to vector<10x10xf32>
    %57 = arith.subf %53, %56 : vector<10x10xf32>
    %58 = math.exp %57 : vector<10x10xf32>
    %cst_23 = arith.constant dense<0.000000e+00> : vector<10xf32>
    %59 = vector.multi_reduction <add>, %58, %cst_23 [1] : vector<10x10xf32> to vector<10xf32>
    %60 = vector.shape_cast %59 : vector<10xf32> to vector<10x1xf32>
    %61 = tpu.reciprocal %60 {approx = true} : vector<10x1xf32> -> vector<10x1xf32>
    %62 = vector.broadcast %61 : vector<10x1xf32> to vector<10x10xf32>
    %63 = arith.mulf %58, %62 : vector<10x10xf32>
    %cst_24 = arith.constant dense<0.000000e+00> : vector<10x8xf32>
    %64 = tpu.matmul %63, %49, %cst_24 {dimension_numbers = #tpu.dot_dimension_numbers<[1], [0], [0], [1], [0, 0, 1, 1], [], []>} : vector<10x10xf32>, vector<10x8xf32>, vector<10x8xf32> -> vector<10x8xf32>
    %65 = vector.extract_strided_slice %46 {offsets = [0, 0], sizes = [8, 32], strides = [1, 1]} : vector<32x32xf32> to vector<8x32xf32>
    %cst_25 = arith.constant dense<0.000000e+00> : vector<10x32xf32>
    %66 = tpu.matmul %64, %65, %cst_25 {dimension_numbers = #tpu.dot_dimension_numbers<[1], [0], [0], [1], [0, 0, 1, 1], [], []>} : vector<10x8xf32>, vector<8x32xf32>, vector<10x32xf32> -> vector<10x32xf32>
    %67 = vector.extract_strided_slice %44 {offsets = [0, 8], sizes = [10, 8], strides = [1, 1]} : vector<10x96xf32> to vector<10x8xf32>
    %68 = vector.extract_strided_slice %44 {offsets = [0, 40], sizes = [10, 8], strides = [1, 1]} : vector<10x96xf32> to vector<10x8xf32>
    %69 = vector.extract_strided_slice %44 {offsets = [0, 72], sizes = [10, 8], strides = [1, 1]} : vector<10x96xf32> to vector<10x8xf32>
    %cst_26 = arith.constant dense<0.000000e+00> : vector<10x10xf32>
    %70 = tpu.matmul %67, %68, %cst_26 {dimension_numbers = #tpu.dot_dimension_numbers<[1], [1], [0], [0], [0, 0, 1, 0], [], []>} : vector<10x8xf32>, vector<10x8xf32>, vector<10x10xf32> -> vector<10x10xf32>
    %cst_27 = arith.constant 0.353553385 : f32
    %71 = vector.broadcast %cst_27 : f32 to vector<10x10xf32>
    %72 = arith.mulf %70, %71 : vector<10x10xf32>
    %73 = arith.addf %72, %45 : vector<10x10xf32>
    %cst_28 = arith.constant dense<0xFF800000> : vector<10xf32>
    %74 = vector.multi_reduction <maximumf>, %73, %cst_28 [1] : vector<10x10xf32> to vector<10xf32>
    %75 = vector.shape_cast %74 : vector<10xf32> to vector<10x1xf32>
    %76 = vector.broadcast %75 : vector<10x1xf32> to vector<10x10xf32>
    %77 = arith.subf %73, %76 : vector<10x10xf32>
    %78 = math.exp %77 : vector<10x10xf32>
    %cst_29 = arith.constant dense<0.000000e+00> : vector<10xf32>
    %79 = vector.multi_reduction <add>, %78, %cst_29 [1] : vector<10x10xf32> to vector<10xf32>
    %80 = vector.shape_cast %79 : vector<10xf32> to vector<10x1xf32>
    %81 = tpu.reciprocal %80 {approx = true} : vector<10x1xf32> -> vector<10x1xf32>
    %82 = vector.broadcast %81 : vector<10x1xf32> to vector<10x10xf32>
    %83 = arith.mulf %78, %82 : vector<10x10xf32>
    %cst_30 = arith.constant dense<0.000000e+00> : vector<10x8xf32>
    %84 = tpu.matmul %83, %69, %cst_30 {dimension_numbers = #tpu.dot_dimension_numbers<[1], [0], [0], [1], [0, 0, 1, 1], [], []>} : vector<10x10xf32>, vector<10x8xf32>, vector<10x8xf32> -> vector<10x8xf32>
    %85 = vector.extract_strided_slice %46 {offsets = [8, 0], sizes = [8, 32], strides = [1, 1]} : vector<32x32xf32> to vector<8x32xf32>
    %cst_31 = arith.constant dense<0.000000e+00> : vector<10x32xf32>
    %86 = tpu.matmul %84, %85, %cst_31 {dimension_numbers = #tpu.dot_dimension_numbers<[1], [0], [0], [1], [0, 0, 1, 1], [], []>} : vector<10x8xf32>, vector<8x32xf32>, vector<10x32xf32> -> vector<10x32xf32>
    %87 = arith.addf %66, %86 : vector<10x32xf32>
    %88 = vector.extract_strided_slice %44 {offsets = [0, 16], sizes = [10, 8], strides = [1, 1]} : vector<10x96xf32> to vector<10x8xf32>
    %89 = vector.extract_strided_slice %44 {offsets = [0, 48], sizes = [10, 8], strides = [1, 1]} : vector<10x96xf32> to vector<10x8xf32>
    %90 = vector.extract_strided_slice %44 {offsets = [0, 80], sizes = [10, 8], strides = [1, 1]} : vector<10x96xf32> to vector<10x8xf32>
    %cst_32 = arith.constant dense<0.000000e+00> : vector<10x10xf32>
    %91 = tpu.matmul %88, %89, %cst_32 {dimension_numbers = #tpu.dot_dimension_numbers<[1], [1], [0], [0], [0, 0, 1, 0], [], []>} : vector<10x8xf32>, vector<10x8xf32>, vector<10x10xf32> -> vector<10x10xf32>
    %cst_33 = arith.constant 0.353553385 : f32
    %92 = vector.broadcast %cst_33 : f32 to vector<10x10xf32>
    %93 = arith.mulf %91, %92 : vector<10x10xf32>
    %94 = arith.addf %93, %45 : vector<10x10xf32>
    %cst_34 = arith.constant dense<0xFF800000> : vector<10xf32>
    %95 = vector.multi_reduction <maximumf>, %94, %cst_34 [1] : vector<10x10xf32> to vector<10xf32>
    %96 = vector.shape_cast %95 : vector<10xf32> to vector<10x1xf32>
    %97 = vector.broadcast %96 : vector<10x1xf32> to vector<10x10xf32>
    %98 = arith.subf %94, %97 : vector<10x10xf32>
    %99 = math.exp %98 : vector<10x10xf32>
    %cst_35 = arith.constant dense<0.000000e+00> : vector<10xf32>
    %100 = vector.multi_reduction <add>, %99, %cst_35 [1] : vector<10x10xf32> to vector<10xf32>
    %101 = vector.shape_cast %100 : vector<10xf32> to vector<10x1xf32>
    %102 = tpu.reciprocal %101 {approx = true} : vector<10x1xf32> -> vector<10x1xf32>
    %103 = vector.broadcast %102 : vector<10x1xf32> to vector<10x10xf32>
    %104 = arith.mulf %99, %103 : vector<10x10xf32>
    %cst_36 = arith.constant dense<0.000000e+00> : vector<10x8xf32>
    %105 = tpu.matmul %104, %90, %cst_36 {dimension_numbers = #tpu.dot_dimension_numbers<[1], [0], [0], [1], [0, 0, 1, 1], [], []>} : vector<10x10xf32>, vector<10x8xf32>, vector<10x8xf32> -> vector<10x8xf32>
    %106 = vector.extract_strided_slice %46 {offsets = [16, 0], sizes = [8, 32], strides = [1, 1]} : vector<32x32xf32> to vector<8x32xf32>
    %cst_37 = arith.constant dense<0.000000e+00> : vector<10x32xf32>
    %107 = tpu.matmul %105, %106, %cst_37 {dimension_numbers = #tpu.dot_dimension_numbers<[1], [0], [0], [1], [0, 0, 1, 1], [], []>} : vector<10x8xf32>, vector<8x32xf32>, vector<10x32xf32> -> vector<10x32xf32>
    %108 = arith.addf %87, %107 : vector<10x32xf32>
    %109 = vector.extract_strided_slice %44 {offsets = [0, 24], sizes = [10, 8], strides = [1, 1]} : vector<10x96xf32> to vector<10x8xf32>
    %110 = vector.extract_strided_slice %44 {offsets = [0, 56], sizes = [10, 8], strides = [1, 1]} : vector<10x96xf32> to vector<10x8xf32>
    %111 = vector.extract_strided_slice %44 {offsets = [0, 88], sizes = [10, 8], strides = [1, 1]} : vector<10x96xf32> to vector<10x8xf32>
    %cst_38 = arith.constant dense<0.000000e+00> : vector<10x10xf32>
    %112 = tpu.matmul %109, %110, %cst_38 {dimension_numbers = #tpu.dot_dimension_numbers<[1], [1], [0], [0], [0, 0, 1, 0], [], []>} : vector<10x8xf32>, vector<10x8xf32>, vector<10x10xf32> -> vector<10x10xf32>
    %cst_39 = arith.constant 0.353553385 : f32
    %113 = vector.broadcast %cst_39 : f32 to vector<10x10xf32>
    %114 = arith.mulf %112, %113 : vector<10x10xf32>
    %115 = arith.addf %114, %45 : vector<10x10xf32>
    %cst_40 = arith.constant dense<0xFF800000> : vector<10xf32>
    %116 = vector.multi_reduction <maximumf>, %115, %cst_40 [1] : vector<10x10xf32> to vector<10xf32>
    %117 = vector.shape_cast %116 : vector<10xf32> to vector<10x1xf32>
    %118 = vector.broadcast %117 : vector<10x1xf32> to vector<10x10xf32>
    %119 = arith.subf %115, %118 : vector<10x10xf32>
    %120 = math.exp %119 : vector<10x10xf32>
    %cst_41 = arith.constant dense<0.000000e+00> : vector<10xf32>
    %121 = vector.multi_reduction <add>, %120, %cst_41 [1] : vector<10x10xf32> to vector<10xf32>
    %122 = vector.shape_cast %121 : vector<10xf32> to vector<10x1xf32>
    %123 = tpu.reciprocal %122 {approx = true} : vector<10x1xf32> -> vector<10x1xf32>
    %124 = vector.broadcast %123 : vector<10x1xf32> to vector<10x10xf32>
    %125 = arith.mulf %120, %124 : vector<10x10xf32>
    %cst_42 = arith.constant dense<0.000000e+00> : vector<10x8xf32>
    %126 = tpu.matmul %125, %111, %cst_42 {dimension_numbers = #tpu.dot_dimension_numbers<[1], [0], [0], [1], [0, 0, 1, 1], [], []>} : vector<10x10xf32>, vector<10x8xf32>, vector<10x8xf32> -> vector<10x8xf32>
    %127 = vector.extract_strided_slice %46 {offsets = [24, 0], sizes = [8, 32], strides = [1, 1]} : vector<32x32xf32> to vector<8x32xf32>
    %cst_43 = arith.constant dense<0.000000e+00> : vector<10x32xf32>
    %128 = tpu.matmul %126, %127, %cst_43 {dimension_numbers = #tpu.dot_dimension_numbers<[1], [0], [0], [1], [0, 0, 1, 1], [], []>} : vector<10x8xf32>, vector<8x32xf32>, vector<10x32xf32> -> vector<10x32xf32>
    %129 = arith.addf %108, %128 : vector<10x32xf32>
    %130 = arith.addf %0, %129 : vector<10x32xf32>
    %c0_44 = arith.constant 0 : index
    %c0_45 = arith.constant 0 : index
    %131 = vector.load %arg8[%c0_44, %c0_45] : memref<1x32xf32, #tpu.memory_space<vmem>>, vector<1x32xf32>
    %132 = vector.broadcast %131 : vector<1x32xf32> to vector<10x32xf32>
    %133 = arith.addf %130, %132 : vector<10x32xf32>
    %c0_46 = arith.constant 0 : index
    %c0_47 = arith.constant 0 : index
    %134 = vector.load %arg9[%c0_46, %c0_47] : memref<2x32xf32, #tpu.memory_space<vmem>>, vector<2x32xf32>
    %c0_48 = arith.constant 0 : index
    %c0_49 = arith.constant 0 : index
    %135 = vector.load %arg10[%c0_48, %c0_49] : memref<2x32xf32, #tpu.memory_space<vmem>>, vector<2x32xf32>
    %136 = vector.extract_strided_slice %134 {offsets = [0, 0], sizes = [1, 32], strides = [1, 1]} : vector<2x32xf32> to vector<1x32xf32>
    %137 = vector.extract_strided_slice %134 {offsets = [1, 0], sizes = [1, 32], strides = [1, 1]} : vector<2x32xf32> to vector<1x32xf32>
    %138 = vector.extract_strided_slice %134 {offsets = [0, 0], sizes = [1, 32], strides = [1, 1]} : vector<2x32xf32> to vector<1x32xf32>
    %139 = arith.subf %137, %138 : vector<1x32xf32>
    %140 = vector.broadcast %1 : vector<10x1xf32> to vector<10x32xf32>
    %141 = vector.broadcast %139 : vector<1x32xf32> to vector<10x32xf32>
    %142 = arith.mulf %140, %141 : vector<10x32xf32>
    %143 = vector.broadcast %136 : vector<1x32xf32> to vector<10x32xf32>
    %144 = arith.addf %143, %142 : vector<10x32xf32>
    %145 = vector.extract_strided_slice %135 {offsets = [0, 0], sizes = [1, 32], strides = [1, 1]} : vector<2x32xf32> to vector<1x32xf32>
    %146 = vector.extract_strided_slice %135 {offsets = [1, 0], sizes = [1, 32], strides = [1, 1]} : vector<2x32xf32> to vector<1x32xf32>
    %147 = vector.extract_strided_slice %135 {offsets = [0, 0], sizes = [1, 32], strides = [1, 1]} : vector<2x32xf32> to vector<1x32xf32>
    %148 = arith.subf %146, %147 : vector<1x32xf32>
    %149 = vector.broadcast %1 : vector<10x1xf32> to vector<10x32xf32>
    %150 = vector.broadcast %148 : vector<1x32xf32> to vector<10x32xf32>
    %151 = arith.mulf %149, %150 : vector<10x32xf32>
    %152 = vector.broadcast %145 : vector<1x32xf32> to vector<10x32xf32>
    %153 = arith.addf %152, %151 : vector<10x32xf32>
    %cst_50 = arith.constant dense<0.000000e+00> : vector<10xf32>
    %154 = vector.multi_reduction <add>, %133, %cst_50 [1] : vector<10x32xf32> to vector<10xf32>
    %155 = vector.shape_cast %154 : vector<10xf32> to vector<10x1xf32>
    %cst_51 = arith.constant 3.200000e+01 : f32
    %156 = vector.broadcast %cst_51 : f32 to vector<10x1xf32>
    %157 = arith.divf %155, %156 : vector<10x1xf32>
    %158 = vector.broadcast %157 : vector<10x1xf32> to vector<10x32xf32>
    %159 = arith.subf %133, %158 : vector<10x32xf32>
    %160 = arith.mulf %159, %159 : vector<10x32xf32>
    %cst_52 = arith.constant dense<0.000000e+00> : vector<10xf32>
    %161 = vector.multi_reduction <add>, %160, %cst_52 [1] : vector<10x32xf32> to vector<10xf32>
    %162 = vector.shape_cast %161 : vector<10xf32> to vector<10x1xf32>
    %cst_53 = arith.constant 3.200000e+01 : f32
    %163 = vector.broadcast %cst_53 : f32 to vector<10x1xf32>
    %164 = arith.divf %162, %163 : vector<10x1xf32>
    %cst_54 = arith.constant 9.99999997E-7 : f32
    %165 = vector.broadcast %cst_54 : f32 to vector<10x1xf32>
    %166 = arith.addf %164, %165 : vector<10x1xf32>
    %167 = math.rsqrt %166 : vector<10x1xf32>
    %168 = vector.broadcast %167 : vector<10x1xf32> to vector<10x32xf32>
    %169 = arith.mulf %159, %168 : vector<10x32xf32>
    %170 = arith.mulf %169, %144 : vector<10x32xf32>
    %171 = arith.addf %170, %153 : vector<10x32xf32>
    %c0_55 = arith.constant 0 : index
    %c0_56 = arith.constant 0 : index
    %172 = vector.load %arg11[%c0_55, %c0_56] : memref<32x128xf32, #tpu.memory_space<vmem>>, vector<32x128xf32>
    %cst_57 = arith.constant dense<0.000000e+00> : vector<10x128xf32>
    %173 = tpu.matmul %171, %172, %cst_57 {dimension_numbers = #tpu.dot_dimension_numbers<[1], [0], [0], [1], [0, 0, 1, 1], [], []>} : vector<10x32xf32>, vector<32x128xf32>, vector<10x128xf32> -> vector<10x128xf32>
    %c0_58 = arith.constant 0 : index
    %c0_59 = arith.constant 0 : index
    %174 = vector.load %arg12[%c0_58, %c0_59] : memref<1x128xf32, #tpu.memory_space<vmem>>, vector<1x128xf32>
    %175 = vector.broadcast %174 : vector<1x128xf32> to vector<10x128xf32>
    %176 = arith.addf %173, %175 : vector<10x128xf32>
    %cst_60 = arith.constant 5.000000e-01 : f32
    %177 = vector.broadcast %cst_60 : f32 to vector<10x128xf32>
    %178 = arith.mulf %177, %176 : vector<10x128xf32>
    %cst_61 = arith.constant 0.707106769 : f32
    %179 = vector.broadcast %cst_61 : f32 to vector<10x128xf32>
    %180 = arith.mulf %176, %179 : vector<10x128xf32>
    %181 = math.absf %180 : vector<10x128xf32>
    %cst_62 = arith.constant 0.327591091 : f32
    %182 = vector.broadcast %cst_62 : f32 to vector<10x128xf32>
    %183 = arith.mulf %182, %181 : vector<10x128xf32>
    %cst_63 = arith.constant 1.000000e+00 : f32
    %184 = vector.broadcast %cst_63 : f32 to vector<10x128xf32>
    %185 = arith.addf %184, %183 : vector<10x128xf32>
    %cst_64 = arith.constant 1.000000e+00 : f32
    %186 = vector.broadcast %cst_64 : f32 to vector<10x128xf32>
    %187 = arith.divf %186, %185 : vector<10x128xf32>
    %cst_65 = arith.constant 1.06140542 : f32
    %188 = vector.broadcast %cst_65 : f32 to vector<10x128xf32>
    %189 = arith.mulf %188, %187 : vector<10x128xf32>
    %cst_66 = arith.constant -1.45315206 : f32
    %190 = vector.broadcast %cst_66 : f32 to vector<10x128xf32>
    %191 = arith.addf %189, %190 : vector<10x128xf32>
    %192 = arith.mulf %191, %187 : vector<10x128xf32>
    %cst_67 = arith.constant 1.42141378 : f32
    %193 = vector.broadcast %cst_67 : f32 to vector<10x128xf32>
    %194 = arith.addf %192, %193 : vector<10x128xf32>
    %195 = arith.mulf %194, %187 : vector<10x128xf32>
    %cst_68 = arith.constant -0.284496725 : f32
    %196 = vector.broadcast %cst_68 : f32 to vector<10x128xf32>
    %197 = arith.addf %195, %196 : vector<10x128xf32>
    %198 = arith.mulf %197, %187 : vector<10x128xf32>
    %cst_69 = arith.constant 0.254829586 : f32
    %199 = vector.broadcast %cst_69 : f32 to vector<10x128xf32>
    %200 = arith.addf %198, %199 : vector<10x128xf32>
    %201 = arith.mulf %200, %187 : vector<10x128xf32>
    %cst_70 = arith.constant 0.000000e+00 : f32
    %202 = vector.broadcast %cst_70 : f32 to vector<10x128xf32>
    %203 = arith.subf %202, %181 : vector<10x128xf32>
    %204 = arith.mulf %203, %181 : vector<10x128xf32>
    %205 = math.exp %204 : vector<10x128xf32>
    %206 = arith.mulf %201, %205 : vector<10x128xf32>
    %cst_71 = arith.constant 1.000000e+00 : f32
    %207 = vector.broadcast %cst_71 : f32 to vector<10x128xf32>
    %208 = arith.subf %207, %206 : vector<10x128xf32>
    %cst_72 = arith.constant 0.000000e+00 : f32
    %209 = vector.broadcast %cst_72 : f32 to vector<10x128xf32>
    %210 = arith.cmpf oge, %180, %209 : vector<10x128xf32>
    %cst_73 = arith.constant 0.000000e+00 : f32
    %211 = vector.broadcast %cst_73 : f32 to vector<10x128xf32>
    %212 = arith.subf %211, %208 : vector<10x128xf32>
    %213 = arith.select %210, %208, %212 : vector<10x128xi1>, vector<10x128xf32>
    %cst_74 = arith.constant 1.000000e+00 : f32
    %214 = vector.broadcast %cst_74 : f32 to vector<10x128xf32>
    %215 = arith.addf %214, %213 : vector<10x128xf32>
    %216 = arith.mulf %178, %215 : vector<10x128xf32>
    %c0_75 = arith.constant 0 : index
    %c0_76 = arith.constant 0 : index
    %217 = vector.load %arg13[%c0_75, %c0_76] : memref<128x32xf32, #tpu.memory_space<vmem>>, vector<128x32xf32>
    %cst_77 = arith.constant dense<0.000000e+00> : vector<10x32xf32>
    %218 = tpu.matmul %216, %217, %cst_77 {dimension_numbers = #tpu.dot_dimension_numbers<[1], [0], [0], [1], [0, 0, 1, 1], [], []>} : vector<10x128xf32>, vector<128x32xf32>, vector<10x32xf32> -> vector<10x32xf32>
    %219 = arith.addf %133, %218 : vector<10x32xf32>
    %c0_78 = arith.constant 0 : index
    %c0_79 = arith.constant 0 : index
    %220 = vector.load %arg14[%c0_78, %c0_79] : memref<1x32xf32, #tpu.memory_space<vmem>>, vector<1x32xf32>
    %221 = vector.broadcast %220 : vector<1x32xf32> to vector<10x32xf32>
    %222 = arith.addf %219, %221 : vector<10x32xf32>
    %c0_80 = arith.constant 0 : index
    %c0_81 = arith.constant 0 : index
    %223 = vector.load %arg15[%c0_80, %c0_81] : memref<10x32xf32, #tpu.memory_space<vmem>>, vector<10x32xf32>
    tpu.vector_store %arg15[%c0_80, %c0_81], %222 {strides = array<i32>} : memref<10x32xf32, #tpu.memory_space<vmem>>, vector<10x32xf32>,
    return
  }
}

module attributes {stable_mosaic.version = 11 : i64} {
  func.func @_block_kernel(%arg0: memref<20x32xf32, #tpu.memory_space<vmem>>, %arg1: memref<20x1xf32, #tpu.memory_space<vmem>>, %arg2: memref<20x20xf32, #tpu.memory_space<vmem>>, %arg3: memref<2x32xf32, #tpu.memory_space<vmem>>, %arg4: memref<2x32xf32, #tpu.memory_space<vmem>>, %arg5: memref<32x96xf32, #tpu.memory_space<vmem>>, %arg6: memref<1x96xf32, #tpu.memory_space<vmem>>, %arg7: memref<32x32xf32, #tpu.memory_space<vmem>>, %arg8: memref<1x32xf32, #tpu.memory_space<vmem>>, %arg9: memref<2x32xf32, #tpu.memory_space<vmem>>, %arg10: memref<2x32xf32, #tpu.memory_space<vmem>>, %arg11: memref<32x128xf32, #tpu.memory_space<vmem>>, %arg12: memref<1x128xf32, #tpu.memory_space<vmem>>, %arg13: memref<128x32xf32, #tpu.memory_space<vmem>>, %arg14: memref<1x32xf32, #tpu.memory_space<vmem>>, %arg15: memref<20x32xf32, #tpu.memory_space<vmem>>) attributes {dimension_semantics = [], scalar_prefetch = 0 : i64, scratch_operands = 0 : i64, tpu.core_type = #tpu.core_type<tc>} {
    %c0 = arith.constant 0 : index
    %c0_0 = arith.constant 0 : index
    %0 = vector.load %arg0[%c0, %c0_0] : memref<20x32xf32, #tpu.memory_space<vmem>>, vector<20x32xf32>
    %c0_1 = arith.constant 0 : index
    %c0_2 = arith.constant 0 : index
    %1 = vector.load %arg1[%c0_1, %c0_2] : memref<20x1xf32, #tpu.memory_space<vmem>>, vector<20x1xf32>
    %c0_3 = arith.constant 0 : index
    %c0_4 = arith.constant 0 : index
    %2 = vector.load %arg3[%c0_3, %c0_4] : memref<2x32xf32, #tpu.memory_space<vmem>>, vector<2x32xf32>
    %c0_5 = arith.constant 0 : index
    %c0_6 = arith.constant 0 : index
    %3 = vector.load %arg4[%c0_5, %c0_6] : memref<2x32xf32, #tpu.memory_space<vmem>>, vector<2x32xf32>
    %4 = vector.extract_strided_slice %2 {offsets = [0, 0], sizes = [1, 32], strides = [1, 1]} : vector<2x32xf32> to vector<1x32xf32>
    %5 = vector.extract_strided_slice %2 {offsets = [1, 0], sizes = [1, 32], strides = [1, 1]} : vector<2x32xf32> to vector<1x32xf32>
    %6 = vector.extract_strided_slice %2 {offsets = [0, 0], sizes = [1, 32], strides = [1, 1]} : vector<2x32xf32> to vector<1x32xf32>
    %7 = arith.subf %5, %6 : vector<1x32xf32>
    %8 = vector.broadcast %1 : vector<20x1xf32> to vector<20x32xf32>
    %9 = vector.broadcast %7 : vector<1x32xf32> to vector<20x32xf32>
    %10 = arith.mulf %8, %9 : vector<20x32xf32>
    %11 = vector.broadcast %4 : vector<1x32xf32> to vector<20x32xf32>
    %12 = arith.addf %11, %10 : vector<20x32xf32>
    %13 = vector.extract_strided_slice %3 {offsets = [0, 0], sizes = [1, 32], strides = [1, 1]} : vector<2x32xf32> to vector<1x32xf32>
    %14 = vector.extract_strided_slice %3 {offsets = [1, 0], sizes = [1, 32], strides = [1, 1]} : vector<2x32xf32> to vector<1x32xf32>
    %15 = vector.extract_strided_slice %3 {offsets = [0, 0], sizes = [1, 32], strides = [1, 1]} : vector<2x32xf32> to vector<1x32xf32>
    %16 = arith.subf %14, %15 : vector<1x32xf32>
    %17 = vector.broadcast %1 : vector<20x1xf32> to vector<20x32xf32>
    %18 = vector.broadcast %16 : vector<1x32xf32> to vector<20x32xf32>
    %19 = arith.mulf %17, %18 : vector<20x32xf32>
    %20 = vector.broadcast %13 : vector<1x32xf32> to vector<20x32xf32>
    %21 = arith.addf %20, %19 : vector<20x32xf32>
    %cst = arith.constant dense<0.000000e+00> : vector<20xf32>
    %22 = vector.multi_reduction <add>, %0, %cst [1] : vector<20x32xf32> to vector<20xf32>
    %23 = vector.shape_cast %22 : vector<20xf32> to vector<20x1xf32>
    %cst_7 = arith.constant 3.200000e+01 : f32
    %24 = vector.broadcast %cst_7 : f32 to vector<20x1xf32>
    %25 = arith.divf %23, %24 : vector<20x1xf32>
    %26 = vector.broadcast %25 : vector<20x1xf32> to vector<20x32xf32>
    %27 = arith.subf %0, %26 : vector<20x32xf32>
    %28 = arith.mulf %27, %27 : vector<20x32xf32>
    %cst_8 = arith.constant dense<0.000000e+00> : vector<20xf32>
    %29 = vector.multi_reduction <add>, %28, %cst_8 [1] : vector<20x32xf32> to vector<20xf32>
    %30 = vector.shape_cast %29 : vector<20xf32> to vector<20x1xf32>
    %cst_9 = arith.constant 3.200000e+01 : f32
    %31 = vector.broadcast %cst_9 : f32 to vector<20x1xf32>
    %32 = arith.divf %30, %31 : vector<20x1xf32>
    %cst_10 = arith.constant 9.99999997E-7 : f32
    %33 = vector.broadcast %cst_10 : f32 to vector<20x1xf32>
    %34 = arith.addf %32, %33 : vector<20x1xf32>
    %35 = math.rsqrt %34 : vector<20x1xf32>
    %36 = vector.broadcast %35 : vector<20x1xf32> to vector<20x32xf32>
    %37 = arith.mulf %27, %36 : vector<20x32xf32>
    %38 = arith.mulf %37, %12 : vector<20x32xf32>
    %39 = arith.addf %38, %21 : vector<20x32xf32>
    %c0_11 = arith.constant 0 : index
    %c0_12 = arith.constant 0 : index
    %40 = vector.load %arg5[%c0_11, %c0_12] : memref<32x96xf32, #tpu.memory_space<vmem>>, vector<32x96xf32>
    %cst_13 = arith.constant dense<0.000000e+00> : vector<20x96xf32>
    %41 = tpu.matmul %39, %40, %cst_13 {dimension_numbers = #tpu.dot_dimension_numbers<[1], [0], [0], [1], [0, 0, 1, 1], [], []>} : vector<20x32xf32>, vector<32x96xf32>, vector<20x96xf32> -> vector<20x96xf32>
    %c0_14 = arith.constant 0 : index
    %c0_15 = arith.constant 0 : index
    %42 = vector.load %arg6[%c0_14, %c0_15] : memref<1x96xf32, #tpu.memory_space<vmem>>, vector<1x96xf32>
    %43 = vector.broadcast %42 : vector<1x96xf32> to vector<20x96xf32>
    %44 = arith.addf %41, %43 : vector<20x96xf32>
    %c0_16 = arith.constant 0 : index
    %c0_17 = arith.constant 0 : index
    %45 = vector.load %arg2[%c0_16, %c0_17] : memref<20x20xf32, #tpu.memory_space<vmem>>, vector<20x20xf32>
    %c0_18 = arith.constant 0 : index
    %c0_19 = arith.constant 0 : index
    %46 = vector.load %arg7[%c0_18, %c0_19] : memref<32x32xf32, #tpu.memory_space<vmem>>, vector<32x32xf32>
    %47 = vector.extract_strided_slice %44 {offsets = [0, 0], sizes = [20, 8], strides = [1, 1]} : vector<20x96xf32> to vector<20x8xf32>
    %48 = vector.extract_strided_slice %44 {offsets = [0, 32], sizes = [20, 8], strides = [1, 1]} : vector<20x96xf32> to vector<20x8xf32>
    %49 = vector.extract_strided_slice %44 {offsets = [0, 64], sizes = [20, 8], strides = [1, 1]} : vector<20x96xf32> to vector<20x8xf32>
    %cst_20 = arith.constant dense<0.000000e+00> : vector<20x20xf32>
    %50 = tpu.matmul %47, %48, %cst_20 {dimension_numbers = #tpu.dot_dimension_numbers<[1], [1], [0], [0], [0, 0, 1, 0], [], []>} : vector<20x8xf32>, vector<20x8xf32>, vector<20x20xf32> -> vector<20x20xf32>
    %cst_21 = arith.constant 0.353553385 : f32
    %51 = vector.broadcast %cst_21 : f32 to vector<20x20xf32>
    %52 = arith.mulf %50, %51 : vector<20x20xf32>
    %53 = arith.addf %52, %45 : vector<20x20xf32>
    %cst_22 = arith.constant dense<0xFF800000> : vector<20xf32>
    %54 = vector.multi_reduction <maximumf>, %53, %cst_22 [1] : vector<20x20xf32> to vector<20xf32>
    %55 = vector.shape_cast %54 : vector<20xf32> to vector<20x1xf32>
    %56 = vector.broadcast %55 : vector<20x1xf32> to vector<20x20xf32>
    %57 = arith.subf %53, %56 : vector<20x20xf32>
    %58 = math.exp %57 : vector<20x20xf32>
    %cst_23 = arith.constant dense<0.000000e+00> : vector<20xf32>
    %59 = vector.multi_reduction <add>, %58, %cst_23 [1] : vector<20x20xf32> to vector<20xf32>
    %60 = vector.shape_cast %59 : vector<20xf32> to vector<20x1xf32>
    %61 = tpu.reciprocal %60 {approx = true} : vector<20x1xf32> -> vector<20x1xf32>
    %62 = vector.broadcast %61 : vector<20x1xf32> to vector<20x20xf32>
    %63 = arith.mulf %58, %62 : vector<20x20xf32>
    %cst_24 = arith.constant dense<0.000000e+00> : vector<20x8xf32>
    %64 = tpu.matmul %63, %49, %cst_24 {dimension_numbers = #tpu.dot_dimension_numbers<[1], [0], [0], [1], [0, 0, 1, 1], [], []>} : vector<20x20xf32>, vector<20x8xf32>, vector<20x8xf32> -> vector<20x8xf32>
    %65 = vector.extract_strided_slice %46 {offsets = [0, 0], sizes = [8, 32], strides = [1, 1]} : vector<32x32xf32> to vector<8x32xf32>
    %cst_25 = arith.constant dense<0.000000e+00> : vector<20x32xf32>
    %66 = tpu.matmul %64, %65, %cst_25 {dimension_numbers = #tpu.dot_dimension_numbers<[1], [0], [0], [1], [0, 0, 1, 1], [], []>} : vector<20x8xf32>, vector<8x32xf32>, vector<20x32xf32> -> vector<20x32xf32>
    %67 = vector.extract_strided_slice %44 {offsets = [0, 8], sizes = [20, 8], strides = [1, 1]} : vector<20x96xf32> to vector<20x8xf32>
    %68 = vector.extract_strided_slice %44 {offsets = [0, 40], sizes = [20, 8], strides = [1, 1]} : vector<20x96xf32> to vector<20x8xf32>
    %69 = vector.extract_strided_slice %44 {offsets = [0, 72], sizes = [20, 8], strides = [1, 1]} : vector<20x96xf32> to vector<20x8xf32>
    %cst_26 = arith.constant dense<0.000000e+00> : vector<20x20xf32>
    %70 = tpu.matmul %67, %68, %cst_26 {dimension_numbers = #tpu.dot_dimension_numbers<[1], [1], [0], [0], [0, 0, 1, 0], [], []>} : vector<20x8xf32>, vector<20x8xf32>, vector<20x20xf32> -> vector<20x20xf32>
    %cst_27 = arith.constant 0.353553385 : f32
    %71 = vector.broadcast %cst_27 : f32 to vector<20x20xf32>
    %72 = arith.mulf %70, %71 : vector<20x20xf32>
    %73 = arith.addf %72, %45 : vector<20x20xf32>
    %cst_28 = arith.constant dense<0xFF800000> : vector<20xf32>
    %74 = vector.multi_reduction <maximumf>, %73, %cst_28 [1] : vector<20x20xf32> to vector<20xf32>
    %75 = vector.shape_cast %74 : vector<20xf32> to vector<20x1xf32>
    %76 = vector.broadcast %75 : vector<20x1xf32> to vector<20x20xf32>
    %77 = arith.subf %73, %76 : vector<20x20xf32>
    %78 = math.exp %77 : vector<20x20xf32>
    %cst_29 = arith.constant dense<0.000000e+00> : vector<20xf32>
    %79 = vector.multi_reduction <add>, %78, %cst_29 [1] : vector<20x20xf32> to vector<20xf32>
    %80 = vector.shape_cast %79 : vector<20xf32> to vector<20x1xf32>
    %81 = tpu.reciprocal %80 {approx = true} : vector<20x1xf32> -> vector<20x1xf32>
    %82 = vector.broadcast %81 : vector<20x1xf32> to vector<20x20xf32>
    %83 = arith.mulf %78, %82 : vector<20x20xf32>
    %cst_30 = arith.constant dense<0.000000e+00> : vector<20x8xf32>
    %84 = tpu.matmul %83, %69, %cst_30 {dimension_numbers = #tpu.dot_dimension_numbers<[1], [0], [0], [1], [0, 0, 1, 1], [], []>} : vector<20x20xf32>, vector<20x8xf32>, vector<20x8xf32> -> vector<20x8xf32>
    %85 = vector.extract_strided_slice %46 {offsets = [8, 0], sizes = [8, 32], strides = [1, 1]} : vector<32x32xf32> to vector<8x32xf32>
    %cst_31 = arith.constant dense<0.000000e+00> : vector<20x32xf32>
    %86 = tpu.matmul %84, %85, %cst_31 {dimension_numbers = #tpu.dot_dimension_numbers<[1], [0], [0], [1], [0, 0, 1, 1], [], []>} : vector<20x8xf32>, vector<8x32xf32>, vector<20x32xf32> -> vector<20x32xf32>
    %87 = arith.addf %66, %86 : vector<20x32xf32>
    %88 = vector.extract_strided_slice %44 {offsets = [0, 16], sizes = [20, 8], strides = [1, 1]} : vector<20x96xf32> to vector<20x8xf32>
    %89 = vector.extract_strided_slice %44 {offsets = [0, 48], sizes = [20, 8], strides = [1, 1]} : vector<20x96xf32> to vector<20x8xf32>
    %90 = vector.extract_strided_slice %44 {offsets = [0, 80], sizes = [20, 8], strides = [1, 1]} : vector<20x96xf32> to vector<20x8xf32>
    %cst_32 = arith.constant dense<0.000000e+00> : vector<20x20xf32>
    %91 = tpu.matmul %88, %89, %cst_32 {dimension_numbers = #tpu.dot_dimension_numbers<[1], [1], [0], [0], [0, 0, 1, 0], [], []>} : vector<20x8xf32>, vector<20x8xf32>, vector<20x20xf32> -> vector<20x20xf32>
    %cst_33 = arith.constant 0.353553385 : f32
    %92 = vector.broadcast %cst_33 : f32 to vector<20x20xf32>
    %93 = arith.mulf %91, %92 : vector<20x20xf32>
    %94 = arith.addf %93, %45 : vector<20x20xf32>
    %cst_34 = arith.constant dense<0xFF800000> : vector<20xf32>
    %95 = vector.multi_reduction <maximumf>, %94, %cst_34 [1] : vector<20x20xf32> to vector<20xf32>
    %96 = vector.shape_cast %95 : vector<20xf32> to vector<20x1xf32>
    %97 = vector.broadcast %96 : vector<20x1xf32> to vector<20x20xf32>
    %98 = arith.subf %94, %97 : vector<20x20xf32>
    %99 = math.exp %98 : vector<20x20xf32>
    %cst_35 = arith.constant dense<0.000000e+00> : vector<20xf32>
    %100 = vector.multi_reduction <add>, %99, %cst_35 [1] : vector<20x20xf32> to vector<20xf32>
    %101 = vector.shape_cast %100 : vector<20xf32> to vector<20x1xf32>
    %102 = tpu.reciprocal %101 {approx = true} : vector<20x1xf32> -> vector<20x1xf32>
    %103 = vector.broadcast %102 : vector<20x1xf32> to vector<20x20xf32>
    %104 = arith.mulf %99, %103 : vector<20x20xf32>
    %cst_36 = arith.constant dense<0.000000e+00> : vector<20x8xf32>
    %105 = tpu.matmul %104, %90, %cst_36 {dimension_numbers = #tpu.dot_dimension_numbers<[1], [0], [0], [1], [0, 0, 1, 1], [], []>} : vector<20x20xf32>, vector<20x8xf32>, vector<20x8xf32> -> vector<20x8xf32>
    %106 = vector.extract_strided_slice %46 {offsets = [16, 0], sizes = [8, 32], strides = [1, 1]} : vector<32x32xf32> to vector<8x32xf32>
    %cst_37 = arith.constant dense<0.000000e+00> : vector<20x32xf32>
    %107 = tpu.matmul %105, %106, %cst_37 {dimension_numbers = #tpu.dot_dimension_numbers<[1], [0], [0], [1], [0, 0, 1, 1], [], []>} : vector<20x8xf32>, vector<8x32xf32>, vector<20x32xf32> -> vector<20x32xf32>
    %108 = arith.addf %87, %107 : vector<20x32xf32>
    %109 = vector.extract_strided_slice %44 {offsets = [0, 24], sizes = [20, 8], strides = [1, 1]} : vector<20x96xf32> to vector<20x8xf32>
    %110 = vector.extract_strided_slice %44 {offsets = [0, 56], sizes = [20, 8], strides = [1, 1]} : vector<20x96xf32> to vector<20x8xf32>
    %111 = vector.extract_strided_slice %44 {offsets = [0, 88], sizes = [20, 8], strides = [1, 1]} : vector<20x96xf32> to vector<20x8xf32>
    %cst_38 = arith.constant dense<0.000000e+00> : vector<20x20xf32>
    %112 = tpu.matmul %109, %110, %cst_38 {dimension_numbers = #tpu.dot_dimension_numbers<[1], [1], [0], [0], [0, 0, 1, 0], [], []>} : vector<20x8xf32>, vector<20x8xf32>, vector<20x20xf32> -> vector<20x20xf32>
    %cst_39 = arith.constant 0.353553385 : f32
    %113 = vector.broadcast %cst_39 : f32 to vector<20x20xf32>
    %114 = arith.mulf %112, %113 : vector<20x20xf32>
    %115 = arith.addf %114, %45 : vector<20x20xf32>
    %cst_40 = arith.constant dense<0xFF800000> : vector<20xf32>
    %116 = vector.multi_reduction <maximumf>, %115, %cst_40 [1] : vector<20x20xf32> to vector<20xf32>
    %117 = vector.shape_cast %116 : vector<20xf32> to vector<20x1xf32>
    %118 = vector.broadcast %117 : vector<20x1xf32> to vector<20x20xf32>
    %119 = arith.subf %115, %118 : vector<20x20xf32>
    %120 = math.exp %119 : vector<20x20xf32>
    %cst_41 = arith.constant dense<0.000000e+00> : vector<20xf32>
    %121 = vector.multi_reduction <add>, %120, %cst_41 [1] : vector<20x20xf32> to vector<20xf32>
    %122 = vector.shape_cast %121 : vector<20xf32> to vector<20x1xf32>
    %123 = tpu.reciprocal %122 {approx = true} : vector<20x1xf32> -> vector<20x1xf32>
    %124 = vector.broadcast %123 : vector<20x1xf32> to vector<20x20xf32>
    %125 = arith.mulf %120, %124 : vector<20x20xf32>
    %cst_42 = arith.constant dense<0.000000e+00> : vector<20x8xf32>
    %126 = tpu.matmul %125, %111, %cst_42 {dimension_numbers = #tpu.dot_dimension_numbers<[1], [0], [0], [1], [0, 0, 1, 1], [], []>} : vector<20x20xf32>, vector<20x8xf32>, vector<20x8xf32> -> vector<20x8xf32>
    %127 = vector.extract_strided_slice %46 {offsets = [24, 0], sizes = [8, 32], strides = [1, 1]} : vector<32x32xf32> to vector<8x32xf32>
    %cst_43 = arith.constant dense<0.000000e+00> : vector<20x32xf32>
    %128 = tpu.matmul %126, %127, %cst_43 {dimension_numbers = #tpu.dot_dimension_numbers<[1], [0], [0], [1], [0, 0, 1, 1], [], []>} : vector<20x8xf32>, vector<8x32xf32>, vector<20x32xf32> -> vector<20x32xf32>
    %129 = arith.addf %108, %128 : vector<20x32xf32>
    %130 = arith.addf %0, %129 : vector<20x32xf32>
    %c0_44 = arith.constant 0 : index
    %c0_45 = arith.constant 0 : index
    %131 = vector.load %arg8[%c0_44, %c0_45] : memref<1x32xf32, #tpu.memory_space<vmem>>, vector<1x32xf32>
    %132 = vector.broadcast %131 : vector<1x32xf32> to vector<20x32xf32>
    %133 = arith.addf %130, %132 : vector<20x32xf32>
    %c0_46 = arith.constant 0 : index
    %c0_47 = arith.constant 0 : index
    %134 = vector.load %arg9[%c0_46, %c0_47] : memref<2x32xf32, #tpu.memory_space<vmem>>, vector<2x32xf32>
    %c0_48 = arith.constant 0 : index
    %c0_49 = arith.constant 0 : index
    %135 = vector.load %arg10[%c0_48, %c0_49] : memref<2x32xf32, #tpu.memory_space<vmem>>, vector<2x32xf32>
    %136 = vector.extract_strided_slice %134 {offsets = [0, 0], sizes = [1, 32], strides = [1, 1]} : vector<2x32xf32> to vector<1x32xf32>
    %137 = vector.extract_strided_slice %134 {offsets = [1, 0], sizes = [1, 32], strides = [1, 1]} : vector<2x32xf32> to vector<1x32xf32>
    %138 = vector.extract_strided_slice %134 {offsets = [0, 0], sizes = [1, 32], strides = [1, 1]} : vector<2x32xf32> to vector<1x32xf32>
    %139 = arith.subf %137, %138 : vector<1x32xf32>
    %140 = vector.broadcast %1 : vector<20x1xf32> to vector<20x32xf32>
    %141 = vector.broadcast %139 : vector<1x32xf32> to vector<20x32xf32>
    %142 = arith.mulf %140, %141 : vector<20x32xf32>
    %143 = vector.broadcast %136 : vector<1x32xf32> to vector<20x32xf32>
    %144 = arith.addf %143, %142 : vector<20x32xf32>
    %145 = vector.extract_strided_slice %135 {offsets = [0, 0], sizes = [1, 32], strides = [1, 1]} : vector<2x32xf32> to vector<1x32xf32>
    %146 = vector.extract_strided_slice %135 {offsets = [1, 0], sizes = [1, 32], strides = [1, 1]} : vector<2x32xf32> to vector<1x32xf32>
    %147 = vector.extract_strided_slice %135 {offsets = [0, 0], sizes = [1, 32], strides = [1, 1]} : vector<2x32xf32> to vector<1x32xf32>
    %148 = arith.subf %146, %147 : vector<1x32xf32>
    %149 = vector.broadcast %1 : vector<20x1xf32> to vector<20x32xf32>
    %150 = vector.broadcast %148 : vector<1x32xf32> to vector<20x32xf32>
    %151 = arith.mulf %149, %150 : vector<20x32xf32>
    %152 = vector.broadcast %145 : vector<1x32xf32> to vector<20x32xf32>
    %153 = arith.addf %152, %151 : vector<20x32xf32>
    %cst_50 = arith.constant dense<0.000000e+00> : vector<20xf32>
    %154 = vector.multi_reduction <add>, %133, %cst_50 [1] : vector<20x32xf32> to vector<20xf32>
    %155 = vector.shape_cast %154 : vector<20xf32> to vector<20x1xf32>
    %cst_51 = arith.constant 3.200000e+01 : f32
    %156 = vector.broadcast %cst_51 : f32 to vector<20x1xf32>
    %157 = arith.divf %155, %156 : vector<20x1xf32>
    %158 = vector.broadcast %157 : vector<20x1xf32> to vector<20x32xf32>
    %159 = arith.subf %133, %158 : vector<20x32xf32>
    %160 = arith.mulf %159, %159 : vector<20x32xf32>
    %cst_52 = arith.constant dense<0.000000e+00> : vector<20xf32>
    %161 = vector.multi_reduction <add>, %160, %cst_52 [1] : vector<20x32xf32> to vector<20xf32>
    %162 = vector.shape_cast %161 : vector<20xf32> to vector<20x1xf32>
    %cst_53 = arith.constant 3.200000e+01 : f32
    %163 = vector.broadcast %cst_53 : f32 to vector<20x1xf32>
    %164 = arith.divf %162, %163 : vector<20x1xf32>
    %cst_54 = arith.constant 9.99999997E-7 : f32
    %165 = vector.broadcast %cst_54 : f32 to vector<20x1xf32>
    %166 = arith.addf %164, %165 : vector<20x1xf32>
    %167 = math.rsqrt %166 : vector<20x1xf32>
    %168 = vector.broadcast %167 : vector<20x1xf32> to vector<20x32xf32>
    %169 = arith.mulf %159, %168 : vector<20x32xf32>
    %170 = arith.mulf %169, %144 : vector<20x32xf32>
    %171 = arith.addf %170, %153 : vector<20x32xf32>
    %c0_55 = arith.constant 0 : index
    %c0_56 = arith.constant 0 : index
    %172 = vector.load %arg11[%c0_55, %c0_56] : memref<32x128xf32, #tpu.memory_space<vmem>>, vector<32x128xf32>
    %cst_57 = arith.constant dense<0.000000e+00> : vector<20x128xf32>
    %173 = tpu.matmul %171, %172, %cst_57 {dimension_numbers = #tpu.dot_dimension_numbers<[1], [0], [0], [1], [0, 0, 1, 1], [], []>} : vector<20x32xf32>, vector<32x128xf32>, vector<20x128xf32> -> vector<20x128xf32>
    %c0_58 = arith.constant 0 : index
    %c0_59 = arith.constant 0 : index
    %174 = vector.load %arg12[%c0_58, %c0_59] : memref<1x128xf32, #tpu.memory_space<vmem>>, vector<1x128xf32>
    %175 = vector.broadcast %174 : vector<1x128xf32> to vector<20x128xf32>
    %176 = arith.addf %173, %175 : vector<20x128xf32>
    %cst_60 = arith.constant 5.000000e-01 : f32
    %177 = vector.broadcast %cst_60 : f32 to vector<20x128xf32>
    %178 = arith.mulf %177, %176 : vector<20x128xf32>
    %cst_61 = arith.constant 0.707106769 : f32
    %179 = vector.broadcast %cst_61 : f32 to vector<20x128xf32>
    %180 = arith.mulf %176, %179 : vector<20x128xf32>
    %181 = math.absf %180 : vector<20x128xf32>
    %cst_62 = arith.constant 0.327591091 : f32
    %182 = vector.broadcast %cst_62 : f32 to vector<20x128xf32>
    %183 = arith.mulf %182, %181 : vector<20x128xf32>
    %cst_63 = arith.constant 1.000000e+00 : f32
    %184 = vector.broadcast %cst_63 : f32 to vector<20x128xf32>
    %185 = arith.addf %184, %183 : vector<20x128xf32>
    %cst_64 = arith.constant 1.000000e+00 : f32
    %186 = vector.broadcast %cst_64 : f32 to vector<20x128xf32>
    %187 = arith.divf %186, %185 : vector<20x128xf32>
    %cst_65 = arith.constant 1.06140542 : f32
    %188 = vector.broadcast %cst_65 : f32 to vector<20x128xf32>
    %189 = arith.mulf %188, %187 : vector<20x128xf32>
    %cst_66 = arith.constant -1.45315206 : f32
    %190 = vector.broadcast %cst_66 : f32 to vector<20x128xf32>
    %191 = arith.addf %189, %190 : vector<20x128xf32>
    %192 = arith.mulf %191, %187 : vector<20x128xf32>
    %cst_67 = arith.constant 1.42141378 : f32
    %193 = vector.broadcast %cst_67 : f32 to vector<20x128xf32>
    %194 = arith.addf %192, %193 : vector<20x128xf32>
    %195 = arith.mulf %194, %187 : vector<20x128xf32>
    %cst_68 = arith.constant -0.284496725 : f32
    %196 = vector.broadcast %cst_68 : f32 to vector<20x128xf32>
    %197 = arith.addf %195, %196 : vector<20x128xf32>
    %198 = arith.mulf %197, %187 : vector<20x128xf32>
    %cst_69 = arith.constant 0.254829586 : f32
    %199 = vector.broadcast %cst_69 : f32 to vector<20x128xf32>
    %200 = arith.addf %198, %199 : vector<20x128xf32>
    %201 = arith.mulf %200, %187 : vector<20x128xf32>
    %cst_70 = arith.constant 0.000000e+00 : f32
    %202 = vector.broadcast %cst_70 : f32 to vector<20x128xf32>
    %203 = arith.subf %202, %181 : vector<20x128xf32>
    %204 = arith.mulf %203, %181 : vector<20x128xf32>
    %205 = math.exp %204 : vector<20x128xf32>
    %206 = arith.mulf %201, %205 : vector<20x128xf32>
    %cst_71 = arith.constant 1.000000e+00 : f32
    %207 = vector.broadcast %cst_71 : f32 to vector<20x128xf32>
    %208 = arith.subf %207, %206 : vector<20x128xf32>
    %cst_72 = arith.constant 0.000000e+00 : f32
    %209 = vector.broadcast %cst_72 : f32 to vector<20x128xf32>
    %210 = arith.cmpf oge, %180, %209 : vector<20x128xf32>
    %cst_73 = arith.constant 0.000000e+00 : f32
    %211 = vector.broadcast %cst_73 : f32 to vector<20x128xf32>
    %212 = arith.subf %211, %208 : vector<20x128xf32>
    %213 = arith.select %210, %208, %212 : vector<20x128xi1>, vector<20x128xf32>
    %cst_74 = arith.constant 1.000000e+00 : f32
    %214 = vector.broadcast %cst_74 : f32 to vector<20x128xf32>
    %215 = arith.addf %214, %213 : vector<20x128xf32>
    %216 = arith.mulf %178, %215 : vector<20x128xf32>
    %c0_75 = arith.constant 0 : index
    %c0_76 = arith.constant 0 : index
    %217 = vector.load %arg13[%c0_75, %c0_76] : memref<128x32xf32, #tpu.memory_space<vmem>>, vector<128x32xf32>
    %cst_77 = arith.constant dense<0.000000e+00> : vector<20x32xf32>
    %218 = tpu.matmul %216, %217, %cst_77 {dimension_numbers = #tpu.dot_dimension_numbers<[1], [0], [0], [1], [0, 0, 1, 1], [], []>} : vector<20x128xf32>, vector<128x32xf32>, vector<20x32xf32> -> vector<20x32xf32>
    %219 = arith.addf %133, %218 : vector<20x32xf32>
    %c0_78 = arith.constant 0 : index
    %c0_79 = arith.constant 0 : index
    %220 = vector.load %arg14[%c0_78, %c0_79] : memref<1x32xf32, #tpu.memory_space<vmem>>, vector<1x32xf32>
    %221 = vector.broadcast %220 : vector<1x32xf32> to vector<20x32xf32>
    %222 = arith.addf %219, %221 : vector<20x32xf32>
    %c0_80 = arith.constant 0 : index
    %c0_81 = arith.constant 0 : index
    %223 = vector.load %arg15[%c0_80, %c0_81] : memref<20x32xf32, #tpu.memory_space<vmem>>, vector<20x32xf32>
    tpu.vector_store %arg15[%c0_80, %c0_81], %222 {strides = array<i32>} : memref<20x32xf32, #tpu.memory_space<vmem>>, vector<20x32xf32>,
    return
  }
}

module attributes {stable_mosaic.version = 11 : i64} {
  func.func @_block_kernel(%arg0: memref<68x32xf32, #tpu.memory_space<vmem>>, %arg1: memref<68x1xf32, #tpu.memory_space<vmem>>, %arg2: memref<68x68xf32, #tpu.memory_space<vmem>>, %arg3: memref<2x32xf32, #tpu.memory_space<vmem>>, %arg4: memref<2x32xf32, #tpu.memory_space<vmem>>, %arg5: memref<32x96xf32, #tpu.memory_space<vmem>>, %arg6: memref<1x96xf32, #tpu.memory_space<vmem>>, %arg7: memref<32x32xf32, #tpu.memory_space<vmem>>, %arg8: memref<1x32xf32, #tpu.memory_space<vmem>>, %arg9: memref<2x32xf32, #tpu.memory_space<vmem>>, %arg10: memref<2x32xf32, #tpu.memory_space<vmem>>, %arg11: memref<32x128xf32, #tpu.memory_space<vmem>>, %arg12: memref<1x128xf32, #tpu.memory_space<vmem>>, %arg13: memref<128x32xf32, #tpu.memory_space<vmem>>, %arg14: memref<1x32xf32, #tpu.memory_space<vmem>>, %arg15: memref<68x32xf32, #tpu.memory_space<vmem>>) attributes {dimension_semantics = [], scalar_prefetch = 0 : i64, scratch_operands = 0 : i64, tpu.core_type = #tpu.core_type<tc>} {
    %c0 = arith.constant 0 : index
    %c0_0 = arith.constant 0 : index
    %0 = vector.load %arg0[%c0, %c0_0] : memref<68x32xf32, #tpu.memory_space<vmem>>, vector<68x32xf32>
    %c0_1 = arith.constant 0 : index
    %c0_2 = arith.constant 0 : index
    %1 = vector.load %arg1[%c0_1, %c0_2] : memref<68x1xf32, #tpu.memory_space<vmem>>, vector<68x1xf32>
    %c0_3 = arith.constant 0 : index
    %c0_4 = arith.constant 0 : index
    %2 = vector.load %arg3[%c0_3, %c0_4] : memref<2x32xf32, #tpu.memory_space<vmem>>, vector<2x32xf32>
    %c0_5 = arith.constant 0 : index
    %c0_6 = arith.constant 0 : index
    %3 = vector.load %arg4[%c0_5, %c0_6] : memref<2x32xf32, #tpu.memory_space<vmem>>, vector<2x32xf32>
    %4 = vector.extract_strided_slice %2 {offsets = [0, 0], sizes = [1, 32], strides = [1, 1]} : vector<2x32xf32> to vector<1x32xf32>
    %5 = vector.extract_strided_slice %2 {offsets = [1, 0], sizes = [1, 32], strides = [1, 1]} : vector<2x32xf32> to vector<1x32xf32>
    %6 = vector.extract_strided_slice %2 {offsets = [0, 0], sizes = [1, 32], strides = [1, 1]} : vector<2x32xf32> to vector<1x32xf32>
    %7 = arith.subf %5, %6 : vector<1x32xf32>
    %8 = vector.broadcast %1 : vector<68x1xf32> to vector<68x32xf32>
    %9 = vector.broadcast %7 : vector<1x32xf32> to vector<68x32xf32>
    %10 = arith.mulf %8, %9 : vector<68x32xf32>
    %11 = vector.broadcast %4 : vector<1x32xf32> to vector<68x32xf32>
    %12 = arith.addf %11, %10 : vector<68x32xf32>
    %13 = vector.extract_strided_slice %3 {offsets = [0, 0], sizes = [1, 32], strides = [1, 1]} : vector<2x32xf32> to vector<1x32xf32>
    %14 = vector.extract_strided_slice %3 {offsets = [1, 0], sizes = [1, 32], strides = [1, 1]} : vector<2x32xf32> to vector<1x32xf32>
    %15 = vector.extract_strided_slice %3 {offsets = [0, 0], sizes = [1, 32], strides = [1, 1]} : vector<2x32xf32> to vector<1x32xf32>
    %16 = arith.subf %14, %15 : vector<1x32xf32>
    %17 = vector.broadcast %1 : vector<68x1xf32> to vector<68x32xf32>
    %18 = vector.broadcast %16 : vector<1x32xf32> to vector<68x32xf32>
    %19 = arith.mulf %17, %18 : vector<68x32xf32>
    %20 = vector.broadcast %13 : vector<1x32xf32> to vector<68x32xf32>
    %21 = arith.addf %20, %19 : vector<68x32xf32>
    %cst = arith.constant dense<0.000000e+00> : vector<68xf32>
    %22 = vector.multi_reduction <add>, %0, %cst [1] : vector<68x32xf32> to vector<68xf32>
    %23 = vector.shape_cast %22 : vector<68xf32> to vector<68x1xf32>
    %cst_7 = arith.constant 3.200000e+01 : f32
    %24 = vector.broadcast %cst_7 : f32 to vector<68x1xf32>
    %25 = arith.divf %23, %24 : vector<68x1xf32>
    %26 = vector.broadcast %25 : vector<68x1xf32> to vector<68x32xf32>
    %27 = arith.subf %0, %26 : vector<68x32xf32>
    %28 = arith.mulf %27, %27 : vector<68x32xf32>
    %cst_8 = arith.constant dense<0.000000e+00> : vector<68xf32>
    %29 = vector.multi_reduction <add>, %28, %cst_8 [1] : vector<68x32xf32> to vector<68xf32>
    %30 = vector.shape_cast %29 : vector<68xf32> to vector<68x1xf32>
    %cst_9 = arith.constant 3.200000e+01 : f32
    %31 = vector.broadcast %cst_9 : f32 to vector<68x1xf32>
    %32 = arith.divf %30, %31 : vector<68x1xf32>
    %cst_10 = arith.constant 9.99999997E-7 : f32
    %33 = vector.broadcast %cst_10 : f32 to vector<68x1xf32>
    %34 = arith.addf %32, %33 : vector<68x1xf32>
    %35 = math.rsqrt %34 : vector<68x1xf32>
    %36 = vector.broadcast %35 : vector<68x1xf32> to vector<68x32xf32>
    %37 = arith.mulf %27, %36 : vector<68x32xf32>
    %38 = arith.mulf %37, %12 : vector<68x32xf32>
    %39 = arith.addf %38, %21 : vector<68x32xf32>
    %c0_11 = arith.constant 0 : index
    %c0_12 = arith.constant 0 : index
    %40 = vector.load %arg5[%c0_11, %c0_12] : memref<32x96xf32, #tpu.memory_space<vmem>>, vector<32x96xf32>
    %cst_13 = arith.constant dense<0.000000e+00> : vector<68x96xf32>
    %41 = tpu.matmul %39, %40, %cst_13 {dimension_numbers = #tpu.dot_dimension_numbers<[1], [0], [0], [1], [0, 0, 1, 1], [], []>} : vector<68x32xf32>, vector<32x96xf32>, vector<68x96xf32> -> vector<68x96xf32>
    %c0_14 = arith.constant 0 : index
    %c0_15 = arith.constant 0 : index
    %42 = vector.load %arg6[%c0_14, %c0_15] : memref<1x96xf32, #tpu.memory_space<vmem>>, vector<1x96xf32>
    %43 = vector.broadcast %42 : vector<1x96xf32> to vector<68x96xf32>
    %44 = arith.addf %41, %43 : vector<68x96xf32>
    %c0_16 = arith.constant 0 : index
    %c0_17 = arith.constant 0 : index
    %45 = vector.load %arg2[%c0_16, %c0_17] : memref<68x68xf32, #tpu.memory_space<vmem>>, vector<68x68xf32>
    %c0_18 = arith.constant 0 : index
    %c0_19 = arith.constant 0 : index
    %46 = vector.load %arg7[%c0_18, %c0_19] : memref<32x32xf32, #tpu.memory_space<vmem>>, vector<32x32xf32>
    %47 = vector.extract_strided_slice %44 {offsets = [0, 0], sizes = [68, 8], strides = [1, 1]} : vector<68x96xf32> to vector<68x8xf32>
    %48 = vector.extract_strided_slice %44 {offsets = [0, 32], sizes = [68, 8], strides = [1, 1]} : vector<68x96xf32> to vector<68x8xf32>
    %49 = vector.extract_strided_slice %44 {offsets = [0, 64], sizes = [68, 8], strides = [1, 1]} : vector<68x96xf32> to vector<68x8xf32>
    %cst_20 = arith.constant dense<0.000000e+00> : vector<68x68xf32>
    %50 = tpu.matmul %47, %48, %cst_20 {dimension_numbers = #tpu.dot_dimension_numbers<[1], [1], [0], [0], [0, 0, 1, 0], [], []>} : vector<68x8xf32>, vector<68x8xf32>, vector<68x68xf32> -> vector<68x68xf32>
    %cst_21 = arith.constant 0.353553385 : f32
    %51 = vector.broadcast %cst_21 : f32 to vector<68x68xf32>
    %52 = arith.mulf %50, %51 : vector<68x68xf32>
    %53 = arith.addf %52, %45 : vector<68x68xf32>
    %cst_22 = arith.constant dense<0xFF800000> : vector<68xf32>
    %54 = vector.multi_reduction <maximumf>, %53, %cst_22 [1] : vector<68x68xf32> to vector<68xf32>
    %55 = vector.shape_cast %54 : vector<68xf32> to vector<68x1xf32>
    %56 = vector.broadcast %55 : vector<68x1xf32> to vector<68x68xf32>
    %57 = arith.subf %53, %56 : vector<68x68xf32>
    %58 = math.exp %57 : vector<68x68xf32>
    %cst_23 = arith.constant dense<0.000000e+00> : vector<68xf32>
    %59 = vector.multi_reduction <add>, %58, %cst_23 [1] : vector<68x68xf32> to vector<68xf32>
    %60 = vector.shape_cast %59 : vector<68xf32> to vector<68x1xf32>
    %61 = tpu.reciprocal %60 {approx = true} : vector<68x1xf32> -> vector<68x1xf32>
    %62 = vector.broadcast %61 : vector<68x1xf32> to vector<68x68xf32>
    %63 = arith.mulf %58, %62 : vector<68x68xf32>
    %cst_24 = arith.constant dense<0.000000e+00> : vector<68x8xf32>
    %64 = tpu.matmul %63, %49, %cst_24 {dimension_numbers = #tpu.dot_dimension_numbers<[1], [0], [0], [1], [0, 0, 1, 1], [], []>} : vector<68x68xf32>, vector<68x8xf32>, vector<68x8xf32> -> vector<68x8xf32>
    %65 = vector.extract_strided_slice %46 {offsets = [0, 0], sizes = [8, 32], strides = [1, 1]} : vector<32x32xf32> to vector<8x32xf32>
    %cst_25 = arith.constant dense<0.000000e+00> : vector<68x32xf32>
    %66 = tpu.matmul %64, %65, %cst_25 {dimension_numbers = #tpu.dot_dimension_numbers<[1], [0], [0], [1], [0, 0, 1, 1], [], []>} : vector<68x8xf32>, vector<8x32xf32>, vector<68x32xf32> -> vector<68x32xf32>
    %67 = vector.extract_strided_slice %44 {offsets = [0, 8], sizes = [68, 8], strides = [1, 1]} : vector<68x96xf32> to vector<68x8xf32>
    %68 = vector.extract_strided_slice %44 {offsets = [0, 40], sizes = [68, 8], strides = [1, 1]} : vector<68x96xf32> to vector<68x8xf32>
    %69 = vector.extract_strided_slice %44 {offsets = [0, 72], sizes = [68, 8], strides = [1, 1]} : vector<68x96xf32> to vector<68x8xf32>
    %cst_26 = arith.constant dense<0.000000e+00> : vector<68x68xf32>
    %70 = tpu.matmul %67, %68, %cst_26 {dimension_numbers = #tpu.dot_dimension_numbers<[1], [1], [0], [0], [0, 0, 1, 0], [], []>} : vector<68x8xf32>, vector<68x8xf32>, vector<68x68xf32> -> vector<68x68xf32>
    %cst_27 = arith.constant 0.353553385 : f32
    %71 = vector.broadcast %cst_27 : f32 to vector<68x68xf32>
    %72 = arith.mulf %70, %71 : vector<68x68xf32>
    %73 = arith.addf %72, %45 : vector<68x68xf32>
    %cst_28 = arith.constant dense<0xFF800000> : vector<68xf32>
    %74 = vector.multi_reduction <maximumf>, %73, %cst_28 [1] : vector<68x68xf32> to vector<68xf32>
    %75 = vector.shape_cast %74 : vector<68xf32> to vector<68x1xf32>
    %76 = vector.broadcast %75 : vector<68x1xf32> to vector<68x68xf32>
    %77 = arith.subf %73, %76 : vector<68x68xf32>
    %78 = math.exp %77 : vector<68x68xf32>
    %cst_29 = arith.constant dense<0.000000e+00> : vector<68xf32>
    %79 = vector.multi_reduction <add>, %78, %cst_29 [1] : vector<68x68xf32> to vector<68xf32>
    %80 = vector.shape_cast %79 : vector<68xf32> to vector<68x1xf32>
    %81 = tpu.reciprocal %80 {approx = true} : vector<68x1xf32> -> vector<68x1xf32>
    %82 = vector.broadcast %81 : vector<68x1xf32> to vector<68x68xf32>
    %83 = arith.mulf %78, %82 : vector<68x68xf32>
    %cst_30 = arith.constant dense<0.000000e+00> : vector<68x8xf32>
    %84 = tpu.matmul %83, %69, %cst_30 {dimension_numbers = #tpu.dot_dimension_numbers<[1], [0], [0], [1], [0, 0, 1, 1], [], []>} : vector<68x68xf32>, vector<68x8xf32>, vector<68x8xf32> -> vector<68x8xf32>
    %85 = vector.extract_strided_slice %46 {offsets = [8, 0], sizes = [8, 32], strides = [1, 1]} : vector<32x32xf32> to vector<8x32xf32>
    %cst_31 = arith.constant dense<0.000000e+00> : vector<68x32xf32>
    %86 = tpu.matmul %84, %85, %cst_31 {dimension_numbers = #tpu.dot_dimension_numbers<[1], [0], [0], [1], [0, 0, 1, 1], [], []>} : vector<68x8xf32>, vector<8x32xf32>, vector<68x32xf32> -> vector<68x32xf32>
    %87 = arith.addf %66, %86 : vector<68x32xf32>
    %88 = vector.extract_strided_slice %44 {offsets = [0, 16], sizes = [68, 8], strides = [1, 1]} : vector<68x96xf32> to vector<68x8xf32>
    %89 = vector.extract_strided_slice %44 {offsets = [0, 48], sizes = [68, 8], strides = [1, 1]} : vector<68x96xf32> to vector<68x8xf32>
    %90 = vector.extract_strided_slice %44 {offsets = [0, 80], sizes = [68, 8], strides = [1, 1]} : vector<68x96xf32> to vector<68x8xf32>
    %cst_32 = arith.constant dense<0.000000e+00> : vector<68x68xf32>
    %91 = tpu.matmul %88, %89, %cst_32 {dimension_numbers = #tpu.dot_dimension_numbers<[1], [1], [0], [0], [0, 0, 1, 0], [], []>} : vector<68x8xf32>, vector<68x8xf32>, vector<68x68xf32> -> vector<68x68xf32>
    %cst_33 = arith.constant 0.353553385 : f32
    %92 = vector.broadcast %cst_33 : f32 to vector<68x68xf32>
    %93 = arith.mulf %91, %92 : vector<68x68xf32>
    %94 = arith.addf %93, %45 : vector<68x68xf32>
    %cst_34 = arith.constant dense<0xFF800000> : vector<68xf32>
    %95 = vector.multi_reduction <maximumf>, %94, %cst_34 [1] : vector<68x68xf32> to vector<68xf32>
    %96 = vector.shape_cast %95 : vector<68xf32> to vector<68x1xf32>
    %97 = vector.broadcast %96 : vector<68x1xf32> to vector<68x68xf32>
    %98 = arith.subf %94, %97 : vector<68x68xf32>
    %99 = math.exp %98 : vector<68x68xf32>
    %cst_35 = arith.constant dense<0.000000e+00> : vector<68xf32>
    %100 = vector.multi_reduction <add>, %99, %cst_35 [1] : vector<68x68xf32> to vector<68xf32>
    %101 = vector.shape_cast %100 : vector<68xf32> to vector<68x1xf32>
    %102 = tpu.reciprocal %101 {approx = true} : vector<68x1xf32> -> vector<68x1xf32>
    %103 = vector.broadcast %102 : vector<68x1xf32> to vector<68x68xf32>
    %104 = arith.mulf %99, %103 : vector<68x68xf32>
    %cst_36 = arith.constant dense<0.000000e+00> : vector<68x8xf32>
    %105 = tpu.matmul %104, %90, %cst_36 {dimension_numbers = #tpu.dot_dimension_numbers<[1], [0], [0], [1], [0, 0, 1, 1], [], []>} : vector<68x68xf32>, vector<68x8xf32>, vector<68x8xf32> -> vector<68x8xf32>
    %106 = vector.extract_strided_slice %46 {offsets = [16, 0], sizes = [8, 32], strides = [1, 1]} : vector<32x32xf32> to vector<8x32xf32>
    %cst_37 = arith.constant dense<0.000000e+00> : vector<68x32xf32>
    %107 = tpu.matmul %105, %106, %cst_37 {dimension_numbers = #tpu.dot_dimension_numbers<[1], [0], [0], [1], [0, 0, 1, 1], [], []>} : vector<68x8xf32>, vector<8x32xf32>, vector<68x32xf32> -> vector<68x32xf32>
    %108 = arith.addf %87, %107 : vector<68x32xf32>
    %109 = vector.extract_strided_slice %44 {offsets = [0, 24], sizes = [68, 8], strides = [1, 1]} : vector<68x96xf32> to vector<68x8xf32>
    %110 = vector.extract_strided_slice %44 {offsets = [0, 56], sizes = [68, 8], strides = [1, 1]} : vector<68x96xf32> to vector<68x8xf32>
    %111 = vector.extract_strided_slice %44 {offsets = [0, 88], sizes = [68, 8], strides = [1, 1]} : vector<68x96xf32> to vector<68x8xf32>
    %cst_38 = arith.constant dense<0.000000e+00> : vector<68x68xf32>
    %112 = tpu.matmul %109, %110, %cst_38 {dimension_numbers = #tpu.dot_dimension_numbers<[1], [1], [0], [0], [0, 0, 1, 0], [], []>} : vector<68x8xf32>, vector<68x8xf32>, vector<68x68xf32> -> vector<68x68xf32>
    %cst_39 = arith.constant 0.353553385 : f32
    %113 = vector.broadcast %cst_39 : f32 to vector<68x68xf32>
    %114 = arith.mulf %112, %113 : vector<68x68xf32>
    %115 = arith.addf %114, %45 : vector<68x68xf32>
    %cst_40 = arith.constant dense<0xFF800000> : vector<68xf32>
    %116 = vector.multi_reduction <maximumf>, %115, %cst_40 [1] : vector<68x68xf32> to vector<68xf32>
    %117 = vector.shape_cast %116 : vector<68xf32> to vector<68x1xf32>
    %118 = vector.broadcast %117 : vector<68x1xf32> to vector<68x68xf32>
    %119 = arith.subf %115, %118 : vector<68x68xf32>
    %120 = math.exp %119 : vector<68x68xf32>
    %cst_41 = arith.constant dense<0.000000e+00> : vector<68xf32>
    %121 = vector.multi_reduction <add>, %120, %cst_41 [1] : vector<68x68xf32> to vector<68xf32>
    %122 = vector.shape_cast %121 : vector<68xf32> to vector<68x1xf32>
    %123 = tpu.reciprocal %122 {approx = true} : vector<68x1xf32> -> vector<68x1xf32>
    %124 = vector.broadcast %123 : vector<68x1xf32> to vector<68x68xf32>
    %125 = arith.mulf %120, %124 : vector<68x68xf32>
    %cst_42 = arith.constant dense<0.000000e+00> : vector<68x8xf32>
    %126 = tpu.matmul %125, %111, %cst_42 {dimension_numbers = #tpu.dot_dimension_numbers<[1], [0], [0], [1], [0, 0, 1, 1], [], []>} : vector<68x68xf32>, vector<68x8xf32>, vector<68x8xf32> -> vector<68x8xf32>
    %127 = vector.extract_strided_slice %46 {offsets = [24, 0], sizes = [8, 32], strides = [1, 1]} : vector<32x32xf32> to vector<8x32xf32>
    %cst_43 = arith.constant dense<0.000000e+00> : vector<68x32xf32>
    %128 = tpu.matmul %126, %127, %cst_43 {dimension_numbers = #tpu.dot_dimension_numbers<[1], [0], [0], [1], [0, 0, 1, 1], [], []>} : vector<68x8xf32>, vector<8x32xf32>, vector<68x32xf32> -> vector<68x32xf32>
    %129 = arith.addf %108, %128 : vector<68x32xf32>
    %130 = arith.addf %0, %129 : vector<68x32xf32>
    %c0_44 = arith.constant 0 : index
    %c0_45 = arith.constant 0 : index
    %131 = vector.load %arg8[%c0_44, %c0_45] : memref<1x32xf32, #tpu.memory_space<vmem>>, vector<1x32xf32>
    %132 = vector.broadcast %131 : vector<1x32xf32> to vector<68x32xf32>
    %133 = arith.addf %130, %132 : vector<68x32xf32>
    %c0_46 = arith.constant 0 : index
    %c0_47 = arith.constant 0 : index
    %134 = vector.load %arg9[%c0_46, %c0_47] : memref<2x32xf32, #tpu.memory_space<vmem>>, vector<2x32xf32>
    %c0_48 = arith.constant 0 : index
    %c0_49 = arith.constant 0 : index
    %135 = vector.load %arg10[%c0_48, %c0_49] : memref<2x32xf32, #tpu.memory_space<vmem>>, vector<2x32xf32>
    %136 = vector.extract_strided_slice %134 {offsets = [0, 0], sizes = [1, 32], strides = [1, 1]} : vector<2x32xf32> to vector<1x32xf32>
    %137 = vector.extract_strided_slice %134 {offsets = [1, 0], sizes = [1, 32], strides = [1, 1]} : vector<2x32xf32> to vector<1x32xf32>
    %138 = vector.extract_strided_slice %134 {offsets = [0, 0], sizes = [1, 32], strides = [1, 1]} : vector<2x32xf32> to vector<1x32xf32>
    %139 = arith.subf %137, %138 : vector<1x32xf32>
    %140 = vector.broadcast %1 : vector<68x1xf32> to vector<68x32xf32>
    %141 = vector.broadcast %139 : vector<1x32xf32> to vector<68x32xf32>
    %142 = arith.mulf %140, %141 : vector<68x32xf32>
    %143 = vector.broadcast %136 : vector<1x32xf32> to vector<68x32xf32>
    %144 = arith.addf %143, %142 : vector<68x32xf32>
    %145 = vector.extract_strided_slice %135 {offsets = [0, 0], sizes = [1, 32], strides = [1, 1]} : vector<2x32xf32> to vector<1x32xf32>
    %146 = vector.extract_strided_slice %135 {offsets = [1, 0], sizes = [1, 32], strides = [1, 1]} : vector<2x32xf32> to vector<1x32xf32>
    %147 = vector.extract_strided_slice %135 {offsets = [0, 0], sizes = [1, 32], strides = [1, 1]} : vector<2x32xf32> to vector<1x32xf32>
    %148 = arith.subf %146, %147 : vector<1x32xf32>
    %149 = vector.broadcast %1 : vector<68x1xf32> to vector<68x32xf32>
    %150 = vector.broadcast %148 : vector<1x32xf32> to vector<68x32xf32>
    %151 = arith.mulf %149, %150 : vector<68x32xf32>
    %152 = vector.broadcast %145 : vector<1x32xf32> to vector<68x32xf32>
    %153 = arith.addf %152, %151 : vector<68x32xf32>
    %cst_50 = arith.constant dense<0.000000e+00> : vector<68xf32>
    %154 = vector.multi_reduction <add>, %133, %cst_50 [1] : vector<68x32xf32> to vector<68xf32>
    %155 = vector.shape_cast %154 : vector<68xf32> to vector<68x1xf32>
    %cst_51 = arith.constant 3.200000e+01 : f32
    %156 = vector.broadcast %cst_51 : f32 to vector<68x1xf32>
    %157 = arith.divf %155, %156 : vector<68x1xf32>
    %158 = vector.broadcast %157 : vector<68x1xf32> to vector<68x32xf32>
    %159 = arith.subf %133, %158 : vector<68x32xf32>
    %160 = arith.mulf %159, %159 : vector<68x32xf32>
    %cst_52 = arith.constant dense<0.000000e+00> : vector<68xf32>
    %161 = vector.multi_reduction <add>, %160, %cst_52 [1] : vector<68x32xf32> to vector<68xf32>
    %162 = vector.shape_cast %161 : vector<68xf32> to vector<68x1xf32>
    %cst_53 = arith.constant 3.200000e+01 : f32
    %163 = vector.broadcast %cst_53 : f32 to vector<68x1xf32>
    %164 = arith.divf %162, %163 : vector<68x1xf32>
    %cst_54 = arith.constant 9.99999997E-7 : f32
    %165 = vector.broadcast %cst_54 : f32 to vector<68x1xf32>
    %166 = arith.addf %164, %165 : vector<68x1xf32>
    %167 = math.rsqrt %166 : vector<68x1xf32>
    %168 = vector.broadcast %167 : vector<68x1xf32> to vector<68x32xf32>
    %169 = arith.mulf %159, %168 : vector<68x32xf32>
    %170 = arith.mulf %169, %144 : vector<68x32xf32>
    %171 = arith.addf %170, %153 : vector<68x32xf32>
    %c0_55 = arith.constant 0 : index
    %c0_56 = arith.constant 0 : index
    %172 = vector.load %arg11[%c0_55, %c0_56] : memref<32x128xf32, #tpu.memory_space<vmem>>, vector<32x128xf32>
    %cst_57 = arith.constant dense<0.000000e+00> : vector<68x128xf32>
    %173 = tpu.matmul %171, %172, %cst_57 {dimension_numbers = #tpu.dot_dimension_numbers<[1], [0], [0], [1], [0, 0, 1, 1], [], []>} : vector<68x32xf32>, vector<32x128xf32>, vector<68x128xf32> -> vector<68x128xf32>
    %c0_58 = arith.constant 0 : index
    %c0_59 = arith.constant 0 : index
    %174 = vector.load %arg12[%c0_58, %c0_59] : memref<1x128xf32, #tpu.memory_space<vmem>>, vector<1x128xf32>
    %175 = vector.broadcast %174 : vector<1x128xf32> to vector<68x128xf32>
    %176 = arith.addf %173, %175 : vector<68x128xf32>
    %cst_60 = arith.constant 5.000000e-01 : f32
    %177 = vector.broadcast %cst_60 : f32 to vector<68x128xf32>
    %178 = arith.mulf %177, %176 : vector<68x128xf32>
    %cst_61 = arith.constant 0.707106769 : f32
    %179 = vector.broadcast %cst_61 : f32 to vector<68x128xf32>
    %180 = arith.mulf %176, %179 : vector<68x128xf32>
    %181 = math.absf %180 : vector<68x128xf32>
    %cst_62 = arith.constant 0.327591091 : f32
    %182 = vector.broadcast %cst_62 : f32 to vector<68x128xf32>
    %183 = arith.mulf %182, %181 : vector<68x128xf32>
    %cst_63 = arith.constant 1.000000e+00 : f32
    %184 = vector.broadcast %cst_63 : f32 to vector<68x128xf32>
    %185 = arith.addf %184, %183 : vector<68x128xf32>
    %cst_64 = arith.constant 1.000000e+00 : f32
    %186 = vector.broadcast %cst_64 : f32 to vector<68x128xf32>
    %187 = arith.divf %186, %185 : vector<68x128xf32>
    %cst_65 = arith.constant 1.06140542 : f32
    %188 = vector.broadcast %cst_65 : f32 to vector<68x128xf32>
    %189 = arith.mulf %188, %187 : vector<68x128xf32>
    %cst_66 = arith.constant -1.45315206 : f32
    %190 = vector.broadcast %cst_66 : f32 to vector<68x128xf32>
    %191 = arith.addf %189, %190 : vector<68x128xf32>
    %192 = arith.mulf %191, %187 : vector<68x128xf32>
    %cst_67 = arith.constant 1.42141378 : f32
    %193 = vector.broadcast %cst_67 : f32 to vector<68x128xf32>
    %194 = arith.addf %192, %193 : vector<68x128xf32>
    %195 = arith.mulf %194, %187 : vector<68x128xf32>
    %cst_68 = arith.constant -0.284496725 : f32
    %196 = vector.broadcast %cst_68 : f32 to vector<68x128xf32>
    %197 = arith.addf %195, %196 : vector<68x128xf32>
    %198 = arith.mulf %197, %187 : vector<68x128xf32>
    %cst_69 = arith.constant 0.254829586 : f32
    %199 = vector.broadcast %cst_69 : f32 to vector<68x128xf32>
    %200 = arith.addf %198, %199 : vector<68x128xf32>
    %201 = arith.mulf %200, %187 : vector<68x128xf32>
    %cst_70 = arith.constant 0.000000e+00 : f32
    %202 = vector.broadcast %cst_70 : f32 to vector<68x128xf32>
    %203 = arith.subf %202, %181 : vector<68x128xf32>
    %204 = arith.mulf %203, %181 : vector<68x128xf32>
    %205 = math.exp %204 : vector<68x128xf32>
    %206 = arith.mulf %201, %205 : vector<68x128xf32>
    %cst_71 = arith.constant 1.000000e+00 : f32
    %207 = vector.broadcast %cst_71 : f32 to vector<68x128xf32>
    %208 = arith.subf %207, %206 : vector<68x128xf32>
    %cst_72 = arith.constant 0.000000e+00 : f32
    %209 = vector.broadcast %cst_72 : f32 to vector<68x128xf32>
    %210 = arith.cmpf oge, %180, %209 : vector<68x128xf32>
    %cst_73 = arith.constant 0.000000e+00 : f32
    %211 = vector.broadcast %cst_73 : f32 to vector<68x128xf32>
    %212 = arith.subf %211, %208 : vector<68x128xf32>
    %213 = arith.select %210, %208, %212 : vector<68x128xi1>, vector<68x128xf32>
    %cst_74 = arith.constant 1.000000e+00 : f32
    %214 = vector.broadcast %cst_74 : f32 to vector<68x128xf32>
    %215 = arith.addf %214, %213 : vector<68x128xf32>
    %216 = arith.mulf %178, %215 : vector<68x128xf32>
    %c0_75 = arith.constant 0 : index
    %c0_76 = arith.constant 0 : index
    %217 = vector.load %arg13[%c0_75, %c0_76] : memref<128x32xf32, #tpu.memory_space<vmem>>, vector<128x32xf32>
    %cst_77 = arith.constant dense<0.000000e+00> : vector<68x32xf32>
    %218 = tpu.matmul %216, %217, %cst_77 {dimension_numbers = #tpu.dot_dimension_numbers<[1], [0], [0], [1], [0, 0, 1, 1], [], []>} : vector<68x128xf32>, vector<128x32xf32>, vector<68x32xf32> -> vector<68x32xf32>
    %219 = arith.addf %133, %218 : vector<68x32xf32>
    %c0_78 = arith.constant 0 : index
    %c0_79 = arith.constant 0 : index
    %220 = vector.load %arg14[%c0_78, %c0_79] : memref<1x32xf32, #tpu.memory_space<vmem>>, vector<1x32xf32>
    %221 = vector.broadcast %220 : vector<1x32xf32> to vector<68x32xf32>
    %222 = arith.addf %219, %221 : vector<68x32xf32>
    %c0_80 = arith.constant 0 : index
    %c0_81 = arith.constant 0 : index
    %223 = vector.load %arg15[%c0_80, %c0_81] : memref<68x32xf32, #tpu.memory_space<vmem>>, vector<68x32xf32>
    tpu.vector_store %arg15[%c0_80, %c0_81], %222 {strides = array<i32>} : memref<68x32xf32, #tpu.memory_space<vmem>>, vector<68x32xf32>,
    return
  }
}

</mosaic_0001>

<bundles_post_ra>
// kernel: div.95
= control target key start
LH: loop header
LB: loop body
LE: loop exit
PB: predicated region body
PF: predicated region fallthrough
CT: control target
= control target key end

     0   :  { %s37_s0 = inlined_call_operand.vmem [shape: f32[10], index: 0, kind: input, shape index: {}]   ;;  %s38_s1 = inlined_call_operand.vmem [shape: f32[10], index: 1, kind: input, shape index: {}]   ;;  %s39_s2 = inlined_call_operand.vmem [shape: f32[10], index: 2, kind: output, shape index: {}]  }
   0x1   :  { %v4_v0 = vld [vmem:[%s38_s1] sm:$0x1] }
   0x2   :  { %11 = vrcp.f32 %v4_v0  ;;  %v3_v1 = vld [vmem:[%s37_s0] sm:$0x1] }
   0xc   :  { %v12_v2 = vpop.eup %11 }
   0xd   :  { %v8_v3 = vmul.f32 %v12_v2, %v3_v1 }
   0xf   :  { %10 = vst [vmem:[%s39_s2] sm:$0x1] %v8_v3 }

// kernel: neg.20
= control target key start
LH: loop header
LB: loop body
LE: loop exit
PB: predicated region body
PF: predicated region fallthrough
CT: control target
= control target key end

     0   :  { %s24_s0 = inlined_call_operand.vmem [shape: f32[10], index: 0, kind: input, shape index: {}]   ;;  %s25_s1 = inlined_call_operand.vmem [shape: f32[10], index: 1, kind: output, shape index: {}]  }
   0x1   :  { %v2_v0 = vld [vmem:[%s24_s0] sm:$0x1] }
   0x2   :  { %v5_v1 = vxor.u32 2147483648, %v2_v0 }
   0x4   :  { %7 = vst [vmem:[%s25_s1] sm:$0x1] %v5_v1 }

// kernel: split.0
= control target key start
LH: loop header
LB: loop body
LE: loop exit
PB: predicated region body
PF: predicated region fallthrough
CT: control target
= control target key end

     0   :  { %vm3_vm0 = vcmask 1040384   ;;  %s38_s0 = inlined_call_operand.vmem [shape: f32[2,5,32], index: 0, kind: input, shape index: {}]   ;;  %s39_s1 = inlined_call_operand.vmem [shape: f32[2,4,32], index: 1, kind: output, shape index: {}]  }
   0x1   :  { %v2_v0 = vld [vmem:[%s38_s0] sm:$0x1f]  ;;  %v14_v1 = vld [vmem:[%s38_s0 + $0x8] sm:$0x1f] }
   0x2   :  { %v4_v2 = vsel %vm3_vm0, 0, %v2_v0  ;;  %v10_v3 = vsel %vm3_vm0, 0, %v14_v1 }
   0x3   :  { %v5_v4 = vrot.slane %v4_v2, 1  ;;  %v11_v5 = vrot.slane %v10_v3, 1 }
   0x5   :  { %6 = vst [vmem:[%s39_s1] sm:$0xf] %v5_v4  ;;  %15 = vst [vmem:[%s39_s1 + $0x4] sm:$0xf] %v11_v5 }

// kernel: jvp__.4
= control target key start
LH: loop header
LB: loop body
LE: loop exit
PB: predicated region body
PF: predicated region fallthrough
CT: control target
= control target key end

     0   :  { %vm98_vm0 = vcmask 261120   ;;  %vm102_vm1 = vcmask 254976   ;;  %v2164_v4 = vmov 0   ;;  %v70_v17 = vlaneseq  ;;  %s2165_s22 = smov 96   ;;  %s2166_s25 = smov 64   ;;  %s2569_s0 = inlined_call_operand.vmem [shape: f32[10,32], index: 0, kind: input, shape index: {}]   ;;  %s2570_s1 = inlined_call_operand.vmem [shape: f32[10,1], index: 1, kind: input, shape index: {}]   ;;  %s2571_s9 = inlined_call_operand.vmem [shape: f32[2,32], index: 9, kind: input, shape index: {}]   ;;  %s2572_s10 = inlined_call_operand.vmem [shape: f32[2,32], index: 10, kind: input, shape index: {}]   ;;  %s2573_s5 = inlined_call_operand.vmem [shape: f32[32,96], index: 5, kind: input, shape index: {}]   ;;  %s2574_s3 = inlined_call_operand.vmem [shape: f32[2,32], index: 3, kind: input, shape index: {}]   ;;  %s2575_s4 = inlined_call_operand.vmem [shape: f32[2,32], index: 4, kind: input, shape index: {}]   ;;  %s2576_s6 = inlined_call_operand.vmem [shape: f32[1,96], index: 6, kind: input, shape index: {}]   ;;  %s2577_s2 = inlined_call_operand.vmem [shape: f32[10,10], index: 2, kind: input, shape index: {}]   ;;  %s2578_s7 = inlined_call_operand.vmem [shape: f32[32,32], index: 7, kind: input, shape index: {}]   ;;  %s2579_s8 = inlined_call_operand.vmem [shape: f32[1,32], index: 8, kind: input, shape index: {}]   ;;  %s2580_s11 = inlined_call_operand.vmem [shape: f32[32,128], index: 11, kind: input, shape index: {}]   ;;  %s2581_s13 = inlined_call_operand.vmem [shape: f32[128,32], index: 13, kind: input, shape index: {}]   ;;  %s2582_s12 = inlined_call_operand.vmem [shape: f32[1,128], index: 12, kind: input, shape index: {}]   ;;  %s2583_s14 = inlined_call_operand.vmem [shape: f32[1,32], index: 14, kind: input, shape index: {}]   ;;  %s2584_s15 = inlined_call_operand.vmem [shape: f32[10,32], index: 15, kind: output, shape index: {}]  }
   0x1   :  { %v2260_v0 = vld [vmem:[%s2569_s0] sm:$0xff]  ;;  %v2265_v1 = vld [vmem:[%s2569_s0 + $0x8] sm:$0x3]  ;;  %2074 = vset.pattern.permute.xlu0 %v2164_v4  ;;  %2075 = vset.pattern.permute.xlu1 %v2164_v4  ;;  %v133_v29 = vld [vmem:[%s2573_s5 + $0x10] sm:$0xff]  ;;  %vm235_vm2 = vcmask 64512   ;;  %vm327_vm4 = vcmask 74752  }
   0x2   :  { %v99_v2 = vsel %vm98_vm0, %v2260_v0, 0.0  ;;  %v103_v3 = vsel %vm102_vm1, %v2265_v1, 0.0  ;;  %v52_v5 = vld [vmem:[%s2570_s1] sm:$0xff]  ;;  %v53_v16 = vld [vmem:[%s2570_s1 + $0x8] sm:$0x3]  ;;  %v71_v18 = vshrl.u32 %v70_v17, 7  ;;  %vm2341_vm3 = vmpackc.low %vm235_vm2, %vm235_vm2 }
   0x3   :  { %100 = vadd.xlane.f32.xlu0 %v99_v2  ;;  %v1390_v19 = vld [vmem:[%s2571_s9] sm:$0x3]  ;;  %v132_v28 = vld [vmem:[%s2573_s5 + $0x8] sm:$0xff]  ;;  %v134_v32 = vld [vmem:[%s2573_s5 + $0x18] sm:$0xff]  ;;  %vm323_vm5 = vcmask 80896   ;;  %s2167_s26 = smov 88  }
   0x4   :  { %v1391_v20 = vld [vmem:[%s2572_s10] sm:$0x3]  ;;  %v1393_v21 = vrot.slane %v1390_v19, 7  ;;  %v78_v23 = vsub.s32 0, %v71_v18  ;;  %v72_v24 = vsub.s32 1, %v71_v18  ;;  %v1963_v36 = vpack.c.bf16 %v134_v32, %v133_v29  ;;  %s2170_s27 = smov 56  }
   0x5   :  { %v1409_v22 = vrot.slane %v1391_v20, 7  ;;  %v131_v27 = vld [vmem:[%s2573_s5] sm:$0xff]  ;;  %v2354_v29 = vld [vmem:[%s2577_s2 + $0x8] sm:$0x3]  ;;  %vm358_vm6 = vcmask 1041408   ;;  %vm2169_vm7 = vmmov 1  }
   0x6   :  { %v1395_v25 = vsub.f32 %v1390_v19, %v1393_v21  ;;  %v1405_v30 = vrot.slane %v1390_v19, %v78_v23  ;;  %v1959_v31 = vpack.c.bf16 %v132_v28, %v131_v27  ;;  %v1421_v35 = vrot.slane %v1391_v20, %v78_v23  ;;  %v54_v42 = vld [vmem:[%s2574_s3] sm:$0x3]  ;;  %vm2368_vm8 = vmpackc.low %vm358_vm6, %vm2169_vm7  ;;  %s2171_s28 = smov 112   ;;  %s2172_s29 = smov 80  }
   0x7   :  { %104 = vadd.xlane.f32.xlu0 %v103_v3  ;;  %v1411_v26 = vsub.f32 %v1391_v20, %v1409_v22  ;;  %v55_v43 = vld [vmem:[%s2575_s4] sm:$0x3]  ;;  %v57_v44 = vrot.slane %v54_v42, 7  ;;  %v79_v60 = vrot.slane %v54_v42, %v78_v23  ;;  %s2173_s30 = smov 104   ;;  %s2174_s1 = smov 72  }
   0x8   :  { %v1399_v33 = vrot.slane %v1395_v25, %v72_v24  ;;  %1960 = vmatprep.subr.bf16.mxu1 %v1959_v31  ;;  %v83_v46 = vrot.slane %v55_v43, 7  ;;  %v95_v2 = vrot.slane %v55_v43, %v78_v23  ;;  %v1708_v19 = vld [vmem:[%s2576_s6] ss:$0 sm:$0xff]  ;;  %s2175_s18 = smov 48   ;;  %s2176_s19 = smov 40  }
   0x9   :  { %v1415_v34 = vrot.slane %v1411_v26, %v72_v24  ;;  %1962 = vmatpush3.bf16.msra.mxu1 %v1959_v31  ;;  %v59_v48 = vsub.f32 %v54_v42, %v57_v44  ;;  %v2359_v32 = vld [vmem:[%s2577_s2] sm:$0xff]  ;;  %s2168_s2 = smov 120  }
   0xa   :  { %1964 = vmatprep.subr.bf16.mxu1 %v1963_v36  ;;  %v85_v51 = vsub.f32 %v55_v43, %v83_v46 }
   0xb   :  { %v73_v53 = vrot.slane %v59_v48, %v72_v24 }
   0xc   :  { %v89_v55 = vrot.slane %v85_v51, %v72_v24 }
   0xd   :  { %1966 = vmatpush3.bf16.msra.mxu1 %v1963_v36 }
  0x1d   :  { %62 = vperm.xlu0 %2074, %v52_v5  }
  0x90   :  { %v101_v6 = vpop.xlane.xlu0 %100 }
  0x91   :  { %v107_v7 = vmul.f32 0.03125, %v101_v6 }
  0x93   :  { %v2275_v8 = vsub.f32 %v2260_v0, %v107_v7 }
  0x94   :  { %v105_v9 = vpop.xlane.xlu0 %104 }
  0x95   :  { %v108_v10 = vmul.f32 0.03125, %v105_v9  ;;  %v111_v11 = vmul.f32 %v2275_v8, %v2275_v8 }
  0x97   :  { %v2280_v12 = vsub.f32 %v2265_v1, %v108_v10  ;;  %v113_v13 = vsel %vm98_vm0, %v111_v11, 0.0 }
  0x98   :  { %114 = vadd.xlane.f32.xlu1 %v113_v13 }
  0x99   :  { %v112_v14 = vmul.f32 %v2280_v12, %v2280_v12 }
  0x9b   :  { %v116_v15 = vsel %vm102_vm1, %v112_v14, 0.0 }
  0x9c   :  { %117 = vadd.xlane.f32.xlu1 %v116_v15  ;;  %v63_v37 = vpop.permute.xlu0 %62 }
  0x9d   :  { %v1400_v38 = vmul.f32 %v1399_v33, %v63_v37  ;;  %v1416_v39 = vmul.f32 %v1415_v34, %v63_v37  ;;  %v74_v58 = vmul.f32 %v73_v53, %v63_v37  ;;  %v90_v63 = vmul.f32 %v89_v55, %v63_v37 }
  0x9f   :  { %v2307_v40 = vadd.f32 %v1405_v30, %v1400_v38  ;;  %v2309_v41 = vadd.f32 %v1421_v35, %v1416_v39  ;;  %v80_v4 = vadd.f32 %v79_v60, %v74_v58  ;;  %v96_v6 = vadd.f32 %v95_v2, %v90_v63 }
  0xad   :  { %67 = vperm.xlu1 %2075, %v53_v16  }
 0x125   :  { %v115_v45 = vpop.xlane.xlu1 %114 }
 0x126   :  { %v119_v47 = vmul.f32 0.03125, %v115_v45 }
 0x128   :  { %v121_v49 = vadd.f32 1e-06, %v119_v47 }
 0x129   :  { %v118_v50 = vpop.xlane.xlu1 %117 }
 0x12a   :  { %2116 = vrsqrt.f32 %v121_v49  ;;  %v120_v52 = vmul.f32 0.03125, %v118_v50 }
 0x12c   :  { %v122_v54 = vadd.f32 1e-06, %v120_v52 }
 0x12d   :  { %v68_v56 = vpop.permute.xlu1 %67 }
 0x12e   :  { %2118 = vrsqrt.f32 %v122_v54  ;;  %v1401_v57 = vmul.f32 %v1399_v33, %v68_v56  ;;  %v1417_v59 = vmul.f32 %v1415_v34, %v68_v56  ;;  %v75_v3 = vmul.f32 %v73_v53, %v68_v56 }
 0x12f   :  { %v91_v9 = vmul.f32 %v89_v55, %v68_v56 }
 0x130   :  { %v2317_v61 = vadd.f32 %v1405_v30, %v1401_v57  ;;  %v2319_v62 = vadd.f32 %v1421_v35, %v1417_v59  ;;  %v81_v10 = vadd.f32 %v79_v60, %v75_v3 }
 0x131   :  { %v97_v16 = vadd.f32 %v95_v2, %v91_v9 }
 0x134   :  { %v2117_v5 = vpop.eup %2116 }
 0x135   :  { %v125_v7 = vmul.f32 %v2117_v5, %v2275_v8 }
 0x137   :  { %v127_v11 = vmul.f32 %v125_v7, %v80_v4 }
 0x138   :  { %v2119_v13 = vpop.eup %2118 }
 0x139   :  { %v129_v14 = vadd.f32 %v127_v11, %v96_v6  ;;  %v126_v15 = vmul.f32 %v2119_v13, %v2280_v12 }
 0x13b   :  { %1834 = vmatprep.mubr.msk.f32.mxu1 %vm98_vm0, %v129_v14  ;;  %v128_v17 = vmul.f32 %v126_v15, %v81_v10 }
 0x13d   :  { %v130_v18 = vadd.f32 %v128_v17, %v97_v16 }
 0x13f   :  { %1835 = vmatmul.mubr.msk.f32.vlgmr.msra.gmra.mrb[0].mxu1 %vm98_vm0, %v130_v18 }
 0x212   :  { %v1836_v20 = vpop.f32.mrb[0].mxu1 }
 0x213   :  { %v2328_v8 = vadd.f32 %v1836_v20, %v1708_v19  ;;  %v214_v21 = vpop.f32.mrb[1].mxu1 }
 0x214   :  { %v2330_v22 = vadd.f32 %v1708_v19, %v214_v21 }
 0x216   :  { %1841 = vmatprep.mubr.msk.f32.mxu1 %vm235_vm2, %v2330_v22  ;;  %v2336_v12 = vpack.i.bf16 %v2328_v8, %v2330_v22 }
 0x218   :  { %2077 = vrot.lane.b32.xlu1 %v2336_v12, %s2165_s22 }
 0x28a   :  { %v2078_v23 = vpop.permute.xlu1 %2077 }
 0x28b   :  { %v2080_v24 = vunpack.i.h.bf16 %v2078_v23  ;;  %v2079_v25 = vunpack.i.l.bf16 %v2078_v23 }
 0x28d   :  { %v1967_v27 = vpack.c.bf16 %v2080_v24, %v2079_v25 }
 0x28f   :  { %1969 = vmatprep.subr.msk.bf16.mxu1 %vm2341_vm3, %v1967_v27 }
 0x290   :  { %1972 = vmatpush3.bf16.xpose.msk.msra.mxu1 %vm2341_vm3, %v1967_v27 }
 0x297   :  { %1842 = vmatmul.mubr.msk.f32.vlgmr.msra.gmra.mrb[2].mxu1 %vm235_vm2, %v2328_v8 }
 0x36a   :  { %v1843_v28 = vpop.f32.mrb[2].mxu1 }
 0x36b   :  { %v320_v30 = vmul.f32 0.35355338, %v1843_v28  ;;  %v310_v31 = vpop.f32.mrb[3].mxu1 }
 0x36c   :  { %v319_v33 = vmul.f32 0.35355338, %v310_v31 }
 0x36d   :  { %v322_v34 = vadd.f32 %v320_v30, %v2354_v29 }
 0x36e   :  { %v321_v35 = vadd.f32 %v319_v33, %v2359_v32 }
 0x36f   :  { %v328_v36 = vsel %vm327_vm4, %v322_v34, -inf }
 0x370   :  { %329 = vmax.xlane.f32.xlu0 %v328_v36  ;;  %v324_v37 = vsel %vm323_vm5, %v321_v35, -inf }
 0x371   :  { %325 = vmax.xlane.f32.xlu1 %v324_v37 }
 0x382   :  { %2082 = vrot.lane.b32.xlu1 %v2336_v12, %s2166_s25 }
 0x386   :  { %2087 = vrot.lane.b32.xlu0 %v2336_v12, %s2167_s26  ;;  %436 = vrot.lane.b32.xlu1 %v2330_v22, %s2168_s2 }
 0x3fd   :  { %v330_v38 = vpop.xlane.xlu0 %329 }
 0x3fe   :  { %v332_v39 = vsub.f32 %v322_v34, %v330_v38  ;;  %v326_v42 = vpop.xlane.xlu1 %325 }
 0x3ff   :  { %v331_v43 = vsub.f32 %v321_v35, %v326_v42 }
 0x400   :  { %v335_v44 = vmul.f32 1.442695, %v332_v39 }
 0x401   :  { %v333_v45 = vmul.f32 1.442695, %v331_v43  ;;  %v2088_v46 = vpop.permute.xlu0 %2087 }
 0x402   :  { %2120 = vpow2.f32 %v335_v44  ;;  %v2083_v47 = vpop.permute.xlu1 %2082  ;;  %v2090_v48 = vunpack.i.h.bf16 %v2088_v46  ;;  %v2089_v49 = vunpack.i.l.bf16 %v2088_v46 }
 0x403   :  { %v2085_v50 = vunpack.i.h.bf16 %v2083_v47  ;;  %v2084_v51 = vunpack.i.l.bf16 %v2083_v47  ;;  %2122 = vpow2.f32 %v333_v45 }
 0x404   :  { %v1979_v54 = vpack.c.bf16 %v2090_v48, %v2089_v49 }
 0x405   :  { %v1973_v53 = vpack.c.bf16 %v2085_v50, %v2084_v51 }
 0x406   :  { %v437_v59 = vpop.permute.xlu1 %436 }
 0x407   :  { %1975 = vmatprep.subr.msk.bf16.mxu1 %vm2368_vm8, %v1973_v53 }
 0x408   :  { %1978 = vmatpush3.bf16.msk.msra.mxu1 %vm2368_vm8, %v1973_v53 }
 0x409   :  { %1981 = vmatprep.subr.msk.bf16.mxu1 %vm2341_vm3, %v1979_v54 }
 0x40c   :  { %v2121_v55 = vpop.eup %2120 }
 0x40d   :  { %v340_v56 = vsel %vm327_vm4, %v2121_v55, 0.0  ;;  %v2123_v57 = vpop.eup %2122 }
 0x40e   :  { %341 = vadd.xlane.f32.xlu1 %v340_v56  ;;  %v337_v58 = vsel %vm323_vm5, %v2123_v57, 0.0  ;;  %v226_v56 = vld [vmem:[%s2578_s7 + $0x8] sm:$0xff] }
 0x40f   :  { %1865 = vmatprep.subr.mxu0 %v226_v56 }
 0x410   :  { %1866 = vmatpush3.msra.mxu0 %v226_v56 }
 0x412   :  { %338 = vadd.xlane.f32.xlu1 %v337_v58 }
 0x423   :  { %438 = vrot.lane.b32.xlu1 %v2328_v8, %s2168_s2 }
 0x49b   :  { %v342_v60 = vpop.xlane.xlu1 %341 }
 0x49c   :  { %2124 = vrcp.f32 %v342_v60 }
 0x49f   :  { %v339_v63 = vpop.xlane.xlu1 %338 }
 0x4a0   :  { %2126 = vrcp.f32 %v339_v63 }
 0x4a3   :  { %v439_v6 = vpop.permute.xlu1 %438 }
 0x4a6   :  { %v2125_v2 = vpop.eup %2124 }
 0x4a7   :  { %v346_v5 = vmul.f32 %v2125_v2, %v2121_v55 }
 0x4aa   :  { %v2127_v3 = vpop.eup %2126 }
 0x4ab   :  { %v345_v4 = vmul.f32 %v2127_v3, %v2123_v57  ;;  %v225_v57 = vld [vmem:[%s2578_s7] sm:$0xff] }
 0x4ac   :  { %1870 = vmatprep.subr.mxu0 %v225_v57 }
 0x4ad   :  { %1848 = vmatprep.mubr.msk.f32.mxu1 %vm323_vm5, %v345_v4 }
 0x4ae   :  { %1849 = vmatmul.mubr.msk.f32.vlgmr.msra.gmra.mrb[4].mxu1 %vm323_vm5, %v346_v5 }
 0x4af   :  { %1984 = vmatpush3.bf16.xpose.msk.msra.mxu1 %vm2341_vm3, %v1979_v54  ;;  %1855 = vmatprep.mubr.msk.f32.mxu1 %vm235_vm2, %v437_v59 }
 0x4b6   :  { %1856 = vmatmul.mubr.msk.f32.vlgmr.msra.gmra.mrb[6].mxu1 %vm235_vm2, %v439_v6 }
 0x581   :  { %v2387_v7 = vpop.f32.mrb[4].mxu1 }
 0x582   :  { %v2389_v9 = vpop.f32.mrb[5].mxu1 }
 0x589   :  { %v1857_v10 = vpop.f32.mrb[6].mxu1 }
 0x58a   :  { %v528_v11 = vmul.f32 0.35355338, %v1857_v10  ;;  %v518_v13 = vpop.f32.mrb[7].mxu1 }
 0x58b   :  { %v527_v14 = vmul.f32 0.35355338, %v518_v13 }
 0x58c   :  { %v530_v15 = vadd.f32 %v528_v11, %v2354_v29 }
 0x58d   :  { %v529_v16 = vadd.f32 %v527_v14, %v2359_v32 }
 0x58e   :  { %v534_v17 = vsel %vm327_vm4, %v530_v15, -inf }
 0x58f   :  { %535 = vmax.xlane.f32.xlu0 %v534_v17  ;;  %v531_v18 = vsel %vm323_vm5, %v529_v16, -inf }
 0x590   :  { %532 = vmax.xlane.f32.xlu1 %v531_v18 }
 0x5a1   :  { %2092 = vrot.lane.b32.xlu1 %v2336_v12, %s2170_s27 }
 0x5a5   :  { %803 = vrot.lane.b32.xlu1 %v2330_v22, %s2171_s28 }
 0x61c   :  { %v536_v19 = vpop.xlane.xlu0 %535 }
 0x61d   :  { %v538_v20 = vsub.f32 %v530_v15, %v536_v19  ;;  %v533_v21 = vpop.xlane.xlu1 %532 }
 0x61e   :  { %v537_v23 = vsub.f32 %v529_v16, %v533_v21 }
 0x61f   :  { %v541_v24 = vmul.f32 1.442695, %v538_v20 }
 0x620   :  { %v539_v25 = vmul.f32 1.442695, %v537_v23 }
 0x621   :  { %2128 = vpow2.f32 %v541_v24  ;;  %v2093_v27 = vpop.permute.xlu1 %2092 }
 0x622   :  { %2130 = vpow2.f32 %v539_v25  ;;  %v2095_v28 = vunpack.i.h.bf16 %v2093_v27  ;;  %v2094_v30 = vunpack.i.l.bf16 %v2093_v27 }
 0x624   :  { %v1985_v31 = vpack.c.bf16 %v2095_v28, %v2094_v30 }
 0x625   :  { %v804_v37 = vpop.permute.xlu1 %803 }
 0x626   :  { %1987 = vmatprep.subr.msk.bf16.mxu1 %vm2368_vm8, %v1985_v31 }
 0x627   :  { %1990 = vmatpush3.bf16.msk.msra.mxu1 %vm2368_vm8, %v1985_v31 }
 0x62b   :  { %v2129_v33 = vpop.eup %2128 }
 0x62c   :  { %v2131_v34 = vpop.eup %2130  ;;  %v546_v35 = vsel %vm327_vm4, %v2129_v33, 0.0 }
 0x62d   :  { %547 = vadd.xlane.f32.xlu0 %v546_v35  ;;  %v543_v36 = vsel %vm323_vm5, %v2131_v34, 0.0 }
 0x62e   :  { %544 = vadd.xlane.f32.xlu1 %v543_v36 }
 0x63f   :  { %805 = vrot.lane.b32.xlu1 %v2328_v8, %s2171_s28 }
 0x643   :  { %2097 = vrot.lane.b32.xlu0 %v2336_v12, %s2172_s29  ;;  %1091 = vrot.lane.b32.xlu1 %v2330_v22, %s2173_s30 }
 0x647   :  { %2102 = vrot.lane.b32.xlu0 %v2336_v12, %s2174_s1 }
 0x64b   :  { %1093 = vrot.lane.b32.xlu0 %v2328_v8, %s2173_s30 }
 0x6ba   :  { %v548_v38 = vpop.xlane.xlu0 %547 }
 0x6bb   :  { %2132 = vrcp.f32 %v548_v38  ;;  %v545_v39 = vpop.xlane.xlu1 %544 }
 0x6bc   :  { %2134 = vrcp.f32 %v545_v39 }
 0x6be   :  { %v2098_v42 = vpop.permute.xlu0 %2097 }
 0x6bf   :  { %v2100_v43 = vunpack.i.h.bf16 %v2098_v42  ;;  %v2099_v44 = vunpack.i.l.bf16 %v2098_v42  ;;  %v806_v53 = vpop.permute.xlu1 %805 }
 0x6c1   :  { %v1991_v45 = vpack.c.bf16 %v2100_v43, %v2099_v44 }
 0x6c2   :  { %v2103_v46 = vpop.permute.xlu0 %2102 }
 0x6c3   :  { %1993 = vmatprep.subr.msk.bf16.mxu1 %vm2341_vm3, %v1991_v45  ;;  %v2105_v48 = vunpack.i.h.bf16 %v2103_v46  ;;  %v2104_v49 = vunpack.i.l.bf16 %v2103_v46  ;;  %v1092_v54 = vpop.permute.xlu1 %1091 }
 0x6c5   :  { %v2133_v47 = vpop.eup %2132  ;;  %v2003_v8 = vpack.c.bf16 %v2105_v48, %v2104_v49 }
 0x6c6   :  { %v2135_v22 = vpop.eup %2134  ;;  %v552_v51 = vmul.f32 %v2133_v47, %v2129_v33  ;;  %v1094_v55 = vpop.permute.xlu0 %1093 }
 0x6c7   :  { %v551_v50 = vmul.f32 %v2135_v22, %v2131_v34 }
 0x6c9   :  { %1862 = vmatprep.mubr.msk.f32.mxu1 %vm323_vm5, %v551_v50  ;;  %v227_v50 = vld [vmem:[%s2578_s7 + $0x10] sm:$0xff] }
 0x6ca   :  { %1863 = vmatmul.mubr.msk.f32.vlgmr.msra.gmra.mrb[8].mxu1 %vm323_vm5, %v552_v51 }
 0x6cb   :  { %1996 = vmatpush3.bf16.xpose.msk.msra.mxu1 %vm2341_vm3, %v1991_v45  ;;  %1879 = vmatprep.mubr.msk.f32.mxu1 %vm235_vm2, %v804_v37 }
 0x6cc   :  { %2005 = vmatprep.subr.msk.bf16.mxu1 %vm2341_vm3, %v2003_v8 }
 0x6d2   :  { %1880 = vmatmul.mubr.msk.f32.vlgmr.msra.gmra.mrb[10].mxu1 %vm235_vm2, %v806_v53 }
 0x6d3   :  { %2008 = vmatpush3.bf16.xpose.msk.msra.mxu1 %vm2341_vm3, %v2003_v8  ;;  %1898 = vmatprep.mubr.msk.f32.mxu1 %vm235_vm2, %v1092_v54 }
 0x6da   :  { %1899 = vmatmul.mubr.msk.f32.vlgmr.msra.gmra.mrb[12].mxu1 %vm235_vm2, %v1094_v55 }
 0x79d   :  { %v1864_v58 = vpop.f32.mrb[8].mxu1 }
 0x79e   :  { %v632_v59 = vpop.f32.mrb[9].mxu1 }
 0x79f   :  { %1867 = vmatprep.mubr.msk.f32.mxu0 %vm235_vm2, %v632_v59 }
 0x7a0   :  { %1868 = vmatmul.mubr.msk.f32.vlgmr.msra.gmra.mrb[0].mxu0 %vm235_vm2, %v1864_v58 }
 0x7a1   :  { %1872 = vmatprep.mubr.msk.f32.mxu0 %vm235_vm2, %v2389_v9  ;;  %1871 = vmatpush3.msra.mxu0 %v225_v57 }
 0x7a5   :  { %v1881_v26 = vpop.f32.mrb[10].mxu1 }
 0x7a6   :  { %v895_v60 = vmul.f32 0.35355338, %v1881_v26  ;;  %v885_v63 = vpop.f32.mrb[11].mxu1 }
 0x7a7   :  { %v894_v2 = vmul.f32 0.35355338, %v885_v63 }
 0x7a8   :  { %1873 = vmatmul.mubr.msk.f32.vlgmr.msra.gmra.mrb[0].mxu0 %vm235_vm2, %v2387_v7  ;;  %v897_v3 = vadd.f32 %v895_v60, %v2354_v29  ;;  %v228_v60 = vld [vmem:[%s2578_s7 + $0x18] sm:$0xff] }
 0x7a9   :  { %v896_v4 = vadd.f32 %v894_v2, %v2359_v32 }
 0x7aa   :  { %v901_v5 = vsel %vm327_vm4, %v897_v3, -inf }
 0x7ab   :  { %902 = vmax.xlane.f32.xlu0 %v901_v5  ;;  %v898_v6 = vsel %vm323_vm5, %v896_v4, -inf  ;;  %v1747_v5 = vld [vmem:[%s2579_s8] ss:$0 sm:$0xff] }
 0x7ac   :  { %899 = vmax.xlane.f32.xlu1 %v898_v6 }
 0x7ad   :  { %v1900_v10 = vpop.f32.mrb[12].mxu1 }
 0x7ae   :  { %v1173_v9 = vpop.f32.mrb[13].mxu1  ;;  %v1183_v20 = vmul.f32 0.35355338, %v1900_v10 }
 0x7af   :  { %v1182_v7 = vmul.f32 0.35355338, %v1173_v9 }
 0x7b0   :  { %v1185_v27 = vadd.f32 %v1183_v20, %v2354_v29 }
 0x7b1   :  { %v1184_v23 = vadd.f32 %v1182_v7, %v2359_v32 }
 0x7b2   :  { %v1189_v28 = vsel %vm327_vm4, %v1185_v27, -inf }
 0x7b3   :  { %v1186_v25 = vsel %vm323_vm5, %v1184_v23, -inf }
 0x838   :  { %v903_v11 = vpop.xlane.xlu0 %902 }
 0x839   :  { %v905_v13 = vsub.f32 %v897_v3, %v903_v11  ;;  %v900_v14 = vpop.xlane.xlu1 %899 }
 0x83a   :  { %v904_v15 = vsub.f32 %v896_v4, %v900_v14 }
 0x83b   :  { %v908_v16 = vmul.f32 1.442695, %v905_v13 }
 0x83c   :  { %v906_v17 = vmul.f32 1.442695, %v904_v15 }
 0x83d   :  { %2136 = vpow2.f32 %v908_v16 }
 0x83e   :  { %2138 = vpow2.f32 %v906_v17 }
 0x847   :  { %v2137_v18 = vpop.eup %2136 }
 0x848   :  { %v2139_v19 = vpop.eup %2138  ;;  %v913_v21 = vsel %vm327_vm4, %v2137_v18, 0.0 }
 0x849   :  { %914 = vadd.xlane.f32.xlu1 %v913_v21  ;;  %v910_v24 = vsel %vm323_vm5, %v2139_v19, 0.0 }
 0x84a   :  { %911 = vadd.xlane.f32.xlu0 %v910_v24  ;;  %v1455_v24 = vld [vmem:[%s2580_s11 + $0x8] sm:$0xff] }
 0x84d   :  { %1187 = vmax.xlane.f32.xlu1 %v1186_v25 }
 0x851   :  { %1190 = vmax.xlane.f32.xlu1 %v1189_v28  ;;  %v1457_v28 = vld [vmem:[%s2580_s11 + $0x18] sm:$0xff] }
 0x860   :  { %2107 = vrot.lane.b32.xlu0 %v2336_v12, %s2175_s18 }
 0x8d6   :  { %v915_v30 = vpop.xlane.xlu1 %914 }
 0x8d7   :  { %2140 = vrcp.f32 %v915_v30  ;;  %v912_v31 = vpop.xlane.xlu0 %911 }
 0x8d8   :  { %2142 = vrcp.f32 %v912_v31 }
 0x8da   :  { %v1188_v32 = vpop.xlane.xlu1 %1187 }
 0x8db   :  { %v2108_v33 = vpop.permute.xlu0 %2107  ;;  %v1192_v36 = vsub.f32 %v1184_v23, %v1188_v32  ;;  %v1454_v23 = vld [vmem:[%s2580_s11] sm:$0xff] }
 0x8dc   :  { %v2110_v34 = vunpack.i.h.bf16 %v2108_v33  ;;  %v2109_v35 = vunpack.i.l.bf16 %v2108_v33  ;;  %v2015_v25 = vpack.c.bf16 %v1455_v24, %v1454_v23 }
 0x8dd   :  { %v1194_v42 = vmul.f32 1.442695, %v1192_v36 }
 0x8de   :  { %v1997_v37 = vpack.c.bf16 %v2110_v34, %v2109_v35  ;;  %v1191_v38 = vpop.xlane.xlu1 %1190  ;;  %2016 = vmatprep.subr.bf16.mxu1 %v2015_v25 }
 0x8df   :  { %v1193_v39 = vsub.f32 %v1185_v27, %v1191_v38  ;;  %2018 = vmatpush3.bf16.msra.mxu1 %v2015_v25  ;;  %v1456_v27 = vld [vmem:[%s2580_s11 + $0x10] sm:$0xff] }
 0x8e0   :  { %1999 = vmatprep.subr.msk.bf16.mxu0 %vm2368_vm8, %v1997_v37  ;;  %v2019_v30 = vpack.c.bf16 %v1457_v28, %v1456_v27 }
 0x8e1   :  { %v2141_v29 = vpop.eup %2140  ;;  %v1196_v43 = vmul.f32 1.442695, %v1193_v39  ;;  %2002 = vmatpush3.bf16.msk.msra.mxu0 %vm2368_vm8, %v1997_v37 }
 0x8e2   :  { %v2143_v44 = vpop.eup %2142  ;;  %v919_v46 = vmul.f32 %v2141_v29, %v2137_v18  ;;  %1889 = vmatprep.subr.mxu0 %v227_v50  ;;  %2020 = vmatprep.subr.bf16.mxu1 %v2019_v30 }
 0x8e3   :  { %2144 = vpow2.f32 %v1196_v43  ;;  %v918_v45 = vmul.f32 %v2143_v44, %v2139_v19  ;;  %2022 = vmatpush3.bf16.msra.mxu1 %v2019_v30 }
 0x8e4   :  { %2146 = vpow2.f32 %v1194_v42 }
 0x8e5   :  { %1886 = vmatprep.mubr.msk.f32.mxu0 %vm323_vm5, %v918_v45 }
 0x8e6   :  { %1887 = vmatmul.mubr.msk.f32.vlgmr.msra.gmra.mrb[2].mxu0 %vm323_vm5, %v919_v46  ;;  %v1600_v46 = vld [vmem:[%s2581_s13] sm:$0xff] }
 0x8e7   :  { %1890 = vmatpush3.msra.mxu0 %v227_v50  ;;  %v1606_v50 = vld [vmem:[%s2581_s13 + $0x30] sm:$0xff] }
 0x8ed   :  { %v2145_v47 = vpop.eup %2144 }
 0x8ee   :  { %v1201_v22 = vsel %vm327_vm4, %v2145_v47, 0.0  ;;  %v2147_v48 = vpop.eup %2146 }
 0x8ef   :  { %1202 = vadd.xlane.f32.xlu1 %v1201_v22  ;;  %v1198_v49 = vsel %vm323_vm5, %v2147_v48, 0.0  ;;  %v1604_v22 = vld [vmem:[%s2581_s13 + $0x20] sm:$0xff] }
 0x8f3   :  { %1199 = vadd.xlane.f32.xlu1 %v1198_v49 }
 0x904   :  { %2112 = vrot.lane.b32.xlu1 %v2336_v12, %s2176_s19 }
 0x97c   :  { %v1203_v51 = vpop.xlane.xlu1 %1202 }
 0x980   :  { %v1200_v8 = vpop.xlane.xlu1 %1199 }
 0x981   :  { %2148 = vrcp.f32 %v1200_v8 }
 0x982   :  { %2150 = vrcp.f32 %v1203_v51  ;;  %v1607_v51 = vld [vmem:[%s2581_s13 + $0x38] sm:$0xff] }
 0x983   :  { %v2035_v8 = vpack.c.bf16 %v1607_v51, %v1606_v50 }
 0x984   :  { %v2113_v53 = vpop.permute.xlu1 %2112 }
 0x985   :  { %v2115_v54 = vunpack.i.h.bf16 %v2113_v53  ;;  %v2114_v55 = vunpack.i.l.bf16 %v2113_v53  ;;  %v1608_v53 = vld [vmem:[%s2581_s13 + $0x40] sm:$0xff] }
 0x987   :  { %v2009_v56 = vpack.c.bf16 %v2115_v54, %v2114_v55  ;;  %v1609_v54 = vld [vmem:[%s2581_s13 + $0x48] sm:$0xff] }
 0x988   :  { %v2039_v55 = vpack.c.bf16 %v1609_v54, %v1608_v53 }
 0x989   :  { %2011 = vmatprep.subr.msk.bf16.mxu0 %vm2368_vm8, %v2009_v56 }
 0x98b   :  { %v2149_v57 = vpop.eup %2148 }
 0x98c   :  { %v2151_v59 = vpop.eup %2150  ;;  %v1206_v26 = vmul.f32 %v2149_v57, %v2147_v48  ;;  %v1605_v48 = vld [vmem:[%s2581_s13 + $0x28] sm:$0xff]  ;;  %v1611_v57 = vld [vmem:[%s2581_s13 + $0x58] sm:$0xff] }
 0x98d   :  { %v1207_v63 = vmul.f32 %v2151_v59, %v2145_v47  ;;  %v2031_v49 = vpack.c.bf16 %v1605_v48, %v1604_v22  ;;  %v1613_v59 = vld [vmem:[%s2581_s13 + $0x68] sm:$0xff] }
 0x9b9   :  { %v1888_v58 = vpop.f32.mrb[2].mxu0 }
 0x9ba   :  { %v999_v12 = vpop.f32.mrb[3].mxu0 }
 0x9bb   :  { %1891 = vmatprep.mubr.msk.f32.mxu0 %vm235_vm2, %v999_v12  ;;  %v1612_v12 = vld [vmem:[%s2581_s13 + $0x60] sm:$0xff] }
 0x9bc   :  { %1892 = vmatmul.mubr.msk.f32.vlgmr.msra.gmra.mrb[0].mxu0 %vm235_vm2, %v1888_v58 }
 0x9bd   :  { %2014 = vmatpush3.bf16.msk.msra.mxu0 %vm2368_vm8, %v2009_v56  ;;  %1905 = vmatprep.mubr.msk.f32.mxu0 %vm323_vm5, %v1206_v26  ;;  %v1610_v56 = vld [vmem:[%s2581_s13 + $0x50] sm:$0xff]  ;;  %v2047_v26 = vpack.c.bf16 %v1613_v59, %v1612_v12  ;;  %v1751_v12 = vld [vmem:[%s2583_s14] ss:$0 sm:$0xff] }
 0x9be   :  { %1908 = vmatprep.subr.mxu0 %v228_v60  ;;  %v2043_v58 = vpack.c.bf16 %v1611_v57, %v1610_v56 }
 0x9c0   :  { %1906 = vmatmul.mubr.msk.f32.vlgmr.msra.gmra.mrb[4].mxu0 %vm323_vm5, %v1207_v63  ;;  %v1615_v63 = vld [vmem:[%s2581_s13 + $0x78] sm:$0xff] }
 0x9c1   :  { %1909 = vmatpush3.msra.mxu0 %v228_v60  ;;  %v1614_v60 = vld [vmem:[%s2581_s13 + $0x70] sm:$0xff] }
 0xa93   :  { %v1907_v2 = vpop.f32.mrb[4].mxu0 }
 0xa94   :  { %v1287_v3 = vpop.f32.mrb[5].mxu0 }
 0xa95   :  { %1910 = vmatprep.mubr.msk.f32.mxu0 %vm235_vm2, %v1287_v3  ;;  %v1748_v3 = vld [vmem:[%s2582_s12] ss:$0 sm:$0xff] }
 0xa96   :  { %1911 = vmatmul.mubr.msk.f32.vlgmr.msra.gmra.mrb[0].mxu0 %vm235_vm2, %v1907_v2  ;;  %v2051_v2 = vpack.c.bf16 %v1615_v63, %v1614_v60 }
 0xb69   :  { %v1912_v4 = vpop.f32.mrb[0].mxu0 }
 0xb6a   :  { %v1380_v52 = vadd.f32 %v1912_v4, %v2265_v1  ;;  %v1368_v6 = vpop.f32.mrb[1].mxu0 }
 0xb6b   :  { %v1379_v10 = vadd.f32 %v1368_v6, %v2260_v0 }
 0xb6c   :  { %v2475_v9 = vadd.f32 %v1747_v5, %v1380_v52 }
 0xb6d   :  { %v2477_v11 = vadd.f32 %v1747_v5, %v1379_v10 }
 0xb6e   :  { %v1427_v13 = vsel %vm102_vm1, %v2475_v9, 0.0 }
 0xb6f   :  { %1428 = vadd.xlane.f32.xlu1 %v1427_v13  ;;  %v1424_v14 = vsel %vm98_vm0, %v2477_v11, 0.0 }
 0xb70   :  { %1425 = vadd.xlane.f32.xlu0 %v1424_v14 }
 0xbfc   :  { %v1429_v15 = vpop.xlane.xlu1 %1428 }
 0xbfd   :  { %v1431_v16 = vmul.f32 0.03125, %v1429_v15  ;;  %v1426_v17 = vpop.xlane.xlu0 %1425 }
 0xbfe   :  { %v1430_v7 = vmul.f32 0.03125, %v1426_v17 }
 0xbff   :  { %v1433_v1 = vsub.f32 %v2475_v9, %v1431_v16 }
 0xc00   :  { %v1432_v0 = vsub.f32 %v2477_v11, %v1430_v7 }
 0xc01   :  { %v1435_v20 = vmul.f32 %v1433_v1, %v1433_v1 }
 0xc02   :  { %v1434_v18 = vmul.f32 %v1432_v0, %v1432_v0 }
 0xc03   :  { %v1439_v21 = vsel %vm102_vm1, %v1435_v20, 0.0 }
 0xc04   :  { %v1436_v19 = vsel %vm98_vm0, %v1434_v18, 0.0 }
 0xc05   :  { %1437 = vadd.xlane.f32.xlu0 %v1436_v19 }
 0xc09   :  { %1440 = vadd.xlane.f32.xlu0 %v1439_v21 }
 0xc92   :  { %v1438_v31 = vpop.xlane.xlu0 %1437 }
 0xc93   :  { %v1442_v32 = vmul.f32 0.03125, %v1438_v31 }
 0xc95   :  { %v1444_v33 = vadd.f32 1e-06, %v1442_v32 }
 0xc96   :  { %v1441_v34 = vpop.xlane.xlu0 %1440 }
 0xc97   :  { %2152 = vrsqrt.f32 %v1444_v33  ;;  %v1443_v35 = vmul.f32 0.03125, %v1441_v34 }
 0xc99   :  { %v1445_v36 = vadd.f32 1e-06, %v1443_v35 }
 0xc9b   :  { %2154 = vrsqrt.f32 %v1445_v36 }
 0xca1   :  { %v2153_v37 = vpop.eup %2152 }
 0xca2   :  { %v1448_v38 = vmul.f32 %v2153_v37, %v1432_v0 }
 0xca4   :  { %v1450_v39 = vmul.f32 %v1448_v38, %v2307_v40  ;;  %v1601_v40 = vld [vmem:[%s2581_s13 + $0x8] sm:$0xff] }
 0xca5   :  { %v2155_v29 = vpop.eup %2154  ;;  %v2023_v47 = vpack.c.bf16 %v1601_v40, %v1600_v46 }
 0xca6   :  { %v1449_v42 = vmul.f32 %v2155_v29, %v1433_v1  ;;  %v1452_v43 = vadd.f32 %v1450_v39, %v2309_v41  ;;  %v1602_v41 = vld [vmem:[%s2581_s13 + $0x10] sm:$0xff] }
 0xca7   :  { %2024 = vmatprep.subr.bf16.mxu0 %v2023_v47 }
 0xca8   :  { %v1451_v44 = vmul.f32 %v1449_v42, %v2317_v61  ;;  %1921 = vmatprep.mubr.msk.f32.mxu1 %vm98_vm0, %v1452_v43  ;;  %2026 = vmatpush3.bf16.msra.mxu0 %v2023_v47  ;;  %v1603_v61 = vld [vmem:[%s2581_s13 + $0x18] sm:$0xff] }
 0xcaa   :  { %v1453_v45 = vadd.f32 %v1451_v44, %v2319_v62  ;;  %v2027_v62 = vpack.c.bf16 %v1603_v61, %v1602_v41 }
 0xcac   :  { %1922 = vmatmul.mubr.msk.f32.vlgmr.msra.gmra.mrb[14].mxu1 %vm98_vm0, %v1453_v45  ;;  %2028 = vmatprep.subr.bf16.mxu0 %v2027_v62 }
 0xcad   :  { %2030 = vmatpush3.bf16.msra.mxu0 %v2027_v62 }
 0xcae   :  { %2032 = vmatprep.subr.bf16.mxu0 %v2031_v49 }
 0xcb1   :  { %2034 = vmatpush3.bf16.msra.mxu0 %v2031_v49 }
 0xcb2   :  { %2036 = vmatprep.subr.bf16.mxu0 %v2035_v8 }
 0xcb5   :  { %2038 = vmatpush3.bf16.msra.mxu0 %v2035_v8 }
 0xcb6   :  { %2040 = vmatprep.subr.bf16.mxu0 %v2039_v55 }
 0xcb9   :  { %2042 = vmatpush3.bf16.msra.mxu0 %v2039_v55 }
 0xcba   :  { %2044 = vmatprep.subr.bf16.mxu0 %v2043_v58 }
 0xcbd   :  { %2046 = vmatpush3.bf16.msra.mxu0 %v2043_v58 }
 0xcbe   :  { %2048 = vmatprep.subr.bf16.mxu0 %v2047_v26 }
 0xcc1   :  { %2050 = vmatpush3.bf16.msra.mxu0 %v2047_v26 }
 0xcc2   :  { %2052 = vmatprep.subr.bf16.mxu0 %v2051_v2 }
 0xcc5   :  { %2054 = vmatpush3.bf16.msra.mxu0 %v2051_v2 }
 0xd7f   :  { %v1923_v4 = vpop.f32.mrb[14].mxu1 }
 0xd80   :  { %v1543_v5 = vadd.f32 %v1923_v4, %v1748_v3  ;;  %v1537_v52 = vpop.f32.mrb[15].mxu1 }
 0xd81   :  { %v1538_v6 = vadd.f32 %v1748_v3, %v1537_v52 }
 0xd82   :  { %v1549_v10 = vmul.f32 0.70710677, %v1543_v5  ;;  %v1547_v55 = vmul.f32 0.5, %v1543_v5 }
 0xd83   :  { %v1548_v13 = vmul.f32 0.70710677, %v1538_v6  ;;  %v1546_v53 = vmul.f32 0.5, %v1538_v6 }
 0xd84   :  { %v1551_v14 = vand.u32 2147483647, %v1549_v10  ;;  %vm1591_vm9 = vcmp.ge.f32.partialorder %v1549_v10, 0.0 }
 0xd85   :  { %v1550_v15 = vand.u32 2147483647, %v1548_v13  ;;  %vm1590_vm10 = vcmp.ge.f32.partialorder %v1548_v13, 0.0 }
 0xd86   :  { %v1553_v16 = vmul.f32 0.3275911, %v1551_v14  ;;  %v1579_v0 = vsub.f32 0.0, %v1551_v14 }
 0xd87   :  { %v1552_v17 = vmul.f32 0.3275911, %v1550_v15  ;;  %v1578_v18 = vsub.f32 0.0, %v1550_v15 }
 0xd88   :  { %v1555_v7 = vadd.f32 1.0, %v1553_v16  ;;  %v1581_v20 = vmul.f32 %v1579_v0, %v1551_v14 }
 0xd89   :  { %v1554_v1 = vadd.f32 1.0, %v1552_v17  ;;  %v1580_v24 = vmul.f32 %v1578_v18, %v1550_v15 }
 0xd8a   :  { %2156 = vrcp.f32 %v1555_v7  ;;  %v1584_v28 = vmul.f32 1.442695, %v1581_v20 }
 0xd8b   :  { %2158 = vrcp.f32 %v1554_v1  ;;  %v1582_v32 = vmul.f32 1.442695, %v1580_v24 }
 0xd8c   :  { %2160 = vpow2.f32 %v1584_v28 }
 0xd8d   :  { %2162 = vpow2.f32 %v1582_v32 }
 0xd94   :  { %v2157_v19 = vpop.eup %2156 }
 0xd95   :  { %v2159_v21 = vpop.eup %2158  ;;  %v1561_v23 = vmul.f32 1.0614054, %v2157_v19 }
 0xd96   :  { %v1560_v25 = vmul.f32 1.0614054, %v2159_v21  ;;  %v2161_v46 = vpop.eup %2160 }
 0xd97   :  { %v1563_v27 = vadd.f32 -1.4531521, %v1561_v23  ;;  %v2163_v47 = vpop.eup %2162 }
 0xd98   :  { %v1562_v30 = vadd.f32 -1.4531521, %v1560_v25 }
 0xd99   :  { %v1565_v31 = vmul.f32 %v2157_v19, %v1563_v27 }
 0xd9a   :  { %v1564_v33 = vmul.f32 %v2159_v21, %v1562_v30 }
 0xd9b   :  { %v1567_v34 = vadd.f32 1.4214138, %v1565_v31 }
 0xd9c   :  { %v1566_v35 = vadd.f32 1.4214138, %v1564_v33 }
 0xd9d   :  { %v1569_v36 = vmul.f32 %v2157_v19, %v1567_v34 }
 0xd9e   :  { %v1568_v37 = vmul.f32 %v2159_v21, %v1566_v35 }
 0xd9f   :  { %v1571_v38 = vadd.f32 -0.28449672, %v1569_v36 }
 0xda0   :  { %v1570_v39 = vadd.f32 -0.28449672, %v1568_v37 }
 0xda1   :  { %v1573_v29 = vmul.f32 %v2157_v19, %v1571_v38 }
 0xda2   :  { %v1572_v42 = vmul.f32 %v2159_v21, %v1570_v39 }
 0xda3   :  { %v1575_v43 = vadd.f32 0.2548296, %v1573_v29 }
 0xda4   :  { %v1574_v44 = vadd.f32 0.2548296, %v1572_v42 }
 0xda5   :  { %v1577_v45 = vmul.f32 %v2157_v19, %v1575_v43 }
 0xda6   :  { %v1576_v40 = vmul.f32 %v2159_v21, %v1574_v44 }
 0xda7   :  { %v1587_v41 = vmul.f32 %v2161_v46, %v1577_v45 }
 0xda8   :  { %v1586_v61 = vmul.f32 %v2163_v47, %v1576_v40 }
 0xda9   :  { %v1589_v62 = vsub.f32 1.0, %v1587_v41 }
 0xdaa   :  { %v1588_v22 = vsub.f32 1.0, %v1586_v61 }
 0xdab   :  { %v1593_v48 = vsub.f32 0.0, %v1589_v62 }
 0xdac   :  { %v1592_v49 = vsub.f32 0.0, %v1588_v22 }
 0xdad   :  { %v1595_v50 = vsel %vm1591_vm9, %v1589_v62, %v1593_v48 }
 0xdae   :  { %v1597_v51 = vadd.f32 1.0, %v1595_v50  ;;  %v1594_v8 = vsel %vm1590_vm10, %v1588_v22, %v1592_v49 }
 0xdaf   :  { %v1596_v54 = vadd.f32 1.0, %v1594_v8 }
 0xdb0   :  { %v1599_v57 = vmul.f32 %v1597_v51, %v1547_v55 }
 0xdb1   :  { %v1598_v56 = vmul.f32 %v1596_v54, %v1546_v53 }
 0xdb3   :  { %1956 = vmatprep.mubr.f32.mxu0 %v1598_v56 }
 0xdb4   :  { %1957 = vmatmul.mubr.f32.vlgmr.msra.gmra.mrb[6].mxu0 %v1599_v57 }
 0xe87   :  { %v1958_v58 = vpop.f32.mrb[6].mxu0 }
 0xe88   :  { %v1692_v59 = vadd.f32 %v1958_v58, %v2475_v9  ;;  %v1682_v26 = vpop.f32.mrb[7].mxu0 }
 0xe89   :  { %v1691_v60 = vadd.f32 %v1682_v26, %v2477_v11 }
 0xe8a   :  { %v1701_v63 = vadd.f32 %v1751_v12, %v1692_v59 }
 0xe8b   :  { %v1700_v2 = vadd.f32 %v1751_v12, %v1691_v60 }
 0xe8c   :  { %1703 = vst.msk [vmem:[%s2584_s15 + $0x8] sm:$0x3] %vm102_vm1, %v1701_v63 }
 0xe8d   :  { %1702 = vst.msk [vmem:[%s2584_s15] sm:$0xff] %vm98_vm0, %v1700_v2 }

// kernel: adv_mae_forward.9
= control target key start
LH: loop header
LB: loop body
LE: loop exit
PB: predicated region body
PF: predicated region fallthrough
CT: control target
= control target key end

     0   :  { %vm109_vm0 = vcmask 261120   ;;  %vm116_vm1 = vcmask 257024   ;;  %v2582_v6 = vmov 0   ;;  %v2583_v22 = vmov 0.0|0.0   ;;  %s2590_s20 = smov 56   ;;  %s2592_s21 = smov 112   ;;  %s3212_s0 = inlined_call_operand.vmem [shape: f32[20,32], index: 0, kind: input, shape index: {}]   ;;  %s3213_s1 = inlined_call_operand.vmem [shape: f32[20,1], index: 1, kind: input, shape index: {}]   ;;  %s3214_s5 = inlined_call_operand.vmem [shape: f32[32,96], index: 5, kind: input, shape index: {}]   ;;  %s3215_s9 = inlined_call_operand.vmem [shape: f32[2,32], index: 9, kind: input, shape index: {}]   ;;  %s3216_s10 = inlined_call_operand.vmem [shape: f32[2,32], index: 10, kind: input, shape index: {}]   ;;  %s3217_s3 = inlined_call_operand.vmem [shape: f32[2,32], index: 3, kind: input, shape index: {}]   ;;  %s3218_s4 = inlined_call_operand.vmem [shape: f32[2,32], index: 4, kind: input, shape index: {}]   ;;  %s3219_s6 = inlined_call_operand.vmem [shape: f32[1,96], index: 6, kind: input, shape index: {}]   ;;  %s3220_s2 = inlined_call_operand.vmem [shape: f32[20,20], index: 2, kind: input, shape index: {}]   ;;  %s3221_s7 = inlined_call_operand.vmem [shape: f32[32,32], index: 7, kind: input, shape index: {}]   ;;  %s3222_s8 = inlined_call_operand.vmem [shape: f32[1,32], index: 8, kind: input, shape index: {}]   ;;  %s3223_s11 = inlined_call_operand.vmem [shape: f32[32,128], index: 11, kind: input, shape index: {}]   ;;  %s3224_s13 = inlined_call_operand.vmem [shape: f32[128,32], index: 13, kind: input, shape index: {}]   ;;  %s3225_s12 = inlined_call_operand.vmem [shape: f32[1,128], index: 12, kind: input, shape index: {}]   ;;  %s3226_s14 = inlined_call_operand.vmem [shape: f32[1,32], index: 14, kind: input, shape index: {}]   ;;  %s3227_s15 = inlined_call_operand.vmem [shape: f32[20,32], index: 15, kind: output, shape index: {}]  }
   0x1   :  { %v50_v0 = vld [vmem:[%s3212_s0] sm:$0xff]  ;;  %v51_v1 = vld [vmem:[%s3212_s0 + $0x8] sm:$0xff]  ;;  %v52_v2 = vld [vmem:[%s3212_s0 + $0x10] sm:$0xf]  ;;  %2466 = vset.pattern.permute.xlu1 %v2582_v6  ;;  %2465 = vset.pattern.permute.xlu0 %v2582_v6  ;;  %vm2584_vm2 = vmmov 0   ;;  %v2585_v26 = vmov 0.0   ;;  %v77_v33 = vlaneseq }
   0x2   :  { %v110_v3 = vsel %vm109_vm0, %v50_v0, 0.0  ;;  %v117_v4 = vsel %vm116_vm1, %v52_v2, 0.0  ;;  %v113_v5 = vsel %vm109_vm0, %v51_v1, 0.0  ;;  %v54_v17 = vld [vmem:[%s3213_s1 + $0x8] sm:$0xff]  ;;  %v53_v18 = vld [vmem:[%s3213_s1] sm:$0xff]  ;;  %2386 = vmatprep.subr.bf16.mxu1 %v2583_v22  ;;  %v159_v23 = vld [vmem:[%s3214_s5 + $0x10] sm:$0xff]  ;;  %2396 = vmatprep.subr.bf16.mxu0 %v2583_v22 }
   0x3   :  { %111 = vadd.xlane.f32.xlu0 %v110_v3  ;;  %118 = vadd.xlane.f32.xlu1 %v117_v4  ;;  %v157_v19 = vld [vmem:[%s3214_s5] sm:$0xff]  ;;  %v158_v20 = vld [vmem:[%s3214_s5 + $0x8] sm:$0xff]  ;;  %v160_v24 = vld [vmem:[%s3214_s5 + $0x18] sm:$0xff]  ;;  %v78_v36 = vshrl.u32 %v77_v33, 7  ;;  %vm273_vm3 = vcmask 64512   ;;  %vm372_vm5 = vcmask 162816  }
   0x4   :  { %v2387_v21 = vpack.c.bf16 %v158_v20, %v157_v19  ;;  %v2390_v25 = vpack.c.bf16 %v160_v24, %v159_v23  ;;  %2155 = vmatprep.mubr.msk.f32.mxu1 %vm2584_vm2, %v2585_v26  ;;  %2185 = vmatprep.mubr.msk.f32.mxu0 %vm2584_vm2, %v2585_v26  ;;  %v55_v32 = vld [vmem:[%s3213_s1 + $0x10] sm:$0xf]  ;;  %v1608_v34 = vld [vmem:[%s3215_s9] sm:$0x3]  ;;  %s2586_s9 = smov 96   ;;  %vm2791_vm4 = vmpackc.low %vm273_vm3, %vm273_vm3  ;;  %vm379_vm6 = vcmask 158720  }
   0x5   :  { %v1609_v35 = vld [vmem:[%s3216_s10] sm:$0x3]  ;;  %v1611_v37 = vrot.slane %v1608_v34, 7  ;;  %v79_v39 = vsub.s32 1, %v78_v36  ;;  %v86_v42 = vsub.s32 0, %v78_v36  ;;  %s2587_s10 = smov 120  }
   0x6   :  { %2388 = vmatpush3.bf16.msra.mxu1 %v2387_v21  ;;  %v1629_v38 = vrot.slane %v1609_v35, 7  ;;  %v56_v44 = vld [vmem:[%s3217_s3] sm:$0x3]  ;;  %s2591_s5 = smov 80   ;;  %vm424_vm7 = vcmask 1043456   ;;  %s2593_s26 = smov 48  }
   0x7   :  { %114 = vadd.xlane.f32.xlu0 %v113_v5  ;;  %2389 = vmatprep.subr.bf16.mxu1 %v2583_v22  ;;  %v1613_v40 = vsub.f32 %v1608_v34, %v1611_v37  ;;  %v57_v45 = vld [vmem:[%s3218_s4] sm:$0x3]  ;;  %v59_v50 = vrot.slane %v56_v44, 7  ;;  %v1624_v52 = vrot.slane %v1608_v34, %v86_v42  ;;  %v1642_v53 = vrot.slane %v1609_v35, %v86_v42  ;;  %s2594_s1 = smov 72   ;;  %s2595_s27 = smov 104  }
   0x8   :  { %v1631_v41 = vsub.f32 %v1609_v35, %v1629_v38  ;;  %v92_v51 = vrot.slane %v57_v45, 7  ;;  %s2596_s4 = smov 40  }
   0x9   :  { %v1617_v47 = vrot.slane %v1613_v40, %v79_v39  ;;  %v61_v59 = vsub.f32 %v56_v44, %v59_v50 }
   0xa   :  { %2391 = vmatpush3.bf16.msra.mxu1 %v2390_v25  ;;  %v1635_v48 = vrot.slane %v1631_v41, %v79_v39  ;;  %v94_v60 = vsub.f32 %v57_v45, %v92_v51 }
   0xb   :  { %2392 = vmatprep.subr.bf16.mxu1 %v2583_v22 }
  0x90   :  { %v112_v7 = vpop.xlane.xlu0 %111  ;;  %v119_v27 = vpop.xlane.xlu1 %118 }
  0x91   :  { %v121_v8 = vmul.f32 0.03125, %v112_v7  ;;  %v123_v28 = vmul.f32 0.03125, %v119_v27 }
  0x93   :  { %v2689_v9 = vsub.f32 %v50_v0, %v121_v8  ;;  %v2725_v29 = vsub.f32 %v52_v2, %v123_v28  ;;  %v80_v0 = vrot.slane %v61_v59, %v79_v39  ;;  %v87_v2 = vrot.slane %v56_v44, %v86_v42 }
  0x94   :  { %v115_v10 = vpop.xlane.xlu0 %114  ;;  %v105_v8 = vrot.slane %v57_v45, %v86_v42 }
  0x95   :  { %v122_v11 = vmul.f32 0.03125, %v115_v10  ;;  %v127_v12 = vmul.f32 %v2689_v9, %v2689_v9  ;;  %v129_v30 = vmul.f32 %v2725_v29, %v2725_v29 }
  0x97   :  { %v2693_v13 = vsub.f32 %v51_v1, %v122_v11  ;;  %v130_v14 = vsel %vm109_vm0, %v127_v12, 0.0  ;;  %v136_v31 = vsel %vm116_vm1, %v129_v30, 0.0  ;;  %v98_v1 = vrot.slane %v94_v60, %v79_v39 }
  0x98   :  { %131 = vadd.xlane.f32.xlu1 %v130_v14 }
  0x99   :  { %v128_v15 = vmul.f32 %v2693_v13, %v2693_v13 }
  0x9b   :  { %v133_v16 = vsel %vm109_vm0, %v128_v15, 0.0 }
  0x9c   :  { %134 = vadd.xlane.f32.xlu0 %v133_v16 }
  0xa9   :  { %69 = vperm.xlu1 %2466, %v54_v17  }
  0xb2   :  { %64 = vperm.xlu0 %2465, %v53_v18  }
  0xcd   :  { %137 = vadd.xlane.f32.xlu1 %v136_v31 }
  0xde   :  { %74 = vperm.xlu1 %2466, %v55_v32  }
 0x125   :  { %v132_v43 = vpop.xlane.xlu1 %131 }
 0x126   :  { %v139_v46 = vmul.f32 0.03125, %v132_v43 }
 0x128   :  { %v142_v49 = vadd.f32 1e-06, %v139_v46  ;;  %v1988_v46 = vld [vmem:[%s3219_s6] ss:$0 sm:$0xff]  ;;  %s2588_s6 = smov 88  }
 0x129   :  { %v70_v54 = vpop.permute.xlu1 %69  ;;  %v135_v55 = vpop.xlane.xlu0 %134 }
 0x12a   :  { %2507 = vrsqrt.f32 %v142_v49  ;;  %v1619_v56 = vmul.f32 %v1617_v47, %v70_v54  ;;  %v1637_v57 = vmul.f32 %v1635_v48, %v70_v54  ;;  %v140_v58 = vmul.f32 0.03125, %v135_v55 }
 0x12b   :  { %v82_v17 = vmul.f32 %v80_v0, %v70_v54  ;;  %v100_v19 = vmul.f32 %v98_v1, %v70_v54 }
 0x12c   :  { %v2745_v61 = vadd.f32 %v1624_v52, %v1619_v56  ;;  %v2747_v62 = vadd.f32 %v1642_v53, %v1637_v57  ;;  %v143_v63 = vadd.f32 1e-06, %v140_v58 }
 0x12d   :  { %v89_v23 = vadd.f32 %v87_v2, %v82_v17  ;;  %v107_v25 = vadd.f32 %v105_v8, %v100_v19 }
 0x12e   :  { %2509 = vrsqrt.f32 %v143_v63 }
 0x131   :  { %v65_v3 = vpop.permute.xlu0 %64 }
 0x132   :  { %v81_v4 = vmul.f32 %v80_v0, %v65_v3  ;;  %v99_v5 = vmul.f32 %v98_v1, %v65_v3  ;;  %v1618_v6 = vmul.f32 %v1617_v47, %v65_v3  ;;  %v1636_v7 = vmul.f32 %v1635_v48, %v65_v3 }
 0x134   :  { %v2508_v10 = vpop.eup %2507  ;;  %v88_v11 = vadd.f32 %v87_v2, %v81_v4  ;;  %v2749_v12 = vadd.f32 %v1624_v52, %v1618_v6  ;;  %v2751_v14 = vadd.f32 %v1642_v53, %v1636_v7  ;;  %v106_v15 = vadd.f32 %v105_v8, %v99_v5  ;;  %v2829_v7 = vld [vmem:[%s3220_s2] sm:$0xff] }
 0x135   :  { %v148_v16 = vmul.f32 %v2508_v10, %v2689_v9 }
 0x137   :  { %v151_v18 = vmul.f32 %v148_v16, %v88_v11  ;;  %v2835_v16 = vld [vmem:[%s3220_s2 + $0x8] sm:$0xff] }
 0x138   :  { %v2510_v20 = vpop.eup %2509 }
 0x139   :  { %v154_v21 = vadd.f32 %v151_v18, %v106_v15  ;;  %v149_v24 = vmul.f32 %v2510_v20, %v2693_v13 }
 0x13b   :  { %2156 = vmatmul.mubr.msk.f32.vlgmr.msra.gmra.mrb[0].mxu1 %vm109_vm0, %v154_v21  ;;  %v152_v27 = vmul.f32 %v149_v24, %v89_v23  ;;  %v2842_v23 = vld [vmem:[%s3220_s2 + $0x10] sm:$0xf]  ;;  %s2589_s2 = smov 64  }
 0x13c   :  { %2158 = vmatprep.mubr.msk.f32.mxu1 %vm2584_vm2, %v2585_v26 }
 0x13d   :  { %v155_v28 = vadd.f32 %v152_v27, %v107_v25 }
 0x13f   :  { %2159 = vmatmul.mubr.msk.f32.gmra.mrb[2].mxu1 %vm109_vm0, %v155_v28 }
 0x140   :  { %2161 = vmatprep.mubr.msk.f32.mxu1 %vm2584_vm2, %v2585_v26 }
 0x15a   :  { %v138_v9 = vpop.xlane.xlu1 %137 }
 0x15b   :  { %v141_v30 = vmul.f32 0.03125, %v138_v9 }
 0x15d   :  { %v144_v31 = vadd.f32 1e-06, %v141_v30 }
 0x15e   :  { %v75_v32 = vpop.permute.xlu1 %74 }
 0x15f   :  { %2511 = vrsqrt.f32 %v144_v31  ;;  %v1620_v33 = vmul.f32 %v1617_v47, %v75_v32  ;;  %v1638_v13 = vmul.f32 %v1635_v48, %v75_v32  ;;  %v83_v36 = vmul.f32 %v80_v0, %v75_v32 }
 0x160   :  { %v101_v37 = vmul.f32 %v98_v1, %v75_v32 }
 0x161   :  { %v2761_v34 = vadd.f32 %v1624_v52, %v1620_v33  ;;  %v2763_v35 = vadd.f32 %v1642_v53, %v1638_v13  ;;  %v90_v39 = vadd.f32 %v87_v2, %v83_v36 }
 0x162   :  { %v108_v41 = vadd.f32 %v105_v8, %v101_v37 }
 0x169   :  { %v2512_v38 = vpop.eup %2511 }
 0x16a   :  { %v150_v40 = vmul.f32 %v2512_v38, %v2725_v29 }
 0x16c   :  { %v153_v42 = vmul.f32 %v150_v40, %v90_v39 }
 0x16e   :  { %v156_v43 = vadd.f32 %v153_v42, %v108_v41 }
 0x170   :  { %2162 = vmatmul.mubr.msk.f32.gmra.mrb[4].mxu1 %vm109_vm0, %v156_v43 }
 0x171   :  { %2170 = vmatprep.mubr.msk.f32.mxu1 %vm2584_vm2, %v2585_v26 }
 0x20e   :  { %v243_v44 = vpop.f32.mrb[0].mxu1 }
 0x20f   :  { %v2157_v45 = vpop.f32.mrb[1].mxu1  ;;  %v2772_v48 = vadd.f32 %v1988_v46, %v243_v44 }
 0x212   :  { %v248_v47 = vpop.f32.mrb[2].mxu1 }
 0x213   :  { %v2774_v49 = vadd.f32 %v1988_v46, %v248_v47  ;;  %v2160_v29 = vpop.f32.mrb[3].mxu1 }
 0x215   :  { %v2778_v50 = vpack.i.bf16 %v2774_v49, %v2772_v48 }
 0x217   :  { %2468 = vrot.lane.b32.xlu1 %v2778_v50, %s2586_s9 }
 0x243   :  { %v253_v51 = vpop.f32.mrb[4].mxu1 }
 0x244   :  { %v2781_v52 = vadd.f32 %v1988_v46, %v253_v51  ;;  %v2163_v53 = vpop.f32.mrb[5].mxu1 }
 0x246   :  { %511 = vrot.lane.b32.xlu0 %v2781_v52, %s2587_s10  ;;  %271 = vrot.lane.b32.xlu1 %v2781_v52, %s2586_s9 }
 0x24a   :  { %2473 = vrot.lane.b32.xlu1 %v2778_v50, %s2588_s6 }
 0x24e   :  { %517 = vrot.lane.b32.xlu1 %v2781_v52, %s2588_s6 }
 0x252   :  { %507 = vrot.lane.b32.xlu1 %v2772_v48, %s2587_s10 }
 0x256   :  { %509 = vrot.lane.b32.xlu1 %v2774_v49, %s2587_s10 }
 0x289   :  { %v2469_v54 = vpop.permute.xlu1 %2468 }
 0x28a   :  { %v2471_v55 = vunpack.i.h.bf16 %v2469_v54  ;;  %v2470_v56 = vunpack.i.l.bf16 %v2469_v54 }
 0x28c   :  { %v2393_v58 = vpack.c.bf16 %v2471_v55, %v2470_v56 }
 0x28e   :  { %2395 = vmatpush3.bf16.xpose.msk.msra.mxu1 %vm2791_vm4, %v2393_v58 }
 0x28f   :  { %2168 = vmatprep.subr.mxu1 %v2585_v26 }
 0x2b8   :  { %v272_v59 = vpop.permute.xlu1 %271  ;;  %v512_v5 = vpop.permute.xlu0 %511 }
 0x2b9   :  { %2169 = vmatpush3.xpose.msk.msra.mxu1 %vm273_vm3, %v272_v59 }
 0x2ba   :  { %2399 = vmatprep.subr.bf16.mxu1 %v2583_v22 }
 0x2bc   :  { %2171 = vmatmul.mubr.msk.f32.vlgmr.msra.gmra.mrb[6].mxu1 %vm273_vm3, %v2772_v48  ;;  %v2474_v60 = vpop.permute.xlu1 %2473 }
 0x2bd   :  { %v2476_v63 = vunpack.i.h.bf16 %v2474_v60  ;;  %v2475_v0 = vunpack.i.l.bf16 %v2474_v60  ;;  %2173 = vmatprep.mubr.msk.f32.mxu1 %vm2584_vm2, %v2585_v26 }
 0x2bf   :  { %v2400_v1 = vpack.c.bf16 %v2476_v63, %v2475_v0 }
 0x2c0   :  { %2174 = vmatmul.mubr.msk.f32.gmra.mrb[8].mxu1 %vm273_vm3, %v2774_v49  ;;  %v518_v2 = vpop.permute.xlu1 %517 }
 0x2c1   :  { %2402 = vmatpush3.bf16.xpose.msk.msra.mxu1 %vm2791_vm4, %v2400_v1  ;;  %2176 = vmatprep.mubr.msk.f32.mxu1 %vm2584_vm2, %v2585_v26 }
 0x2c2   :  { %2198 = vmatprep.subr.mxu1 %v2585_v26 }
 0x2c4   :  { %2177 = vmatmul.mubr.msk.f32.gmra.mrb[10].mxu1 %vm273_vm3, %v2781_v52  ;;  %v508_v3 = vpop.permute.xlu1 %507 }
 0x2c5   :  { %2200 = vmatprep.mubr.msk.f32.mxu1 %vm2584_vm2, %v2585_v26 }
 0x2c8   :  { %v510_v4 = vpop.permute.xlu1 %509 }
 0x2c9   :  { %2199 = vmatpush3.xpose.msk.msra.mxu1 %vm273_vm3, %v518_v2 }
 0x2ca   :  { %2224 = vmatprep.subr.mxu1 %v2585_v26 }
 0x2cc   :  { %2201 = vmatmul.mubr.msk.f32.vlgmr.msra.gmra.mrb[12].mxu1 %vm273_vm3, %v508_v3 }
 0x2cd   :  { %2203 = vmatprep.mubr.msk.f32.mxu1 %vm2584_vm2, %v2585_v26 }
 0x2d0   :  { %2204 = vmatmul.mubr.msk.f32.gmra.mrb[14].mxu1 %vm273_vm3, %v510_v4 }
 0x2d1   :  { %2206 = vmatprep.mubr.msk.f32.mxu1 %vm2584_vm2, %v2585_v26 }
 0x2d4   :  { %2207 = vmatmul.mubr.msk.f32.gmra.mrb[16].mxu1 %vm273_vm3, %v512_v5 }
 0x2d5   :  { %2226 = vmatprep.mubr.msk.f32.mxu1 %vm2584_vm2, %v2585_v26 }
 0x38f   :  { %v352_v6 = vpop.f32.mrb[6].mxu1 }
 0x390   :  { %v366_v8 = vmul.f32 0.35355338, %v352_v6  ;;  %v2172_v10 = vpop.f32.mrb[7].mxu1 }
 0x392   :  { %v369_v11 = vadd.f32 %v366_v8, %v2829_v7 }
 0x393   :  { %v357_v15 = vpop.f32.mrb[8].mxu1 }
 0x394   :  { %v367_v17 = vmul.f32 0.35355338, %v357_v15  ;;  %v2175_v18 = vpop.f32.mrb[9].mxu1  ;;  %v373_v19 = vsel %vm372_vm5, %v369_v11, -inf }
 0x395   :  { %374 = vmax.xlane.f32.xlu1 %v373_v19 }
 0x396   :  { %v370_v20 = vadd.f32 %v367_v17, %v2835_v16 }
 0x397   :  { %v362_v21 = vpop.f32.mrb[10].mxu1 }
 0x398   :  { %v368_v24 = vmul.f32 0.35355338, %v362_v21  ;;  %v2178_v25 = vpop.f32.mrb[11].mxu1  ;;  %v376_v27 = vsel %vm372_vm5, %v370_v20, -inf }
 0x399   :  { %377 = vmax.xlane.f32.xlu0 %v376_v27 }
 0x39a   :  { %v371_v28 = vadd.f32 %v368_v24, %v2842_v23 }
 0x39c   :  { %v380_v9 = vsel %vm379_vm6, %v371_v28, -inf }
 0x39d   :  { %381 = vmax.xlane.f32.xlu0 %v380_v9 }
 0x39f   :  { %v597_v30 = vpop.f32.mrb[12].mxu1 }
 0x3a0   :  { %v611_v31 = vmul.f32 0.35355338, %v597_v30  ;;  %v2202_v32 = vpop.f32.mrb[13].mxu1 }
 0x3a2   :  { %v614_v33 = vadd.f32 %v611_v31, %v2829_v7 }
 0x3a3   :  { %v602_v13 = vpop.f32.mrb[14].mxu1 }
 0x3a4   :  { %v612_v36 = vmul.f32 0.35355338, %v602_v13  ;;  %v2205_v37 = vpop.f32.mrb[15].mxu1  ;;  %v617_v38 = vsel %vm372_vm5, %v614_v33, -inf }
 0x3a5   :  { %618 = vmax.xlane.f32.xlu1 %v617_v38 }
 0x3a6   :  { %v615_v39 = vadd.f32 %v612_v36, %v2835_v16 }
 0x3a7   :  { %v607_v40 = vpop.f32.mrb[16].mxu1 }
 0x3a8   :  { %v613_v41 = vmul.f32 0.35355338, %v607_v40  ;;  %v2208_v42 = vpop.f32.mrb[17].mxu1  ;;  %v620_v43 = vsel %vm372_vm5, %v615_v39, -inf }
 0x3a9   :  { %621 = vmax.xlane.f32.xlu0 %v620_v43 }
 0x3aa   :  { %v616_v44 = vadd.f32 %v613_v41, %v2842_v23 }
 0x3ac   :  { %v623_v45 = vsel %vm379_vm6, %v616_v44, -inf }
 0x3ad   :  { %624 = vmax.xlane.f32.xlu1 %v623_v45 }
 0x3be   :  { %2478 = vrot.lane.b32.xlu1 %v2778_v50, %s2589_s2 }
 0x422   :  { %v375_v46 = vpop.xlane.xlu1 %374 }
 0x423   :  { %v383_v47 = vsub.f32 %v369_v11, %v375_v46 }
 0x425   :  { %v386_v29 = vmul.f32 1.442695, %v383_v47 }
 0x426   :  { %v378_v51 = vpop.xlane.xlu0 %377 }
 0x427   :  { %2513 = vpow2.f32 %v386_v29  ;;  %v384_v53 = vsub.f32 %v370_v20, %v378_v51 }
 0x429   :  { %v388_v54 = vmul.f32 1.442695, %v384_v53 }
 0x42a   :  { %v382_v55 = vpop.xlane.xlu0 %381 }
 0x42b   :  { %2515 = vpow2.f32 %v388_v54  ;;  %v385_v56 = vsub.f32 %v371_v28, %v382_v55 }
 0x42d   :  { %v390_v58 = vmul.f32 1.442695, %v385_v56 }
 0x42f   :  { %2517 = vpow2.f32 %v390_v58 }
 0x431   :  { %v2855_v59 = vpop.eup %2513 }
 0x432   :  { %v619_v60 = vpop.xlane.xlu1 %618  ;;  %v392_v63 = vsel %vm372_vm5, %v2855_v59, 0.0 }
 0x433   :  { %v626_v0 = vsub.f32 %v614_v33, %v619_v60  ;;  %393 = vadd.xlane.f32.xlu0 %v392_v63  ;;  %v260_v60 = vld [vmem:[%s3221_s7] sm:$0xff]  ;;  %v261_v63 = vld [vmem:[%s3221_s7 + $0x8] sm:$0xff] }
 0x434   :  { %2225 = vmatpush3.msra.mxu1 %v261_v63 }
 0x435   :  { %v2859_v1 = vpop.eup %2515  ;;  %v629_v2 = vmul.f32 1.442695, %v626_v0  ;;  %2406 = vmatprep.subr.bf16.mxu1 %v2583_v22 }
 0x436   :  { %v622_v3 = vpop.xlane.xlu0 %621  ;;  %v395_v4 = vsel %vm372_vm5, %v2859_v1, 0.0 }
 0x437   :  { %2519 = vpow2.f32 %v629_v2  ;;  %v627_v5 = vsub.f32 %v615_v39, %v622_v3  ;;  %396 = vadd.xlane.f32.xlu1 %v395_v4 }
 0x439   :  { %v2863_v6 = vpop.eup %2517  ;;  %v631_v8 = vmul.f32 1.442695, %v627_v5 }
 0x43a   :  { %v625_v10 = vpop.xlane.xlu1 %624  ;;  %v398_v11 = vsel %vm379_vm6, %v2863_v6, 0.0 }
 0x43b   :  { %2521 = vpow2.f32 %v631_v8  ;;  %v628_v15 = vsub.f32 %v616_v44, %v625_v10  ;;  %399 = vadd.xlane.f32.xlu0 %v398_v11 }
 0x43d   :  { %v633_v17 = vmul.f32 1.442695, %v628_v15 }
 0x43e   :  { %v2479_v18 = vpop.permute.xlu1 %2478 }
 0x43f   :  { %2523 = vpow2.f32 %v633_v17  ;;  %v2481_v19 = vunpack.i.h.bf16 %v2479_v18  ;;  %v2480_v20 = vunpack.i.l.bf16 %v2479_v18 }
 0x441   :  { %v2520_v21 = vpop.eup %2519  ;;  %v2397_v24 = vpack.c.bf16 %v2481_v19, %v2480_v20 }
 0x442   :  { %v635_v25 = vsel %vm372_vm5, %v2520_v21, 0.0 }
 0x443   :  { %636 = vadd.xlane.f32.xlu1 %v635_v25  ;;  %2398 = vmatpush3.bf16.msra.mxu0 %v2397_v24 }
 0x444   :  { %2183 = vmatprep.subr.mxu0 %v2585_v26 }
 0x445   :  { %v2522_v27 = vpop.eup %2521 }
 0x446   :  { %v638_v28 = vsel %vm372_vm5, %v2522_v27, 0.0 }
 0x447   :  { %639 = vadd.xlane.f32.xlu0 %v638_v28 }
 0x449   :  { %v2524_v9 = vpop.eup %2523 }
 0x44a   :  { %v641_v30 = vsel %vm379_vm6, %v2524_v9, 0.0 }
 0x44b   :  { %642 = vadd.xlane.f32.xlu0 %v641_v30 }
 0x454   :  { %2483 = vrot.lane.b32.xlu1 %v2778_v50, %s2590_s20 }
 0x458   :  { %654 = vrot.lane.b32.xlu1 %v2781_v52, %s2590_s20 }
 0x45c   :  { %2488 = vrot.lane.b32.xlu1 %v2778_v50, %s2591_s5 }
 0x460   :  { %927 = vrot.lane.b32.xlu1 %v2772_v48, %s2592_s21 }
 0x461   :  { %411 = vrot.lane.b32.xlu0 %v2781_v52, %s2589_s2 }
 0x464   :  { %931 = vrot.lane.b32.xlu1 %v2781_v52, %s2592_s21 }
 0x465   :  { %937 = vrot.lane.b32.xlu0 %v2781_v52, %s2591_s5 }
 0x469   :  { %929 = vrot.lane.b32.xlu0 %v2774_v49, %s2592_s21 }
 0x4c0   :  { %v394_v31 = vpop.xlane.xlu0 %393 }
 0x4c1   :  { %2525 = vrcp.f32 %v394_v31 }
 0x4c4   :  { %v397_v32 = vpop.xlane.xlu1 %396 }
 0x4c5   :  { %2527 = vrcp.f32 %v397_v32 }
 0x4c8   :  { %v400_v33 = vpop.xlane.xlu0 %399 }
 0x4c9   :  { %2529 = vrcp.f32 %v400_v33 }
 0x4cb   :  { %v2526_v39 = vpop.eup %2525 }
 0x4cc   :  { %v404_v43 = vmul.f32 %v2526_v39, %v2855_v59 }
 0x4cf   :  { %v2528_v44 = vpop.eup %2527 }
 0x4d0   :  { %v637_v13 = vpop.xlane.xlu1 %636  ;;  %v405_v46 = vmul.f32 %v2528_v44, %v2859_v1 }
 0x4d1   :  { %2531 = vrcp.f32 %v637_v13 }
 0x4d3   :  { %v2530_v47 = vpop.eup %2529 }
 0x4d4   :  { %v640_v36 = vpop.xlane.xlu0 %639  ;;  %v2484_v37 = vpop.permute.xlu1 %2483  ;;  %v406_v51 = vmul.f32 %v2530_v47, %v2863_v6 }
 0x4d5   :  { %v2486_v40 = vunpack.i.h.bf16 %v2484_v37  ;;  %v2485_v41 = vunpack.i.l.bf16 %v2484_v37  ;;  %2533 = vrcp.f32 %v640_v36 }
 0x4d7   :  { %v2404_v45 = vpack.c.bf16 %v2486_v40, %v2485_v41 }
 0x4d8   :  { %v643_v38 = vpop.xlane.xlu0 %642  ;;  %v655_v29 = vpop.permute.xlu1 %654 }
 0x4d9   :  { %2535 = vrcp.f32 %v643_v38 }
 0x4db   :  { %v2532_v53 = vpop.eup %2531 }
 0x4dc   :  { %v412_v42 = vpop.permute.xlu0 %411  ;;  %v647_v54 = vmul.f32 %v2532_v53, %v2520_v21  ;;  %v2489_v3 = vpop.permute.xlu1 %2488 }
 0x4dd   :  { %2184 = vmatpush3.msk.msra.mxu0 %vm424_vm7, %v412_v42  ;;  %v2491_v5 = vunpack.i.h.bf16 %v2489_v3  ;;  %v2490_v6 = vunpack.i.l.bf16 %v2489_v3 }
 0x4de   :  { %2186 = vmatmul.mubr.msk.f32.vlgmr.msra.gmra.mrb[0].mxu0 %vm372_vm5, %v404_v43  ;;  %2403 = vmatprep.subr.bf16.mxu0 %v2583_v22 }
 0x4df   :  { %2405 = vmatpush3.bf16.msra.mxu0 %v2404_v45  ;;  %2188 = vmatprep.mubr.msk.f32.mxu0 %vm2584_vm2, %v2585_v26  ;;  %v2534_v55 = vpop.eup %2533  ;;  %v2407_v11 = vpack.c.bf16 %v2491_v5, %v2490_v6 }
 0x4e0   :  { %2213 = vmatprep.subr.mxu0 %v2585_v26  ;;  %v648_v56 = vmul.f32 %v2534_v55, %v2522_v27  ;;  %v938_v21 = vpop.permute.xlu0 %937  ;;  %v928_v25 = vpop.permute.xlu1 %927 }
 0x4e2   :  { %2189 = vmatmul.mubr.msk.f32.gmra.mrb[2].mxu0 %vm372_vm5, %v405_v46 }
 0x4e3   :  { %2214 = vmatpush3.msk.msra.mxu0 %vm424_vm7, %v655_v29  ;;  %2191 = vmatprep.mubr.msk.f32.mxu0 %vm2584_vm2, %v2585_v26  ;;  %v2536_v58 = vpop.eup %2535 }
 0x4e4   :  { %2235 = vmatprep.subr.mxu0 %v2585_v26  ;;  %v649_v59 = vmul.f32 %v2536_v58, %v2524_v9  ;;  %v930_v27 = vpop.permute.xlu0 %929  ;;  %v932_v28 = vpop.permute.xlu1 %931 }
 0x4e6   :  { %2192 = vmatmul.mubr.msk.f32.gmra.mrb[4].mxu0 %vm372_vm5, %v406_v51 }
 0x4e7   :  { %2215 = vmatprep.mubr.msk.f32.mxu0 %vm2584_vm2, %v2585_v26 }
 0x4ea   :  { %2216 = vmatmul.mubr.msk.f32.vlgmr.msra.gmra.mrb[6].mxu0 %vm372_vm5, %v647_v54 }
 0x4eb   :  { %2218 = vmatprep.mubr.msk.f32.mxu0 %vm2584_vm2, %v2585_v26  ;;  %2236 = vmatpush3.msra.mxu0 %v260_v60 }
 0x4ec   :  { %2410 = vmatprep.subr.bf16.mxu0 %v2583_v22 }
 0x4ee   :  { %2219 = vmatmul.mubr.msk.f32.gmra.mrb[8].mxu0 %vm372_vm5, %v648_v56 }
 0x4ef   :  { %2221 = vmatprep.mubr.msk.f32.mxu0 %vm2584_vm2, %v2585_v26 }
 0x4f2   :  { %2222 = vmatmul.mubr.msk.f32.gmra.mrb[10].mxu0 %vm372_vm5, %v649_v59 }
 0x4f3   :  { %2237 = vmatprep.mubr.msk.f32.mxu0 %vm2584_vm2, %v2585_v26 }
 0x5b1   :  { %v493_v0 = vpop.f32.mrb[0].mxu0 }
 0x5b2   :  { %v2187_v1 = vpop.f32.mrb[1].mxu0  ;;  %2238 = vmatmul.mubr.msk.f32.vlgmr.msra.gmra.mrb[12].mxu0 %vm273_vm3, %v493_v0 }
 0x5b3   :  { %2240 = vmatprep.mubr.msk.f32.mxu0 %vm2584_vm2, %v2585_v26 }
 0x5b5   :  { %v498_v2 = vpop.f32.mrb[2].mxu0 }
 0x5b6   :  { %v2190_v4 = vpop.f32.mrb[3].mxu0  ;;  %2241 = vmatmul.mubr.msk.f32.gmra.mrb[14].mxu0 %vm273_vm3, %v498_v2 }
 0x5b7   :  { %2243 = vmatprep.mubr.msk.f32.mxu0 %vm2584_vm2, %v2585_v26 }
 0x5b9   :  { %v503_v8 = vpop.f32.mrb[4].mxu0 }
 0x5ba   :  { %v2193_v10 = vpop.f32.mrb[5].mxu0  ;;  %2244 = vmatmul.mubr.msk.f32.gmra.mrb[16].mxu0 %vm273_vm3, %v503_v8 }
 0x5bb   :  { %2267 = vmatprep.mubr.msk.f32.mxu0 %vm2584_vm2, %v2585_v26 }
 0x5bd   :  { %v735_v15 = vpop.f32.mrb[6].mxu0 }
 0x5be   :  { %v2217_v17 = vpop.f32.mrb[7].mxu0  ;;  %2227 = vmatmul.mubr.msk.f32.vlgmr.msra.gmra.mrb[18].mxu1 %vm273_vm3, %v735_v15 }
 0x5bf   :  { %2409 = vmatpush3.bf16.xpose.msk.msra.mxu1 %vm2791_vm4, %v2407_v11  ;;  %2229 = vmatprep.mubr.msk.f32.mxu1 %vm2584_vm2, %v2585_v26 }
 0x5c0   :  { %2250 = vmatprep.subr.mxu1 %v2585_v26 }
 0x5c1   :  { %v740_v18 = vpop.f32.mrb[8].mxu0 }
 0x5c2   :  { %v2220_v19 = vpop.f32.mrb[9].mxu0  ;;  %2230 = vmatmul.mubr.msk.f32.gmra.mrb[20].mxu1 %vm273_vm3, %v740_v18 }
 0x5c3   :  { %2232 = vmatprep.mubr.msk.f32.mxu1 %vm2584_vm2, %v2585_v26 }
 0x5c5   :  { %v745_v20 = vpop.f32.mrb[10].mxu0 }
 0x5c6   :  { %v2223_v24 = vpop.f32.mrb[11].mxu0  ;;  %2233 = vmatmul.mubr.msk.f32.gmra.mrb[22].mxu1 %vm273_vm3, %v745_v20 }
 0x5c7   :  { %2251 = vmatpush3.xpose.msk.msra.mxu1 %vm273_vm3, %v938_v21  ;;  %2252 = vmatprep.mubr.msk.f32.mxu1 %vm2584_vm2, %v2585_v26 }
 0x5c8   :  { %2276 = vmatprep.subr.mxu1 %v2585_v26 }
 0x5ca   :  { %2253 = vmatmul.mubr.msk.f32.vlgmr.msra.gmra.mrb[24].mxu1 %vm273_vm3, %v928_v25 }
 0x5cb   :  { %2255 = vmatprep.mubr.msk.f32.mxu1 %vm2584_vm2, %v2585_v26 }
 0x5ce   :  { %2256 = vmatmul.mubr.msk.f32.gmra.mrb[26].mxu1 %vm273_vm3, %v930_v27 }
 0x5cf   :  { %2258 = vmatprep.mubr.msk.f32.mxu1 %vm2584_vm2, %v2585_v26 }
 0x5d2   :  { %2259 = vmatmul.mubr.msk.f32.gmra.mrb[28].mxu1 %vm273_vm3, %v932_v28 }
 0x5d3   :  { %2278 = vmatprep.mubr.msk.f32.mxu1 %vm2584_vm2, %v2585_v26 }
 0x685   :  { %v913_v9 = vpop.f32.mrb[12].mxu0 }
 0x686   :  { %v2239_v30 = vpop.f32.mrb[13].mxu0 }
 0x689   :  { %v918_v31 = vpop.f32.mrb[14].mxu0 }
 0x68a   :  { %v2242_v32 = vpop.f32.mrb[15].mxu0 }
 0x68d   :  { %v923_v33 = vpop.f32.mrb[16].mxu0 }
 0x68e   :  { %v2245_v13 = vpop.f32.mrb[17].mxu0 }
 0x691   :  { %v824_v36 = vpop.f32.mrb[18].mxu1 }
 0x692   :  { %v2946_v37 = vadd.f32 %v913_v9, %v824_v36  ;;  %v2228_v38 = vpop.f32.mrb[19].mxu1 }
 0x695   :  { %v829_v39 = vpop.f32.mrb[20].mxu1 }
 0x696   :  { %v2948_v40 = vadd.f32 %v918_v31, %v829_v39  ;;  %v2231_v41 = vpop.f32.mrb[21].mxu1 }
 0x699   :  { %v834_v42 = vpop.f32.mrb[22].mxu1 }
 0x69a   :  { %v2950_v43 = vadd.f32 %v923_v33, %v834_v42  ;;  %v2234_v44 = vpop.f32.mrb[23].mxu1 }
 0x69d   :  { %v1017_v45 = vpop.f32.mrb[24].mxu1 }
 0x69e   :  { %v1031_v46 = vmul.f32 0.35355338, %v1017_v45  ;;  %v2254_v47 = vpop.f32.mrb[25].mxu1 }
 0x6a0   :  { %v1034_v29 = vadd.f32 %v1031_v46, %v2829_v7 }
 0x6a1   :  { %v1022_v51 = vpop.f32.mrb[26].mxu1 }
 0x6a2   :  { %v1032_v53 = vmul.f32 0.35355338, %v1022_v51  ;;  %v2257_v54 = vpop.f32.mrb[27].mxu1  ;;  %v1037_v55 = vsel %vm372_vm5, %v1034_v29, -inf  ;;  %v262_v51 = vld [vmem:[%s3221_s7 + $0x10] sm:$0xff] }
 0x6a3   :  { %1038 = vmax.xlane.f32.xlu0 %v1037_v55  ;;  %2277 = vmatpush3.msra.mxu1 %v262_v51 }
 0x6a4   :  { %v1035_v56 = vadd.f32 %v1032_v53, %v2835_v16  ;;  %2417 = vmatprep.subr.bf16.mxu1 %v2583_v22 }
 0x6a5   :  { %v1027_v58 = vpop.f32.mrb[28].mxu1 }
 0x6a6   :  { %v1033_v59 = vmul.f32 0.35355338, %v1027_v58  ;;  %v2260_v60 = vpop.f32.mrb[29].mxu1  ;;  %v1040_v63 = vsel %vm372_vm5, %v1035_v56, -inf }
 0x6a7   :  { %1041 = vmax.xlane.f32.xlu1 %v1040_v63 }
 0x6a8   :  { %v1036_v0 = vadd.f32 %v1033_v59, %v2842_v23 }
 0x6aa   :  { %v1043_v1 = vsel %vm379_vm6, %v1036_v0, -inf }
 0x6ab   :  { %1044 = vmax.xlane.f32.xlu0 %v1043_v1 }
 0x6b8   :  { %2493 = vrot.lane.b32.xlu1 %v2778_v50, %s2593_s26 }
 0x6bc   :  { %2498 = vrot.lane.b32.xlu1 %v2778_v50, %s2594_s1 }
 0x730   :  { %v1039_v2 = vpop.xlane.xlu0 %1038 }
 0x731   :  { %v1046_v3 = vsub.f32 %v1034_v29, %v1039_v2 }
 0x733   :  { %v1049_v4 = vmul.f32 1.442695, %v1046_v3 }
 0x734   :  { %v1042_v5 = vpop.xlane.xlu1 %1041 }
 0x735   :  { %2537 = vpow2.f32 %v1049_v4  ;;  %v1047_v6 = vsub.f32 %v1035_v56, %v1042_v5 }
 0x737   :  { %v1051_v8 = vmul.f32 1.442695, %v1047_v6 }
 0x738   :  { %v2494_v10 = vpop.permute.xlu1 %2493  ;;  %v1045_v24 = vpop.xlane.xlu0 %1044 }
 0x739   :  { %2539 = vpow2.f32 %v1051_v8  ;;  %v2496_v11 = vunpack.i.h.bf16 %v2494_v10  ;;  %v2495_v15 = vunpack.i.l.bf16 %v2494_v10  ;;  %v1048_v25 = vsub.f32 %v1036_v0, %v1045_v24 }
 0x73b   :  { %v2411_v17 = vpack.c.bf16 %v2496_v11, %v2495_v15  ;;  %v1053_v27 = vmul.f32 1.442695, %v1048_v25 }
 0x73c   :  { %v2499_v30 = vpop.permute.xlu1 %2498 }
 0x73d   :  { %2412 = vmatpush3.bf16.msra.mxu0 %v2411_v17  ;;  %2541 = vpow2.f32 %v1053_v27  ;;  %v2500_v13 = vunpack.i.l.bf16 %v2499_v30 }
 0x73e   :  { %2265 = vmatprep.subr.mxu0 %v2585_v26 }
 0x73f   :  { %v2538_v18 = vpop.eup %2537 }
 0x740   :  { %v1055_v19 = vsel %vm372_vm5, %v2538_v18, 0.0 }
 0x741   :  { %1056 = vadd.xlane.f32.xlu0 %v1055_v19 }
 0x743   :  { %v2540_v20 = vpop.eup %2539 }
 0x744   :  { %v1058_v21 = vsel %vm372_vm5, %v2540_v20, 0.0 }
 0x745   :  { %1059 = vadd.xlane.f32.xlu1 %v1058_v21 }
 0x747   :  { %v2542_v28 = vpop.eup %2541 }
 0x748   :  { %v1061_v9 = vsel %vm379_vm6, %v2542_v28, 0.0 }
 0x756   :  { %1271 = vrot.lane.b32.xlu1 %v2781_v52, %s2594_s1 }
 0x757   :  { %1074 = vrot.lane.b32.xlu0 %v2781_v52, %s2593_s26 }
 0x75a   :  { %1263 = vrot.lane.b32.xlu1 %v2774_v49, %s2595_s27  ;;  %v2501_v49 = vunpack.i.h.bf16 %v2499_v30 }
 0x75c   :  { %v2414_v39 = vpack.c.bf16 %v2501_v49, %v2500_v13 }
 0x776   :  { %1062 = vadd.xlane.f32.xlu0 %v1061_v9 }
 0x78c   :  { %1261 = vrot.lane.b32.xlu0 %v2772_v48, %s2595_s27 }
 0x790   :  { %1265 = vrot.lane.b32.xlu0 %v2781_v52, %s2595_s27 }
 0x7ce   :  { %v1057_v31 = vpop.xlane.xlu0 %1056 }
 0x7cf   :  { %2543 = vrcp.f32 %v1057_v31 }
 0x7d2   :  { %v1060_v32 = vpop.xlane.xlu1 %1059  ;;  %v1075_v33 = vpop.permute.xlu0 %1074 }
 0x7d3   :  { %2545 = vrcp.f32 %v1060_v32  ;;  %2266 = vmatpush3.msk.msra.mxu0 %vm424_vm7, %v1075_v33 }
 0x7d4   :  { %2413 = vmatprep.subr.bf16.mxu0 %v2583_v22 }
 0x7d6   :  { %v1272_v42 = vpop.permute.xlu1 %1271 }
 0x7d9   :  { %v2544_v36 = vpop.eup %2543 }
 0x7da   :  { %v1067_v38 = vmul.f32 %v2544_v36, %v2538_v18  ;;  %v1264_v47 = vpop.permute.xlu1 %1263 }
 0x7dc   :  { %2268 = vmatmul.mubr.msk.f32.vlgmr.msra.gmra.mrb[18].mxu0 %vm372_vm5, %v1067_v38 }
 0x7dd   :  { %v2546_v48 = vpop.eup %2545  ;;  %2416 = vmatpush3.bf16.xpose.msk.msra.mxu0 %vm2791_vm4, %v2414_v39  ;;  %2270 = vmatprep.mubr.msk.f32.mxu0 %vm2584_vm2, %v2585_v26 }
 0x7de   :  { %v1068_v41 = vmul.f32 %v2546_v48, %v2540_v20  ;;  %2291 = vmatprep.subr.mxu0 %v2585_v26 }
 0x7e0   :  { %2271 = vmatmul.mubr.msk.f32.gmra.mrb[20].mxu0 %vm372_vm5, %v1068_v41 }
 0x7e1   :  { %2273 = vmatprep.mubr.msk.f32.mxu0 %vm2584_vm2, %v2585_v26 }
 0x7e5   :  { %2292 = vmatpush3.xpose.msk.msra.mxu0 %vm273_vm3, %v1272_v42 }
 0x7e6   :  { %2317 = vmatprep.subr.mxu0 %v2585_v26 }
 0x803   :  { %v1063_v44 = vpop.xlane.xlu0 %1062 }
 0x804   :  { %2547 = vrcp.f32 %v1063_v44 }
 0x807   :  { %v1262_v46 = vpop.permute.xlu0 %1261 }
 0x80b   :  { %v1266_v29 = vpop.permute.xlu0 %1265 }
 0x80e   :  { %v2548_v57 = vpop.eup %2547 }
 0x80f   :  { %v1069_v45 = vmul.f32 %v2548_v57, %v2542_v28 }
 0x811   :  { %2274 = vmatmul.mubr.msk.f32.gmra.mrb[22].mxu0 %vm372_vm5, %v1069_v45 }
 0x812   :  { %2293 = vmatprep.mubr.msk.f32.mxu0 %vm2584_vm2, %v2585_v26 }
 0x815   :  { %2294 = vmatmul.mubr.msk.f32.vlgmr.msra.gmra.mrb[24].mxu0 %vm273_vm3, %v1262_v46 }
 0x816   :  { %2296 = vmatprep.mubr.msk.f32.mxu0 %vm2584_vm2, %v2585_v26 }
 0x819   :  { %2297 = vmatmul.mubr.msk.f32.gmra.mrb[26].mxu0 %vm273_vm3, %v1264_v47 }
 0x81a   :  { %2299 = vmatprep.mubr.msk.f32.mxu0 %vm2584_vm2, %v2585_v26 }
 0x81d   :  { %2300 = vmatmul.mubr.msk.f32.gmra.mrb[28].mxu0 %vm273_vm3, %v1266_v29 }
 0x81e   :  { %2319 = vmatprep.mubr.msk.f32.mxu0 %vm2584_vm2, %v2585_v26 }
 0x8af   :  { %v1155_v53 = vpop.f32.mrb[18].mxu0 }
 0x8b0   :  { %v2269_v54 = vpop.f32.mrb[19].mxu0  ;;  %2279 = vmatmul.mubr.msk.f32.vlgmr.msra.gmra.mrb[30].mxu1 %vm273_vm3, %v1155_v53 }
 0x8b1   :  { %2281 = vmatprep.mubr.msk.f32.mxu1 %vm2584_vm2, %v2585_v26 }
 0x8b3   :  { %v1160_v55 = vpop.f32.mrb[20].mxu0 }
 0x8b4   :  { %v2272_v56 = vpop.f32.mrb[21].mxu0  ;;  %2282 = vmatmul.mubr.msk.f32.gmra.mrb[32].mxu1 %vm273_vm3, %v1160_v55 }
 0x8b5   :  { %2284 = vmatprep.mubr.msk.f32.mxu1 %vm2584_vm2, %v2585_v26 }
 0x8e4   :  { %v1165_v58 = vpop.f32.mrb[22].mxu0 }
 0x8e5   :  { %v2275_v59 = vpop.f32.mrb[23].mxu0  ;;  %2285 = vmatmul.mubr.msk.f32.gmra.mrb[34].mxu1 %vm273_vm3, %v1165_v58 }
 0x8e6   :  { %2308 = vmatprep.mubr.msk.f32.mxu1 %vm2584_vm2, %v2585_v26 }
 0x8e8   :  { %v1351_v60 = vpop.f32.mrb[24].mxu0 }
 0x8e9   :  { %v1365_v63 = vmul.f32 0.35355338, %v1351_v60  ;;  %v2295_v0 = vpop.f32.mrb[25].mxu0 }
 0x8eb   :  { %v1368_v1 = vadd.f32 %v1365_v63, %v2829_v7 }
 0x8ec   :  { %v1356_v2 = vpop.f32.mrb[26].mxu0 }
 0x8ed   :  { %v1366_v3 = vmul.f32 0.35355338, %v1356_v2  ;;  %v2298_v4 = vpop.f32.mrb[27].mxu0  ;;  %v1371_v5 = vsel %vm372_vm5, %v1368_v1, -inf }
 0x8ee   :  { %1372 = vmax.xlane.f32.xlu1 %v1371_v5  ;;  %v2044_v5 = vld [vmem:[%s3222_s8] ss:$0 sm:$0xff] }
 0x8ef   :  { %v1369_v6 = vadd.f32 %v1366_v3, %v2835_v16 }
 0x8f0   :  { %v1361_v8 = vpop.f32.mrb[28].mxu0 }
 0x8f1   :  { %v1367_v10 = vmul.f32 0.35355338, %v1361_v8  ;;  %v2301_v11 = vpop.f32.mrb[29].mxu0  ;;  %v1374_v15 = vsel %vm372_vm5, %v1369_v6, -inf }
 0x8f2   :  { %1375 = vmax.xlane.f32.xlu0 %v1374_v15 }
 0x8f3   :  { %v1370_v17 = vadd.f32 %v1367_v10, %v2842_v23 }
 0x8f5   :  { %v1377_v18 = vsel %vm379_vm6, %v1370_v17, -inf }
 0x8f6   :  { %1378 = vmax.xlane.f32.xlu0 %v1377_v18  ;;  %v2580_v18 = vld [vmem:[%s3212_s0 + $0x8] sm:$0xff] }
 0x97b   :  { %v1373_v7 = vpop.xlane.xlu1 %1372 }
 0x97c   :  { %v1380_v19 = vsub.f32 %v1368_v1, %v1373_v7 }
 0x97e   :  { %v1383_v20 = vmul.f32 1.442695, %v1380_v19 }
 0x97f   :  { %v1376_v21 = vpop.xlane.xlu0 %1375 }
 0x980   :  { %2549 = vpow2.f32 %v1383_v20  ;;  %v1381_v24 = vsub.f32 %v1369_v6, %v1376_v21  ;;  %v2579_v6 = vld [vmem:[%s3212_s0] sm:$0xff] }
 0x982   :  { %v1385_v25 = vmul.f32 1.442695, %v1381_v24 }
 0x983   :  { %v1379_v27 = vpop.xlane.xlu0 %1378  ;;  %v1244_v16 = vpop.f32.mrb[30].mxu1 }
 0x984   :  { %2551 = vpow2.f32 %v1385_v25  ;;  %v1382_v28 = vsub.f32 %v1370_v17, %v1379_v27  ;;  %v3014_v9 = vadd.f32 %v1244_v16, %v2946_v37  ;;  %v2280_v30 = vpop.f32.mrb[31].mxu1  ;;  %v2581_v27 = vld [vmem:[%s3212_s0 + $0x10] sm:$0xf] }
 0x986   :  { %v1387_v31 = vmul.f32 1.442695, %v1382_v28 }
 0x987   :  { %v1249_v23 = vpop.f32.mrb[32].mxu1 }
 0x988   :  { %2553 = vpow2.f32 %v1387_v31  ;;  %v3017_v32 = vadd.f32 %v1249_v23, %v2948_v40  ;;  %v2283_v33 = vpop.f32.mrb[33].mxu1  ;;  %v263_v40 = vld [vmem:[%s3221_s7 + $0x18] sm:$0xff] }
 0x989   :  { %2318 = vmatpush3.msra.mxu0 %v263_v40 }
 0x98a   :  { %v2550_v49 = vpop.eup %2549  ;;  %2426 = vmatprep.subr.bf16.mxu0 %v2583_v22 }
 0x98b   :  { %v1389_v13 = vsel %vm372_vm5, %v2550_v49, 0.0 }
 0x98c   :  { %1390 = vadd.xlane.f32.xlu1 %v1389_v13 }
 0x98e   :  { %v2552_v36 = vpop.eup %2551 }
 0x98f   :  { %v1392_v38 = vsel %vm372_vm5, %v2552_v36, 0.0 }
 0x990   :  { %1393 = vadd.xlane.f32.xlu0 %v1392_v38 }
 0x992   :  { %v2554_v39 = vpop.eup %2553 }
 0x993   :  { %v1395_v37 = vsel %vm379_vm6, %v2554_v39, 0.0 }
 0x994   :  { %1396 = vadd.xlane.f32.xlu1 %v1395_v37 }
 0x9a5   :  { %1408 = vrot.lane.b32.xlu1 %v2781_v52, %s2596_s4 }
 0x9a6   :  { %2503 = vrot.lane.b32.xlu0 %v2778_v50, %s2596_s4 }
 0x9b8   :  { %v1254_v48 = vpop.f32.mrb[34].mxu1 }
 0x9b9   :  { %v1260_v41 = vadd.f32 %v1254_v48, %v2950_v43  ;;  %v2286_v42 = vpop.f32.mrb[35].mxu1 }
 0xa19   :  { %v1391_v44 = vpop.xlane.xlu1 %1390 }
 0xa1a   :  { %2555 = vrcp.f32 %v1391_v44 }
 0xa1d   :  { %v1394_v57 = vpop.xlane.xlu0 %1393 }
 0xa1e   :  { %2557 = vrcp.f32 %v1394_v57  ;;  %v1691_v57 = vld [vmem:[%s3223_s11] sm:$0xff] }
 0xa21   :  { %v1397_v45 = vpop.xlane.xlu1 %1396  ;;  %v2504_v46 = vpop.permute.xlu0 %2503 }
 0xa22   :  { %v2506_v52 = vunpack.i.h.bf16 %v2504_v46  ;;  %v2505_v47 = vunpack.i.l.bf16 %v2504_v46  ;;  %2559 = vrcp.f32 %v1397_v45  ;;  %v1692_v45 = vld [vmem:[%s3223_s11 + $0x8] sm:$0xff] }
 0xa23   :  { %v2421_v46 = vpack.c.bf16 %v1692_v45, %v1691_v57 }
 0xa24   :  { %v2418_v50 = vpack.c.bf16 %v2506_v52, %v2505_v47  ;;  %v2556_v29 = vpop.eup %2555  ;;  %v1693_v52 = vld [vmem:[%s3223_s11 + $0x10] sm:$0xff]  ;;  %v1694_v47 = vld [vmem:[%s3223_s11 + $0x18] sm:$0xff] }
 0xa25   :  { %v1401_v51 = vmul.f32 %v2556_v29, %v2550_v49  ;;  %v1409_v53 = vpop.permute.xlu1 %1408 }
 0xa26   :  { %2419 = vmatpush3.bf16.msra.mxu1 %v2418_v50  ;;  %v2424_v50 = vpack.c.bf16 %v1694_v47, %v1693_v52 }
 0xa27   :  { %2306 = vmatprep.subr.mxu1 %v2585_v26 }
 0xa28   :  { %v2558_v54 = vpop.eup %2557 }
 0xa29   :  { %v1402_v43 = vmul.f32 %v2558_v54, %v2552_v36 }
 0xa2a   :  { %2307 = vmatpush3.msk.msra.mxu1 %vm424_vm7, %v1409_v53 }
 0xa2b   :  { %2309 = vmatmul.mubr.msk.f32.vlgmr.msra.gmra.mrb[36].mxu1 %vm372_vm5, %v1401_v51  ;;  %2420 = vmatprep.subr.bf16.mxu1 %v2583_v22 }
 0xa2c   :  { %2311 = vmatprep.mubr.msk.f32.mxu1 %vm2584_vm2, %v2585_v26  ;;  %v2560_v55 = vpop.eup %2559  ;;  %2422 = vmatpush3.bf16.msra.mxu1 %v2421_v46 }
 0xa2d   :  { %v1403_v56 = vmul.f32 %v2560_v55, %v2554_v39  ;;  %2423 = vmatprep.subr.bf16.mxu1 %v2583_v22 }
 0xa2f   :  { %2312 = vmatmul.mubr.msk.f32.gmra.mrb[38].mxu1 %vm372_vm5, %v1402_v43 }
 0xa30   :  { %2314 = vmatprep.mubr.msk.f32.mxu1 %vm2584_vm2, %v2585_v26  ;;  %2425 = vmatpush3.bf16.msra.mxu1 %v2424_v50 }
 0xa33   :  { %2315 = vmatmul.mubr.msk.f32.gmra.mrb[40].mxu1 %vm372_vm5, %v1403_v56 }
 0xa34   :  { %2336 = vmatprep.mubr.msk.f32.mxu1 %vm2584_vm2, %v2585_v26 }
 0xafe   :  { %v1489_v58 = vpop.f32.mrb[36].mxu1 }
 0xaff   :  { %v2310_v59 = vpop.f32.mrb[37].mxu1  ;;  %2320 = vmatmul.mubr.msk.f32.vlgmr.msra.gmra.mrb[30].mxu0 %vm273_vm3, %v1489_v58 }
 0xb00   :  { %2322 = vmatprep.mubr.msk.f32.mxu0 %vm2584_vm2, %v2585_v26 }
 0xb02   :  { %v1494_v60 = vpop.f32.mrb[38].mxu1 }
 0xb03   :  { %v2313_v63 = vpop.f32.mrb[39].mxu1  ;;  %2323 = vmatmul.mubr.msk.f32.gmra.mrb[32].mxu0 %vm273_vm3, %v1494_v60 }
 0xb04   :  { %2325 = vmatprep.mubr.msk.f32.mxu0 %vm2584_vm2, %v2585_v26 }
 0xb06   :  { %v1499_v0 = vpop.f32.mrb[40].mxu1 }
 0xb07   :  { %v2316_v1 = vpop.f32.mrb[41].mxu1  ;;  %2326 = vmatmul.mubr.msk.f32.gmra.mrb[34].mxu0 %vm273_vm3, %v1499_v0 }
 0xb08   :  { %2377 = vmatprep.mubr.msk.f32.mxu0 %vm2584_vm2, %v2585_v26 }
 0xbd2   :  { %v1578_v2 = vpop.f32.mrb[30].mxu0 }
 0xbd3   :  { %v1592_v3 = vadd.f32 %v1578_v2, %v3014_v9  ;;  %v2321_v4 = vpop.f32.mrb[31].mxu0 }
 0xbd5   :  { %v1595_v8 = vadd.f32 %v2579_v6, %v1592_v3 }
 0xbd6   :  { %v1583_v10 = vpop.f32.mrb[32].mxu0 }
 0xbd7   :  { %v3057_v11 = vadd.f32 %v2044_v5, %v1595_v8  ;;  %v1593_v15 = vadd.f32 %v1583_v10, %v3017_v32  ;;  %v2324_v17 = vpop.f32.mrb[33].mxu0 }
 0xbd8   :  { %v1876_v17 = vld [vmem:[%s3224_s13 + $0x20] sm:$0xff] }
 0xbd9   :  { %v1596_v7 = vadd.f32 %v2580_v18, %v1593_v15  ;;  %v1646_v19 = vsel %vm109_vm0, %v3057_v11, 0.0  ;;  %v1877_v18 = vld [vmem:[%s3224_s13 + $0x28] sm:$0xff] }
 0xbda   :  { %1647 = vadd.xlane.f32.xlu1 %v1646_v19  ;;  %v1588_v20 = vpop.f32.mrb[34].mxu0  ;;  %v1878_v19 = vld [vmem:[%s3224_s13 + $0x30] sm:$0xff] }
 0xbdb   :  { %v3065_v21 = vadd.f32 %v2044_v5, %v1596_v7  ;;  %v1594_v24 = vadd.f32 %v1588_v20, %v1260_v41  ;;  %v2327_v25 = vpop.f32.mrb[35].mxu0  ;;  %v2433_v7 = vpack.c.bf16 %v1877_v18, %v1876_v17  ;;  %v1879_v20 = vld [vmem:[%s3224_s13 + $0x38] sm:$0xff] }
 0xbdc   :  { %v1880_v25 = vld [vmem:[%s3224_s13 + $0x40] sm:$0xff] }
 0xbdd   :  { %v1597_v16 = vadd.f32 %v2581_v27, %v1594_v24  ;;  %v1649_v28 = vsel %vm109_vm0, %v3065_v21, 0.0  ;;  %v2436_v24 = vpack.c.bf16 %v1879_v20, %v1878_v19  ;;  %v1881_v27 = vld [vmem:[%s3224_s13 + $0x48] sm:$0xff] }
 0xbde   :  { %1650 = vadd.xlane.f32.xlu0 %v1649_v28  ;;  %v1882_v28 = vld [vmem:[%s3224_s13 + $0x50] sm:$0xff] }
 0xbdf   :  { %v3072_v9 = vadd.f32 %v2044_v5, %v1597_v16  ;;  %v2439_v16 = vpack.c.bf16 %v1881_v27, %v1880_v25 }
 0xbe1   :  { %v1652_v30 = vsel %vm116_vm1, %v3072_v9, 0.0 }
 0xbe2   :  { %1653 = vadd.xlane.f32.xlu0 %v1652_v30  ;;  %v1883_v30 = vld [vmem:[%s3224_s13 + $0x58] sm:$0xff] }
 0xc67   :  { %v1648_v31 = vpop.xlane.xlu1 %1647 }
 0xc68   :  { %v1655_v23 = vmul.f32 0.03125, %v1648_v31  ;;  %v2442_v31 = vpack.c.bf16 %v1883_v30, %v1882_v28 }
 0xc6a   :  { %v1658_v32 = vsub.f32 %v3057_v11, %v1655_v23  ;;  %v1884_v23 = vld [vmem:[%s3224_s13 + $0x60] sm:$0xff] }
 0xc6b   :  { %v1651_v33 = vpop.xlane.xlu0 %1650 }
 0xc6c   :  { %v1656_v49 = vmul.f32 0.03125, %v1651_v33  ;;  %v1661_v13 = vmul.f32 %v1658_v32, %v1658_v32 }
 0xc6e   :  { %v1659_v36 = vsub.f32 %v3065_v21, %v1656_v49  ;;  %v1664_v38 = vsel %vm109_vm0, %v1661_v13, 0.0  ;;  %v1886_v49 = vld [vmem:[%s3224_s13 + $0x70] sm:$0xff]  ;;  %v1887_v13 = vld [vmem:[%s3224_s13 + $0x78] sm:$0xff] }
 0xc6f   :  { %1665 = vadd.xlane.f32.xlu1 %v1664_v38  ;;  %v1654_v39 = vpop.xlane.xlu0 %1653  ;;  %v2045_v38 = vld [vmem:[%s3225_s12] ss:$0 sm:$0xff] }
 0xc70   :  { %v1657_v37 = vmul.f32 0.03125, %v1654_v39  ;;  %v1662_v40 = vmul.f32 %v1659_v36, %v1659_v36 }
 0xc72   :  { %v1660_v48 = vsub.f32 %v3072_v9, %v1657_v37  ;;  %v1667_v41 = vsel %vm109_vm0, %v1662_v40, 0.0 }
 0xc73   :  { %1668 = vadd.xlane.f32.xlu0 %v1667_v41 }
 0xc74   :  { %v1663_v42 = vmul.f32 %v1660_v48, %v1660_v48 }
 0xc76   :  { %v1670_v44 = vsel %vm116_vm1, %v1663_v42, 0.0 }
 0xc77   :  { %1671 = vadd.xlane.f32.xlu1 %v1670_v44 }
 0xcfc   :  { %v1666_v29 = vpop.xlane.xlu1 %1665 }
 0xcfd   :  { %v1673_v51 = vmul.f32 0.03125, %v1666_v29 }
 0xcff   :  { %v1676_v53 = vadd.f32 1e-06, %v1673_v51 }
 0xd00   :  { %v1669_v54 = vpop.xlane.xlu0 %1668 }
 0xd01   :  { %2561 = vrsqrt.f32 %v1676_v53  ;;  %v1674_v43 = vmul.f32 0.03125, %v1669_v54 }
 0xd03   :  { %v1677_v55 = vadd.f32 1e-06, %v1674_v43 }
 0xd04   :  { %v1672_v56 = vpop.xlane.xlu1 %1671 }
 0xd05   :  { %2563 = vrsqrt.f32 %v1677_v55  ;;  %v1675_v58 = vmul.f32 0.03125, %v1672_v56 }
 0xd07   :  { %v1678_v59 = vadd.f32 1e-06, %v1675_v58 }
 0xd09   :  { %2565 = vrsqrt.f32 %v1678_v59 }
 0xd0b   :  { %v2562_v60 = vpop.eup %2561 }
 0xd0c   :  { %v1682_v63 = vmul.f32 %v2562_v60, %v1658_v32  ;;  %v1885_v32 = vld [vmem:[%s3224_s13 + $0x68] sm:$0xff] }
 0xd0d   :  { %v2445_v33 = vpack.c.bf16 %v1885_v32, %v1884_v23 }
 0xd0e   :  { %v1685_v0 = vmul.f32 %v1682_v63, %v2749_v12 }
 0xd0f   :  { %v2564_v1 = vpop.eup %2563 }
 0xd10   :  { %v1688_v2 = vadd.f32 %v1685_v0, %v2751_v14  ;;  %v1683_v3 = vmul.f32 %v2564_v1, %v1659_v36  ;;  %v2448_v36 = vpack.c.bf16 %v1887_v13, %v1886_v49 }
 0xd12   :  { %2337 = vmatmul.mubr.msk.f32.vlgmr.msra.gmra.mrb[42].mxu1 %vm109_vm0, %v1688_v2  ;;  %v1686_v4 = vmul.f32 %v1683_v3, %v2745_v61  ;;  %v1872_v61 = vld [vmem:[%s3224_s13] sm:$0xff] }
 0xd13   :  { %v2566_v5 = vpop.eup %2565  ;;  %2339 = vmatprep.mubr.msk.f32.mxu1 %vm2584_vm2, %v2585_v26 }
 0xd14   :  { %v1689_v6 = vadd.f32 %v1686_v4, %v2747_v62  ;;  %v1684_v8 = vmul.f32 %v2566_v5, %v1660_v48  ;;  %v1873_v62 = vld [vmem:[%s3224_s13 + $0x8] sm:$0xff] }
 0xd15   :  { %v2427_v14 = vpack.c.bf16 %v1873_v62, %v1872_v61 }
 0xd16   :  { %2340 = vmatmul.mubr.msk.f32.gmra.mrb[44].mxu1 %vm109_vm0, %v1689_v6  ;;  %v1687_v10 = vmul.f32 %v1684_v8, %v2761_v34  ;;  %v1874_v34 = vld [vmem:[%s3224_s13 + $0x10] sm:$0xff] }
 0xd17   :  { %2342 = vmatprep.mubr.msk.f32.mxu1 %vm2584_vm2, %v2585_v26  ;;  %2428 = vmatpush3.bf16.msra.mxu0 %v2427_v14 }
 0xd18   :  { %v1690_v12 = vadd.f32 %v1687_v10, %v2763_v35  ;;  %2429 = vmatprep.subr.bf16.mxu0 %v2583_v22  ;;  %v1875_v35 = vld [vmem:[%s3224_s13 + $0x18] sm:$0xff] }
 0xd19   :  { %v2430_v15 = vpack.c.bf16 %v1875_v35, %v1874_v34 }
 0xd1a   :  { %2343 = vmatmul.mubr.msk.f32.gmra.mrb[46].mxu1 %vm109_vm0, %v1690_v12 }
 0xd1b   :  { %2431 = vmatpush3.bf16.msra.mxu0 %v2430_v15 }
 0xd1c   :  { %2432 = vmatprep.subr.bf16.mxu0 %v2583_v22 }
 0xd1f   :  { %2434 = vmatpush3.bf16.msra.mxu0 %v2433_v7 }
 0xd20   :  { %2435 = vmatprep.subr.bf16.mxu0 %v2583_v22 }
 0xd23   :  { %2437 = vmatpush3.bf16.msra.mxu0 %v2436_v24 }
 0xd24   :  { %2438 = vmatprep.subr.bf16.mxu0 %v2583_v22 }
 0xd27   :  { %2440 = vmatpush3.bf16.msra.mxu0 %v2439_v16 }
 0xd28   :  { %2441 = vmatprep.subr.bf16.mxu0 %v2583_v22 }
 0xd2b   :  { %2443 = vmatpush3.bf16.msra.mxu0 %v2442_v31 }
 0xd2c   :  { %2444 = vmatprep.subr.bf16.mxu0 %v2583_v22 }
 0xd2f   :  { %2446 = vmatpush3.bf16.msra.mxu0 %v2445_v33 }
 0xd30   :  { %2447 = vmatprep.subr.bf16.mxu0 %v2583_v22 }
 0xd33   :  { %2449 = vmatpush3.bf16.msra.mxu0 %v2448_v36 }
 0xde5   :  { %v1777_v39 = vpop.f32.mrb[42].mxu1 }
 0xde6   :  { %v3166_v37 = vadd.f32 %v2045_v38, %v1777_v39  ;;  %v2338_v40 = vpop.f32.mrb[43].mxu1 }
 0xde8   :  { %v3169_v22 = vmul.f32 0.70710677, %v3166_v37 }
 0xde9   :  { %v1782_v48 = vpop.f32.mrb[44].mxu1 }
 0xdea   :  { %v1797_v41 = vand.u32 2147483647, %v3169_v22  ;;  %v3172_v42 = vadd.f32 %v2045_v38, %v1782_v48  ;;  %v2341_v44 = vpop.f32.mrb[45].mxu1  ;;  %vm1857_vm8 = vcmp.ge.f32.partialorder %v3169_v22, 0.0 }
 0xdec   :  { %v1800_v57 = vmul.f32 0.3275911, %v1797_v41  ;;  %v3175_v45 = vmul.f32 0.70710677, %v3172_v42  ;;  %v1839_v56 = vsub.f32 0.0, %v1797_v41 }
 0xded   :  { %v1787_v46 = vpop.f32.mrb[46].mxu1 }
 0xdee   :  { %v1803_v52 = vadd.f32 1.0, %v1800_v57  ;;  %v1798_v47 = vand.u32 2147483647, %v3175_v45  ;;  %v2344_v50 = vpop.f32.mrb[47].mxu1  ;;  %v3178_v29 = vadd.f32 %v2045_v38, %v1787_v46  ;;  %v1842_v60 = vmul.f32 %v1839_v56, %v1797_v41 }
 0xdef   :  { %vm1858_vm9 = vcmp.ge.f32.partialorder %v3175_v45, 0.0 }
 0xdf0   :  { %2567 = vrcp.f32 %v1803_v52  ;;  %v1801_v51 = vmul.f32 0.3275911, %v1798_v47  ;;  %v3181_v53 = vmul.f32 0.70710677, %v3178_v29  ;;  %v1840_v63 = vsub.f32 0.0, %v1798_v47 }
 0xdf1   :  { %v1845_v3 = vmul.f32 1.442695, %v1842_v60  ;;  %v1791_v52 = vmul.f32 0.5, %v3166_v37 }
 0xdf2   :  { %v1804_v54 = vadd.f32 1.0, %v1801_v51  ;;  %v1799_v43 = vand.u32 2147483647, %v3181_v53  ;;  %v1843_v4 = vmul.f32 %v1840_v63, %v1798_v47  ;;  %vm1859_vm10 = vcmp.ge.f32.partialorder %v3181_v53, 0.0 }
 0xdf4   :  { %2569 = vrcp.f32 %v1804_v54  ;;  %v1802_v55 = vmul.f32 0.3275911, %v1799_v43  ;;  %v1841_v6 = vsub.f32 0.0, %v1799_v43  ;;  %v1847_v61 = vmul.f32 1.442695, %v1843_v4 }
 0xdf6   :  { %v1805_v58 = vadd.f32 1.0, %v1802_v55  ;;  %v1844_v34 = vmul.f32 %v1841_v6, %v1799_v43 }
 0xdf8   :  { %2571 = vrcp.f32 %v1805_v58  ;;  %v1849_v20 = vmul.f32 1.442695, %v1844_v34  ;;  %v1792_v58 = vmul.f32 0.5, %v3172_v42 }
 0xdf9   :  { %2573 = vpow2.f32 %v1845_v3 }
 0xdfa   :  { %v2568_v59 = vpop.eup %2567  ;;  %2575 = vpow2.f32 %v1847_v61 }
 0xdfb   :  { %v1812_v0 = vmul.f32 1.0614054, %v2568_v59  ;;  %2577 = vpow2.f32 %v1849_v20 }
 0xdfd   :  { %v1815_v1 = vadd.f32 -1.4531521, %v1812_v0  ;;  %v1793_v0 = vmul.f32 0.5, %v3178_v29 }
 0xdfe   :  { %v2570_v2 = vpop.eup %2569 }
 0xdff   :  { %v1818_v5 = vmul.f32 %v2568_v59, %v1815_v1  ;;  %v1813_v8 = vmul.f32 1.0614054, %v2570_v2 }
 0xe01   :  { %v1821_v10 = vadd.f32 1.4214138, %v1818_v5  ;;  %v1816_v12 = vadd.f32 -1.4531521, %v1813_v8 }
 0xe02   :  { %v2572_v62 = vpop.eup %2571 }
 0xe03   :  { %v1824_v14 = vmul.f32 %v2568_v59, %v1821_v10  ;;  %v1819_v35 = vmul.f32 %v2570_v2, %v1816_v12  ;;  %v1814_v15 = vmul.f32 1.0614054, %v2572_v62  ;;  %v2574_v23 = vpop.eup %2573 }
 0xe04   :  { %v2576_v39 = vpop.eup %2575 }
 0xe05   :  { %v1827_v17 = vadd.f32 -0.28449672, %v1824_v14  ;;  %v1822_v18 = vadd.f32 1.4214138, %v1819_v35  ;;  %v1817_v7 = vadd.f32 -1.4531521, %v1814_v15  ;;  %v2578_v51 = vpop.eup %2577 }
 0xe07   :  { %v1830_v19 = vmul.f32 %v2568_v59, %v1827_v17  ;;  %v1825_v24 = vmul.f32 %v2570_v2, %v1822_v18  ;;  %v1820_v25 = vmul.f32 %v2572_v62, %v1817_v7 }
 0xe09   :  { %v1833_v27 = vadd.f32 0.2548296, %v1830_v19  ;;  %v1828_v16 = vadd.f32 -0.28449672, %v1825_v24  ;;  %v1823_v28 = vadd.f32 1.4214138, %v1820_v25 }
 0xe0b   :  { %v1836_v30 = vmul.f32 %v2568_v59, %v1833_v27  ;;  %v1831_v31 = vmul.f32 %v2570_v2, %v1828_v16  ;;  %v1826_v32 = vmul.f32 %v2572_v62, %v1823_v28 }
 0xe0d   :  { %v1851_v33 = vmul.f32 %v2574_v23, %v1836_v30  ;;  %v1834_v49 = vadd.f32 0.2548296, %v1831_v31  ;;  %v1829_v13 = vadd.f32 -0.28449672, %v1826_v32 }
 0xe0f   :  { %v1854_v36 = vsub.f32 1.0, %v1851_v33  ;;  %v1837_v38 = vmul.f32 %v2570_v2, %v1834_v49  ;;  %v1832_v40 = vmul.f32 %v2572_v62, %v1829_v13  ;;  %v2049_v2 = vld [vmem:[%s3226_s14] ss:$0 sm:$0xff] }
 0xe11   :  { %v1860_v48 = vsub.f32 0.0, %v1854_v36  ;;  %v1852_v41 = vmul.f32 %v2576_v39, %v1837_v38  ;;  %v1835_v44 = vadd.f32 0.2548296, %v1832_v40 }
 0xe13   :  { %v1863_v57 = vsel %vm1857_vm8, %v1854_v36, %v1860_v48  ;;  %v1855_v46 = vsub.f32 1.0, %v1852_v41  ;;  %v1838_v50 = vmul.f32 %v2572_v62, %v1835_v44 }
 0xe14   :  { %v1866_v47 = vadd.f32 1.0, %v1863_v57 }
 0xe15   :  { %v1861_v54 = vsub.f32 0.0, %v1855_v46  ;;  %v1853_v55 = vmul.f32 %v2578_v51, %v1838_v50 }
 0xe16   :  { %v1869_v43 = vmul.f32 %v1866_v47, %v1791_v52 }
 0xe17   :  { %v1864_v56 = vsel %vm1858_vm9, %v1855_v46, %v1861_v54  ;;  %v1856_v60 = vsub.f32 1.0, %v1853_v55 }
 0xe18   :  { %2378 = vmatmul.mubr.f32.vlgmr.msra.gmra.mrb[36].mxu0 %v1869_v43  ;;  %v1867_v59 = vadd.f32 1.0, %v1864_v56 }
 0xe19   :  { %2380 = vmatprep.mubr.msk.f32.mxu0 %vm2584_vm2, %v2585_v26  ;;  %v1862_v63 = vsub.f32 0.0, %v1856_v60 }
 0xe1a   :  { %v1870_v22 = vmul.f32 %v1867_v59, %v1792_v58 }
 0xe1b   :  { %v1865_v37 = vsel %vm1859_vm10, %v1856_v60, %v1862_v63 }
 0xe1c   :  { %2381 = vmatmul.mubr.f32.gmra.mrb[38].mxu0 %v1870_v22  ;;  %v1868_v45 = vadd.f32 1.0, %v1865_v37 }
 0xe1d   :  { %2383 = vmatprep.mubr.msk.f32.mxu0 %vm2584_vm2, %v2585_v26 }
 0xe1e   :  { %v1871_v1 = vmul.f32 %v1868_v45, %v1793_v0 }
 0xe20   :  { %2384 = vmatmul.mubr.f32.gmra.mrb[40].mxu0 %v1871_v1 }
 0xeeb   :  { %v1954_v42 = vpop.f32.mrb[36].mxu0 }
 0xeec   :  { %v1968_v3 = vadd.f32 %v1954_v42, %v3057_v11  ;;  %v2379_v4 = vpop.f32.mrb[37].mxu0 }
 0xeee   :  { %v1978_v5 = vadd.f32 %v2049_v2, %v1968_v3 }
 0xeef   :  { %v1959_v53 = vpop.f32.mrb[38].mxu0 }
 0xef0   :  { %1981 = vst.msk [vmem:[%s3227_s15] sm:$0xff] %vm109_vm0, %v1978_v5  ;;  %v1969_v26 = vadd.f32 %v1959_v53, %v3065_v21  ;;  %v2382_v29 = vpop.f32.mrb[39].mxu0 }
 0xef2   :  { %v1979_v6 = vadd.f32 %v2049_v2, %v1969_v26 }
 0xef3   :  { %v1964_v8 = vpop.f32.mrb[40].mxu0 }
 0xef4   :  { %1982 = vst.msk [vmem:[%s3227_s15 + $0x8] sm:$0xff] %vm109_vm0, %v1979_v6  ;;  %v1970_v11 = vadd.f32 %v1964_v8, %v3072_v9  ;;  %v2385_v10 = vpop.f32.mrb[41].mxu0 }
 0xef6   :  { %v1980_v12 = vadd.f32 %v2049_v2, %v1970_v11 }
 0xef8   :  { %1983 = vst.msk [vmem:[%s3227_s15 + $0x10] sm:$0xf] %vm116_vm1, %v1980_v12 }

// kernel: adv_mae_forward.11
= control target key start
LH: loop header
LB: loop body
LE: loop exit
PB: predicated region body
PF: predicated region fallthrough
CT: control target
= control target key end

     0   :  { %vm175_vm0 = vcmask 261120   ;;  %v5247_v3 = vmov 0   ;;  %vm200_vm1 = vcmask 257024   ;;  %v119_v27 = vlaneseq  ;;  %s5253_s20 = smov 120   ;;  %s5254_s21 = smov 64   ;;  %s7305_s0 = inlined_call_operand.vmem [shape: f32[68,32], index: 0, kind: input, shape index: {}]   ;;  %s7306_s1 = inlined_call_operand.vmem [shape: f32[68,1], index: 1, kind: input, shape index: {}]   ;;  %s7307_s9 = inlined_call_operand.vmem [shape: f32[2,32], index: 9, kind: input, shape index: {}]   ;;  %s7308_s10 = inlined_call_operand.vmem [shape: f32[2,32], index: 10, kind: input, shape index: {}]   ;;  %s7309_s5 = inlined_call_operand.vmem [shape: f32[32,96], index: 5, kind: input, shape index: {}]   ;;  %s7310_s3 = inlined_call_operand.vmem [shape: f32[2,32], index: 3, kind: input, shape index: {}]   ;;  %s7311_s4 = inlined_call_operand.vmem [shape: f32[2,32], index: 4, kind: input, shape index: {}]   ;;  %s7312_s6 = inlined_call_operand.vmem [shape: f32[1,96], index: 6, kind: input, shape index: {}]   ;;  %s7313_s2 = inlined_call_operand.vmem [shape: f32[68,68], index: 2, kind: input, shape index: {}]   ;;  %s7314_s7 = inlined_call_operand.vmem [shape: f32[32,32], index: 7, kind: input, shape index: {}]   ;;  %s7315_s8 = inlined_call_operand.vmem [shape: f32[1,32], index: 8, kind: input, shape index: {}]   ;;  %s7316_s11 = inlined_call_operand.vmem [shape: f32[32,128], index: 11, kind: input, shape index: {}]   ;;  %s7317_s13 = inlined_call_operand.vmem [shape: f32[128,32], index: 13, kind: input, shape index: {}]   ;;  %s7318_s12 = inlined_call_operand.vmem [shape: f32[1,128], index: 12, kind: input, shape index: {}]   ;;  %s7319_s14 = inlined_call_operand.vmem [shape: f32[1,32], index: 14, kind: input, shape index: {}]   ;;  %s7320_s15 = inlined_call_operand.vmem [shape: f32[68,32], index: 15, kind: output, shape index: {}]  }
   0x1   :  { %v52_v0 = vld [vmem:[%s7305_s0 + $0x10] sm:$0xff]  ;;  %v50_v1 = vld [vmem:[%s7305_s0] sm:$0xff]  ;;  %v53_v2 = vld [vmem:[%s7305_s0 + $0x18] sm:$0xff]  ;;  %4852 = vset.pattern.permute.xlu1 %v5247_v3  ;;  %4851 = vset.pattern.permute.xlu0 %v5247_v3  ;;  %vm5249_vm2 = vmmov 0   ;;  %vm501_vm3 = vcmask 64512   ;;  %vm820_vm5 = vcmask 1043456  }
   0x2   :  { %v182_v4 = vsel %vm175_vm0, %v52_v0, 0.0  ;;  %v176_v5 = vsel %vm175_vm0, %v50_v1, 0.0  ;;  %v51_v6 = vld [vmem:[%s7305_s0 + $0x8] sm:$0xff]  ;;  %v185_v7 = vsel %vm175_vm0, %v53_v2, 0.0  ;;  %v54_v10 = vld [vmem:[%s7305_s0 + $0x20] sm:$0xff]  ;;  %v5369_v13 = vld [vmem:[%s7305_s0 + $0x38] sm:$0xff] }
   0x3   :  { %183 = vadd.xlane.f32.xlu1 %v182_v4  ;;  %177 = vadd.xlane.f32.xlu0 %v176_v5  ;;  %v179_v8 = vsel %vm175_vm0, %v51_v6, 0.0  ;;  %v55_v9 = vld [vmem:[%s7305_s0 + $0x28] sm:$0xff]  ;;  %v188_v12 = vsel %vm175_vm0, %v54_v10, 0.0  ;;  %v5374_v14 = vld [vmem:[%s7305_s0 + $0x30] sm:$0xff]  ;;  %v197_v15 = vsel %vm175_vm0, %v5369_v13, 0.0  ;;  %v62_v20 = vld [vmem:[%s7306_s1 + $0x18] sm:$0xff] }
   0x4   :  { %v191_v11 = vsel %vm175_vm0, %v55_v9, 0.0  ;;  %v194_v16 = vsel %vm175_vm0, %v5374_v14, 0.0  ;;  %v5383_v17 = vld [vmem:[%s7305_s0 + $0x40] sm:$0xf]  ;;  %v60_v19 = vld [vmem:[%s7306_s1 + $0x8] sm:$0xff]  ;;  %v61_v22 = vld [vmem:[%s7306_s1 + $0x10] sm:$0xff] }
   0x5   :  { %v201_v18 = vsel %vm200_vm1, %v5383_v17, 0.0  ;;  %v59_v21 = vld [vmem:[%s7306_s1] sm:$0xff]  ;;  %v120_v38 = vshrl.u32 %v119_v27, 7  ;;  %vm5775_vm4 = vmpackc.low %vm501_vm3, %vm501_vm3  ;;  %vm666_vm6 = vcmask 556032   ;;  %vm691_vm7 = vcmask 551936   ;;  %s5261_s25 = smov 40  }
   0x6   :  { %v2916_v30 = vld [vmem:[%s7307_s9] sm:$0x3] }
   0x7   :  { %186 = vadd.xlane.f32.xlu1 %v185_v7  ;;  %180 = vadd.xlane.f32.xlu0 %v179_v8  ;;  %v2917_v31 = vld [vmem:[%s7308_s10] sm:$0x3]  ;;  %v2919_v39 = vrot.slane %v2916_v30, 7  ;;  %v5423_v51 = vsub.s32 1, %v120_v38  ;;  %v5431_v60 = vsub.s32 0, %v120_v38  ;;  %v314_v38 = vld [vmem:[%s7309_s5 + $0x8] sm:$0xff] }
   0x8   :  { %v2949_v40 = vrot.slane %v2917_v31, 7 }
   0x9   :  { %v2921_v52 = vsub.f32 %v2916_v30, %v2919_v39  ;;  %v5456_v8 = vrot.slane %v2917_v31, %v5431_v60 }
   0xa   :  { %v2951_v53 = vsub.f32 %v2917_v31, %v2949_v40  ;;  %v7323_v40 = vmov 0.0|0.0  }
   0xb   :  { %192 = vadd.xlane.f32.xlu1 %v191_v11  ;;  %189 = vadd.xlane.f32.xlu0 %v188_v12 }
   0xc   :  { %4678 = vmatprep.subr.bf16.mxu0 %v7323_v40  ;;  %4684 = vmatprep.subr.bf16.mxu1 %v7323_v40 }
   0xf   :  { %198 = vadd.xlane.f32.xlu1 %v197_v15  ;;  %195 = vadd.xlane.f32.xlu0 %v194_v16 }
  0x13   :  { %202 = vadd.xlane.f32.xlu0 %v201_v18 }
  0x20   :  { %81 = vperm.xlu1 %4852, %v60_v19  }
  0x24   :  { %91 = vperm.xlu1 %4852, %v62_v20  }
  0x29   :  { %76 = vperm.xlu0 %4851, %v59_v21  }
  0x2d   :  { %86 = vperm.xlu0 %4851, %v61_v22  }
  0x90   :  { %v184_v23 = vpop.xlane.xlu1 %183  ;;  %v178_v24 = vpop.xlane.xlu0 %177 }
  0x91   :  { %v207_v25 = vmul.f32 0.03125, %v184_v23  ;;  %v205_v26 = vmul.f32 0.03125, %v178_v24 }
  0x93   :  { %v5399_v28 = vsub.f32 %v52_v0, %v207_v25  ;;  %v5401_v29 = vsub.f32 %v50_v1, %v205_v26  ;;  %v5438_v1 = vrot.slane %v2921_v52, %v5423_v51  ;;  %v67_v52 = vld [vmem:[%s7306_s1 + $0x40] sm:$0xf] }
  0x94   :  { %v187_v32 = vpop.xlane.xlu1 %186  ;;  %v181_v33 = vpop.xlane.xlu0 %180 }
  0x95   :  { %v208_v34 = vmul.f32 0.03125, %v187_v32  ;;  %v206_v35 = vmul.f32 0.03125, %v181_v33  ;;  %v223_v36 = vmul.f32 %v5401_v29, %v5401_v29  ;;  %v225_v37 = vmul.f32 %v5399_v28, %v5399_v28 }
  0x97   :  { %v5413_v41 = vsub.f32 %v53_v2, %v208_v34  ;;  %v5415_v42 = vsub.f32 %v51_v6, %v206_v35  ;;  %v232_v43 = vsel %vm175_vm0, %v223_v36, 0.0  ;;  %v238_v46 = vsel %vm175_vm0, %v225_v37, 0.0  ;;  %v313_v37 = vld [vmem:[%s7309_s5] sm:$0xff] }
  0x98   :  { %v193_v44 = vpop.xlane.xlu1 %192  ;;  %233 = vadd.xlane.f32.xlu1 %v232_v43  ;;  %v190_v45 = vpop.xlane.xlu0 %189  ;;  %v5441_v2 = vrot.slane %v2951_v53, %v5423_v51  ;;  %v5451_v6 = vrot.slane %v2916_v30, %v5431_v60  ;;  %v4679_v39 = vpack.c.bf16 %v314_v38, %v313_v37  ;;  %v63_v43 = vld [vmem:[%s7306_s1 + $0x20] sm:$0xff] }
  0x99   :  { %v210_v47 = vmul.f32 0.03125, %v193_v44  ;;  %v209_v48 = vmul.f32 0.03125, %v190_v45  ;;  %v224_v49 = vmul.f32 %v5415_v42, %v5415_v42  ;;  %v226_v50 = vmul.f32 %v5413_v41, %v5413_v41  ;;  %v315_v44 = vld [vmem:[%s7309_s5 + $0x10] sm:$0xff]  ;;  %v316_v45 = vld [vmem:[%s7309_s5 + $0x18] sm:$0xff] }
  0x9a   :  { %4680 = vmatpush3.bf16.msra.mxu0 %v4679_v39 }
  0x9b   :  { %v5425_v54 = vsub.f32 %v55_v9, %v210_v47  ;;  %v5427_v55 = vsub.f32 %v54_v10, %v209_v48  ;;  %v235_v56 = vsel %vm175_vm0, %v224_v49, 0.0  ;;  %v241_v58 = vsel %vm175_vm0, %v226_v50, 0.0  ;;  %4681 = vmatprep.subr.bf16.mxu0 %v7323_v40  ;;  %v65_v48 = vld [vmem:[%s7306_s1 + $0x30] sm:$0xff]  ;;  %v66_v50 = vld [vmem:[%s7306_s1 + $0x38] sm:$0xff] }
  0x9c   :  { %v199_v57 = vpop.xlane.xlu1 %198  ;;  %239 = vadd.xlane.f32.xlu1 %v238_v46  ;;  %236 = vadd.xlane.f32.xlu0 %v235_v56  ;;  %v196_v59 = vpop.xlane.xlu0 %195  ;;  %v64_v46 = vld [vmem:[%s7306_s1 + $0x28] sm:$0xff]  ;;  %v4682_v47 = vpack.c.bf16 %v316_v45, %v315_v44  ;;  %v7321_v49 = vmov 0.0  }
  0x9d   :  { %v212_v61 = vmul.f32 0.03125, %v199_v57  ;;  %v227_v62 = vmul.f32 %v5427_v55, %v5427_v55  ;;  %v211_v63 = vmul.f32 0.03125, %v196_v59  ;;  %v228_v0 = vmul.f32 %v5425_v54, %v5425_v54  ;;  %4081 = vmatprep.mubr.msk.f32.mxu0 %vm5249_vm2, %v7321_v49  ;;  %4126 = vmatprep.mubr.msk.f32.mxu1 %vm5249_vm2, %v7321_v49  ;;  %v68_v59 = vld [vmem:[%s7310_s3] sm:$0x3] }
  0x9e   :  { %4683 = vmatpush3.bf16.msra.mxu0 %v4682_v47 }
  0x9f   :  { %v5444_v3 = vsub.f32 %v5369_v13, %v212_v61  ;;  %v244_v4 = vsel %vm175_vm0, %v227_v62, 0.0  ;;  %v5448_v5 = vsub.f32 %v5374_v14, %v211_v63  ;;  %v247_v10 = vsel %vm175_vm0, %v228_v0, 0.0  ;;  %4700 = vmatprep.subr.bf16.mxu0 %v7323_v40  ;;  %v69_v62 = vld [vmem:[%s7311_s4] sm:$0x3]  ;;  %s5251_s4 = smov 96  }
  0xa0   :  { %242 = vadd.xlane.f32.xlu0 %v241_v58  ;;  %245 = vadd.xlane.f32.xlu1 %v244_v4  ;;  %v5453_v7 = vpop.permute.xlu1 %81  ;;  %v203_v15 = vpop.xlane.xlu0 %202  ;;  %v71_v0 = vrot.slane %v68_v59, 7 }
  0xa1   :  { %v230_v9 = vmul.f32 %v5444_v3, %v5444_v3  ;;  %v229_v11 = vmul.f32 %v5448_v5, %v5448_v5  ;;  %v2927_v12 = vmul.f32 %v5438_v1, %v5453_v7  ;;  %v2957_v13 = vmul.f32 %v5441_v2, %v5453_v7 }
  0xa2   :  { %v213_v53 = vmul.f32 0.03125, %v203_v15 }
  0xa3   :  { %v253_v14 = vsel %vm175_vm0, %v230_v9, 0.0  ;;  %v5469_v16 = vadd.f32 %v5451_v6, %v2927_v12  ;;  %v5474_v19 = vadd.f32 %v5456_v8, %v2957_v13  ;;  %v250_v20 = vsel %vm175_vm0, %v229_v11, 0.0 }
  0xa4   :  { %254 = vadd.xlane.f32.xlu0 %v253_v14  ;;  %248 = vadd.xlane.f32.xlu1 %v247_v10  ;;  %v5471_v18 = vpop.permute.xlu1 %91  ;;  %v5547_v56 = vsub.f32 %v5383_v17, %v213_v53  ;;  %v146_v17 = vrot.slane %v69_v62, 7  ;;  %v73_v13 = vsub.f32 %v68_v59, %v71_v0 }
  0xa5   :  { %v2929_v21 = vmul.f32 %v5438_v1, %v5471_v18  ;;  %v2959_v22 = vmul.f32 %v5441_v2, %v5471_v18 }
  0xa6   :  { %v231_v57 = vmul.f32 %v5547_v56, %v5547_v56 }
  0xa7   :  { %v5482_v23 = vadd.f32 %v5451_v6, %v2929_v21  ;;  %v5487_v25 = vadd.f32 %v5456_v8, %v2959_v22 }
  0xa8   :  { %251 = vadd.xlane.f32.xlu1 %v250_v20  ;;  %v5484_v24 = vpop.permute.xlu0 %76  ;;  %v256_v58 = vsel %vm200_vm1, %v231_v57, 0.0  ;;  %v148_v20 = vsub.f32 %v69_v62, %v146_v17 }
  0xa9   :  { %7325 = vst [vmem:[#allocation2_spill] sm:$0xff] %v5482_v23  ;;  %7326 = vst [vmem:[#allocation3_spill] sm:$0xff] %v5487_v25  ;;  %v2926_v26 = vmul.f32 %v5438_v1, %v5484_v24  ;;  %v2956_v27 = vmul.f32 %v5441_v2, %v5484_v24 }
  0xaa   :  { %v5562_v37 = vrot.slane %v148_v20, %v5423_v51 }
  0xab   :  { %v5494_v30 = vadd.f32 %v5451_v6, %v2926_v26  ;;  %v5497_v31 = vadd.f32 %v5456_v8, %v2956_v27  ;;  %v5559_v27 = vrot.slane %v73_v13, %v5423_v51  ;;  %v5573_v51 = vrot.slane %v69_v62, %v5431_v60 }
  0xac   :  { %v5499_v32 = vpop.permute.xlu0 %86  ;;  %v153_v44 = vmul.f32 %v5562_v37, %v5484_v24  ;;  %v154_v62 = vmul.f32 %v5562_v37, %v5453_v7 }
  0xad   :  { %v2928_v33 = vmul.f32 %v5438_v1, %v5499_v32  ;;  %v2958_v34 = vmul.f32 %v5441_v2, %v5499_v32  ;;  %v123_v38 = vmul.f32 %v5559_v27, %v5484_v24  ;;  %v124_v0 = vmul.f32 %v5559_v27, %v5453_v7 }
  0xaf   :  { %v5506_v35 = vadd.f32 %v5451_v6, %v2928_v33  ;;  %v5509_v36 = vadd.f32 %v5456_v8, %v2958_v34 }
  0xb9   :  { %96 = vperm.xlu1 %4852, %v63_v43   ;;  %v5567_v43 = vrot.slane %v68_v59, %v5431_v60  ;;  %v125_v60 = vmul.f32 %v5559_v27, %v5499_v32 }
  0xba   :  { %101 = vperm.xlu0 %4851, %v64_v46  }
  0xbe   :  { %106 = vperm.xlu0 %4851, %v65_v48   ;;  %v136_v48 = vadd.f32 %v5567_v43, %v123_v38 }
  0xc2   :  { %111 = vperm.xlu0 %4851, %v66_v50  }
  0xc6   :  { %116 = vperm.xlu0 %4851, %v67_v52  }
  0xdd   :  { %257 = vadd.xlane.f32.xlu1 %v256_v58  ;;  %v166_v58 = vadd.f32 %v5573_v51, %v153_v44 }
 0x125   :  { %v234_v61 = vpop.xlane.xlu1 %233 }
 0x126   :  { %v259_v63 = vmul.f32 0.03125, %v234_v61 }
 0x128   :  { %v268_v4 = vadd.f32 1e-06, %v259_v63 }
 0x129   :  { %v240_v9 = vpop.xlane.xlu1 %239  ;;  %v237_v10 = vpop.xlane.xlu0 %236 }
 0x12a   :  { %5013 = vrsqrt.f32 %v268_v4  ;;  %v261_v11 = vmul.f32 0.03125, %v240_v9  ;;  %v260_v12 = vmul.f32 0.03125, %v237_v10 }
 0x12c   :  { %v270_v14 = vadd.f32 1e-06, %v261_v11  ;;  %v269_v15 = vadd.f32 1e-06, %v260_v12 }
 0x12d   :  { %v246_v21 = vpop.xlane.xlu1 %245  ;;  %v243_v22 = vpop.xlane.xlu0 %242 }
 0x12e   :  { %5015 = vrsqrt.f32 %v270_v14  ;;  %v262_v26 = vmul.f32 0.03125, %v243_v22  ;;  %v263_v33 = vmul.f32 0.03125, %v246_v21  ;;  %v138_v22 = vadd.f32 %v5567_v43, %v125_v60 }
 0x12f   :  { %5017 = vrsqrt.f32 %v269_v15  ;;  %v137_v15 = vadd.f32 %v5567_v43, %v124_v0 }
 0x130   :  { %v271_v34 = vadd.f32 1e-06, %v262_v26  ;;  %v272_v46 = vadd.f32 1e-06, %v263_v33  ;;  %v155_v26 = vmul.f32 %v5562_v37, %v5499_v32 }
 0x131   :  { %v249_v39 = vpop.xlane.xlu1 %248  ;;  %v255_v50 = vpop.xlane.xlu0 %254 }
 0x132   :  { %5019 = vrsqrt.f32 %v271_v34  ;;  %v264_v47 = vmul.f32 0.03125, %v249_v39  ;;  %v266_v33 = vmul.f32 0.03125, %v255_v50 }
 0x133   :  { %5021 = vrsqrt.f32 %v272_v46 }
 0x134   :  { %v5014_v45 = vpop.eup %5013  ;;  %v273_v24 = vadd.f32 1e-06, %v264_v47 }
 0x135   :  { %v252_v52 = vpop.xlane.xlu1 %251  ;;  %v286_v53 = vmul.f32 %v5014_v45, %v5401_v29 }
 0x136   :  { %v265_v57 = vmul.f32 0.03125, %v252_v52  ;;  %5023 = vrsqrt.f32 %v273_v24  ;;  %v156_v24 = vmul.f32 %v5562_v37, %v5471_v18 }
 0x137   :  { %v295_v59 = vmul.f32 %v286_v53, %v136_v48 }
 0x138   :  { %v5016_v61 = vpop.eup %5015  ;;  %v274_v10 = vadd.f32 1e-06, %v265_v57  ;;  %v275_v57 = vadd.f32 1e-06, %v266_v33 }
 0x139   :  { %v5018_v63 = vpop.eup %5017  ;;  %v97_v4 = vpop.permute.xlu1 %96  ;;  %v304_v9 = vadd.f32 %v295_v59, %v166_v58  ;;  %v288_v14 = vmul.f32 %v5016_v61, %v5399_v28  ;;  %v126_v28 = vmul.f32 %v5559_v27, %v5471_v18  ;;  %v168_v59 = vadd.f32 %v5573_v51, %v155_v26 }
 0x13a   :  { %v5579_v17 = vpop.permute.xlu0 %101  ;;  %v2930_v29 = vmul.f32 %v5438_v1, %v97_v4  ;;  %v287_v13 = vmul.f32 %v5018_v63, %v5415_v42  ;;  %5025 = vrsqrt.f32 %v274_v10  ;;  %v167_v42 = vadd.f32 %v5573_v51, %v154_v62 }
 0x13b   :  { %v2931_v11 = vmul.f32 %v5438_v1, %v5579_v17  ;;  %4082 = vmatmul.mubr.msk.f32.vlgmr.msra.gmra.mrb[0].mxu0 %vm175_vm0, %v304_v9  ;;  %v127_v39 = vmul.f32 %v5559_v27, %v97_v4  ;;  %v2960_v44 = vmul.f32 %v5441_v2, %v97_v4  ;;  %v297_v46 = vmul.f32 %v288_v14, %v138_v22 }
 0x13c   :  { %v5590_v12 = vadd.f32 %v5451_v6, %v2930_v29  ;;  %4084 = vmatprep.mubr.msk.f32.mxu0 %vm5249_vm2, %v7321_v49  ;;  %v5020_v21 = vpop.eup %5019  ;;  %v296_v38 = vmul.f32 %v287_v13, %v137_v15  ;;  %v2961_v32 = vmul.f32 %v5441_v2, %v5579_v17  ;;  %v139_v61 = vadd.f32 %v5567_v43, %v126_v28 }
 0x13d   :  { %v5598_v7 = vadd.f32 %v5451_v6, %v2931_v11  ;;  %v289_v52 = vmul.f32 %v5020_v21, %v5413_v41  ;;  %v5022_v53 = vpop.eup %5021  ;;  %v140_v0 = vadd.f32 %v5567_v43, %v127_v39  ;;  %v306_v41 = vadd.f32 %v297_v46, %v168_v59 }
 0x13e   :  { %7327 = vst [vmem:[#allocation4_spill] sm:$0xff] %v5590_v12  ;;  %v5600_v20 = vpop.permute.xlu0 %106  ;;  %v305_v48 = vadd.f32 %v296_v38, %v167_v42  ;;  %v5634_v60 = vadd.f32 %v5456_v8, %v2960_v44  ;;  %v290_v18 = vmul.f32 %v5022_v53, %v5427_v55  ;;  %v5638_v10 = vadd.f32 %v5456_v8, %v2961_v32 }
 0x13f   :  { %7328 = vst [vmem:[#allocation5_spill] sm:$0xff] %v5598_v7  ;;  %v2932_v34 = vmul.f32 %v5438_v1, %v5600_v20  ;;  %v2962_v47 = vmul.f32 %v5441_v2, %v5600_v20  ;;  %v298_v62 = vmul.f32 %v289_v52, %v139_v61  ;;  %5027 = vrsqrt.f32 %v275_v57 }
 0x140   :  { %4085 = vmatmul.mubr.msk.f32.gmra.mrb[2].mxu0 %vm175_vm0, %v305_v48  ;;  %7331 = vst [vmem:[#allocation8_spill] sm:$0xff] %v5634_v60  ;;  %7332 = vst [vmem:[#allocation9_spill] sm:$0xff] %v5638_v10  ;;  %v5024_v13 = vpop.eup %5023  ;;  %v157_v21 = vmul.f32 %v5562_v37, %v97_v4  ;;  %v128_v22 = vmul.f32 %v5559_v27, %v5579_v17  ;;  %v169_v55 = vadd.f32 %v5573_v51, %v156_v24 }
 0x141   :  { %v5613_v45 = vadd.f32 %v5451_v6, %v2932_v34  ;;  %4087 = vmatprep.mubr.msk.f32.mxu0 %vm5249_vm2, %v7321_v49  ;;  %v5641_v11 = vadd.f32 %v5456_v8, %v2962_v47  ;;  %v299_v34 = vmul.f32 %v290_v18, %v140_v0  ;;  %v291_v28 = vmul.f32 %v5024_v13, %v5425_v54 }
 0x142   :  { %v112_v50 = vpop.permute.xlu0 %111  ;;  %v307_v4 = vadd.f32 %v298_v62, %v169_v55  ;;  %v141_v42 = vadd.f32 %v5567_v43, %v128_v22  ;;  %v158_v38 = vmul.f32 %v5562_v37, %v5579_v17  ;;  %v170_v39 = vadd.f32 %v5573_v51, %v157_v21 }
 0x143   :  { %7329 = vst [vmem:[#allocation6_spill] sm:$0xff] %v5613_v45  ;;  %v2933_v58 = vmul.f32 %v5438_v1, %v112_v50  ;;  %v2963_v63 = vmul.f32 %v5441_v2, %v112_v50  ;;  %7333 = vst [vmem:[#allocation10_spill] sm:$0xff] %v5641_v11  ;;  %v159_v17 = vmul.f32 %v5562_v37, %v5600_v20 }
 0x144   :  { %4088 = vmatmul.mubr.msk.f32.gmra.mrb[4].mxu0 %vm175_vm0, %v306_v41  ;;  %v308_v44 = vadd.f32 %v299_v34, %v170_v39  ;;  %v300_v46 = vmul.f32 %v291_v28, %v141_v42  ;;  %v171_v47 = vadd.f32 %v5573_v51, %v158_v38 }
 0x145   :  { %v5629_v9 = vadd.f32 %v5451_v6, %v2933_v58  ;;  %v5651_v26 = vadd.f32 %v5456_v8, %v2963_v63  ;;  %4090 = vmatprep.mubr.msk.f32.mxu0 %vm5249_vm2, %v7321_v49  ;;  %v160_v58 = vmul.f32 %v5562_v37, %v112_v50 }
 0x146   :  { %v117_v29 = vpop.permute.xlu0 %116  ;;  %v309_v53 = vadd.f32 %v300_v46, %v171_v47 }
 0x147   :  { %7330 = vst [vmem:[#allocation7_spill] sm:$0xff] %v5629_v9  ;;  %v2934_v14 = vmul.f32 %v5438_v1, %v117_v29  ;;  %v2964_v15 = vmul.f32 %v5441_v2, %v117_v29  ;;  %7334 = vst [vmem:[#allocation11_spill] sm:$0xff] %v5651_v26  ;;  %v5026_v2 = vpop.eup %5025  ;;  %v173_v24 = vadd.f32 %v5573_v51, %v160_v58 }
 0x148   :  { %4091 = vmatmul.mubr.msk.f32.gmra.mrb[6].mxu0 %vm175_vm0, %v307_v4  ;;  %v292_v54 = vmul.f32 %v5026_v2, %v5448_v5  ;;  %v172_v5 = vadd.f32 %v5573_v51, %v159_v17  ;;  %v131_v41 = vmul.f32 %v5559_v27, %v117_v29  ;;  %v161_v62 = vmul.f32 %v5562_v37, %v117_v29 }
 0x149   :  { %v5654_v33 = vadd.f32 %v5451_v6, %v2934_v14  ;;  %v5659_v1 = vadd.f32 %v5456_v8, %v2964_v15  ;;  %v129_v6 = vmul.f32 %v5559_v27, %v5600_v20  ;;  %4093 = vmatprep.mubr.msk.f32.mxu0 %vm5249_vm2, %v7321_v49  ;;  %v130_v8 = vmul.f32 %v5559_v27, %v112_v50  ;;  %v5028_v48 = vpop.eup %5027  ;;  %v3668_v27 = vld [vmem:[%s7312_s6] ss:$0 sm:$0xff]  ;;  %s5252_s6 = smov 88  }
 0x14a   :  { %v293_v20 = vmul.f32 %v5028_v48, %v5444_v3  ;;  %v144_v13 = vadd.f32 %v5567_v43, %v131_v41  ;;  %v174_v15 = vadd.f32 %v5573_v51, %v161_v62 }
 0x14b   :  { %7335 = vst [vmem:[#allocation12_spill] sm:$0xff] %v5654_v33  ;;  %7336 = vst [vmem:[#allocation13_spill] sm:$0xff] %v5659_v1  ;;  %v142_v32 = vadd.f32 %v5567_v43, %v129_v6  ;;  %v143_v52 = vadd.f32 %v5567_v43, %v130_v8 }
 0x14c   :  { %4094 = vmatmul.mubr.msk.f32.gmra.mrb[8].mxu0 %vm175_vm0, %v308_v44 }
 0x14d   :  { %4096 = vmatprep.mubr.msk.f32.mxu0 %vm5249_vm2, %v7321_v49  ;;  %v301_v57 = vmul.f32 %v292_v54, %v142_v32  ;;  %v302_v61 = vmul.f32 %v293_v20, %v143_v52 }
 0x14f   :  { %v310_v59 = vadd.f32 %v301_v57, %v172_v5  ;;  %v311_v63 = vadd.f32 %v302_v61, %v173_v24 }
 0x150   :  { %4097 = vmatmul.mubr.msk.f32.gmra.mrb[10].mxu0 %vm175_vm0, %v309_v53 }
 0x151   :  { %4099 = vmatprep.mubr.msk.f32.mxu0 %vm5249_vm2, %v7321_v49 }
 0x154   :  { %4100 = vmatmul.mubr.msk.f32.gmra.mrb[12].mxu0 %vm175_vm0, %v310_v59 }
 0x155   :  { %4102 = vmatprep.mubr.msk.f32.mxu0 %vm5249_vm2, %v7321_v49 }
 0x158   :  { %4103 = vmatmul.mubr.msk.f32.gmra.mrb[14].mxu0 %vm175_vm0, %v311_v63 }
 0x159   :  { %4105 = vmatprep.mubr.msk.f32.mxu0 %vm5249_vm2, %v7321_v49 }
 0x16a   :  { %v258_v50 = vpop.xlane.xlu1 %257 }
 0x16b   :  { %v267_v3 = vmul.f32 0.03125, %v258_v50 }
 0x16d   :  { %v276_v0 = vadd.f32 1e-06, %v267_v3 }
 0x16f   :  { %5029 = vrsqrt.f32 %v276_v0 }
 0x179   :  { %v5030_v18 = vpop.eup %5029 }
 0x17a   :  { %v294_v14 = vmul.f32 %v5030_v18, %v5547_v56 }
 0x17c   :  { %v303_v21 = vmul.f32 %v294_v14, %v144_v13 }
 0x17e   :  { %v312_v22 = vadd.f32 %v303_v21, %v174_v15 }
 0x180   :  { %4106 = vmatmul.mubr.msk.f32.gmra.mrb[16].mxu0 %vm175_vm0, %v312_v22 }
 0x181   :  { %4171 = vmatprep.mubr.msk.f32.mxu0 %vm5249_vm2, %v7321_v49 }
 0x20e   :  { %v417_v55 = vpop.f32.mrb[0].mxu0 }
 0x20f   :  { %v4083_v2 = vpop.f32.mrb[1].mxu0  ;;  %v5705_v29 = vadd.f32 %v3668_v27, %v417_v55 }
 0x213   :  { %v422_v37 = vpop.f32.mrb[2].mxu0 }
 0x214   :  { %v5707_v43 = vadd.f32 %v3668_v27, %v422_v37  ;;  %v4086_v56 = vpop.f32.mrb[3].mxu0 }
 0x216   :  { %v5711_v51 = vpack.i.bf16 %v5707_v43, %v5705_v29 }
 0x217   :  { %v427_v4 = vpop.f32.mrb[4].mxu0 }
 0x218   :  { %4854 = vrot.lane.b32.xlu0 %v5711_v51, %s5251_s4  ;;  %v4089_v34 = vpop.f32.mrb[5].mxu0  ;;  %v5715_v42 = vadd.f32 %v3668_v27, %v427_v4 }
 0x21b   :  { %v432_v28 = vpop.f32.mrb[6].mxu0 }
 0x21c   :  { %v5717_v38 = vadd.f32 %v3668_v27, %v432_v28  ;;  %v4092_v6 = vpop.f32.mrb[7].mxu0 }
 0x21e   :  { %v5721_v39 = vpack.i.bf16 %v5717_v38, %v5715_v42 }
 0x21f   :  { %v437_v8 = vpop.f32.mrb[8].mxu0 }
 0x220   :  { %4859 = vrot.lane.b32.xlu1 %v5721_v39, %s5251_s4  ;;  %v4095_v44 = vpop.f32.mrb[9].mxu0  ;;  %v5725_v54 = vadd.f32 %v3668_v27, %v437_v8 }
 0x223   :  { %v442_v46 = vpop.f32.mrb[10].mxu0 }
 0x224   :  { %v5727_v32 = vadd.f32 %v3668_v27, %v442_v46  ;;  %4879 = vrot.lane.b32.xlu1 %v5721_v39, %s5252_s6  ;;  %v4098_v17 = vpop.f32.mrb[11].mxu0 }
 0x226   :  { %v5733_v47 = vpack.i.bf16 %v5727_v32, %v5725_v54 }
 0x227   :  { %v447_v48 = vpop.f32.mrb[12].mxu0 }
 0x228   :  { %4864 = vrot.lane.b32.xlu0 %v5733_v47, %s5251_s4  ;;  %v4101_v52 = vpop.f32.mrb[13].mxu0  ;;  %v5737_v57 = vadd.f32 %v3668_v27, %v447_v48 }
 0x22b   :  { %v452_v53 = vpop.f32.mrb[14].mxu0 }
 0x22c   :  { %v5739_v58 = vadd.f32 %v3668_v27, %v452_v53  ;;  %v4104_v5 = vpop.f32.mrb[15].mxu0 }
 0x22e   :  { %v5743_v20 = vpack.i.bf16 %v5739_v58, %v5737_v57 }
 0x230   :  { %4889 = vrot.lane.b32.xlu1 %v5743_v20, %s5252_s6  ;;  %4869 = vrot.lane.b32.xlu0 %v5743_v20, %s5251_s4 }
 0x234   :  { %933 = vrot.lane.b32.xlu1 %v5705_v29, %s5253_s20 }
 0x238   :  { %937 = vrot.lane.b32.xlu1 %v5715_v42, %s5253_s20 }
 0x23c   :  { %941 = vrot.lane.b32.xlu1 %v5725_v54, %s5253_s20 }
 0x240   :  { %945 = vrot.lane.b32.xlu1 %v5737_v57, %s5253_s20 }
 0x253   :  { %v457_v59 = vpop.f32.mrb[16].mxu0 }
 0x254   :  { %v5753_v61 = vadd.f32 %v3668_v27, %v457_v59  ;;  %v4107_v24 = vpop.f32.mrb[17].mxu0 }
 0x256   :  { %949 = vrot.lane.b32.xlu1 %v5753_v61, %s5253_s20  ;;  %499 = vrot.lane.b32.xlu0 %v5753_v61, %s5251_s4  ;;  %s5255_s4 = smov 56  }
 0x25a   :  { %4899 = vrot.lane.b32.xlu1 %v5721_v39, %s5254_s21  ;;  %4874 = vrot.lane.b32.xlu0 %v5711_v51, %s5252_s6 }
 0x25e   :  { %4904 = vrot.lane.b32.xlu1 %v5733_v47, %s5254_s21  ;;  %4884 = vrot.lane.b32.xlu0 %v5733_v47, %s5252_s6 }
 0x262   :  { %783 = vrot.lane.b32.xlu1 %v5753_v61, %s5254_s21  ;;  %967 = vrot.lane.b32.xlu0 %v5753_v61, %s5252_s6  ;;  %s5256_s6 = smov 80  }
 0x266   :  { %935 = vrot.lane.b32.xlu0 %v5707_v43, %s5253_s20 }
 0x26a   :  { %939 = vrot.lane.b32.xlu0 %v5717_v38, %s5253_s20 }
 0x26e   :  { %943 = vrot.lane.b32.xlu0 %v5727_v32, %s5253_s20 }
 0x272   :  { %947 = vrot.lane.b32.xlu0 %v5739_v58, %s5253_s20  ;;  %s5257_s20 = smov 112  }
 0x276   :  { %4894 = vrot.lane.b32.xlu0 %v5711_v51, %s5254_s21 }
 0x27a   :  { %4909 = vrot.lane.b32.xlu0 %v5743_v20, %s5254_s21  ;;  %s5258_s21 = smov 48  }
 0x28a   :  { %v4855_v63 = vpop.permute.xlu0 %4854 }
 0x28b   :  { %v4857_v50 = vunpack.i.h.bf16 %v4855_v63  ;;  %v4856_v3 = vunpack.i.l.bf16 %v4855_v63 }
 0x28d   :  { %v4685_v41 = vpack.c.bf16 %v4857_v50, %v4856_v3 }
 0x28f   :  { %4687 = vmatpush3.bf16.xpose.msk.msra.mxu1 %vm5775_vm4, %v4685_v41 }
 0x290   :  { %4688 = vmatprep.subr.bf16.mxu1 %v7323_v40 }
 0x292   :  { %v4860_v62 = vpop.permute.xlu1 %4859 }
 0x293   :  { %v4862_v18 = vunpack.i.h.bf16 %v4860_v62  ;;  %v4861_v13 = vunpack.i.l.bf16 %v4860_v62 }
 0x295   :  { %v4689_v14 = vpack.c.bf16 %v4862_v18, %v4861_v13 }
 0x296   :  { %v4880_v4 = vpop.permute.xlu1 %4879 }
 0x297   :  { %4691 = vmatpush3.bf16.xpose.msk.msra.mxu1 %vm5775_vm4, %v4689_v14  ;;  %v4882_v53 = vunpack.i.h.bf16 %v4880_v4  ;;  %v4881_v5 = vunpack.i.l.bf16 %v4880_v4 }
 0x298   :  { %4692 = vmatprep.subr.bf16.mxu1 %v7323_v40 }
 0x299   :  { %v4717_v63 = vpack.c.bf16 %v4882_v53, %v4881_v5 }
 0x29a   :  { %v4865_v15 = vpop.permute.xlu0 %4864 }
 0x29b   :  { %v4867_v21 = vunpack.i.h.bf16 %v4865_v15  ;;  %v4866_v22 = vunpack.i.l.bf16 %v4865_v15 }
 0x29d   :  { %v4693_v55 = vpack.c.bf16 %v4867_v21, %v4866_v22 }
 0x29f   :  { %4695 = vmatpush3.bf16.xpose.msk.msra.mxu1 %vm5775_vm4, %v4693_v55 }
 0x2a0   :  { %4696 = vmatprep.subr.bf16.mxu1 %v7323_v40 }
 0x2a2   :  { %v4870_v2 = vpop.permute.xlu0 %4869  ;;  %v4890_v34 = vpop.permute.xlu1 %4889 }
 0x2a3   :  { %v4872_v27 = vunpack.i.h.bf16 %v4870_v2  ;;  %v4871_v37 = vunpack.i.l.bf16 %v4870_v2  ;;  %v4892_v21 = vunpack.i.h.bf16 %v4890_v34  ;;  %v4891_v22 = vunpack.i.l.bf16 %v4890_v34 }
 0x2a5   :  { %v4697_v56 = vpack.c.bf16 %v4872_v27, %v4871_v37  ;;  %v4725_v27 = vpack.c.bf16 %v4892_v21, %v4891_v22 }
 0x2a6   :  { %v5792_v6 = vpop.permute.xlu1 %933 }
 0x2a7   :  { %4699 = vmatpush3.bf16.xpose.msk.msra.mxu1 %vm5775_vm4, %v4697_v56 }
 0x2a8   :  { %4124 = vmatprep.subr.mxu1 %v7321_v49 }
 0x2aa   :  { %v5799_v48 = vpop.permute.xlu1 %937 }
 0x2ae   :  { %v5812_v24 = vpop.permute.xlu1 %941 }
 0x2b2   :  { %v5821_v62 = vpop.permute.xlu1 %945 }
 0x2c8   :  { %v500_v28 = vpop.permute.xlu0 %499  ;;  %v5827_v14 = vpop.permute.xlu1 %949 }
 0x2c9   :  { %4125 = vmatpush3.xpose.msk.msra.mxu1 %vm501_vm3, %v500_v28 }
 0x2ca   :  { %4712 = vmatprep.subr.bf16.mxu1 %v7323_v40 }
 0x2cc   :  { %v4875_v8 = vpop.permute.xlu0 %4874  ;;  %4127 = vmatmul.mubr.msk.f32.vlgmr.msra.gmra.mrb[0].mxu1 %vm501_vm3, %v5705_v29  ;;  %v4900_v2 = vpop.permute.xlu1 %4899 }
 0x2cd   :  { %v4877_v44 = vunpack.i.h.bf16 %v4875_v8  ;;  %v4876_v46 = vunpack.i.l.bf16 %v4875_v8  ;;  %4129 = vmatprep.mubr.msk.f32.mxu1 %vm5249_vm2, %v7321_v49  ;;  %v4902_v34 = vunpack.i.h.bf16 %v4900_v2  ;;  %v4901_v28 = vunpack.i.l.bf16 %v4900_v2  ;;  %v5912_v2 = vld [vmem:[%s7313_s2 + $0x10] sm:$0xff] }
 0x2cf   :  { %v4713_v17 = vpack.c.bf16 %v4877_v44, %v4876_v46  ;;  %v4704_v46 = vpack.c.bf16 %v4902_v34, %v4901_v28  ;;  %v5922_v28 = vld [vmem:[%s7313_s2 + $0x18] sm:$0xff] }
 0x2d0   :  { %v4885_v52 = vpop.permute.xlu0 %4884  ;;  %4130 = vmatmul.mubr.msk.f32.gmra.mrb[2].mxu1 %vm501_vm3, %v5707_v43  ;;  %v4905_v44 = vpop.permute.xlu1 %4904 }
 0x2d1   :  { %4715 = vmatpush3.bf16.xpose.msk.msra.mxu1 %vm5775_vm4, %v4713_v17  ;;  %4132 = vmatprep.mubr.msk.f32.mxu1 %vm5249_vm2, %v7321_v49  ;;  %v4887_v3 = vunpack.i.h.bf16 %v4885_v52  ;;  %v4886_v41 = vunpack.i.l.bf16 %v4885_v52  ;;  %v4907_v17 = vunpack.i.h.bf16 %v4905_v44  ;;  %v4906_v52 = vunpack.i.l.bf16 %v4905_v44 }
 0x2d2   :  { %4716 = vmatprep.subr.bf16.mxu1 %v7323_v40 }
 0x2d3   :  { %v4721_v13 = vpack.c.bf16 %v4887_v3, %v4886_v41  ;;  %v4707_v5 = vpack.c.bf16 %v4907_v17, %v4906_v52 }
 0x2d4   :  { %v968_v59 = vpop.permute.xlu0 %967  ;;  %4133 = vmatmul.mubr.msk.f32.gmra.mrb[4].mxu1 %vm501_vm3, %v5715_v42 }
 0x2d5   :  { %4135 = vmatprep.mubr.msk.f32.mxu1 %vm5249_vm2, %v7321_v49 }
 0x2d8   :  { %v936_v50 = vpop.permute.xlu0 %935  ;;  %4136 = vmatmul.mubr.msk.f32.gmra.mrb[6].mxu1 %vm501_vm3, %v5717_v38 }
 0x2d9   :  { %4719 = vmatpush3.bf16.xpose.msk.msra.mxu1 %vm5775_vm4, %v4717_v63  ;;  %4138 = vmatprep.mubr.msk.f32.mxu1 %vm5249_vm2, %v7321_v49 }
 0x2da   :  { %4720 = vmatprep.subr.bf16.mxu1 %v7323_v40 }
 0x2dc   :  { %v940_v18 = vpop.permute.xlu0 %939  ;;  %4139 = vmatmul.mubr.msk.f32.gmra.mrb[8].mxu1 %vm501_vm3, %v5725_v54 }
 0x2dd   :  { %4141 = vmatprep.mubr.msk.f32.mxu1 %vm5249_vm2, %v7321_v49 }
 0x2e0   :  { %v944_v15 = vpop.permute.xlu0 %943  ;;  %4142 = vmatmul.mubr.msk.f32.gmra.mrb[10].mxu1 %vm501_vm3, %v5727_v32 }
 0x2e1   :  { %4723 = vmatpush3.bf16.xpose.msk.msra.mxu1 %vm5775_vm4, %v4721_v13  ;;  %4144 = vmatprep.mubr.msk.f32.mxu1 %vm5249_vm2, %v7321_v49  ;;  %v5902_v13 = vld [vmem:[%s7313_s2 + $0x8] sm:$0xff] }
 0x2e2   :  { %4724 = vmatprep.subr.bf16.mxu1 %v7323_v40 }
 0x2e4   :  { %v948_v55 = vpop.permute.xlu0 %947  ;;  %4145 = vmatmul.mubr.msk.f32.gmra.mrb[12].mxu1 %vm501_vm3, %v5737_v57 }
 0x2e5   :  { %4147 = vmatprep.mubr.msk.f32.mxu1 %vm5249_vm2, %v7321_v49 }
 0x2e8   :  { %v4895_v37 = vpop.permute.xlu0 %4894  ;;  %4148 = vmatmul.mubr.msk.f32.gmra.mrb[14].mxu1 %vm501_vm3, %v5739_v58 }
 0x2e9   :  { %v4897_v56 = vunpack.i.h.bf16 %v4895_v37  ;;  %v4896_v4 = vunpack.i.l.bf16 %v4895_v37  ;;  %4727 = vmatpush3.bf16.xpose.msk.msra.mxu1 %vm5775_vm4, %v4725_v27  ;;  %4150 = vmatprep.mubr.msk.f32.mxu1 %vm5249_vm2, %v7321_v49 }
 0x2ea   :  { %4214 = vmatprep.subr.mxu1 %v7321_v49 }
 0x2eb   :  { %v4701_v8 = vpack.c.bf16 %v4897_v56, %v4896_v4 }
 0x2ec   :  { %4151 = vmatmul.mubr.msk.f32.gmra.mrb[16].mxu1 %vm501_vm3, %v5753_v61  ;;  %v4910_v53 = vpop.permute.xlu0 %4909 }
 0x2ed   :  { %4702 = vmatpush3.bf16.msra.mxu0 %v4701_v8  ;;  %4216 = vmatprep.mubr.msk.f32.mxu1 %vm5249_vm2, %v7321_v49  ;;  %v4912_v63 = vunpack.i.h.bf16 %v4910_v53  ;;  %v4911_v3 = vunpack.i.l.bf16 %v4910_v53  ;;  %v5932_v53 = vld [vmem:[%s7313_s2 + $0x20] sm:$0xff] }
 0x2ee   :  { %4703 = vmatprep.subr.bf16.mxu0 %v7323_v40 }
 0x2ef   :  { %v4710_v41 = vpack.c.bf16 %v4912_v63, %v4911_v3 }
 0x2f1   :  { %4705 = vmatpush3.bf16.msra.mxu0 %v4704_v46  ;;  %4215 = vmatpush3.xpose.msk.msra.mxu1 %vm501_vm3, %v968_v59  ;;  %v784_v59 = vpop.permute.xlu1 %783 }
 0x2f2   :  { %4706 = vmatprep.subr.bf16.mxu0 %v7323_v40  ;;  %4826 = vmatprep.subr.bf16.mxu1 %v7323_v40 }
 0x2f4   :  { %4217 = vmatmul.mubr.msk.f32.vlgmr.msra.gmra.mrb[18].mxu1 %vm501_vm3, %v5792_v6 }
 0x2f5   :  { %4708 = vmatpush3.bf16.msra.mxu0 %v4707_v5  ;;  %4219 = vmatprep.mubr.msk.f32.mxu1 %vm5249_vm2, %v7321_v49 }
 0x2f6   :  { %4709 = vmatprep.subr.bf16.mxu0 %v7323_v40 }
 0x2f8   :  { %4220 = vmatmul.mubr.msk.f32.gmra.mrb[20].mxu1 %vm501_vm3, %v936_v50 }
 0x2f9   :  { %4711 = vmatpush3.bf16.msra.mxu0 %v4710_v41  ;;  %4222 = vmatprep.mubr.msk.f32.mxu1 %vm5249_vm2, %v7321_v49 }
 0x2fa   :  { %4169 = vmatprep.subr.mxu0 %v7321_v49 }
 0x2fc   :  { %4223 = vmatmul.mubr.msk.f32.gmra.mrb[22].mxu1 %vm501_vm3, %v5799_v48  ;;  %v5894_v48 = vld [vmem:[%s7313_s2] sm:$0xff] }
 0x2fd   :  { %4170 = vmatpush3.msk.msra.mxu0 %vm820_vm5, %v784_v59  ;;  %4225 = vmatprep.mubr.msk.f32.mxu1 %vm5249_vm2, %v7321_v49 }
 0x2fe   :  { %4728 = vmatprep.subr.bf16.mxu0 %v7323_v40 }
 0x300   :  { %4226 = vmatmul.mubr.msk.f32.gmra.mrb[24].mxu1 %vm501_vm3, %v940_v18 }
 0x301   :  { %4228 = vmatprep.mubr.msk.f32.mxu1 %vm5249_vm2, %v7321_v49 }
 0x304   :  { %4229 = vmatmul.mubr.msk.f32.gmra.mrb[26].mxu1 %vm501_vm3, %v5812_v24 }
 0x305   :  { %4231 = vmatprep.mubr.msk.f32.mxu1 %vm5249_vm2, %v7321_v49 }
 0x308   :  { %4232 = vmatmul.mubr.msk.f32.gmra.mrb[28].mxu1 %vm501_vm3, %v944_v15 }
 0x309   :  { %4234 = vmatprep.mubr.msk.f32.mxu1 %vm5249_vm2, %v7321_v49 }
 0x30c   :  { %4235 = vmatmul.mubr.msk.f32.gmra.mrb[30].mxu1 %vm501_vm3, %v5821_v62 }
 0x30d   :  { %4237 = vmatprep.mubr.msk.f32.mxu1 %vm5249_vm2, %v7321_v49 }
 0x310   :  { %4238 = vmatmul.mubr.msk.f32.gmra.mrb[32].mxu1 %vm501_vm3, %v948_v55 }
 0x311   :  { %4240 = vmatprep.mubr.msk.f32.mxu1 %vm5249_vm2, %v7321_v49 }
 0x314   :  { %4241 = vmatmul.mubr.msk.f32.gmra.mrb[34].mxu1 %vm501_vm3, %v5827_v14 }
 0x315   :  { %4285 = vmatprep.mubr.msk.f32.mxu1 %vm5249_vm2, %v7321_v49 }
 0x39f   :  { %v604_v6 = vpop.f32.mrb[0].mxu1 }
 0x3a0   :  { %v648_v24 = vmul.f32 0.35355338, %v604_v6  ;;  %v4128_v50 = vpop.f32.mrb[1].mxu1  ;;  %v5942_v6 = vld [vmem:[%s7313_s2 + $0x28] sm:$0xff] }
 0x3a2   :  { %v5897_v62 = vadd.f32 %v648_v24, %v5894_v48 }
 0x3a3   :  { %v609_v18 = vpop.f32.mrb[2].mxu1 }
 0x3a4   :  { %v649_v14 = vmul.f32 0.35355338, %v609_v18  ;;  %v4131_v15 = vpop.f32.mrb[3].mxu1  ;;  %v667_v21 = vsel %vm666_vm6, %v5897_v62, -inf }
 0x3a5   :  { %668 = vmax.xlane.f32.xlu0 %v667_v21  ;;  %v467_v21 = vld [vmem:[%s7313_s2 + $0x30] sm:$0xff] }
 0x3a6   :  { %v5907_v22 = vadd.f32 %v649_v14, %v5902_v13 }
 0x3a7   :  { %v614_v55 = vpop.f32.mrb[4].mxu1 }
 0x3a8   :  { %v650_v27 = vmul.f32 0.35355338, %v614_v55  ;;  %v4134_v37 = vpop.f32.mrb[5].mxu1  ;;  %v670_v56 = vsel %vm666_vm6, %v5907_v22, -inf }
 0x3a9   :  { %671 = vmax.xlane.f32.xlu1 %v670_v56 }
 0x3aa   :  { %v5917_v4 = vadd.f32 %v650_v27, %v5912_v2 }
 0x3ab   :  { %v619_v34 = vpop.f32.mrb[6].mxu1 }
 0x3ac   :  { %v651_v8 = vmul.f32 0.35355338, %v619_v34  ;;  %v4137_v44 = vpop.f32.mrb[7].mxu1  ;;  %v673_v46 = vsel %vm666_vm6, %v5917_v4, -inf }
 0x3ad   :  { %674 = vmax.xlane.f32.xlu0 %v673_v46 }
 0x3ae   :  { %v5927_v17 = vadd.f32 %v651_v8, %v5922_v28  ;;  %v468_v8 = vld [vmem:[%s7313_s2 + $0x38] sm:$0xff] }
 0x3af   :  { %v624_v52 = vpop.f32.mrb[8].mxu1 }
 0x3b0   :  { %v652_v5 = vmul.f32 0.35355338, %v624_v52  ;;  %v4140_v63 = vpop.f32.mrb[9].mxu1  ;;  %v676_v3 = vsel %vm666_vm6, %v5927_v17, -inf }
 0x3b1   :  { %677 = vmax.xlane.f32.xlu0 %v676_v3  ;;  %v469_v3 = vld [vmem:[%s7313_s2 + $0x40] sm:$0xf] }
 0x3b2   :  { %v5937_v41 = vadd.f32 %v652_v5, %v5932_v53 }
 0x3b3   :  { %v629_v59 = vpop.f32.mrb[10].mxu1 }
 0x3b4   :  { %v653_v24 = vmul.f32 0.35355338, %v629_v59  ;;  %v4143_v50 = vpop.f32.mrb[11].mxu1  ;;  %v679_v18 = vsel %vm666_vm6, %v5937_v41, -inf }
 0x3b5   :  { %680 = vmax.xlane.f32.xlu1 %v679_v18 }
 0x3b6   :  { %v5947_v14 = vadd.f32 %v653_v24, %v5942_v6 }
 0x3b7   :  { %v634_v15 = vpop.f32.mrb[12].mxu1 }
 0x3b8   :  { %v654_v55 = vmul.f32 0.35355338, %v634_v15  ;;  %v4146_v27 = vpop.f32.mrb[13].mxu1  ;;  %v682_v37 = vsel %vm666_vm6, %v5947_v14, -inf }
 0x3b9   :  { %683 = vmax.xlane.f32.xlu0 %v682_v37 }
 0x3ba   :  { %v5954_v56 = vadd.f32 %v654_v55, %v467_v21 }
 0x3bb   :  { %v639_v34 = vpop.f32.mrb[14].mxu1 }
 0x3bc   :  { %v655_v44 = vmul.f32 0.35355338, %v639_v34  ;;  %v4149_v46 = vpop.f32.mrb[15].mxu1  ;;  %v685_v52 = vsel %vm666_vm6, %v5954_v56, -inf }
 0x3bd   :  { %686 = vmax.xlane.f32.xlu1 %v685_v52 }
 0x3be   :  { %v5961_v5 = vadd.f32 %v655_v44, %v468_v8 }
 0x3bf   :  { %v644_v63 = vpop.f32.mrb[16].mxu1 }
 0x3c0   :  { %v656_v59 = vmul.f32 0.35355338, %v644_v63  ;;  %v4152_v24 = vpop.f32.mrb[17].mxu1  ;;  %v688_v50 = vsel %vm666_vm6, %v5961_v5, -inf }
 0x3c1   :  { %689 = vmax.xlane.f32.xlu0 %v688_v50 }
 0x3c2   :  { %v5968_v18 = vadd.f32 %v656_v59, %v469_v3 }
 0x3c4   :  { %v692_v15 = vsel %vm691_vm7, %v5968_v18, -inf }
 0x3c5   :  { %693 = vmax.xlane.f32.xlu1 %v692_v15 }
 0x3c7   :  { %v1071_v55 = vpop.f32.mrb[18].mxu1 }
 0x3c8   :  { %v1115_v27 = vmul.f32 0.35355338, %v1071_v55  ;;  %v4218_v37 = vpop.f32.mrb[19].mxu1 }
 0x3ca   :  { %v5973_v34 = vadd.f32 %v1115_v27, %v5894_v48 }
 0x3cb   :  { %v1076_v44 = vpop.f32.mrb[20].mxu1 }
 0x3cc   :  { %v1116_v46 = vmul.f32 0.35355338, %v1076_v44  ;;  %v4221_v52 = vpop.f32.mrb[21].mxu1  ;;  %v1133_v63 = vsel %vm666_vm6, %v5973_v34, -inf }
 0x3cd   :  { %1134 = vmax.xlane.f32.xlu0 %v1133_v63 }
 0x3ce   :  { %v5978_v59 = vadd.f32 %v1116_v46, %v5902_v13 }
 0x3cf   :  { %v1081_v24 = vpop.f32.mrb[22].mxu1 }
 0x3d0   :  { %v1117_v50 = vmul.f32 0.35355338, %v1081_v24  ;;  %v4224_v49 = vpop.f32.mrb[23].mxu1  ;;  %v1136_v15 = vsel %vm666_vm6, %v5978_v59, -inf }
 0x3d1   :  { %1137 = vmax.xlane.f32.xlu1 %v1136_v15 }
 0x3d2   :  { %v5983_v48 = vadd.f32 %v1117_v50, %v5912_v2 }
 0x3d3   :  { %v1086_v55 = vpop.f32.mrb[24].mxu1 }
 0x3d4   :  { %v1118_v27 = vmul.f32 0.35355338, %v1086_v55  ;;  %v4227_v37 = vpop.f32.mrb[25].mxu1  ;;  %v1139_v44 = vsel %vm666_vm6, %v5983_v48, -inf }
 0x3d5   :  { %1140 = vmax.xlane.f32.xlu0 %v1139_v44 }
 0x3d6   :  { %v5988_v13 = vadd.f32 %v1118_v27, %v5922_v28 }
 0x3d7   :  { %v1091_v46 = vpop.f32.mrb[26].mxu1 }
 0x3d8   :  { %v1119_v52 = vmul.f32 0.35355338, %v1091_v46  ;;  %v4230_v49 = vpop.f32.mrb[27].mxu1  ;;  %v1142_v63 = vsel %vm666_vm6, %v5988_v13, -inf }
 0x3d9   :  { %1143 = vmax.xlane.f32.xlu1 %v1142_v63 }
 0x3da   :  { %v5993_v2 = vadd.f32 %v1119_v52, %v5932_v53 }
 0x3db   :  { %v1096_v24 = vpop.f32.mrb[28].mxu1 }
 0x3dc   :  { %v1120_v50 = vmul.f32 0.35355338, %v1096_v24  ;;  %v4233_v15 = vpop.f32.mrb[29].mxu1  ;;  %v1145_v55 = vsel %vm666_vm6, %v5993_v2, -inf }
 0x3dd   :  { %1146 = vmax.xlane.f32.xlu0 %v1145_v55 }
 0x3de   :  { %v5998_v28 = vadd.f32 %v1120_v50, %v5942_v6 }
 0x3df   :  { %v1101_v27 = vpop.f32.mrb[30].mxu1 }
 0x3e0   :  { %v1121_v37 = vmul.f32 0.35355338, %v1101_v27  ;;  %v4236_v44 = vpop.f32.mrb[31].mxu1  ;;  %v1148_v46 = vsel %vm666_vm6, %v5998_v28, -inf }
 0x3e1   :  { %1149 = vmax.xlane.f32.xlu1 %v1148_v46 }
 0x3e2   :  { %v6002_v49 = vadd.f32 %v1121_v37, %v467_v21 }
 0x3e3   :  { %v1106_v53 = vpop.f32.mrb[32].mxu1 }
 0x3e4   :  { %v1122_v52 = vmul.f32 0.35355338, %v1106_v53  ;;  %v4239_v63 = vpop.f32.mrb[33].mxu1  ;;  %v1151_v24 = vsel %vm666_vm6, %v6002_v49, -inf }
 0x3e5   :  { %1152 = vmax.xlane.f32.xlu0 %v1151_v24 }
 0x3e6   :  { %v6006_v15 = vadd.f32 %v1122_v52, %v468_v8 }
 0x3e7   :  { %v1111_v6 = vpop.f32.mrb[34].mxu1 }
 0x3e8   :  { %v1123_v50 = vmul.f32 0.35355338, %v1111_v6  ;;  %v4242_v55 = vpop.f32.mrb[35].mxu1  ;;  %v1154_v27 = vsel %vm666_vm6, %v6006_v15, -inf }
 0x3e9   :  { %1155 = vmax.xlane.f32.xlu1 %v1154_v27 }
 0x3ea   :  { %v6010_v44 = vadd.f32 %v1123_v50, %v469_v3 }
 0x3ec   :  { %v1157_v21 = vsel %vm691_vm7, %v6010_v44, -inf }
 0x3ed   :  { %1158 = vmax.xlane.f32.xlu0 %v1157_v21 }
 0x3fa   :  { %4919 = vrot.lane.b32.xlu1 %v5721_v39, %s5255_s4 }
 0x3fe   :  { %4924 = vrot.lane.b32.xlu1 %v5733_v47, %s5255_s4 }
 0x403   :  { %4914 = vrot.lane.b32.xlu0 %v5711_v51, %s5255_s4 }
 0x432   :  { %v669_v8 = vpop.xlane.xlu0 %668 }
 0x433   :  { %v695_v37 = vsub.f32 %v5897_v62, %v669_v8 }
 0x435   :  { %v704_v46 = vmul.f32 1.442695, %v695_v37 }
 0x436   :  { %v672_v3 = vpop.xlane.xlu1 %671 }
 0x437   :  { %5031 = vpow2.f32 %v704_v46  ;;  %v696_v53 = vsub.f32 %v5907_v22, %v672_v3 }
 0x439   :  { %v706_v52 = vmul.f32 1.442695, %v696_v53 }
 0x43a   :  { %v675_v63 = vpop.xlane.xlu0 %674 }
 0x43b   :  { %5033 = vpow2.f32 %v706_v52  ;;  %v697_v24 = vsub.f32 %v5917_v4, %v675_v63 }
 0x43d   :  { %v708_v6 = vmul.f32 1.442695, %v697_v24 }
 0x43e   :  { %v678_v50 = vpop.xlane.xlu0 %677 }
 0x43f   :  { %5035 = vpow2.f32 %v708_v6  ;;  %v698_v55 = vsub.f32 %v5927_v17, %v678_v50 }
 0x441   :  { %v6024_v27 = vpop.eup %5031  ;;  %v710_v21 = vmul.f32 1.442695, %v698_v55 }
 0x442   :  { %v681_v40 = vpop.xlane.xlu1 %680  ;;  %v722_v62 = vsel %vm666_vm6, %v6024_v27, 0.0 }
 0x443   :  { %5037 = vpow2.f32 %v710_v21  ;;  %v699_v22 = vsub.f32 %v5937_v41, %v681_v40  ;;  %723 = vadd.xlane.f32.xlu1 %v722_v62 }
 0x445   :  { %v6029_v8 = vpop.eup %5033  ;;  %v712_v37 = vmul.f32 1.442695, %v699_v22 }
 0x446   :  { %v684_v4 = vpop.xlane.xlu0 %683  ;;  %v725_v46 = vsel %vm666_vm6, %v6029_v8, 0.0 }
 0x447   :  { %5039 = vpow2.f32 %v712_v37  ;;  %v700_v17 = vsub.f32 %v5947_v14, %v684_v4  ;;  %726 = vadd.xlane.f32.xlu0 %v725_v46 }
 0x449   :  { %v6034_v3 = vpop.eup %5035  ;;  %v714_v53 = vmul.f32 1.442695, %v700_v17 }
 0x44a   :  { %v687_v52 = vpop.xlane.xlu1 %686  ;;  %v728_v63 = vsel %vm666_vm6, %v6034_v3, 0.0 }
 0x44b   :  { %5041 = vpow2.f32 %v714_v53  ;;  %v701_v40 = vsub.f32 %v5954_v56, %v687_v52  ;;  %729 = vadd.xlane.f32.xlu1 %v728_v63 }
 0x44d   :  { %v6039_v41 = vpop.eup %5037  ;;  %v716_v24 = vmul.f32 1.442695, %v701_v40 }
 0x44e   :  { %v690_v6 = vpop.xlane.xlu0 %689  ;;  %v731_v50 = vsel %vm666_vm6, %v6039_v41, 0.0 }
 0x44f   :  { %5043 = vpow2.f32 %v716_v24  ;;  %v702_v14 = vsub.f32 %v5961_v5, %v690_v6  ;;  %732 = vadd.xlane.f32.xlu1 %v731_v50 }
 0x451   :  { %v6044_v55 = vpop.eup %5039  ;;  %v718_v21 = vmul.f32 1.442695, %v702_v14 }
 0x452   :  { %v694_v62 = vpop.xlane.xlu1 %693  ;;  %v734_v22 = vsel %vm666_vm6, %v6044_v55, 0.0 }
 0x453   :  { %5045 = vpow2.f32 %v718_v21  ;;  %v703_v56 = vsub.f32 %v5968_v18, %v694_v62  ;;  %735 = vadd.xlane.f32.xlu0 %v734_v22 }
 0x455   :  { %v6049_v37 = vpop.eup %5041  ;;  %v720_v4 = vmul.f32 1.442695, %v703_v56 }
 0x456   :  { %v737_v46 = vsel %vm666_vm6, %v6049_v37, 0.0 }
 0x457   :  { %5047 = vpow2.f32 %v720_v4  ;;  %738 = vadd.xlane.f32.xlu1 %v737_v46 }
 0x459   :  { %v6053_v5 = vpop.eup %5043 }
 0x45a   :  { %v1135_v17 = vpop.xlane.xlu0 %1134  ;;  %v740_v53 = vsel %vm666_vm6, %v6053_v5, 0.0 }
 0x45b   :  { %v1160_v52 = vsub.f32 %v5973_v34, %v1135_v17  ;;  %741 = vadd.xlane.f32.xlu1 %v740_v53 }
 0x45d   :  { %v6058_v63 = vpop.eup %5045  ;;  %v1169_v18 = vmul.f32 1.442695, %v1160_v52 }
 0x45e   :  { %v1138_v40 = vpop.xlane.xlu1 %1137  ;;  %v743_v24 = vsel %vm666_vm6, %v6058_v63, 0.0 }
 0x45f   :  { %5049 = vpow2.f32 %v1169_v18  ;;  %v1161_v6 = vsub.f32 %v5978_v59, %v1138_v40  ;;  %744 = vadd.xlane.f32.xlu0 %v743_v24 }
 0x461   :  { %v6063_v50 = vpop.eup %5047  ;;  %v1171_v14 = vmul.f32 1.442695, %v1161_v6 }
 0x462   :  { %v1141_v21 = vpop.xlane.xlu0 %1140  ;;  %v746_v62 = vsel %vm691_vm7, %v6063_v50, 0.0 }
 0x463   :  { %5051 = vpow2.f32 %v1171_v14  ;;  %v1162_v34 = vsub.f32 %v5983_v48, %v1141_v21  ;;  %747 = vadd.xlane.f32.xlu1 %v746_v62 }
 0x465   :  { %v1173_v22 = vmul.f32 1.442695, %v1162_v34 }
 0x466   :  { %v1144_v56 = vpop.xlane.xlu1 %1143 }
 0x467   :  { %5053 = vpow2.f32 %v1173_v22  ;;  %v1163_v4 = vsub.f32 %v5988_v13, %v1144_v56 }
 0x469   :  { %v6069_v46 = vpop.eup %5049  ;;  %v1175_v59 = vmul.f32 1.442695, %v1163_v4 }
 0x46a   :  { %v1147_v17 = vpop.xlane.xlu0 %1146  ;;  %v1187_v53 = vsel %vm666_vm6, %v6069_v46, 0.0 }
 0x46b   :  { %5055 = vpow2.f32 %v1175_v59  ;;  %v1164_v52 = vsub.f32 %v5993_v2, %v1147_v17  ;;  %1188 = vadd.xlane.f32.xlu0 %v1187_v53 }
 0x46d   :  { %v6074_v18 = vpop.eup %5051  ;;  %v1177_v48 = vmul.f32 1.442695, %v1164_v52 }
 0x46e   :  { %v1150_v40 = vpop.xlane.xlu1 %1149  ;;  %v1190_v24 = vsel %vm666_vm6, %v6074_v18, 0.0 }
 0x46f   :  { %5057 = vpow2.f32 %v1177_v48  ;;  %v1165_v13 = vsub.f32 %v5998_v28, %v1150_v40  ;;  %1191 = vadd.xlane.f32.xlu0 %v1190_v24 }
 0x471   :  { %v6079_v6 = vpop.eup %5053  ;;  %v1179_v14 = vmul.f32 1.442695, %v1165_v13 }
 0x472   :  { %v1153_v21 = vpop.xlane.xlu0 %1152  ;;  %v1193_v62 = vsel %vm666_vm6, %v6079_v6, 0.0 }
 0x473   :  { %5059 = vpow2.f32 %v1179_v14  ;;  %v1166_v2 = vsub.f32 %v6002_v49, %v1153_v21  ;;  %1194 = vadd.xlane.f32.xlu0 %v1193_v62 }
 0x475   :  { %v6084_v34 = vpop.eup %5055  ;;  %v1181_v22 = vmul.f32 1.442695, %v1166_v2 }
 0x476   :  { %v1196_v56 = vsel %vm666_vm6, %v6084_v34, 0.0  ;;  %v1156_v28 = vpop.xlane.xlu1 %1155 }
 0x477   :  { %5061 = vpow2.f32 %v1181_v22  ;;  %1197 = vadd.xlane.f32.xlu1 %v1196_v56  ;;  %v7339_v56 = vmov 0.0|0.0  }
 0x479   :  { %v6088_v4 = vpop.eup %5057 }
 0x47a   :  { %v1159_v59 = vpop.xlane.xlu0 %1158  ;;  %v1199_v17 = vsel %vm666_vm6, %v6088_v4, 0.0  ;;  %v4920_v49 = vpop.permute.xlu1 %4919 }
 0x47b   :  { %1200 = vadd.xlane.f32.xlu0 %v1199_v17  ;;  %v4922_v14 = vunpack.i.h.bf16 %v4920_v49  ;;  %v4921_v21 = vunpack.i.l.bf16 %v4920_v49  ;;  %v1167_v49 = vsub.f32 %v6006_v15, %v1156_v28 }
 0x47d   :  { %v6092_v53 = vpop.eup %5059  ;;  %v4732_v17 = vpack.c.bf16 %v4922_v14, %v4921_v21 }
 0x47e   :  { %v4915_v52 = vpop.permute.xlu0 %4914  ;;  %v1202_v48 = vsel %vm666_vm6, %v6092_v53, 0.0  ;;  %v4925_v22 = vpop.permute.xlu1 %4924 }
 0x47f   :  { %v4917_v40 = vunpack.i.h.bf16 %v4915_v52  ;;  %1203 = vadd.xlane.f32.xlu1 %v1202_v48  ;;  %v4916_v24 = vunpack.i.l.bf16 %v4915_v52  ;;  %v4927_v1 = vunpack.i.h.bf16 %v4925_v22  ;;  %v4926_v33 = vunpack.i.l.bf16 %v4925_v22 }
 0x480   :  { %v1183_v48 = vmul.f32 1.442695, %v1167_v49 }
 0x481   :  { %v6096_v13 = vpop.eup %5061  ;;  %v4729_v62 = vpack.c.bf16 %v4917_v40, %v4916_v24  ;;  %v6102_v52 = vpack.c.bf16 %v4927_v1, %v4926_v33  ;;  %v1168_v40 = vsub.f32 %v6010_v44, %v1159_v59 }
 0x482   :  { %v1205_v2 = vsel %vm666_vm6, %v6096_v13, 0.0  ;;  %5063 = vpow2.f32 %v1183_v48  ;;  %v7340_v48 = vmov 0.0  }
 0x483   :  { %1206 = vadd.xlane.f32.xlu1 %v1205_v2  ;;  %4831 = vmatpush3.bf16.msra.mxu1 %v4729_v62  ;;  %v1185_v24 = vmul.f32 1.442695, %v1168_v40 }
 0x484   :  { %4827 = vmatprep.subr.bf16.mxu1 %v7339_v56 }
 0x485   :  { %5065 = vpow2.f32 %v1185_v24 }
 0x487   :  { %4832 = vmatpush3.bf16.msra.mxu1 %v4732_v17 }
 0x488   :  { %4828 = vmatprep.subr.bf16.mxu1 %v7339_v56 }
 0x48b   :  { %4833 = vmatpush3.bf16.msra.mxu1 %v6102_v52 }
 0x48c   :  { %4829 = vmatprep.subr.bf16.mxu1 %v7339_v56  ;;  %v6112_v33 = vpop.eup %5063 }
 0x48d   :  { %v1208_v1 = vsel %vm666_vm6, %v6112_v33, 0.0 }
 0x48f   :  { %v6116_v14 = vpop.eup %5065 }
 0x490   :  { %v1211_v21 = vsel %vm691_vm7, %v6116_v14, 0.0 }
 0x491   :  { %4929 = vrot.lane.b32.xlu0 %v5743_v20, %s5255_s4 }
 0x494   :  { %1248 = vrot.lane.b32.xlu1 %v5753_v61, %s5255_s4 }
 0x4b0   :  { %1209 = vadd.xlane.f32.xlu0 %v1208_v1 }
 0x4b8   :  { %1212 = vadd.xlane.f32.xlu1 %v1211_v21 }
 0x4c6   :  { %4934 = vrot.lane.b32.xlu0 %v5711_v51, %s5256_s6 }
 0x4c9   :  { %4939 = vrot.lane.b32.xlu1 %v5721_v39, %s5256_s6 }
 0x4ca   :  { %4944 = vrot.lane.b32.xlu0 %v5733_v47, %s5256_s6 }
 0x4cd   :  { %1671 = vrot.lane.b32.xlu1 %v5705_v29, %s5257_s20 }
 0x4ce   :  { %4949 = vrot.lane.b32.xlu0 %v5743_v20, %s5256_s6 }
 0x4d0   :  { %v724_v15 = vpop.xlane.xlu1 %723 }
 0x4d1   :  { %5067 = vrcp.f32 %v724_v15  ;;  %1675 = vrot.lane.b32.xlu1 %v5715_v42, %s5257_s20 }
 0x4d2   :  { %1705 = vrot.lane.b32.xlu0 %v5753_v61, %s5256_s6 }
 0x4d4   :  { %v727_v44 = vpop.xlane.xlu0 %726 }
 0x4d5   :  { %5069 = vrcp.f32 %v727_v44  ;;  %1679 = vrot.lane.b32.xlu1 %v5725_v54, %s5257_s20 }
 0x4d6   :  { %1673 = vrot.lane.b32.xlu0 %v5707_v43, %s5257_s20 }
 0x4d8   :  { %v730_v28 = vpop.xlane.xlu1 %729 }
 0x4d9   :  { %5071 = vrcp.f32 %v730_v28  ;;  %1683 = vrot.lane.b32.xlu1 %v5737_v57, %s5257_s20 }
 0x4da   :  { %1677 = vrot.lane.b32.xlu0 %v5717_v38, %s5257_s20 }
 0x4db   :  { %v5068_v59 = vpop.eup %5067 }
 0x4dc   :  { %v758_v2 = vmul.f32 %v5068_v59, %v6024_v27  ;;  %v733_v22 = vpop.xlane.xlu1 %732 }
 0x4dd   :  { %5073 = vrcp.f32 %v733_v22  ;;  %1687 = vrot.lane.b32.xlu1 %v5753_v61, %s5257_s20 }
 0x4de   :  { %4172 = vmatmul.mubr.msk.f32.vlgmr.msra.gmra.mrb[18].mxu0 %vm666_vm6, %v758_v2  ;;  %1681 = vrot.lane.b32.xlu0 %v5727_v32, %s5257_s20 }
 0x4df   :  { %v5070_v49 = vpop.eup %5069  ;;  %4730 = vmatpush3.bf16.msra.mxu0 %v4729_v62  ;;  %4174 = vmatprep.mubr.msk.f32.mxu0 %vm5249_vm2, %v7340_v48 }
 0x4e0   :  { %v736_v40 = vpop.xlane.xlu0 %735  ;;  %4731 = vmatprep.subr.bf16.mxu0 %v7339_v56  ;;  %v759_v27 = vmul.f32 %v5070_v49, %v6029_v8 }
 0x4e1   :  { %5075 = vrcp.f32 %v736_v40  ;;  %4954 = vrot.lane.b32.xlu1 %v5711_v51, %s5258_s21 }
 0x4e2   :  { %1685 = vrot.lane.b32.xlu0 %v5739_v58, %s5257_s20  ;;  %4175 = vmatmul.mubr.msk.f32.gmra.mrb[20].mxu0 %vm666_vm6, %v759_v27  ;;  %s5259_s20 = smov 72  }
 0x4e3   :  { %v5072_v24 = vpop.eup %5071  ;;  %4733 = vmatpush3.bf16.msra.mxu0 %v4732_v17  ;;  %4177 = vmatprep.mubr.msk.f32.mxu0 %vm5249_vm2, %v7340_v48 }
 0x4e4   :  { %v739_v62 = vpop.xlane.xlu1 %738  ;;  %4734 = vmatprep.subr.bf16.mxu0 %v7339_v56  ;;  %v760_v8 = vmul.f32 %v5072_v24, %v6034_v3 }
 0x4e5   :  { %5077 = vrcp.f32 %v739_v62  ;;  %4969 = vrot.lane.b32.xlu1 %v5743_v20, %s5258_s21 }
 0x4e6   :  { %4959 = vrot.lane.b32.xlu0 %v5721_v39, %s5258_s21  ;;  %4178 = vmatmul.mubr.msk.f32.gmra.mrb[22].mxu0 %vm666_vm6, %v760_v8 }
 0x4e7   :  { %v5074_v1 = vpop.eup %5073  ;;  %4736 = vmatpush3.bf16.msra.mxu0 %v6102_v52  ;;  %4180 = vmatprep.mubr.msk.f32.mxu0 %vm5249_vm2, %v7340_v48 }
 0x4e8   :  { %v742_v17 = vpop.xlane.xlu1 %741  ;;  %v761_v21 = vmul.f32 %v5074_v1, %v6039_v41  ;;  %4737 = vmatprep.subr.bf16.mxu0 %v7339_v56 }
 0x4e9   :  { %5079 = vrcp.f32 %v742_v17 }
 0x4ea   :  { %4964 = vrot.lane.b32.xlu0 %v5733_v47, %s5258_s21  ;;  %4181 = vmatmul.mubr.msk.f32.gmra.mrb[24].mxu0 %vm666_vm6, %v761_v21 }
 0x4eb   :  { %v5076_v3 = vpop.eup %5075  ;;  %4183 = vmatprep.mubr.msk.f32.mxu0 %vm5249_vm2, %v7340_v48 }
 0x4ec   :  { %v745_v15 = vpop.xlane.xlu0 %744  ;;  %v762_v52 = vmul.f32 %v5076_v3, %v6044_v55 }
 0x4ed   :  { %5081 = vrcp.f32 %v745_v15 }
 0x4ee   :  { %4184 = vmatmul.mubr.msk.f32.gmra.mrb[26].mxu0 %vm666_vm6, %v762_v52 }
 0x4ef   :  { %v5078_v44 = vpop.eup %5077  ;;  %4186 = vmatprep.mubr.msk.f32.mxu0 %vm5249_vm2, %v7340_v48 }
 0x4f0   :  { %v748_v41 = vpop.xlane.xlu1 %747  ;;  %v763_v28 = vmul.f32 %v5078_v44, %v6049_v37  ;;  %v470_v44 = vld [vmem:[%s7314_s7] sm:$0xff] }
 0x4f1   :  { %5083 = vrcp.f32 %v748_v41 }
 0x4f2   :  { %4187 = vmatmul.mubr.msk.f32.gmra.mrb[28].mxu0 %vm666_vm6, %v763_v28 }
 0x4f3   :  { %v5080_v59 = vpop.eup %5079  ;;  %4189 = vmatprep.mubr.msk.f32.mxu0 %vm5249_vm2, %v7340_v48 }
 0x4f4   :  { %v764_v2 = vmul.f32 %v5080_v59, %v6053_v5 }
 0x4f6   :  { %4190 = vmatmul.mubr.msk.f32.gmra.mrb[30].mxu0 %vm666_vm6, %v764_v2 }
 0x4f7   :  { %v5082_v55 = vpop.eup %5081  ;;  %4192 = vmatprep.mubr.msk.f32.mxu0 %vm5249_vm2, %v7340_v48 }
 0x4f8   :  { %v1189_v22 = vpop.xlane.xlu0 %1188  ;;  %v765_v49 = vmul.f32 %v5082_v55, %v6058_v63 }
 0x4f9   :  { %5085 = vrcp.f32 %v1189_v22 }
 0x4fa   :  { %4193 = vmatmul.mubr.msk.f32.gmra.mrb[32].mxu0 %vm666_vm6, %v765_v49 }
 0x4fb   :  { %v5084_v37 = vpop.eup %5083  ;;  %4195 = vmatprep.mubr.msk.f32.mxu0 %vm5249_vm2, %v7340_v48 }
 0x4fc   :  { %v766_v40 = vmul.f32 %v5084_v37, %v6063_v50  ;;  %v1192_v27 = vpop.xlane.xlu0 %1191 }
 0x4fd   :  { %5087 = vrcp.f32 %v1192_v27 }
 0x4fe   :  { %4196 = vmatmul.mubr.msk.f32.gmra.mrb[34].mxu0 %vm666_vm6, %v766_v40 }
 0x4ff   :  { %4261 = vmatprep.mubr.msk.f32.mxu0 %vm5249_vm2, %v7340_v48 }
 0x500   :  { %v1195_v5 = vpop.xlane.xlu0 %1194 }
 0x501   :  { %5089 = vrcp.f32 %v1195_v5 }
 0x503   :  { %v5086_v15 = vpop.eup %5085 }
 0x504   :  { %v1198_v24 = vpop.xlane.xlu1 %1197  ;;  %v1223_v50 = vmul.f32 %v5086_v15, %v6069_v46 }
 0x505   :  { %5091 = vrcp.f32 %v1198_v24  ;;  %v471_v24 = vld [vmem:[%s7314_s7 + $0x8] sm:$0xff] }
 0x507   :  { %v5088_v41 = vpop.eup %5087 }
 0x508   :  { %v1201_v62 = vpop.xlane.xlu0 %1200  ;;  %v1224_v46 = vmul.f32 %v5088_v41, %v6074_v18 }
 0x509   :  { %5093 = vrcp.f32 %v1201_v62 }
 0x50b   :  { %v5090_v28 = vpop.eup %5089 }
 0x50c   :  { %v1204_v63 = vpop.xlane.xlu1 %1203  ;;  %v4930_v8 = vpop.permute.xlu0 %4929  ;;  %v1225_v59 = vmul.f32 %v5090_v28, %v6079_v6 }
 0x50d   :  { %v4932_v1 = vunpack.i.h.bf16 %v4930_v8  ;;  %v4931_v17 = vunpack.i.l.bf16 %v4930_v8  ;;  %5095 = vrcp.f32 %v1204_v63 }
 0x50f   :  { %v4738_v21 = vpack.c.bf16 %v4932_v1, %v4931_v17  ;;  %v5092_v2 = vpop.eup %5091 }
 0x510   :  { %v1207_v3 = vpop.xlane.xlu1 %1206  ;;  %v1226_v18 = vmul.f32 %v5092_v2, %v6084_v34 }
 0x511   :  { %4739 = vmatpush3.bf16.msra.mxu0 %v4738_v21  ;;  %4834 = vmatpush3.bf16.msra.mxu1 %v4738_v21  ;;  %5097 = vrcp.f32 %v1207_v3 }
 0x512   :  { %4259 = vmatprep.subr.mxu0 %v7340_v48  ;;  %4830 = vmatprep.subr.mxu1 %v7340_v48 }
 0x513   :  { %v5094_v55 = vpop.eup %5093 }
 0x514   :  { %v1249_v52 = vpop.permute.xlu1 %1248  ;;  %v1227_v22 = vmul.f32 %v5094_v55, %v6088_v4 }
 0x515   :  { %4260 = vmatpush3.msk.msra.mxu0 %vm820_vm5, %v1249_v52  ;;  %4835 = vmatpush3.msk.msra.mxu1 %vm820_vm5, %v1249_v52 }
 0x516   :  { %4262 = vmatmul.mubr.msk.f32.vlgmr.msra.gmra.mrb[36].mxu0 %vm666_vm6, %v1223_v50  ;;  %4317 = vmatprep.subr.mxu0 %v7340_v48 }
 0x517   :  { %4264 = vmatprep.mubr.msk.f32.mxu0 %vm5249_vm2, %v7340_v48  ;;  %4318 = vmatpush3.msra.mxu0 %v470_v44  ;;  %v5096_v49 = vpop.eup %5095 }
 0x518   :  { %4756 = vmatprep.subr.bf16.mxu0 %v7339_v56  ;;  %4288 = vmatprep.subr.mxu1 %v7340_v48  ;;  %v1228_v6 = vmul.f32 %v5096_v49, %v6092_v53 }
 0x51a   :  { %4265 = vmatmul.mubr.msk.f32.gmra.mrb[38].mxu0 %vm666_vm6, %v1224_v46 }
 0x51b   :  { %4267 = vmatprep.mubr.msk.f32.mxu0 %vm5249_vm2, %v7340_v48  ;;  %v5098_v37 = vpop.eup %5097 }
 0x51c   :  { %v1229_v34 = vmul.f32 %v5098_v37, %v6096_v13 }
 0x51e   :  { %4268 = vmatmul.mubr.msk.f32.gmra.mrb[40].mxu0 %vm666_vm6, %v1225_v59 }
 0x51f   :  { %4270 = vmatprep.mubr.msk.f32.mxu0 %vm5249_vm2, %v7340_v48 }
 0x522   :  { %4271 = vmatmul.mubr.msk.f32.gmra.mrb[42].mxu0 %vm666_vm6, %v1226_v18 }
 0x523   :  { %4273 = vmatprep.mubr.msk.f32.mxu0 %vm5249_vm2, %v7340_v48 }
 0x526   :  { %4274 = vmatmul.mubr.msk.f32.gmra.mrb[44].mxu0 %vm666_vm6, %v1227_v22 }
 0x527   :  { %4276 = vmatprep.mubr.msk.f32.mxu0 %vm5249_vm2, %v7340_v48 }
 0x52a   :  { %4277 = vmatmul.mubr.msk.f32.gmra.mrb[46].mxu0 %vm666_vm6, %v1228_v6 }
 0x52b   :  { %4279 = vmatprep.mubr.msk.f32.mxu0 %vm5249_vm2, %v7340_v48 }
 0x52e   :  { %4280 = vmatmul.mubr.msk.f32.gmra.mrb[48].mxu0 %vm666_vm6, %v1229_v34 }
 0x52f   :  { %4282 = vmatprep.mubr.msk.f32.mxu0 %vm5249_vm2, %v7340_v48 }
 0x53d   :  { %v1210_v4 = vpop.xlane.xlu0 %1209 }
 0x53e   :  { %5099 = vrcp.f32 %v1210_v4 }
 0x545   :  { %v1213_v40 = vpop.xlane.xlu1 %1212 }
 0x546   :  { %5101 = vrcp.f32 %v1213_v40 }
 0x548   :  { %v5100_v27 = vpop.eup %5099 }
 0x549   :  { %v1230_v53 = vmul.f32 %v5100_v27, %v6112_v33  ;;  %v6241_v33 = vpop.permute.xlu0 %4934  ;;  %v6245_v63 = vpop.permute.xlu1 %4939 }
 0x54b   :  { %4283 = vmatmul.mubr.msk.f32.gmra.mrb[50].mxu0 %vm666_vm6, %v1230_v53 }
 0x54c   :  { %4319 = vmatprep.mubr.msk.f32.mxu0 %vm5249_vm2, %v7340_v48 }
 0x54d   :  { %v6243_v62 = vpop.permute.xlu0 %4944 }
 0x550   :  { %v5102_v5 = vpop.eup %5101 }
 0x551   :  { %v1231_v13 = vmul.f32 %v5102_v5, %v6116_v14  ;;  %v6247_v8 = vpop.permute.xlu0 %4949  ;;  %v6249_v14 = vpop.permute.xlu1 %1671 }
 0x553   :  { %4286 = vmatmul.mubr.msk.f32.vlgmr.msra.gmra.mrb[36].mxu1 %vm666_vm6, %v1231_v13 }
 0x554   :  { %4289 = vmatpush3.msra.mxu1 %v471_v24  ;;  %4290 = vmatprep.mubr.msk.f32.mxu1 %vm5249_vm2, %v7340_v48 }
 0x555   :  { %4740 = vmatprep.subr.bf16.mxu1 %v7339_v56  ;;  %v6251_v1 = vpop.permute.xlu0 %1705  ;;  %v6253_v17 = vpop.permute.xlu1 %1675 }
 0x559   :  { %v6255_v21 = vpop.permute.xlu0 %1673  ;;  %v6257_v3 = vpop.permute.xlu1 %1679 }
 0x55d   :  { %v6259_v15 = vpop.permute.xlu0 %1677  ;;  %v6261_v50 = vpop.permute.xlu1 %1683 }
 0x561   :  { %v6263_v52 = vpop.permute.xlu0 %1681  ;;  %v6265_v44 = vpop.permute.xlu1 %1687 }
 0x565   :  { %v6267_v41 = vpop.permute.xlu0 %1685  ;;  %v4955_v46 = vpop.permute.xlu1 %4954 }
 0x566   :  { %v4957_v59 = vunpack.i.h.bf16 %v4955_v46  ;;  %v4956_v2 = vunpack.i.l.bf16 %v4955_v46 }
 0x568   :  { %v4757_v18 = vpack.c.bf16 %v4957_v59, %v4956_v2 }
 0x569   :  { %v4960_v28 = vpop.permute.xlu0 %4959  ;;  %v4970_v53 = vpop.permute.xlu1 %4969 }
 0x56a   :  { %v4962_v55 = vunpack.i.h.bf16 %v4960_v28  ;;  %v4961_v22 = vunpack.i.l.bf16 %v4960_v28  ;;  %v4972_v13 = vunpack.i.h.bf16 %v4970_v53  ;;  %v4971_v24 = vunpack.i.l.bf16 %v4970_v53 }
 0x56c   :  { %v4760_v34 = vpack.c.bf16 %v4962_v55, %v4961_v22  ;;  %v4766_v2 = vpack.c.bf16 %v4972_v13, %v4971_v24  ;;  %v4937_v13 = vunpack.i.h.bf16 %v6241_v33  ;;  %v4936_v24 = vunpack.i.l.bf16 %v6241_v33 }
 0x56d   :  { %v4965_v6 = vpop.permute.xlu0 %4964 }
 0x56e   :  { %v4967_v4 = vunpack.i.h.bf16 %v4965_v6  ;;  %v4966_v40 = vunpack.i.l.bf16 %v4965_v6 }
 0x570   :  { %v4763_v46 = vpack.c.bf16 %v4967_v4, %v4966_v40 }
 0x5b1   :  { %v889_v49 = vpop.f32.mrb[18].mxu0 }
 0x5b2   :  { %v4173_v37 = vpop.f32.mrb[19].mxu0  ;;  %4320 = vmatmul.mubr.msk.f32.vlgmr.msra.gmra.mrb[52].mxu0 %vm501_vm3, %v889_v49 }
 0x5b3   :  { %4758 = vmatpush3.bf16.msra.mxu0 %v4757_v18  ;;  %4322 = vmatprep.mubr.msk.f32.mxu0 %vm5249_vm2, %v7340_v48 }
 0x5b4   :  { %4759 = vmatprep.subr.bf16.mxu0 %v7339_v56 }
 0x5b5   :  { %v894_v27 = vpop.f32.mrb[20].mxu0 }
 0x5b6   :  { %v4176_v5 = vpop.f32.mrb[21].mxu0  ;;  %4323 = vmatmul.mubr.msk.f32.gmra.mrb[54].mxu0 %vm501_vm3, %v894_v27 }
 0x5b7   :  { %4761 = vmatpush3.bf16.msra.mxu0 %v4760_v34  ;;  %4325 = vmatprep.mubr.msk.f32.mxu0 %vm5249_vm2, %v7340_v48 }
 0x5b8   :  { %4762 = vmatprep.subr.bf16.mxu0 %v7339_v56 }
 0x5b9   :  { %v899_v28 = vpop.f32.mrb[22].mxu0 }
 0x5ba   :  { %v4179_v59 = vpop.f32.mrb[23].mxu0  ;;  %4326 = vmatmul.mubr.msk.f32.gmra.mrb[56].mxu0 %vm501_vm3, %v899_v28 }
 0x5bb   :  { %4764 = vmatpush3.bf16.msra.mxu0 %v4763_v46  ;;  %4328 = vmatprep.mubr.msk.f32.mxu0 %vm5249_vm2, %v7340_v48  ;;  %v4741_v46 = vpack.c.bf16 %v4937_v13, %v4936_v24 }
 0x5bc   :  { %4765 = vmatprep.subr.bf16.mxu0 %v7339_v56 }
 0x5bd   :  { %v904_v18 = vpop.f32.mrb[24].mxu0 }
 0x5be   :  { %v4182_v55 = vpop.f32.mrb[25].mxu0  ;;  %4329 = vmatmul.mubr.msk.f32.gmra.mrb[58].mxu0 %vm501_vm3, %v904_v18  ;;  %v4941_v18 = vunpack.i.l.bf16 %v6245_v63 }
 0x5bf   :  { %4767 = vmatpush3.bf16.msra.mxu0 %v4766_v2  ;;  %4331 = vmatprep.mubr.msk.f32.mxu0 %vm5249_vm2, %v7340_v48  ;;  %v4942_v2 = vunpack.i.h.bf16 %v6245_v63  ;;  %v4947_v63 = vunpack.i.h.bf16 %v6243_v62 }
 0x5c0   :  { %4407 = vmatprep.subr.mxu0 %v7340_v48 }
 0x5c1   :  { %v909_v22 = vpop.f32.mrb[26].mxu0  ;;  %v4745_v33 = vpack.c.bf16 %v4942_v2, %v4941_v18 }
 0x5c2   :  { %v4185_v49 = vpop.f32.mrb[27].mxu0  ;;  %4332 = vmatmul.mubr.msk.f32.gmra.mrb[60].mxu0 %vm501_vm3, %v909_v22 }
 0x5c3   :  { %4334 = vmatprep.mubr.msk.f32.mxu0 %vm5249_vm2, %v7340_v48 }
 0x5c5   :  { %v914_v6 = vpop.f32.mrb[28].mxu0 }
 0x5c6   :  { %v4188_v37 = vpop.f32.mrb[29].mxu0  ;;  %4335 = vmatmul.mubr.msk.f32.gmra.mrb[62].mxu0 %vm501_vm3, %v914_v6 }
 0x5c7   :  { %4337 = vmatprep.mubr.msk.f32.mxu0 %vm5249_vm2, %v7340_v48  ;;  %v4946_v37 = vunpack.i.l.bf16 %v6243_v62  ;;  %v4952_v62 = vunpack.i.h.bf16 %v6247_v8 }
 0x5c9   :  { %v919_v34 = vpop.f32.mrb[30].mxu0 }
 0x5ca   :  { %v4191_v4 = vpop.f32.mrb[31].mxu0  ;;  %4338 = vmatmul.mubr.msk.f32.gmra.mrb[64].mxu0 %vm501_vm3, %v919_v34 }
 0x5cb   :  { %4340 = vmatprep.mubr.msk.f32.mxu0 %vm5249_vm2, %v7340_v48 }
 0x5cd   :  { %v924_v40 = vpop.f32.mrb[32].mxu0 }
 0x5ce   :  { %v4194_v27 = vpop.f32.mrb[33].mxu0  ;;  %4341 = vmatmul.mubr.msk.f32.gmra.mrb[66].mxu0 %vm501_vm3, %v924_v40  ;;  %v4749_v40 = vpack.c.bf16 %v4947_v63, %v4946_v37 }
 0x5cf   :  { %4343 = vmatprep.mubr.msk.f32.mxu0 %vm5249_vm2, %v7340_v48 }
 0x5d1   :  { %v929_v53 = vpop.f32.mrb[34].mxu0 }
 0x5d2   :  { %v4197_v5 = vpop.f32.mrb[35].mxu0  ;;  %4344 = vmatmul.mubr.msk.f32.gmra.mrb[68].mxu0 %vm501_vm3, %v929_v53 }
 0x5d3   :  { %4409 = vmatprep.mubr.msk.f32.mxu0 %vm5249_vm2, %v7340_v48  ;;  %v4951_v5 = vunpack.i.l.bf16 %v6247_v8 }
 0x5e9   :  { %v1353_v28 = vpop.f32.mrb[36].mxu0 }
 0x5ea   :  { %v4263_v59 = vpop.f32.mrb[37].mxu0  ;;  %4291 = vmatmul.mubr.msk.f32.vlgmr.msra.gmra.mrb[38].mxu1 %vm501_vm3, %v1353_v28 }
 0x5eb   :  { %4743 = vmatpush3.bf16.xpose.msk.msra.mxu1 %vm5775_vm4, %v4741_v46  ;;  %4293 = vmatprep.mubr.msk.f32.mxu1 %vm5249_vm2, %v7340_v48  ;;  %v4753_v46 = vpack.c.bf16 %v4952_v62, %v4951_v5 }
 0x5ec   :  { %4744 = vmatprep.subr.bf16.mxu1 %v7339_v56 }
 0x5ed   :  { %v1358_v55 = vpop.f32.mrb[38].mxu0 }
 0x5ee   :  { %v4266_v22 = vpop.f32.mrb[39].mxu0  ;;  %4294 = vmatmul.mubr.msk.f32.gmra.mrb[40].mxu1 %vm501_vm3, %v1358_v55 }
 0x5ef   :  { %4296 = vmatprep.mubr.msk.f32.mxu1 %vm5249_vm2, %v7340_v48 }
 0x5f1   :  { %v1363_v49 = vpop.f32.mrb[40].mxu0 }
 0x5f2   :  { %v4269_v6 = vpop.f32.mrb[41].mxu0  ;;  %4297 = vmatmul.mubr.msk.f32.gmra.mrb[42].mxu1 %vm501_vm3, %v1363_v49 }
 0x5f3   :  { %4747 = vmatpush3.bf16.xpose.msk.msra.mxu1 %vm5775_vm4, %v4745_v33  ;;  %4299 = vmatprep.mubr.msk.f32.mxu1 %vm5249_vm2, %v7340_v48 }
 0x5f4   :  { %4748 = vmatprep.subr.bf16.mxu1 %v7339_v56 }
 0x5f5   :  { %v1368_v34 = vpop.f32.mrb[42].mxu0 }
 0x5f6   :  { %v4272_v4 = vpop.f32.mrb[43].mxu0  ;;  %4300 = vmatmul.mubr.msk.f32.gmra.mrb[44].mxu1 %vm501_vm3, %v1368_v34 }
 0x5f7   :  { %4302 = vmatprep.mubr.msk.f32.mxu1 %vm5249_vm2, %v7340_v48 }
 0x5f9   :  { %v1373_v27 = vpop.f32.mrb[44].mxu0 }
 0x5fa   :  { %v4275_v53 = vpop.f32.mrb[45].mxu0  ;;  %4303 = vmatmul.mubr.msk.f32.gmra.mrb[46].mxu1 %vm501_vm3, %v1373_v27 }
 0x5fb   :  { %4751 = vmatpush3.bf16.xpose.msk.msra.mxu1 %vm5775_vm4, %v4749_v40  ;;  %4305 = vmatprep.mubr.msk.f32.mxu1 %vm5249_vm2, %v7340_v48 }
 0x5fc   :  { %4752 = vmatprep.subr.bf16.mxu1 %v7339_v56 }
 0x5fd   :  { %v1378_v13 = vpop.f32.mrb[46].mxu0 }
 0x5fe   :  { %v4278_v24 = vpop.f32.mrb[47].mxu0  ;;  %4306 = vmatmul.mubr.msk.f32.gmra.mrb[48].mxu1 %vm501_vm3, %v1378_v13 }
 0x5ff   :  { %4308 = vmatprep.mubr.msk.f32.mxu1 %vm5249_vm2, %v7340_v48 }
 0x601   :  { %v1383_v28 = vpop.f32.mrb[48].mxu0 }
 0x602   :  { %v4281_v59 = vpop.f32.mrb[49].mxu0  ;;  %4309 = vmatmul.mubr.msk.f32.gmra.mrb[50].mxu1 %vm501_vm3, %v1383_v28 }
 0x603   :  { %4755 = vmatpush3.bf16.xpose.msk.msra.mxu1 %vm5775_vm4, %v4753_v46  ;;  %4311 = vmatprep.mubr.msk.f32.mxu1 %vm5249_vm2, %v7340_v48 }
 0x604   :  { %4362 = vmatprep.subr.mxu1 %v7340_v48 }
 0x60b   :  { %4363 = vmatpush3.xpose.msk.msra.mxu1 %vm501_vm3, %v6251_v1 }
 0x60c   :  { %4436 = vmatprep.subr.mxu1 %v7340_v48 }
 0x61e   :  { %v1388_v8 = vpop.f32.mrb[50].mxu0 }
 0x61f   :  { %v4284_v2 = vpop.f32.mrb[51].mxu0  ;;  %4312 = vmatmul.mubr.msk.f32.gmra.mrb[52].mxu1 %vm501_vm3, %v1388_v8 }
 0x620   :  { %4314 = vmatprep.mubr.msk.f32.mxu1 %vm5249_vm2, %v7340_v48 }
 0x626   :  { %v1393_v18 = vpop.f32.mrb[36].mxu1 }
 0x627   :  { %v4287_v55 = vpop.f32.mrb[37].mxu1  ;;  %4315 = vmatmul.mubr.msk.f32.gmra.mrb[54].mxu1 %vm501_vm3, %v1393_v18 }
 0x628   :  { %4364 = vmatprep.mubr.msk.f32.mxu1 %vm5249_vm2, %v7340_v48 }
 0x62b   :  { %4365 = vmatmul.mubr.msk.f32.vlgmr.msra.gmra.mrb[56].mxu1 %vm501_vm3, %v6249_v14 }
 0x62c   :  { %4367 = vmatprep.mubr.msk.f32.mxu1 %vm5249_vm2, %v7340_v48 }
 0x62f   :  { %4368 = vmatmul.mubr.msk.f32.gmra.mrb[58].mxu1 %vm501_vm3, %v6255_v21 }
 0x630   :  { %4370 = vmatprep.mubr.msk.f32.mxu1 %vm5249_vm2, %v7340_v48 }
 0x633   :  { %4371 = vmatmul.mubr.msk.f32.gmra.mrb[60].mxu1 %vm501_vm3, %v6253_v17 }
 0x634   :  { %4373 = vmatprep.mubr.msk.f32.mxu1 %vm5249_vm2, %v7340_v48 }
 0x637   :  { %4374 = vmatmul.mubr.msk.f32.gmra.mrb[62].mxu1 %vm501_vm3, %v6259_v15 }
 0x638   :  { %4376 = vmatprep.mubr.msk.f32.mxu1 %vm5249_vm2, %v7340_v48 }
 0x63b   :  { %4377 = vmatmul.mubr.msk.f32.gmra.mrb[64].mxu1 %vm501_vm3, %v6257_v3 }
 0x63c   :  { %4379 = vmatprep.mubr.msk.f32.mxu1 %vm5249_vm2, %v7340_v48 }
 0x63f   :  { %4380 = vmatmul.mubr.msk.f32.gmra.mrb[66].mxu1 %vm501_vm3, %v6263_v52 }
 0x640   :  { %4382 = vmatprep.mubr.msk.f32.mxu1 %vm5249_vm2, %v7340_v48 }
 0x643   :  { %4383 = vmatmul.mubr.msk.f32.gmra.mrb[68].mxu1 %vm501_vm3, %v6261_v50 }
 0x644   :  { %4385 = vmatprep.mubr.msk.f32.mxu1 %vm5249_vm2, %v7340_v48 }
 0x647   :  { %4386 = vmatmul.mubr.msk.f32.gmra.mrb[70].mxu1 %vm501_vm3, %v6267_v41 }
 0x648   :  { %4388 = vmatprep.mubr.msk.f32.mxu1 %vm5249_vm2, %v7340_v48 }
 0x64b   :  { %4389 = vmatmul.mubr.msk.f32.gmra.mrb[72].mxu1 %vm501_vm3, %v6265_v44 }
 0x64c   :  { %4438 = vmatprep.mubr.msk.f32.mxu1 %vm5249_vm2, %v7340_v48 }
 0x685   :  { %v1627_v14 = vpop.f32.mrb[52].mxu0 }
 0x686   :  { %v4321_v1 = vpop.f32.mrb[53].mxu0 }
 0x689   :  { %v1632_v17 = vpop.f32.mrb[54].mxu0 }
 0x68a   :  { %v4324_v21 = vpop.f32.mrb[55].mxu0 }
 0x68d   :  { %v1637_v3 = vpop.f32.mrb[56].mxu0 }
 0x68e   :  { %v4327_v15 = vpop.f32.mrb[57].mxu0 }
 0x691   :  { %v1642_v50 = vpop.f32.mrb[58].mxu0 }
 0x692   :  { %v4330_v52 = vpop.f32.mrb[59].mxu0 }
 0x695   :  { %v1647_v22 = vpop.f32.mrb[60].mxu0 }
 0x696   :  { %v4333_v33 = vpop.f32.mrb[61].mxu0 }
 0x699   :  { %v1652_v41 = vpop.f32.mrb[62].mxu0 }
 0x69a   :  { %v4336_v49 = vpop.f32.mrb[63].mxu0 }
 0x69d   :  { %v1657_v6 = vpop.f32.mrb[64].mxu0 }
 0x69e   :  { %v4339_v63 = vpop.f32.mrb[65].mxu0 }
 0x6a1   :  { %v1662_v37 = vpop.f32.mrb[66].mxu0 }
 0x6a2   :  { %v4342_v34 = vpop.f32.mrb[67].mxu0 }
 0x6a5   :  { %v1667_v44 = vpop.f32.mrb[68].mxu0 }
 0x6a6   :  { %v4345_v4 = vpop.f32.mrb[69].mxu0 }
 0x6bd   :  { %v1490_v40 = vpop.f32.mrb[38].mxu1 }
 0x6be   :  { %v6386_v27 = vadd.f32 %v1627_v14, %v1490_v40  ;;  %v4292_v53 = vpop.f32.mrb[39].mxu1 }
 0x6c1   :  { %v1495_v62 = vpop.f32.mrb[40].mxu1 }
 0x6c2   :  { %v6388_v5 = vadd.f32 %v1632_v17, %v1495_v62  ;;  %v4295_v13 = vpop.f32.mrb[41].mxu1 }
 0x6c5   :  { %v1500_v24 = vpop.f32.mrb[42].mxu1 }
 0x6c6   :  { %v6390_v46 = vadd.f32 %v1637_v3, %v1500_v24  ;;  %v4298_v28 = vpop.f32.mrb[43].mxu1 }
 0x6c9   :  { %v1505_v59 = vpop.f32.mrb[44].mxu1 }
 0x6ca   :  { %v6392_v8 = vadd.f32 %v1642_v50, %v1505_v59  ;;  %v4301_v2 = vpop.f32.mrb[45].mxu1 }
 0x6cd   :  { %v1510_v18 = vpop.f32.mrb[46].mxu1 }
 0x6ce   :  { %v6394_v55 = vadd.f32 %v1647_v22, %v1510_v18  ;;  %v4304_v1 = vpop.f32.mrb[47].mxu1 }
 0x6d1   :  { %v1515_v21 = vpop.f32.mrb[48].mxu1 }
 0x6d2   :  { %v6396_v14 = vadd.f32 %v1652_v41, %v1515_v21  ;;  %v4307_v15 = vpop.f32.mrb[49].mxu1  ;;  %v6407_v41 = vld [vmem:[%s7313_s2] sm:$0xff]  ;;  %v6424_v21 = vld [vmem:[%s7313_s2 + $0x10] sm:$0xff] }
 0x6d5   :  { %v1520_v52 = vpop.f32.mrb[50].mxu1 }
 0x6d6   :  { %v6398_v17 = vadd.f32 %v1657_v6, %v1520_v52  ;;  %v4310_v33 = vpop.f32.mrb[51].mxu1 }
 0x6f2   :  { %v1525_v49 = vpop.f32.mrb[52].mxu1 }
 0x6f3   :  { %v6400_v3 = vadd.f32 %v1662_v37, %v1525_v49  ;;  %v4313_v63 = vpop.f32.mrb[53].mxu1 }
 0x6fa   :  { %v1530_v34 = vpop.f32.mrb[54].mxu1 }
 0x6fb   :  { %v6402_v50 = vadd.f32 %v1667_v44, %v1530_v34  ;;  %v4316_v4 = vpop.f32.mrb[55].mxu1  ;;  %v6417_v44 = vld [vmem:[%s7313_s2 + $0x8] sm:$0xff]  ;;  %v6431_v34 = vld [vmem:[%s7313_s2 + $0x18] sm:$0xff] }
 0x6fe   :  { %v1809_v40 = vpop.f32.mrb[56].mxu1 }
 0x6ff   :  { %v1853_v22 = vmul.f32 0.35355338, %v1809_v40  ;;  %v4366_v53 = vpop.f32.mrb[57].mxu1 }
 0x701   :  { %v6410_v6 = vadd.f32 %v6407_v41, %v1853_v22 }
 0x702   :  { %v1814_v62 = vpop.f32.mrb[58].mxu1 }
 0x703   :  { %v1854_v13 = vmul.f32 0.35355338, %v1814_v62  ;;  %v4369_v37 = vpop.f32.mrb[59].mxu1  ;;  %v1871_v24 = vsel %vm666_vm6, %v6410_v6, -inf }
 0x704   :  { %1872 = vmax.xlane.f32.xlu0 %v1871_v24 }
 0x705   :  { %v1863_v28 = vadd.f32 %v6417_v44, %v1854_v13  ;;  %v6438_v13 = vld [vmem:[%s7313_s2 + $0x20] sm:$0xff] }
 0x706   :  { %v1819_v59 = vpop.f32.mrb[60].mxu1 }
 0x707   :  { %v1855_v2 = vmul.f32 0.35355338, %v1819_v59  ;;  %v4372_v18 = vpop.f32.mrb[61].mxu1  ;;  %v1874_v1 = vsel %vm666_vm6, %v1863_v28, -inf }
 0x708   :  { %1875 = vmax.xlane.f32.xlu1 %v1874_v1  ;;  %v6445_v1 = vld [vmem:[%s7313_s2 + $0x28] sm:$0xff] }
 0x709   :  { %v1864_v15 = vadd.f32 %v6424_v21, %v1855_v2 }
 0x70a   :  { %v1824_v52 = vpop.f32.mrb[62].mxu1 }
 0x70b   :  { %v1856_v33 = vmul.f32 0.35355338, %v1824_v52  ;;  %v4375_v49 = vpop.f32.mrb[63].mxu1  ;;  %v1877_v63 = vsel %vm666_vm6, %v1864_v15, -inf }
 0x70c   :  { %1878 = vmax.xlane.f32.xlu0 %v1877_v63 }
 0x70d   :  { %v1865_v4 = vadd.f32 %v6431_v34, %v1856_v33 }
 0x70e   :  { %v1829_v40 = vpop.f32.mrb[64].mxu1 }
 0x70f   :  { %v1857_v22 = vmul.f32 0.35355338, %v1829_v40  ;;  %v4378_v53 = vpop.f32.mrb[65].mxu1  ;;  %v1880_v62 = vsel %vm666_vm6, %v1865_v4, -inf }
 0x710   :  { %1881 = vmax.xlane.f32.xlu0 %v1880_v62 }
 0x711   :  { %v1866_v37 = vadd.f32 %v6438_v13, %v1857_v22  ;;  %v6452_v22 = vld [vmem:[%s7313_s2 + $0x30] sm:$0xff] }
 0x712   :  { %v1834_v24 = vpop.f32.mrb[66].mxu1 }
 0x713   :  { %v1858_v59 = vmul.f32 0.35355338, %v1834_v24  ;;  %v4381_v2 = vpop.f32.mrb[67].mxu1  ;;  %v1883_v18 = vsel %vm666_vm6, %v1866_v37, -inf }
 0x714   :  { %1884 = vmax.xlane.f32.xlu1 %v1883_v18 }
 0x715   :  { %v1867_v52 = vadd.f32 %v6445_v1, %v1858_v59 }
 0x716   :  { %v1839_v33 = vpop.f32.mrb[68].mxu1 }
 0x717   :  { %v1859_v49 = vmul.f32 0.35355338, %v1839_v33  ;;  %v4384_v63 = vpop.f32.mrb[69].mxu1  ;;  %v1886_v40 = vsel %vm666_vm6, %v1867_v52, -inf  ;;  %v6459_v33 = vld [vmem:[%s7313_s2 + $0x40] sm:$0xf] }
 0x718   :  { %1887 = vmax.xlane.f32.xlu0 %v1886_v40 }
 0x719   :  { %v1868_v53 = vadd.f32 %v6452_v22, %v1859_v49  ;;  %v6473_v49 = vld [vmem:[%s7313_s2 + $0x38] sm:$0xff]  ;;  %s5260_s2 = smov 104  }
 0x71a   :  { %v1844_v62 = vpop.f32.mrb[70].mxu1 }
 0x71b   :  { %v4387_v24 = vpop.f32.mrb[71].mxu1  ;;  %v1889_v2 = vsel %vm666_vm6, %v1868_v53, -inf }
 0x71c   :  { %1890 = vmax.xlane.f32.xlu1 %v1889_v2 }
 0x71e   :  { %v1849_v18 = vpop.f32.mrb[72].mxu1 }
 0x71f   :  { %v1861_v59 = vmul.f32 0.35355338, %v1849_v18  ;;  %v4390_v26 = vpop.f32.mrb[73].mxu1 }
 0x720   :  { %v1860_v26 = vmul.f32 0.35355338, %v1844_v62 }
 0x721   :  { %v6462_v63 = vadd.f32 %v6459_v33, %v1861_v59 }
 0x722   :  { %v1869_v24 = vadd.f32 %v6473_v49, %v1860_v26 }
 0x723   :  { %v1895_v40 = vsel %vm691_vm7, %v6462_v63, -inf }
 0x724   :  { %1896 = vmax.xlane.f32.xlu1 %v1895_v40  ;;  %v1892_v2 = vsel %vm666_vm6, %v1869_v24, -inf }
 0x72e   :  { %1986 = vrot.lane.b32.xlu0 %v5753_v61, %s5258_s21 }
 0x735   :  { %4979 = vrot.lane.b32.xlu1 %v5721_v39, %s5259_s20 }
 0x74d   :  { %1893 = vmax.xlane.f32.xlu0 %v1892_v2 }
 0x763   :  { %4974 = vrot.lane.b32.xlu0 %v5711_v51, %s5259_s20 }
 0x791   :  { %v1873_v18 = vpop.xlane.xlu0 %1872 }
 0x792   :  { %v1898_v59 = vsub.f32 %v6410_v6, %v1873_v18 }
 0x794   :  { %v1907_v40 = vmul.f32 1.442695, %v1898_v59 }
 0x795   :  { %v1876_v9 = vpop.xlane.xlu1 %1875 }
 0x796   :  { %5103 = vpow2.f32 %v1907_v40  ;;  %v1899_v62 = vsub.f32 %v1863_v28, %v1876_v9 }
 0x798   :  { %v1909_v11 = vmul.f32 1.442695, %v1899_v62 }
 0x799   :  { %v1879_v45 = vpop.xlane.xlu0 %1878 }
 0x79a   :  { %5105 = vpow2.f32 %v1909_v11  ;;  %v1900_v10 = vsub.f32 %v1864_v15, %v1879_v45 }
 0x79c   :  { %v1911_v7 = vmul.f32 1.442695, %v1900_v10 }
 0x79d   :  { %v1882_v60 = vpop.xlane.xlu0 %1881 }
 0x79e   :  { %5107 = vpow2.f32 %v1911_v7  ;;  %v1901_v26 = vsub.f32 %v1865_v4, %v1882_v60 }
 0x7a0   :  { %v6480_v12 = vpop.eup %5103  ;;  %v1913_v2 = vmul.f32 1.442695, %v1901_v26 }
 0x7a1   :  { %v1885_v25 = vpop.xlane.xlu1 %1884  ;;  %v1925_v23 = vsel %vm666_vm6, %v6480_v12, 0.0 }
 0x7a2   :  { %5109 = vpow2.f32 %v1913_v2  ;;  %v1902_v6 = vsub.f32 %v1866_v37, %v1885_v25  ;;  %1926 = vadd.xlane.f32.xlu0 %v1925_v23 }
 0x7a4   :  { %v6484_v18 = vpop.eup %5105  ;;  %v1915_v9 = vmul.f32 1.442695, %v1902_v6 }
 0x7a5   :  { %v1888_v28 = vpop.xlane.xlu0 %1887  ;;  %v1928_v45 = vsel %vm666_vm6, %v6484_v18, 0.0 }
 0x7a6   :  { %5111 = vpow2.f32 %v1915_v9  ;;  %v1903_v7 = vsub.f32 %v1867_v52, %v1888_v28  ;;  %1929 = vadd.xlane.f32.xlu0 %v1928_v45 }
 0x7a8   :  { %v6488_v60 = vpop.eup %5107  ;;  %v1917_v10 = vmul.f32 1.442695, %v1903_v7 }
 0x7a9   :  { %v1987_v11 = vpop.permute.xlu0 %1986  ;;  %v1891_v15 = vpop.xlane.xlu1 %1890  ;;  %v1931_v4 = vsel %vm666_vm6, %v6488_v60, 0.0 }
 0x7aa   :  { %5113 = vpow2.f32 %v1917_v10  ;;  %v1904_v23 = vsub.f32 %v1868_v53, %v1891_v15  ;;  %4408 = vmatpush3.msk.msra.mxu0 %vm820_vm5, %v1987_v11  ;;  %1932 = vadd.xlane.f32.xlu1 %v1931_v4 }
 0x7ab   :  { %4768 = vmatprep.subr.bf16.mxu0 %v7339_v56 }
 0x7ac   :  { %v6494_v25 = vpop.eup %5109  ;;  %v1919_v37 = vmul.f32 1.442695, %v1904_v23 }
 0x7ad   :  { %v1934_v52 = vsel %vm666_vm6, %v6494_v25, 0.0 }
 0x7ae   :  { %5115 = vpow2.f32 %v1919_v37  ;;  %1935 = vadd.xlane.f32.xlu0 %v1934_v52 }
 0x7b0   :  { %v6498_v59 = vpop.eup %5111 }
 0x7b1   :  { %v1937_v40 = vsel %vm666_vm6, %v6498_v59, 0.0  ;;  %v1897_v45 = vpop.xlane.xlu1 %1896 }
 0x7b2   :  { %1938 = vadd.xlane.f32.xlu0 %v1937_v40  ;;  %v1906_v7 = vsub.f32 %v6462_v63, %v1897_v45 }
 0x7b4   :  { %v6502_v53 = vpop.eup %5113  ;;  %v1923_v10 = vmul.f32 1.442695, %v1906_v7 }
 0x7b5   :  { %v1940_v62 = vsel %vm666_vm6, %v6502_v53, 0.0  ;;  %v4980_v23 = vpop.permute.xlu1 %4979 }
 0x7b6   :  { %1941 = vadd.xlane.f32.xlu0 %v1940_v62 }
 0x7b8   :  { %v6506_v26 = vpop.eup %5115 }
 0x7b9   :  { %v1943_v2 = vsel %vm666_vm6, %v6506_v26, 0.0 }
 0x7ba   :  { %1944 = vadd.xlane.f32.xlu1 %v1943_v2  ;;  %v4982_v2 = vunpack.i.h.bf16 %v4980_v23 }
 0x7cb   :  { %4989 = vrot.lane.b32.xlu1 %v5743_v20, %s5259_s20 }
 0x7cf   :  { %2315 = vrot.lane.b32.xlu1 %v5753_v61, %s5259_s20 }
 0x7d3   :  { %2281 = vrot.lane.b32.xlu1 %v5705_v29, %s5260_s2 }
 0x7da   :  { %v1894_v6 = vpop.xlane.xlu0 %1893 }
 0x7db   :  { %v1905_v9 = vsub.f32 %v1869_v24, %v1894_v6  ;;  %v4981_v6 = vunpack.i.l.bf16 %v4980_v23 }
 0x7dd   :  { %v1921_v28 = vmul.f32 1.442695, %v1905_v9  ;;  %v4773_v45 = vpack.c.bf16 %v4982_v2, %v4981_v6  ;;  %v472_v6 = vld [vmem:[%s7314_s7 + $0x10] sm:$0xff] }
 0x7de   :  { %v4975_v63 = vpop.permute.xlu0 %4974  ;;  %4437 = vmatpush3.msra.mxu1 %v472_v6 }
 0x7df   :  { %5117 = vpow2.f32 %v1921_v28  ;;  %v4976_v52 = vunpack.i.l.bf16 %v4975_v63  ;;  %4784 = vmatprep.subr.bf16.mxu1 %v7339_v56 }
 0x7e0   :  { %5119 = vpow2.f32 %v1923_v10 }
 0x7e9   :  { %v6516_v11 = vpop.eup %5117 }
 0x7ea   :  { %v1946_v15 = vsel %vm666_vm6, %v6516_v11, 0.0  ;;  %v6520_v4 = vpop.eup %5119 }
 0x7eb   :  { %1947 = vadd.xlane.f32.xlu0 %v1946_v15  ;;  %v1949_v29 = vsel %vm691_vm7, %v6520_v4, 0.0 }
 0x7f7   :  { %1950 = vadd.xlane.f32.xlu1 %v1949_v29 }
 0x801   :  { %4984 = vrot.lane.b32.xlu0 %v5733_v47, %s5259_s20 }
 0x805   :  { %2289 = vrot.lane.b32.xlu0 %v5725_v54, %s5260_s2 }
 0x808   :  { %2283 = vrot.lane.b32.xlu1 %v5707_v43, %s5260_s2  ;;  %v4977_v43 = vunpack.i.h.bf16 %v4975_v63 }
 0x809   :  { %2293 = vrot.lane.b32.xlu0 %v5737_v57, %s5260_s2 }
 0x80a   :  { %v4769_v62 = vpack.c.bf16 %v4977_v43, %v4976_v52 }
 0x80c   :  { %2285 = vrot.lane.b32.xlu1 %v5715_v42, %s5260_s2 }
 0x80d   :  { %2297 = vrot.lane.b32.xlu0 %v5753_v61, %s5260_s2 }
 0x810   :  { %2287 = vrot.lane.b32.xlu1 %v5717_v38, %s5260_s2 }
 0x814   :  { %2291 = vrot.lane.b32.xlu1 %v5727_v32, %s5260_s2 }
 0x818   :  { %2295 = vrot.lane.b32.xlu1 %v5739_v58, %s5260_s2 }
 0x82f   :  { %v1927_v24 = vpop.xlane.xlu0 %1926 }
 0x830   :  { %5121 = vrcp.f32 %v1927_v24 }
 0x833   :  { %v1930_v37 = vpop.xlane.xlu0 %1929 }
 0x834   :  { %5123 = vrcp.f32 %v1930_v37 }
 0x837   :  { %v1933_v54 = vpop.xlane.xlu1 %1932 }
 0x838   :  { %5125 = vrcp.f32 %v1933_v54 }
 0x83a   :  { %v5122_v57 = vpop.eup %5121 }
 0x83b   :  { %v1961_v42 = vmul.f32 %v5122_v57, %v6480_v12  ;;  %v1936_v40 = vpop.xlane.xlu0 %1935 }
 0x83c   :  { %5127 = vrcp.f32 %v1936_v40 }
 0x83d   :  { %4410 = vmatmul.mubr.msk.f32.vlgmr.msra.gmra.mrb[70].mxu0 %vm666_vm6, %v1961_v42 }
 0x83e   :  { %v5124_v38 = vpop.eup %5123  ;;  %4771 = vmatpush3.bf16.xpose.msk.msra.mxu0 %vm5775_vm4, %v4769_v62  ;;  %4412 = vmatprep.mubr.msk.f32.mxu0 %vm5249_vm2, %v7340_v48 }
 0x83f   :  { %v1939_v32 = vpop.xlane.xlu0 %1938  ;;  %v1962_v58 = vmul.f32 %v5124_v38, %v6484_v18  ;;  %4772 = vmatprep.subr.bf16.mxu0 %v7339_v56 }
 0x840   :  { %5129 = vrcp.f32 %v1939_v32 }
 0x841   :  { %4413 = vmatmul.mubr.msk.f32.gmra.mrb[72].mxu0 %vm666_vm6, %v1962_v58 }
 0x842   :  { %v5126_v12 = vpop.eup %5125  ;;  %4415 = vmatprep.mubr.msk.f32.mxu0 %vm5249_vm2, %v7340_v48 }
 0x843   :  { %v1942_v9 = vpop.xlane.xlu0 %1941  ;;  %v1963_v28 = vmul.f32 %v5126_v12, %v6488_v60 }
 0x844   :  { %5131 = vrcp.f32 %v1942_v9 }
 0x845   :  { %4416 = vmatmul.mubr.msk.f32.gmra.mrb[74].mxu0 %vm666_vm6, %v1963_v28 }
 0x846   :  { %v5128_v7 = vpop.eup %5127  ;;  %4775 = vmatpush3.bf16.xpose.msk.msra.mxu0 %vm5775_vm4, %v4773_v45  ;;  %4418 = vmatprep.mubr.msk.f32.mxu0 %vm5249_vm2, %v7340_v48 }
 0x847   :  { %v1945_v18 = vpop.xlane.xlu1 %1944  ;;  %v1964_v10 = vmul.f32 %v5128_v7, %v6494_v25  ;;  %4776 = vmatprep.subr.bf16.mxu0 %v7339_v56 }
 0x848   :  { %5133 = vrcp.f32 %v1945_v18 }
 0x849   :  { %4419 = vmatmul.mubr.msk.f32.gmra.mrb[76].mxu0 %vm666_vm6, %v1964_v10 }
 0x84a   :  { %v5130_v60 = vpop.eup %5129  ;;  %4421 = vmatprep.mubr.msk.f32.mxu0 %vm5249_vm2, %v7340_v48 }
 0x84b   :  { %v1965_v15 = vmul.f32 %v5130_v60, %v6498_v59  ;;  %v4990_v59 = vpop.permute.xlu1 %4989 }
 0x84c   :  { %v4992_v42 = vunpack.i.h.bf16 %v4990_v59  ;;  %v4991_v40 = vunpack.i.l.bf16 %v4990_v59 }
 0x84d   :  { %4422 = vmatmul.mubr.msk.f32.gmra.mrb[78].mxu0 %vm666_vm6, %v1965_v15 }
 0x84e   :  { %v5132_v29 = vpop.eup %5131  ;;  %4424 = vmatprep.mubr.msk.f32.mxu0 %vm5249_vm2, %v7340_v48  ;;  %v4781_v32 = vpack.c.bf16 %v4992_v42, %v4991_v40 }
 0x84f   :  { %v1966_v63 = vmul.f32 %v5132_v29, %v6502_v53  ;;  %v2316_v37 = vpop.permute.xlu1 %2315 }
 0x851   :  { %4425 = vmatmul.mubr.msk.f32.gmra.mrb[80].mxu0 %vm666_vm6, %v1966_v63 }
 0x852   :  { %v5134_v25 = vpop.eup %5133  ;;  %4427 = vmatprep.mubr.msk.f32.mxu0 %vm5249_vm2, %v7340_v48 }
 0x853   :  { %v1967_v24 = vmul.f32 %v5134_v25, %v6506_v26  ;;  %v2282_v57 = vpop.permute.xlu1 %2281 }
 0x855   :  { %4428 = vmatmul.mubr.msk.f32.gmra.mrb[82].mxu0 %vm666_vm6, %v1967_v24 }
 0x856   :  { %4430 = vmatprep.mubr.msk.f32.mxu0 %vm5249_vm2, %v7340_v48 }
 0x878   :  { %v1948_v23 = vpop.xlane.xlu0 %1947 }
 0x879   :  { %5135 = vrcp.f32 %v1948_v23 }
 0x87c   :  { %v4985_v54 = vpop.permute.xlu0 %4984 }
 0x87d   :  { %v4987_v43 = vunpack.i.h.bf16 %v4985_v54  ;;  %v4986_v53 = vunpack.i.l.bf16 %v4985_v54 }
 0x87f   :  { %v4777_v52 = vpack.c.bf16 %v4987_v43, %v4986_v53 }
 0x880   :  { %v2290_v12 = vpop.permute.xlu0 %2289 }
 0x881   :  { %4779 = vmatpush3.bf16.xpose.msk.msra.mxu0 %vm5775_vm4, %v4777_v52 }
 0x882   :  { %4780 = vmatprep.subr.bf16.mxu0 %v7339_v56 }
 0x883   :  { %v5136_v26 = vpop.eup %5135 }
 0x884   :  { %v1951_v62 = vpop.xlane.xlu1 %1950  ;;  %v1968_v38 = vmul.f32 %v5136_v26, %v6516_v11  ;;  %v2294_v28 = vpop.permute.xlu0 %2293 }
 0x885   :  { %5137 = vrcp.f32 %v1951_v62 }
 0x886   :  { %4431 = vmatmul.mubr.msk.f32.gmra.mrb[84].mxu0 %vm666_vm6, %v1968_v38 }
 0x887   :  { %4433 = vmatprep.mubr.msk.f32.mxu0 %vm5249_vm2, %v7340_v48 }
 0x888   :  { %v2284_v0 = vpop.permute.xlu1 %2283  ;;  %v2298_v7 = vpop.permute.xlu0 %2297 }
 0x889   :  { %4783 = vmatpush3.bf16.xpose.msk.msra.mxu0 %vm5775_vm4, %v4781_v32 }
 0x88a   :  { %4481 = vmatprep.subr.mxu0 %v7340_v48 }
 0x88c   :  { %v2286_v11 = vpop.permute.xlu1 %2285 }
 0x88f   :  { %v5138_v58 = vpop.eup %5137 }
 0x890   :  { %v1969_v2 = vmul.f32 %v5138_v58, %v6520_v4  ;;  %v2288_v4 = vpop.permute.xlu1 %2287 }
 0x891   :  { %4482 = vmatpush3.xpose.msk.msra.mxu0 %vm501_vm3, %v2316_v37 }
 0x892   :  { %4434 = vmatmul.mubr.msk.f32.gmra.mrb[86].mxu0 %vm666_vm6, %v1969_v2  ;;  %4555 = vmatprep.subr.mxu0 %v7340_v48 }
 0x893   :  { %4483 = vmatprep.mubr.msk.f32.mxu0 %vm5249_vm2, %v7340_v48 }
 0x894   :  { %v2292_v9 = vpop.permute.xlu1 %2291 }
 0x896   :  { %4484 = vmatmul.mubr.msk.f32.vlgmr.msra.gmra.mrb[88].mxu0 %vm501_vm3, %v2282_v57 }
 0x897   :  { %4486 = vmatprep.mubr.msk.f32.mxu0 %vm5249_vm2, %v7340_v48 }
 0x898   :  { %v2296_v45 = vpop.permute.xlu1 %2295 }
 0x89a   :  { %4487 = vmatmul.mubr.msk.f32.gmra.mrb[90].mxu0 %vm501_vm3, %v2284_v0 }
 0x89b   :  { %4489 = vmatprep.mubr.msk.f32.mxu0 %vm5249_vm2, %v7340_v48 }
 0x89e   :  { %4490 = vmatmul.mubr.msk.f32.gmra.mrb[92].mxu0 %vm501_vm3, %v2286_v11 }
 0x89f   :  { %4492 = vmatprep.mubr.msk.f32.mxu0 %vm5249_vm2, %v7340_v48 }
 0x8a2   :  { %4493 = vmatmul.mubr.msk.f32.gmra.mrb[94].mxu0 %vm501_vm3, %v2288_v4 }
 0x8a3   :  { %4495 = vmatprep.mubr.msk.f32.mxu0 %vm5249_vm2, %v7340_v48 }
 0x8a6   :  { %4496 = vmatmul.mubr.msk.f32.gmra.mrb[96].mxu0 %vm501_vm3, %v2290_v12 }
 0x8a7   :  { %4498 = vmatprep.mubr.msk.f32.mxu0 %vm5249_vm2, %v7340_v48 }
 0x8aa   :  { %4499 = vmatmul.mubr.msk.f32.gmra.mrb[98].mxu0 %vm501_vm3, %v2292_v9 }
 0x8ab   :  { %4501 = vmatprep.mubr.msk.f32.mxu0 %vm5249_vm2, %v7340_v48 }
 0x8ae   :  { %4502 = vmatmul.mubr.msk.f32.gmra.mrb[100].mxu0 %vm501_vm3, %v2294_v28 }
 0x8af   :  { %4504 = vmatprep.mubr.msk.f32.mxu0 %vm5249_vm2, %v7340_v48 }
 0x8b2   :  { %4505 = vmatmul.mubr.msk.f32.gmra.mrb[102].mxu0 %vm501_vm3, %v2296_v45 }
 0x8b3   :  { %4507 = vmatprep.mubr.msk.f32.mxu0 %vm5249_vm2, %v7340_v48 }
 0x8b6   :  { %4508 = vmatmul.mubr.msk.f32.gmra.mrb[104].mxu0 %vm501_vm3, %v2298_v7 }
 0x8b7   :  { %4557 = vmatprep.mubr.msk.f32.mxu0 %vm5249_vm2, %v7340_v48 }
 0x910   :  { %v2091_v18 = vpop.f32.mrb[70].mxu0 }
 0x911   :  { %v4411_v10 = vpop.f32.mrb[71].mxu0  ;;  %4439 = vmatmul.mubr.msk.f32.vlgmr.msra.gmra.mrb[74].mxu1 %vm501_vm3, %v2091_v18 }
 0x912   :  { %4441 = vmatprep.mubr.msk.f32.mxu1 %vm5249_vm2, %v7340_v48 }
 0x914   :  { %v2096_v60 = vpop.f32.mrb[72].mxu0 }
 0x915   :  { %v4414_v15 = vpop.f32.mrb[73].mxu0  ;;  %4442 = vmatmul.mubr.msk.f32.gmra.mrb[76].mxu1 %vm501_vm3, %v2096_v60 }
 0x916   :  { %4444 = vmatprep.mubr.msk.f32.mxu1 %vm5249_vm2, %v7340_v48 }
 0x918   :  { %v2101_v29 = vpop.f32.mrb[74].mxu0 }
 0x919   :  { %v4417_v63 = vpop.f32.mrb[75].mxu0  ;;  %4445 = vmatmul.mubr.msk.f32.gmra.mrb[78].mxu1 %vm501_vm3, %v2101_v29 }
 0x91a   :  { %4447 = vmatprep.mubr.msk.f32.mxu1 %vm5249_vm2, %v7340_v48 }
 0x91c   :  { %v2106_v25 = vpop.f32.mrb[76].mxu0 }
 0x91d   :  { %v4420_v24 = vpop.f32.mrb[77].mxu0  ;;  %4448 = vmatmul.mubr.msk.f32.gmra.mrb[80].mxu1 %vm501_vm3, %v2106_v25 }
 0x91e   :  { %4450 = vmatprep.mubr.msk.f32.mxu1 %vm5249_vm2, %v7340_v48 }
 0x920   :  { %v2111_v59 = vpop.f32.mrb[78].mxu0 }
 0x921   :  { %v4423_v23 = vpop.f32.mrb[79].mxu0  ;;  %4451 = vmatmul.mubr.msk.f32.gmra.mrb[82].mxu1 %vm501_vm3, %v2111_v59 }
 0x922   :  { %4453 = vmatprep.mubr.msk.f32.mxu1 %vm5249_vm2, %v7340_v48 }
 0x924   :  { %v2116_v37 = vpop.f32.mrb[80].mxu0 }
 0x925   :  { %v4426_v54 = vpop.f32.mrb[81].mxu0  ;;  %4454 = vmatmul.mubr.msk.f32.gmra.mrb[84].mxu1 %vm501_vm3, %v2116_v37 }
 0x926   :  { %4456 = vmatprep.mubr.msk.f32.mxu1 %vm5249_vm2, %v7340_v48 }
 0x928   :  { %v2121_v43 = vpop.f32.mrb[82].mxu0 }
 0x929   :  { %v4429_v53 = vpop.f32.mrb[83].mxu0  ;;  %4457 = vmatmul.mubr.msk.f32.gmra.mrb[86].mxu1 %vm501_vm3, %v2121_v43 }
 0x92a   :  { %4459 = vmatprep.mubr.msk.f32.mxu1 %vm5249_vm2, %v7340_v48 }
 0x959   :  { %v2126_v52 = vpop.f32.mrb[84].mxu0 }
 0x95a   :  { %v4432_v57 = vpop.f32.mrb[85].mxu0  ;;  %4460 = vmatmul.mubr.msk.f32.gmra.mrb[88].mxu1 %vm501_vm3, %v2126_v52 }
 0x95b   :  { %4462 = vmatprep.mubr.msk.f32.mxu1 %vm5249_vm2, %v7340_v48 }
 0x965   :  { %v2131_v26 = vpop.f32.mrb[86].mxu0 }
 0x966   :  { %v4435_v42 = vpop.f32.mrb[87].mxu0  ;;  %4463 = vmatmul.mubr.msk.f32.gmra.mrb[90].mxu1 %vm501_vm3, %v2131_v26 }
 0x967   :  { %4528 = vmatprep.mubr.msk.f32.mxu1 %vm5249_vm2, %v7340_v48 }
 0x969   :  { %v2419_v40 = vpop.f32.mrb[88].mxu0 }
 0x96a   :  { %v2463_v62 = vmul.f32 0.35355338, %v2419_v40  ;;  %v4485_v38 = vpop.f32.mrb[89].mxu0 }
 0x96c   :  { %v6643_v32 = vadd.f32 %v6407_v41, %v2463_v62 }
 0x96d   :  { %v2424_v58 = vpop.f32.mrb[90].mxu0 }
 0x96e   :  { %v2464_v2 = vmul.f32 0.35355338, %v2424_v58  ;;  %v4488_v6 = vpop.f32.mrb[91].mxu0  ;;  %v2481_v0 = vsel %vm666_vm6, %v6643_v32, -inf }
 0x96f   :  { %2482 = vmax.xlane.f32.xlu1 %v2481_v0 }
 0x970   :  { %v6648_v11 = vadd.f32 %v6417_v44, %v2464_v2 }
 0x971   :  { %v2429_v4 = vpop.f32.mrb[92].mxu0 }
 0x972   :  { %v2465_v12 = vmul.f32 0.35355338, %v2429_v4  ;;  %v4491_v9 = vpop.f32.mrb[93].mxu0  ;;  %v2484_v28 = vsel %vm666_vm6, %v6648_v11, -inf }
 0x973   :  { %2485 = vmax.xlane.f32.xlu0 %v2484_v28 }
 0x974   :  { %v6653_v41 = vadd.f32 %v6424_v21, %v2465_v12 }
 0x975   :  { %v2434_v45 = vpop.f32.mrb[94].mxu0 }
 0x976   :  { %v2466_v7 = vmul.f32 0.35355338, %v2434_v45  ;;  %v4494_v18 = vpop.f32.mrb[95].mxu0  ;;  %v2487_v10 = vsel %vm666_vm6, %v6653_v41, -inf }
 0x977   :  { %2488 = vmax.xlane.f32.xlu0 %v2487_v10 }
 0x978   :  { %v6658_v44 = vadd.f32 %v6431_v34, %v2466_v7 }
 0x979   :  { %v2439_v60 = vpop.f32.mrb[96].mxu0 }
 0x97a   :  { %v2467_v15 = vmul.f32 0.35355338, %v2439_v60  ;;  %v4497_v29 = vpop.f32.mrb[97].mxu0  ;;  %v2490_v63 = vsel %vm666_vm6, %v6658_v44, -inf }
 0x97b   :  { %2491 = vmax.xlane.f32.xlu1 %v2490_v63 }
 0x97c   :  { %v6663_v21 = vadd.f32 %v6438_v13, %v2467_v15 }
 0x97d   :  { %v2444_v25 = vpop.f32.mrb[98].mxu0 }
 0x97e   :  { %v2468_v24 = vmul.f32 0.35355338, %v2444_v25  ;;  %v4500_v59 = vpop.f32.mrb[99].mxu0  ;;  %v2493_v23 = vsel %vm666_vm6, %v6663_v21, -inf }
 0x97f   :  { %2494 = vmax.xlane.f32.xlu0 %v2493_v23 }
 0x980   :  { %v6668_v34 = vadd.f32 %v6445_v1, %v2468_v24 }
 0x981   :  { %v2449_v37 = vpop.f32.mrb[100].mxu0 }
 0x982   :  { %v2469_v54 = vmul.f32 0.35355338, %v2449_v37  ;;  %v4503_v43 = vpop.f32.mrb[101].mxu0  ;;  %v2496_v53 = vsel %vm666_vm6, %v6668_v34, -inf }
 0x983   :  { %2497 = vmax.xlane.f32.xlu1 %v2496_v53 }
 0x984   :  { %v6673_v13 = vadd.f32 %v6452_v22, %v2469_v54 }
 0x985   :  { %v2454_v52 = vpop.f32.mrb[102].mxu0 }
 0x986   :  { %v2470_v57 = vmul.f32 0.35355338, %v2454_v52  ;;  %v4506_v26 = vpop.f32.mrb[103].mxu0  ;;  %v2499_v42 = vsel %vm666_vm6, %v6673_v13, -inf }
 0x987   :  { %2500 = vmax.xlane.f32.xlu0 %v2499_v42 }
 0x988   :  { %v6678_v1 = vadd.f32 %v6473_v49, %v2470_v57 }
 0x989   :  { %v2459_v40 = vpop.f32.mrb[104].mxu0 }
 0x98a   :  { %v2471_v62 = vmul.f32 0.35355338, %v2459_v40  ;;  %v4509_v38 = vpop.f32.mrb[105].mxu0  ;;  %v2502_v58 = vsel %vm666_vm6, %v6678_v1, -inf }
 0x98b   :  { %2503 = vmax.xlane.f32.xlu1 %v2502_v58 }
 0x98c   :  { %v6683_v22 = vadd.f32 %v6459_v33, %v2471_v62 }
 0x98e   :  { %v2505_v2 = vsel %vm691_vm7, %v6683_v22, -inf }
 0x98f   :  { %2506 = vmax.xlane.f32.xlu0 %v2505_v2 }
 0x99c   :  { %4999 = vrot.lane.b32.xlu1 %v5721_v39, %s5261_s25 }
 0x9a0   :  { %5004 = vrot.lane.b32.xlu1 %v5733_v47, %s5261_s25 }
 0x9a5   :  { %4994 = vrot.lane.b32.xlu0 %v5711_v51, %s5261_s25 }
 0x9e4   :  { %v2228_v49 = vpop.f32.mrb[74].mxu1 }
 0x9e5   :  { %v6694_v6 = vadd.f32 %v2228_v49, %v6386_v27  ;;  %v4440_v33 = vpop.f32.mrb[75].mxu1 }
 0x9e8   :  { %v2233_v0 = vpop.f32.mrb[76].mxu1 }
 0x9e9   :  { %v6697_v4 = vadd.f32 %v2233_v0, %v6388_v5  ;;  %v4443_v12 = vpop.f32.mrb[77].mxu1 }
 0x9ec   :  { %v2238_v9 = vpop.f32.mrb[78].mxu1 }
 0x9ed   :  { %v6700_v28 = vadd.f32 %v2238_v9, %v6390_v46  ;;  %v4446_v39 = vpop.f32.mrb[79].mxu1 }
 0x9f0   :  { %v2243_v45 = vpop.f32.mrb[80].mxu1 }
 0x9f1   :  { %v6703_v47 = vadd.f32 %v2243_v45, %v6392_v8  ;;  %v4449_v51 = vpop.f32.mrb[81].mxu1 }
 0x9f4   :  { %v2248_v7 = vpop.f32.mrb[82].mxu1 }
 0x9f5   :  { %v6706_v27 = vadd.f32 %v2248_v7, %v6394_v55  ;;  %v4452_v18 = vpop.f32.mrb[83].mxu1 }
 0x9f8   :  { %v2253_v10 = vpop.f32.mrb[84].mxu1 }
 0x9f9   :  { %v6709_v5 = vadd.f32 %v2253_v10, %v6396_v14  ;;  %v4455_v60 = vpop.f32.mrb[85].mxu1 }
 0x9fc   :  { %v2483_v15 = vpop.xlane.xlu1 %2482  ;;  %v2258_v29 = vpop.f32.mrb[86].mxu1 }
 0x9fd   :  { %v2508_v46 = vsub.f32 %v6643_v32, %v2483_v15  ;;  %v6713_v63 = vadd.f32 %v2258_v29, %v6398_v17  ;;  %v4458_v8 = vpop.f32.mrb[87].mxu1 }
 0x9ff   :  { %v2517_v25 = vmul.f32 1.442695, %v2508_v46 }
 0xa00   :  { %v2486_v24 = vpop.xlane.xlu0 %2485 }
 0xa01   :  { %5139 = vpow2.f32 %v2517_v25  ;;  %v2509_v55 = vsub.f32 %v6648_v11, %v2486_v24 }
 0xa03   :  { %v2519_v59 = vmul.f32 1.442695, %v2509_v55 }
 0xa04   :  { %v2489_v23 = vpop.xlane.xlu0 %2488 }
 0xa05   :  { %5141 = vpow2.f32 %v2519_v59  ;;  %v2510_v14 = vsub.f32 %v6653_v41, %v2489_v23 }
 0xa07   :  { %v2521_v37 = vmul.f32 1.442695, %v2510_v14 }
 0xa08   :  { %v2492_v54 = vpop.xlane.xlu1 %2491 }
 0xa09   :  { %5143 = vpow2.f32 %v2521_v37  ;;  %v2511_v43 = vsub.f32 %v6658_v44, %v2492_v54 }
 0xa0b   :  { %v6718_v32 = vpop.eup %5139  ;;  %v2523_v17 = vmul.f32 1.442695, %v2511_v43 }
 0xa0c   :  { %v2495_v53 = vpop.xlane.xlu0 %2494  ;;  %v2535_v52 = vsel %vm666_vm6, %v6718_v32, 0.0 }
 0xa0d   :  { %5145 = vpow2.f32 %v2523_v17  ;;  %v2512_v11 = vsub.f32 %v6663_v21, %v2495_v53  ;;  %2536 = vadd.xlane.f32.xlu1 %v2535_v52 }
 0xa0f   :  { %v6723_v57 = vpop.eup %5141  ;;  %v2525_v26 = vmul.f32 1.442695, %v2512_v11 }
 0xa10   :  { %v2498_v41 = vpop.xlane.xlu1 %2497  ;;  %v2538_v42 = vsel %vm666_vm6, %v6723_v57, 0.0 }
 0xa11   :  { %5147 = vpow2.f32 %v2525_v26  ;;  %v2513_v44 = vsub.f32 %v6668_v34, %v2498_v41  ;;  %2539 = vadd.xlane.f32.xlu0 %v2538_v42 }
 0xa13   :  { %v6728_v40 = vpop.eup %5143  ;;  %v2527_v62 = vmul.f32 1.442695, %v2513_v44 }
 0xa14   :  { %v2501_v38 = vpop.xlane.xlu0 %2500  ;;  %v2541_v58 = vsel %vm666_vm6, %v6728_v40, 0.0 }
 0xa15   :  { %5149 = vpow2.f32 %v2527_v62  ;;  %v2514_v21 = vsub.f32 %v6673_v13, %v2501_v38  ;;  %2542 = vadd.xlane.f32.xlu1 %v2541_v58 }
 0xa17   :  { %v6733_v2 = vpop.eup %5145  ;;  %v2529_v49 = vmul.f32 1.442695, %v2514_v21 }
 0xa18   :  { %v2544_v33 = vsel %vm666_vm6, %v6733_v2, 0.0  ;;  %v2504_v34 = vpop.xlane.xlu1 %2503 }
 0xa19   :  { %5151 = vpow2.f32 %v2529_v49  ;;  %2545 = vadd.xlane.f32.xlu1 %v2544_v33  ;;  %v2515_v53 = vsub.f32 %v6678_v1, %v2504_v34  ;;  %v473_v1 = vld [vmem:[%s7314_s7 + $0x18] sm:$0xff] }
 0xa1a   :  { %4556 = vmatpush3.msra.mxu0 %v473_v1 }
 0xa1b   :  { %v6737_v0 = vpop.eup %5147  ;;  %v2531_v52 = vmul.f32 1.442695, %v2515_v53  ;;  %4802 = vmatprep.subr.bf16.mxu0 %v7339_v56 }
 0xa1c   :  { %v2507_v12 = vpop.xlane.xlu0 %2506  ;;  %v2547_v9 = vsel %vm666_vm6, %v6737_v0, 0.0  ;;  %v5000_v13 = vpop.permute.xlu1 %4999 }
 0xa1d   :  { %2548 = vadd.xlane.f32.xlu0 %v2547_v9  ;;  %v5002_v60 = vunpack.i.h.bf16 %v5000_v13  ;;  %v5001_v15 = vunpack.i.l.bf16 %v5000_v13  ;;  %5153 = vpow2.f32 %v2531_v52 }
 0xa1f   :  { %v6741_v39 = vpop.eup %5149  ;;  %v4788_v25 = vpack.c.bf16 %v5002_v60, %v5001_v15 }
 0xa20   :  { %v4995_v45 = vpop.permute.xlu0 %4994  ;;  %v2550_v51 = vsel %vm666_vm6, %v6741_v39, 0.0  ;;  %v5005_v8 = vpop.permute.xlu1 %5004 }
 0xa21   :  { %v4997_v7 = vunpack.i.h.bf16 %v4995_v45  ;;  %2551 = vadd.xlane.f32.xlu1 %v2550_v51  ;;  %v4996_v18 = vunpack.i.l.bf16 %v4995_v45  ;;  %v5007_v24 = vunpack.i.h.bf16 %v5005_v8  ;;  %v5006_v55 = vunpack.i.l.bf16 %v5005_v8 }
 0xa23   :  { %v6745_v10 = vpop.eup %5151  ;;  %v4785_v29 = vpack.c.bf16 %v4997_v7, %v4996_v18  ;;  %v4791_v59 = vpack.c.bf16 %v5007_v24, %v5006_v55 }
 0xa24   :  { %v2553_v46 = vsel %vm666_vm6, %v6745_v10, 0.0 }
 0xa25   :  { %2554 = vadd.xlane.f32.xlu1 %v2553_v46  ;;  %4786 = vmatpush3.bf16.msra.mxu1 %v4785_v29 }
 0xa26   :  { %4787 = vmatprep.subr.bf16.mxu1 %v7339_v56 }
 0xa27   :  { %v6764_v26 = vpop.eup %5153 }
 0xa29   :  { %4789 = vmatpush3.bf16.msra.mxu1 %v4788_v25 }
 0xa2a   :  { %4790 = vmatprep.subr.bf16.mxu1 %v7339_v56 }
 0xa2d   :  { %v2263_v23 = vpop.f32.mrb[88].mxu1  ;;  %4792 = vmatpush3.bf16.msra.mxu1 %v4791_v59 }
 0xa2e   :  { %v6752_v14 = vadd.f32 %v2263_v23, %v6400_v3  ;;  %v4461_v37 = vpop.f32.mrb[89].mxu1  ;;  %4793 = vmatprep.subr.bf16.mxu1 %v7339_v56  ;;  %v2516_v3 = vsub.f32 %v6683_v22, %v2507_v12 }
 0xa30   :  { %v2533_v11 = vmul.f32 1.442695, %v2516_v3 }
 0xa32   :  { %5155 = vpow2.f32 %v2533_v11 }
 0xa33   :  { %5009 = vrot.lane.b32.xlu0 %v5743_v20, %s5261_s25  ;;  %v2556_v20 = vsel %vm666_vm6, %v6764_v26, 0.0 }
 0xa36   :  { %2596 = vrot.lane.b32.xlu1 %v5753_v61, %s5261_s25 }
 0xa39   :  { %v2268_v54 = vpop.f32.mrb[90].mxu1 }
 0xa3a   :  { %v6760_v43 = vadd.f32 %v2268_v54, %v6402_v50  ;;  %v4464_v17 = vpop.f32.mrb[91].mxu1 }
 0xa3c   :  { %v6768_v61 = vpop.eup %5155 }
 0xa3d   :  { %v2559_v50 = vsel %vm691_vm7, %v6768_v61, 0.0 }
 0xa52   :  { %2557 = vadd.xlane.f32.xlu0 %v2556_v20 }
 0xa5a   :  { %2560 = vadd.xlane.f32.xlu1 %v2559_v50 }
 0xa9a   :  { %v2537_v22 = vpop.xlane.xlu1 %2536 }
 0xa9b   :  { %5157 = vrcp.f32 %v2537_v22 }
 0xa9e   :  { %v2540_v42 = vpop.xlane.xlu0 %2539 }
 0xa9f   :  { %5159 = vrcp.f32 %v2540_v42 }
 0xaa2   :  { %v2543_v41 = vpop.xlane.xlu1 %2542 }
 0xaa3   :  { %5161 = vrcp.f32 %v2543_v41 }
 0xaa5   :  { %v5158_v12 = vpop.eup %5157 }
 0xaa6   :  { %v2546_v44 = vpop.xlane.xlu1 %2545  ;;  %v2571_v9 = vmul.f32 %v5158_v12, %v6718_v32 }
 0xaa7   :  { %5163 = vrcp.f32 %v2546_v44 }
 0xaa9   :  { %v5160_v45 = vpop.eup %5159 }
 0xaaa   :  { %v2549_v62 = vpop.xlane.xlu0 %2548  ;;  %v2572_v51 = vmul.f32 %v5160_v45, %v6723_v57 }
 0xaab   :  { %5165 = vrcp.f32 %v2549_v62 }
 0xaad   :  { %v5162_v7 = vpop.eup %5161 }
 0xaae   :  { %v2552_v38 = vpop.xlane.xlu1 %2551  ;;  %v5010_v58 = vpop.permute.xlu0 %5009  ;;  %v2573_v32 = vmul.f32 %v5162_v7, %v6728_v40 }
 0xaaf   :  { %v5012_v21 = vunpack.i.h.bf16 %v5010_v58  ;;  %v5011_v49 = vunpack.i.l.bf16 %v5010_v58  ;;  %5167 = vrcp.f32 %v2552_v38  ;;  %v6846_v58 = vld [vmem:[%s7315_s8] ss:$0 sm:$0xff] }
 0xab1   :  { %v4794_v33 = vpack.c.bf16 %v5012_v21, %v5011_v49  ;;  %v5164_v18 = vpop.eup %5163  ;;  %v5238_v21 = vld [vmem:[%s7305_s0] sm:$0xff] }
 0xab2   :  { %v2555_v34 = vpop.xlane.xlu1 %2554  ;;  %v2574_v60 = vmul.f32 %v5164_v18, %v6733_v2 }
 0xab3   :  { %4795 = vmatpush3.bf16.msra.mxu1 %v4794_v33  ;;  %5169 = vrcp.f32 %v2555_v34 }
 0xab4   :  { %4526 = vmatprep.subr.mxu1 %v7340_v48 }
 0xab5   :  { %v5166_v15 = vpop.eup %5165 }
 0xab6   :  { %v2597_v13 = vpop.permute.xlu1 %2596  ;;  %v2575_v57 = vmul.f32 %v5166_v15, %v6737_v0 }
 0xab7   :  { %4527 = vmatpush3.msk.msra.mxu1 %vm820_vm5, %v2597_v13 }
 0xab8   :  { %4529 = vmatmul.mubr.msk.f32.vlgmr.msra.gmra.mrb[92].mxu1 %vm666_vm6, %v2571_v9  ;;  %4796 = vmatprep.subr.bf16.mxu1 %v7339_v56 }
 0xab9   :  { %4531 = vmatprep.mubr.msk.f32.mxu1 %vm5249_vm2, %v7340_v48  ;;  %v5168_v29 = vpop.eup %5167 }
 0xaba   :  { %v2576_v40 = vmul.f32 %v5168_v29, %v6741_v39 }
 0xabc   :  { %4532 = vmatmul.mubr.msk.f32.gmra.mrb[94].mxu1 %vm666_vm6, %v2572_v51 }
 0xabd   :  { %4534 = vmatprep.mubr.msk.f32.mxu1 %vm5249_vm2, %v7340_v48  ;;  %v5170_v46 = vpop.eup %5169 }
 0xabe   :  { %v2577_v2 = vmul.f32 %v5170_v46, %v6745_v10 }
 0xac0   :  { %4535 = vmatmul.mubr.msk.f32.gmra.mrb[96].mxu1 %vm666_vm6, %v2573_v32 }
 0xac1   :  { %4537 = vmatprep.mubr.msk.f32.mxu1 %vm5249_vm2, %v7340_v48 }
 0xac4   :  { %4538 = vmatmul.mubr.msk.f32.gmra.mrb[98].mxu1 %vm666_vm6, %v2574_v60 }
 0xac5   :  { %4540 = vmatprep.mubr.msk.f32.mxu1 %vm5249_vm2, %v7340_v48 }
 0xac8   :  { %4541 = vmatmul.mubr.msk.f32.gmra.mrb[100].mxu1 %vm666_vm6, %v2575_v57 }
 0xac9   :  { %4543 = vmatprep.mubr.msk.f32.mxu1 %vm5249_vm2, %v7340_v48 }
 0xacc   :  { %4544 = vmatmul.mubr.msk.f32.gmra.mrb[102].mxu1 %vm666_vm6, %v2576_v40 }
 0xacd   :  { %4546 = vmatprep.mubr.msk.f32.mxu1 %vm5249_vm2, %v7340_v48 }
 0xad0   :  { %4547 = vmatmul.mubr.msk.f32.gmra.mrb[104].mxu1 %vm666_vm6, %v2577_v2 }
 0xad1   :  { %4549 = vmatprep.mubr.msk.f32.mxu1 %vm5249_vm2, %v7340_v48 }
 0xadf   :  { %v2558_v0 = vpop.xlane.xlu0 %2557 }
 0xae0   :  { %5171 = vrcp.f32 %v2558_v0 }
 0xae7   :  { %v2561_v8 = vpop.xlane.xlu1 %2560 }
 0xae8   :  { %5173 = vrcp.f32 %v2561_v8 }
 0xaea   :  { %v5172_v25 = vpop.eup %5171 }
 0xaeb   :  { %v2578_v39 = vmul.f32 %v5172_v25, %v6764_v26 }
 0xaed   :  { %4550 = vmatmul.mubr.msk.f32.gmra.mrb[106].mxu1 %vm666_vm6, %v2578_v39 }
 0xaee   :  { %4552 = vmatprep.mubr.msk.f32.mxu1 %vm5249_vm2, %v7340_v48 }
 0xaf2   :  { %v5174_v24 = vpop.eup %5173 }
 0xaf3   :  { %v2579_v10 = vmul.f32 %v5174_v24, %v6768_v61 }
 0xaf5   :  { %4553 = vmatmul.mubr.msk.f32.gmra.mrb[108].mxu1 %vm666_vm6, %v2579_v10 }
 0xaf6   :  { %4592 = vmatprep.mubr.msk.f32.mxu1 %vm5249_vm2, %v7340_v48 }
 0xb8b   :  { %v2701_v55 = vpop.f32.mrb[92].mxu1 }
 0xb8c   :  { %v4530_v59 = vpop.f32.mrb[93].mxu1  ;;  %4558 = vmatmul.mubr.msk.f32.vlgmr.msra.gmra.mrb[106].mxu0 %vm501_vm3, %v2701_v55 }
 0xb8d   :  { %4560 = vmatprep.mubr.msk.f32.mxu0 %vm5249_vm2, %v7340_v48 }
 0xb8f   :  { %v2706_v23 = vpop.f32.mrb[94].mxu1 }
 0xb90   :  { %v4533_v37 = vpop.f32.mrb[95].mxu1  ;;  %4561 = vmatmul.mubr.msk.f32.gmra.mrb[108].mxu0 %vm501_vm3, %v2706_v23 }
 0xb91   :  { %4563 = vmatprep.mubr.msk.f32.mxu0 %vm5249_vm2, %v7340_v48 }
 0xb93   :  { %v2711_v54 = vpop.f32.mrb[96].mxu1 }
 0xb94   :  { %v4536_v17 = vpop.f32.mrb[97].mxu1  ;;  %4564 = vmatmul.mubr.msk.f32.gmra.mrb[110].mxu0 %vm501_vm3, %v2711_v54 }
 0xb95   :  { %4566 = vmatprep.mubr.msk.f32.mxu0 %vm5249_vm2, %v7340_v48 }
 0xb97   :  { %v2716_v53 = vpop.f32.mrb[98].mxu1 }
 0xb98   :  { %v4539_v52 = vpop.f32.mrb[99].mxu1  ;;  %4567 = vmatmul.mubr.msk.f32.gmra.mrb[112].mxu0 %vm501_vm3, %v2716_v53 }
 0xb99   :  { %4569 = vmatprep.mubr.msk.f32.mxu0 %vm5249_vm2, %v7340_v48 }
 0xb9b   :  { %v2721_v3 = vpop.f32.mrb[100].mxu1 }
 0xb9c   :  { %v4542_v11 = vpop.f32.mrb[101].mxu1  ;;  %4570 = vmatmul.mubr.msk.f32.gmra.mrb[114].mxu0 %vm501_vm3, %v2721_v3 }
 0xb9d   :  { %4572 = vmatprep.mubr.msk.f32.mxu0 %vm5249_vm2, %v7340_v48 }
 0xb9f   :  { %v2726_v26 = vpop.f32.mrb[102].mxu1 }
 0xba0   :  { %v4545_v20 = vpop.f32.mrb[103].mxu1  ;;  %4573 = vmatmul.mubr.msk.f32.gmra.mrb[116].mxu0 %vm501_vm3, %v2726_v26 }
 0xba1   :  { %4575 = vmatprep.mubr.msk.f32.mxu0 %vm5249_vm2, %v7340_v48 }
 0xba3   :  { %v2731_v61 = vpop.f32.mrb[104].mxu1 }
 0xba4   :  { %v4548_v50 = vpop.f32.mrb[105].mxu1  ;;  %4576 = vmatmul.mubr.msk.f32.gmra.mrb[118].mxu0 %vm501_vm3, %v2731_v61 }
 0xba5   :  { %4578 = vmatprep.mubr.msk.f32.mxu0 %vm5249_vm2, %v7340_v48 }
 0xbc0   :  { %v2736_v1 = vpop.f32.mrb[106].mxu1 }
 0xbc1   :  { %v4551_v22 = vpop.f32.mrb[107].mxu1  ;;  %4579 = vmatmul.mubr.msk.f32.gmra.mrb[120].mxu0 %vm501_vm3, %v2736_v1 }
 0xbc2   :  { %4581 = vmatprep.mubr.msk.f32.mxu0 %vm5249_vm2, %v7340_v48 }
 0xbc8   :  { %v2741_v41 = vpop.f32.mrb[108].mxu1 }
 0xbc9   :  { %v4554_v42 = vpop.f32.mrb[109].mxu1  ;;  %4582 = vmatmul.mubr.msk.f32.gmra.mrb[122].mxu0 %vm501_vm3, %v2741_v41 }
 0xbca   :  { %4651 = vmatprep.mubr.msk.f32.mxu0 %vm5249_vm2, %v7340_v48  ;;  %v5245_v42 = vld [vmem:[%s7305_s0 + $0x38] sm:$0xff] }
 0xc5f   :  { %v2838_v44 = vpop.f32.mrb[106].mxu0 }
 0xc60   :  { %v2882_v62 = vadd.f32 %v2838_v44, %v6694_v6  ;;  %v4559_v38 = vpop.f32.mrb[107].mxu0  ;;  %v5239_v6 = vld [vmem:[%s7305_s0 + $0x8] sm:$0xff] }
 0xc62   :  { %v2891_v49 = vadd.f32 %v5238_v21, %v2882_v62 }
 0xc63   :  { %v2843_v33 = vpop.f32.mrb[108].mxu0 }
 0xc64   :  { %v6852_v34 = vadd.f32 %v6846_v58, %v2891_v49  ;;  %v2883_v12 = vadd.f32 %v2843_v33, %v6697_v4  ;;  %v4562_v9 = vpop.f32.mrb[109].mxu0  ;;  %v5240_v4 = vld [vmem:[%s7305_s0 + $0x10] sm:$0xff] }
 0xc66   :  { %v2892_v13 = vadd.f32 %v5239_v6, %v2883_v12  ;;  %v2978_v45 = vsel %vm175_vm0, %v6852_v34, 0.0 }
 0xc67   :  { %2979 = vadd.xlane.f32.xlu0 %v2978_v45  ;;  %v2848_v51 = vpop.f32.mrb[110].mxu0 }
 0xc68   :  { %v6861_v7 = vadd.f32 %v6846_v58, %v2892_v13  ;;  %v2884_v32 = vadd.f32 %v2848_v51, %v6700_v28  ;;  %v4565_v18 = vpop.f32.mrb[111].mxu0  ;;  %v5241_v28 = vld [vmem:[%s7305_s0 + $0x18] sm:$0xff] }
 0xc6a   :  { %v2893_v60 = vadd.f32 %v5240_v4, %v2884_v32  ;;  %v2981_v15 = vsel %vm175_vm0, %v6861_v7, 0.0 }
 0xc6b   :  { %2982 = vadd.xlane.f32.xlu0 %v2981_v15  ;;  %v2853_v57 = vpop.f32.mrb[112].mxu0 }
 0xc6c   :  { %v6870_v29 = vadd.f32 %v6846_v58, %v2893_v60  ;;  %v2885_v40 = vadd.f32 %v2853_v57, %v6703_v47  ;;  %v4568_v46 = vpop.f32.mrb[113].mxu0  ;;  %v5242_v47 = vld [vmem:[%s7305_s0 + $0x20] sm:$0xff] }
 0xc6e   :  { %v2894_v2 = vadd.f32 %v5241_v28, %v2885_v40  ;;  %v2984_v0 = vsel %vm175_vm0, %v6870_v29, 0.0 }
 0xc6f   :  { %2985 = vadd.xlane.f32.xlu0 %v2984_v0  ;;  %v2858_v8 = vpop.f32.mrb[114].mxu0 }
 0xc70   :  { %v6879_v25 = vadd.f32 %v6846_v58, %v2894_v2  ;;  %v2886_v39 = vadd.f32 %v2858_v8, %v6706_v27  ;;  %v4571_v24 = vpop.f32.mrb[115].mxu0  ;;  %v5243_v27 = vld [vmem:[%s7305_s0 + $0x28] sm:$0xff] }
 0xc72   :  { %v2895_v10 = vadd.f32 %v5242_v47, %v2886_v39  ;;  %v2987_v55 = vsel %vm175_vm0, %v6879_v25, 0.0 }
 0xc73   :  { %2988 = vadd.xlane.f32.xlu0 %v2987_v55  ;;  %v2863_v59 = vpop.f32.mrb[116].mxu0 }
 0xc74   :  { %v6888_v23 = vadd.f32 %v6846_v58, %v2895_v10  ;;  %v2887_v37 = vadd.f32 %v2863_v59, %v6709_v5  ;;  %v4574_v54 = vpop.f32.mrb[117].mxu0  ;;  %v5244_v5 = vld [vmem:[%s7305_s0 + $0x30] sm:$0xff] }
 0xc76   :  { %v2896_v17 = vadd.f32 %v5243_v27, %v2887_v37  ;;  %v2990_v53 = vsel %vm175_vm0, %v6888_v23, 0.0 }
 0xc77   :  { %2991 = vadd.xlane.f32.xlu1 %v2990_v53  ;;  %v2868_v52 = vpop.f32.mrb[118].mxu0 }
 0xc78   :  { %v6897_v3 = vadd.f32 %v6846_v58, %v2896_v17  ;;  %v2888_v11 = vadd.f32 %v2868_v52, %v6713_v63  ;;  %v4577_v26 = vpop.f32.mrb[119].mxu0 }
 0xc7a   :  { %v2897_v20 = vadd.f32 %v5244_v5, %v2888_v11  ;;  %v2993_v61 = vsel %vm175_vm0, %v6897_v3, 0.0 }
 0xc7b   :  { %2994 = vadd.xlane.f32.xlu0 %v2993_v61 }
 0xc7c   :  { %v6906_v50 = vadd.f32 %v6846_v58, %v2897_v20 }
 0xc7e   :  { %v2996_v1 = vsel %vm175_vm0, %v6906_v50, 0.0 }
 0xc7f   :  { %2997 = vadd.xlane.f32.xlu1 %v2996_v1 }
 0xc94   :  { %v2873_v22 = vpop.f32.mrb[120].mxu0 }
 0xc95   :  { %v2889_v63 = vadd.f32 %v2873_v22, %v6752_v14  ;;  %v4580_v41 = vpop.f32.mrb[121].mxu0  ;;  %v5246_v14 = vld [vmem:[%s7305_s0 + $0x40] sm:$0xf] }
 0xc96   :  { %v3113_v22 = vld [vmem:[%s7316_s11] sm:$0xff] }
 0xc97   :  { %v2898_v44 = vadd.f32 %v5245_v42, %v2889_v63  ;;  %v3114_v63 = vld [vmem:[%s7316_s11 + $0x8] sm:$0xff]  ;;  %v3115_v42 = vld [vmem:[%s7316_s11 + $0x10] sm:$0xff] }
 0xc98   :  { %v4797_v41 = vpack.c.bf16 %v3114_v63, %v3113_v22 }
 0xc99   :  { %v6915_v62 = vadd.f32 %v6846_v58, %v2898_v44  ;;  %v3116_v44 = vld [vmem:[%s7316_s11 + $0x18] sm:$0xff] }
 0xc9a   :  { %4798 = vmatpush3.bf16.msra.mxu1 %v4797_v41 }
 0xc9b   :  { %v2999_v38 = vsel %vm175_vm0, %v6915_v62, 0.0  ;;  %4799 = vmatprep.subr.bf16.mxu1 %v7339_v56 }
 0xc9c   :  { %3000 = vadd.xlane.f32.xlu0 %v2999_v38  ;;  %v2878_v21 = vpop.f32.mrb[122].mxu0  ;;  %v4800_v38 = vpack.c.bf16 %v3116_v44, %v3115_v42 }
 0xc9d   :  { %v2890_v49 = vadd.f32 %v2878_v21, %v6760_v43  ;;  %v4583_v33 = vpop.f32.mrb[123].mxu0 }
 0xc9e   :  { %4801 = vmatpush3.bf16.msra.mxu1 %v4800_v38 }
 0xc9f   :  { %v2899_v12 = vadd.f32 %v5246_v14, %v2890_v49 }
 0xca1   :  { %v6924_v9 = vadd.f32 %v6846_v58, %v2899_v12 }
 0xca3   :  { %v3002_v6 = vsel %vm200_vm1, %v6924_v9, 0.0 }
 0xca4   :  { %3003 = vadd.xlane.f32.xlu1 %v3002_v6 }
 0xcf4   :  { %v2980_v13 = vpop.xlane.xlu0 %2979 }
 0xcf5   :  { %v3005_v45 = vmul.f32 0.03125, %v2980_v13 }
 0xcf7   :  { %v6929_v51 = vsub.f32 %v6852_v34, %v3005_v45 }
 0xcf8   :  { %v2983_v32 = vpop.xlane.xlu0 %2982 }
 0xcf9   :  { %v3006_v43 = vmul.f32 0.03125, %v2983_v32  ;;  %v3023_v18 = vmul.f32 %v6929_v51, %v6929_v51 }
 0xcfb   :  { %v6934_v4 = vsub.f32 %v6861_v7, %v3006_v43  ;;  %v3032_v58 = vsel %vm175_vm0, %v3023_v18, 0.0 }
 0xcfc   :  { %v2986_v60 = vpop.xlane.xlu0 %2985  ;;  %3033 = vadd.xlane.f32.xlu0 %v3032_v58 }
 0xcfd   :  { %v3007_v15 = vmul.f32 0.03125, %v2986_v60  ;;  %v3024_v57 = vmul.f32 %v6934_v4, %v6934_v4 }
 0xcff   :  { %v6940_v40 = vsub.f32 %v6870_v29, %v3007_v15  ;;  %v3035_v46 = vsel %vm175_vm0, %v3024_v57, 0.0 }
 0xd00   :  { %v2989_v28 = vpop.xlane.xlu0 %2988  ;;  %3036 = vadd.xlane.f32.xlu1 %v3035_v46 }
 0xd01   :  { %v3008_v2 = vmul.f32 0.03125, %v2989_v28  ;;  %v3025_v0 = vmul.f32 %v6940_v40, %v6940_v40 }
 0xd03   :  { %v6946_v8 = vsub.f32 %v6879_v25, %v3008_v2  ;;  %v3038_v39 = vsel %vm175_vm0, %v3025_v0, 0.0 }
 0xd04   :  { %v2992_v24 = vpop.xlane.xlu1 %2991  ;;  %3039 = vadd.xlane.f32.xlu0 %v3038_v39 }
 0xd05   :  { %v3009_v47 = vmul.f32 0.03125, %v2992_v24  ;;  %v3026_v10 = vmul.f32 %v6946_v8, %v6946_v8 }
 0xd07   :  { %v6952_v55 = vsub.f32 %v6888_v23, %v3009_v47  ;;  %v3041_v59 = vsel %vm175_vm0, %v3026_v10, 0.0 }
 0xd08   :  { %v2995_v37 = vpop.xlane.xlu0 %2994  ;;  %3042 = vadd.xlane.f32.xlu1 %v3041_v59 }
 0xd09   :  { %v3010_v54 = vmul.f32 0.03125, %v2995_v37  ;;  %v3027_v27 = vmul.f32 %v6952_v55, %v6952_v55 }
 0xd0b   :  { %v6958_v17 = vsub.f32 %v6897_v3, %v3010_v54  ;;  %v3044_v53 = vsel %vm175_vm0, %v3027_v27, 0.0 }
 0xd0c   :  { %v2998_v52 = vpop.xlane.xlu1 %2997  ;;  %3045 = vadd.xlane.f32.xlu0 %v3044_v53 }
 0xd0d   :  { %v3011_v11 = vmul.f32 0.03125, %v2998_v52  ;;  %v3028_v26 = vmul.f32 %v6958_v17, %v6958_v17 }
 0xd0f   :  { %v6964_v5 = vsub.f32 %v6906_v50, %v3011_v11  ;;  %v3047_v20 = vsel %vm175_vm0, %v3028_v26, 0.0 }
 0xd10   :  { %3048 = vadd.xlane.f32.xlu1 %v3047_v20 }
 0xd11   :  { %v3029_v61 = vmul.f32 %v6964_v5, %v6964_v5 }
 0xd13   :  { %v3050_v1 = vsel %vm175_vm0, %v3029_v61, 0.0 }
 0xd14   :  { %3051 = vadd.xlane.f32.xlu0 %v3050_v1 }
 0xd29   :  { %v3001_v21 = vpop.xlane.xlu0 %3000 }
 0xd2a   :  { %v3012_v49 = vmul.f32 0.03125, %v3001_v21 }
 0xd2c   :  { %v6984_v33 = vsub.f32 %v6915_v62, %v3012_v49  ;;  %v7342_v49 = vld [vmem:[#allocation3_spill] sm:$0xff] }
 0xd2e   :  { %v3030_v14 = vmul.f32 %v6984_v33, %v6984_v33 }
 0xd30   :  { %v3053_v12 = vsel %vm175_vm0, %v3030_v14, 0.0 }
 0xd31   :  { %3054 = vadd.xlane.f32.xlu1 %v3053_v12  ;;  %v3004_v6 = vpop.xlane.xlu1 %3003  ;;  %v7343_v12 = vld [vmem:[#allocation4_spill] sm:$0xff] }
 0xd32   :  { %v3013_v13 = vmul.f32 0.03125, %v3004_v6 }
 0xd34   :  { %v6990_v45 = vsub.f32 %v6924_v9, %v3013_v13 }
 0xd36   :  { %v3031_v32 = vmul.f32 %v6990_v45, %v6990_v45 }
 0xd38   :  { %v3056_v43 = vsel %vm200_vm1, %v3031_v32, 0.0 }
 0xd39   :  { %3057 = vadd.xlane.f32.xlu0 %v3056_v43  ;;  %v7345_v43 = vld [vmem:[#allocation5_spill] sm:$0xff] }
 0xd89   :  { %v3034_v18 = vpop.xlane.xlu0 %3033 }
 0xd8a   :  { %v3059_v58 = vmul.f32 0.03125, %v3034_v18 }
 0xd8c   :  { %v3068_v60 = vadd.f32 1e-06, %v3059_v58 }
 0xd8d   :  { %v3037_v15 = vpop.xlane.xlu1 %3036 }
 0xd8e   :  { %5175 = vrsqrt.f32 %v3068_v60  ;;  %v3060_v57 = vmul.f32 0.03125, %v3037_v15 }
 0xd90   :  { %v3069_v46 = vadd.f32 1e-06, %v3060_v57  ;;  %v7347_v57 = vld [vmem:[#allocation6_spill] sm:$0xff] }
 0xd91   :  { %v3040_v28 = vpop.xlane.xlu0 %3039 }
 0xd92   :  { %5177 = vrsqrt.f32 %v3069_v46  ;;  %v3061_v2 = vmul.f32 0.03125, %v3040_v28 }
 0xd94   :  { %v3070_v0 = vadd.f32 1e-06, %v3061_v2 }
 0xd95   :  { %v3043_v39 = vpop.xlane.xlu1 %3042 }
 0xd96   :  { %5179 = vrsqrt.f32 %v3070_v0  ;;  %v3062_v24 = vmul.f32 0.03125, %v3043_v39 }
 0xd98   :  { %v5176_v47 = vpop.eup %5175  ;;  %v3071_v10 = vadd.f32 1e-06, %v3062_v24 }
 0xd99   :  { %v3086_v59 = vmul.f32 %v5176_v47, %v6929_v51  ;;  %v3046_v37 = vpop.xlane.xlu0 %3045 }
 0xd9a   :  { %5181 = vrsqrt.f32 %v3071_v10  ;;  %v3063_v54 = vmul.f32 0.03125, %v3046_v37  ;;  %v7349_v37 = vld [vmem:[#allocation7_spill] sm:$0xff] }
 0xd9b   :  { %v3095_v27 = vmul.f32 %v3086_v59, %v5494_v30 }
 0xd9c   :  { %v5178_v53 = vpop.eup %5177  ;;  %v3072_v52 = vadd.f32 1e-06, %v3063_v54 }
 0xd9d   :  { %v3104_v11 = vadd.f32 %v3095_v27, %v5497_v31  ;;  %v3049_v26 = vpop.xlane.xlu1 %3048  ;;  %v3087_v20 = vmul.f32 %v5178_v53, %v6934_v4  ;;  %v7350_v27 = vld [vmem:[#allocation11_spill] sm:$0xff] }
 0xd9e   :  { %5183 = vrsqrt.f32 %v3072_v52  ;;  %v3064_v61 = vmul.f32 0.03125, %v3049_v26  ;;  %v7351_v26 = vld [vmem:[#allocation12_spill] sm:$0xff] }
 0xd9f   :  { %4593 = vmatmul.mubr.msk.f32.vlgmr.msra.gmra.mrb[110].mxu1 %vm175_vm0, %v3104_v11  ;;  %v3096_v1 = vmul.f32 %v3087_v20, %v5469_v16 }
 0xda0   :  { %v5180_v22 = vpop.eup %5179  ;;  %v3073_v51 = vadd.f32 1e-06, %v3064_v61  ;;  %4595 = vmatprep.mubr.msk.f32.mxu1 %vm5249_vm2, %v7340_v48  ;;  %v7352_v61 = vld [vmem:[#allocation13_spill] sm:$0xff] }
 0xda1   :  { %v3052_v63 = vpop.xlane.xlu0 %3051  ;;  %v3105_v30 = vadd.f32 %v3096_v1, %v5474_v19  ;;  %v3088_v41 = vmul.f32 %v5180_v22, %v6940_v40  ;;  %v7341_v19 = vld [vmem:[#allocation2_spill] sm:$0xff]  ;;  %v3505_v22 = vld [vmem:[%s7317_s13 + $0x8] sm:$0xff] }
 0xda2   :  { %5185 = vrsqrt.f32 %v3073_v51  ;;  %v3065_v31 = vmul.f32 0.03125, %v3052_v63  ;;  %v3507_v63 = vld [vmem:[%s7317_s13 + $0x18] sm:$0xff] }
 0xda3   :  { %4596 = vmatmul.mubr.msk.f32.gmra.mrb[112].mxu1 %vm175_vm0, %v3105_v30  ;;  %v3097_v4 = vmul.f32 %v3088_v41, %v5506_v35  ;;  %v3508_v41 = vld [vmem:[%s7317_s13 + $0x20] sm:$0xff] }
 0xda4   :  { %v5182_v42 = vpop.eup %5181  ;;  %v3074_v44 = vadd.f32 1e-06, %v3065_v31  ;;  %4598 = vmatprep.mubr.msk.f32.mxu1 %vm5249_vm2, %v7340_v48  ;;  %v3509_v31 = vld [vmem:[%s7317_s13 + $0x28] sm:$0xff] }
 0xda5   :  { %v3106_v16 = vadd.f32 %v3097_v4, %v5509_v36  ;;  %v3089_v38 = vmul.f32 %v5182_v42, %v6946_v8  ;;  %v7344_v8 = vld [vmem:[#allocation8_spill] sm:$0xff]  ;;  %v4809_v4 = vpack.c.bf16 %v3509_v31, %v3508_v41 }
 0xda6   :  { %5187 = vrsqrt.f32 %v3074_v44  ;;  %v3510_v42 = vld [vmem:[%s7317_s13 + $0x30] sm:$0xff]  ;;  %v3511_v44 = vld [vmem:[%s7317_s13 + $0x38] sm:$0xff] }
 0xda7   :  { %4599 = vmatmul.mubr.msk.f32.gmra.mrb[114].mxu1 %vm175_vm0, %v3106_v16  ;;  %v3098_v40 = vmul.f32 %v3089_v38, %v7341_v19  ;;  %v4812_v16 = vpack.c.bf16 %v3511_v44, %v3510_v42  ;;  %v3512_v38 = vld [vmem:[%s7317_s13 + $0x40] sm:$0xff]  ;;  %v3513_v19 = vld [vmem:[%s7317_s13 + $0x48] sm:$0xff] }
 0xda8   :  { %v5184_v21 = vpop.eup %5183  ;;  %4601 = vmatprep.mubr.msk.f32.mxu1 %vm5249_vm2, %v7340_v48 }
 0xda9   :  { %v3107_v35 = vadd.f32 %v3098_v40, %v7342_v49  ;;  %v3090_v14 = vmul.f32 %v5184_v21, %v6952_v55  ;;  %v7346_v55 = vld [vmem:[#allocation9_spill] sm:$0xff]  ;;  %v4815_v40 = vpack.c.bf16 %v3513_v19, %v3512_v38  ;;  %v3514_v21 = vld [vmem:[%s7317_s13 + $0x50] sm:$0xff] }
 0xdaa   :  { %v3515_v49 = vld [vmem:[%s7317_s13 + $0x58] sm:$0xff] }
 0xdab   :  { %4602 = vmatmul.mubr.msk.f32.gmra.mrb[116].mxu1 %vm175_vm0, %v3107_v35  ;;  %v3099_v6 = vmul.f32 %v3090_v14, %v7343_v12  ;;  %v4818_v35 = vpack.c.bf16 %v3515_v49, %v3514_v21  ;;  %v3516_v14 = vld [vmem:[%s7317_s13 + $0x60] sm:$0xff]  ;;  %v3517_v12 = vld [vmem:[%s7317_s13 + $0x68] sm:$0xff] }
 0xdac   :  { %v5186_v36 = vpop.eup %5185  ;;  %4604 = vmatprep.mubr.msk.f32.mxu1 %vm5249_vm2, %v7340_v48 }
 0xdad   :  { %v3108_v13 = vadd.f32 %v3099_v6, %v7344_v8  ;;  %v3091_v32 = vmul.f32 %v5186_v36, %v6958_v17  ;;  %v7348_v17 = vld [vmem:[#allocation10_spill] sm:$0xff]  ;;  %v4821_v6 = vpack.c.bf16 %v3517_v12, %v3516_v14  ;;  %v3518_v36 = vld [vmem:[%s7317_s13 + $0x70] sm:$0xff]  ;;  %v3519_v8 = vld [vmem:[%s7317_s13 + $0x78] sm:$0xff] }
 0xdaf   :  { %4605 = vmatmul.mubr.msk.f32.gmra.mrb[118].mxu1 %vm175_vm0, %v3108_v13  ;;  %v3100_v18 = vmul.f32 %v3091_v32, %v7345_v43  ;;  %v4824_v13 = vpack.c.bf16 %v3519_v8, %v3518_v36  ;;  %v7105_v32 = vld [vmem:[%s7318_s12] ss:$0 sm:$0xff] }
 0xdb0   :  { %v5188_v58 = vpop.eup %5187  ;;  %4607 = vmatprep.mubr.msk.f32.mxu1 %vm5249_vm2, %v7340_v48 }
 0xdb1   :  { %v3109_v60 = vadd.f32 %v3100_v18, %v7346_v55  ;;  %v3092_v15 = vmul.f32 %v5188_v58, %v6964_v5 }
 0xdb3   :  { %4608 = vmatmul.mubr.msk.f32.gmra.mrb[120].mxu1 %vm175_vm0, %v3109_v60  ;;  %v3101_v46 = vmul.f32 %v3092_v15, %v7347_v57 }
 0xdb4   :  { %4610 = vmatprep.mubr.msk.f32.mxu1 %vm5249_vm2, %v7340_v48 }
 0xdb5   :  { %v3110_v28 = vadd.f32 %v3101_v46, %v7348_v17 }
 0xdb7   :  { %4611 = vmatmul.mubr.msk.f32.gmra.mrb[122].mxu1 %vm175_vm0, %v3110_v28 }
 0xdb8   :  { %4613 = vmatprep.mubr.msk.f32.mxu1 %vm5249_vm2, %v7340_v48 }
 0xdbe   :  { %v3055_v2 = vpop.xlane.xlu1 %3054 }
 0xdbf   :  { %v3066_v0 = vmul.f32 0.03125, %v3055_v2 }
 0xdc1   :  { %v3075_v39 = vadd.f32 1e-06, %v3066_v0 }
 0xdc3   :  { %5189 = vrsqrt.f32 %v3075_v39 }
 0xdc6   :  { %v3058_v24 = vpop.xlane.xlu0 %3057 }
 0xdc7   :  { %v3067_v5 = vmul.f32 0.03125, %v3058_v24 }
 0xdc9   :  { %v3076_v47 = vadd.f32 1e-06, %v3067_v5 }
 0xdcb   :  { %5191 = vrsqrt.f32 %v3076_v47 }
 0xdcd   :  { %v5190_v10 = vpop.eup %5189 }
 0xdce   :  { %v3093_v59 = vmul.f32 %v5190_v10, %v6984_v33  ;;  %v3504_v33 = vld [vmem:[%s7317_s13] sm:$0xff] }
 0xdcf   :  { %v4803_v51 = vpack.c.bf16 %v3505_v22, %v3504_v33 }
 0xdd0   :  { %v3102_v54 = vmul.f32 %v3093_v59, %v7349_v37 }
 0xdd1   :  { %4804 = vmatpush3.bf16.msra.mxu0 %v4803_v51 }
 0xdd2   :  { %v3111_v53 = vadd.f32 %v3102_v54, %v7350_v27  ;;  %4805 = vmatprep.subr.bf16.mxu0 %v7339_v56 }
 0xdd4   :  { %4614 = vmatmul.mubr.msk.f32.gmra.mrb[124].mxu1 %vm175_vm0, %v3111_v53 }
 0xdd5   :  { %v5192_v52 = vpop.eup %5191  ;;  %4616 = vmatprep.mubr.msk.f32.mxu1 %vm5249_vm2, %v7340_v48 }
 0xdd6   :  { %v3094_v11 = vmul.f32 %v5192_v52, %v6990_v45  ;;  %v3506_v45 = vld [vmem:[%s7317_s13 + $0x10] sm:$0xff] }
 0xdd7   :  { %v4806_v30 = vpack.c.bf16 %v3507_v63, %v3506_v45 }
 0xdd8   :  { %v3103_v20 = vmul.f32 %v3094_v11, %v7351_v26 }
 0xdd9   :  { %4807 = vmatpush3.bf16.msra.mxu0 %v4806_v30 }
 0xdda   :  { %v3112_v1 = vadd.f32 %v3103_v20, %v7352_v61  ;;  %4808 = vmatprep.subr.bf16.mxu0 %v7339_v56 }
 0xddc   :  { %4617 = vmatmul.mubr.msk.f32.gmra.mrb[126].mxu1 %vm175_vm0, %v3112_v1 }
 0xddd   :  { %4810 = vmatpush3.bf16.msra.mxu0 %v4809_v4 }
 0xdde   :  { %4811 = vmatprep.subr.bf16.mxu0 %v7339_v56 }
 0xde1   :  { %4813 = vmatpush3.bf16.msra.mxu0 %v4812_v16 }
 0xde2   :  { %4814 = vmatprep.subr.bf16.mxu0 %v7339_v56 }
 0xde5   :  { %4816 = vmatpush3.bf16.msra.mxu0 %v4815_v40 }
 0xde6   :  { %4817 = vmatprep.subr.bf16.mxu0 %v7339_v56 }
 0xde9   :  { %4819 = vmatpush3.bf16.msra.mxu0 %v4818_v35 }
 0xdea   :  { %4820 = vmatprep.subr.bf16.mxu0 %v7339_v56 }
 0xded   :  { %4822 = vmatpush3.bf16.msra.mxu0 %v4821_v6 }
 0xdee   :  { %4823 = vmatprep.subr.bf16.mxu0 %v7339_v56 }
 0xdf1   :  { %4825 = vmatpush3.bf16.msra.mxu0 %v4824_v13 }
 0xe72   :  { %v3217_v43 = vpop.f32.mrb[110].mxu1 }
 0xe73   :  { %v7108_v18 = vadd.f32 %v7105_v32, %v3217_v43  ;;  %v4594_v58 = vpop.f32.mrb[111].mxu1 }
 0xe75   :  { %v7111_v55 = vmul.f32 0.70710677, %v7108_v18 }
 0xe76   :  { %v3222_v60 = vpop.f32.mrb[112].mxu1 }
 0xe77   :  { %v3279_v15 = vand.u32 2147483647, %v7111_v55  ;;  %v7115_v57 = vadd.f32 %v7105_v32, %v3222_v60  ;;  %v4597_v56 = vpop.f32.mrb[113].mxu1  ;;  %vm3459_vm8 = vcmp.ge.f32.partialorder %v7111_v55, 0.0 }
 0xe79   :  { %v3288_v46 = vmul.f32 0.3275911, %v3279_v15  ;;  %v7118_v17 = vmul.f32 0.70710677, %v7115_v57  ;;  %v3405_v26 = vsub.f32 0.0, %v3279_v15 }
 0xe7a   :  { %v3227_v28 = vpop.f32.mrb[114].mxu1 }
 0xe7b   :  { %v3297_v2 = vadd.f32 1.0, %v3288_v46  ;;  %v3280_v0 = vand.u32 2147483647, %v7118_v17  ;;  %v4600_v39 = vpop.f32.mrb[115].mxu1  ;;  %v7122_v24 = vadd.f32 %v7105_v32, %v3227_v28  ;;  %v3414_v30 = vmul.f32 %v3405_v26, %v3279_v15 }
 0xe7c   :  { %vm3460_vm9 = vcmp.ge.f32.partialorder %v7118_v17, 0.0 }
 0xe7d   :  { %5193 = vrcp.f32 %v3297_v2  ;;  %v3289_v5 = vmul.f32 0.3275911, %v3280_v0  ;;  %v7125_v47 = vmul.f32 0.70710677, %v7122_v24  ;;  %v3406_v41 = vsub.f32 0.0, %v3280_v0 }
 0xe7e   :  { %v3232_v10 = vpop.f32.mrb[116].mxu1  ;;  %v3423_v35 = vmul.f32 1.442695, %v3414_v30 }
 0xe7f   :  { %v3298_v59 = vadd.f32 1.0, %v3289_v5  ;;  %v7128_v37 = vadd.f32 %v7105_v32, %v3232_v10  ;;  %v4603_v54 = vpop.f32.mrb[117].mxu1  ;;  %v3281_v27 = vand.u32 2147483647, %v7125_v47  ;;  %v3415_v14 = vmul.f32 %v3406_v41, %v3280_v0 }
 0xe80   :  { %vm3461_vm10 = vcmp.ge.f32.partialorder %v7125_v47, 0.0  ;;  %v3263_v47 = vmul.f32 0.5, %v7122_v24 }
 0xe81   :  { %5195 = vrcp.f32 %v3298_v59  ;;  %v7132_v53 = vmul.f32 0.70710677, %v7128_v37  ;;  %v3290_v52 = vmul.f32 0.3275911, %v3281_v27  ;;  %v3407_v13 = vsub.f32 0.0, %v3281_v27 }
 0xe82   :  { %v3237_v11 = vpop.f32.mrb[118].mxu1  ;;  %v3425_v5 = vmul.f32 1.442695, %v3415_v14 }
 0xe83   :  { %v3282_v20 = vand.u32 2147483647, %v7132_v53  ;;  %v7136_v61 = vadd.f32 %v7105_v32, %v3237_v11  ;;  %v4606_v1 = vpop.f32.mrb[119].mxu1  ;;  %v3299_v33 = vadd.f32 1.0, %v3290_v52  ;;  %v3416_v10 = vmul.f32 %v3407_v13, %v3281_v27 }
 0xe84   :  { %vm3462_vm11 = vcmp.ge.f32.partialorder %v7132_v53, 0.0 }
 0xe85   :  { %v3291_v22 = vmul.f32 0.3275911, %v3282_v20  ;;  %v7139_v51 = vmul.f32 0.70710677, %v7136_v61  ;;  %5197 = vrcp.f32 %v3299_v33  ;;  %v3408_v56 = vsub.f32 0.0, %v3282_v20 }
 0xe86   :  { %v3242_v45 = vpop.f32.mrb[120].mxu1 }
 0xe87   :  { %v7141_v63 = vpop.eup %5193  ;;  %v3300_v31 = vadd.f32 1.0, %v3291_v22  ;;  %v3283_v4 = vand.u32 2147483647, %v7139_v51  ;;  %v4609_v42 = vpop.f32.mrb[121].mxu1  ;;  %v7146_v16 = vadd.f32 %v7105_v32, %v3242_v45  ;;  %v3417_v1 = vmul.f32 %v3408_v56, %v3282_v20 }
 0xe88   :  { %v3324_v44 = vmul.f32 1.0614054, %v7141_v63  ;;  %v3427_v42 = vmul.f32 1.442695, %v3416_v10  ;;  %vm3463_vm12 = vcmp.ge.f32.partialorder %v7139_v51, 0.0 }
 0xe89   :  { %5199 = vrcp.f32 %v3300_v31  ;;  %v3292_v38 = vmul.f32 0.3275911, %v3283_v4  ;;  %v7149_v40 = vmul.f32 0.70710677, %v7146_v16  ;;  %v3409_v33 = vsub.f32 0.0, %v3283_v4 }
 0xe8a   :  { %v3333_v19 = vadd.f32 -1.4531521, %v3324_v44  ;;  %v3247_v21 = vpop.f32.mrb[122].mxu1 }
 0xe8b   :  { %v7151_v49 = vpop.eup %5195  ;;  %v3301_v12 = vadd.f32 1.0, %v3292_v38  ;;  %v7154_v6 = vadd.f32 %v7105_v32, %v3247_v21  ;;  %v4612_v36 = vpop.f32.mrb[123].mxu1  ;;  %v3284_v43 = vand.u32 2147483647, %v7149_v40  ;;  %v3429_v21 = vmul.f32 1.442695, %v3417_v1 }
 0xe8c   :  { %v3342_v8 = vmul.f32 %v7141_v63, %v3333_v19  ;;  %v3325_v58 = vmul.f32 1.0614054, %v7151_v49  ;;  %v3261_v36 = vmul.f32 0.5, %v7108_v18  ;;  %vm3464_vm13 = vcmp.ge.f32.partialorder %v7149_v40, 0.0 }
 0xe8d   :  { %5201 = vrcp.f32 %v3301_v12  ;;  %v7160_v60 = vmul.f32 0.70710677, %v7154_v6  ;;  %v3293_v46 = vmul.f32 0.3275911, %v3284_v43  ;;  %v3410_v44 = vsub.f32 0.0, %v3284_v43 }
 0xe8e   :  { %v3351_v15 = vadd.f32 1.4214138, %v3342_v8  ;;  %5203 = vpow2.f32 %v3423_v35  ;;  %v3334_v2 = vadd.f32 -1.4531521, %v3325_v58  ;;  %v3418_v35 = vmul.f32 %v3409_v33, %v3283_v4 }
 0xe8f   :  { %v3285_v28 = vand.u32 2147483647, %v7160_v60  ;;  %v7163_v0 = vpop.eup %5197  ;;  %v3302_v59 = vadd.f32 1.0, %v3293_v46  ;;  %vm3465_vm14 = vcmp.ge.f32.partialorder %v7160_v60, 0.0 }
 0xe90   :  { %v3360_v39 = vmul.f32 %v7141_v63, %v3351_v15  ;;  %v3343_v52 = vmul.f32 %v7151_v49, %v3334_v2  ;;  %v3326_v11 = vmul.f32 1.0614054, %v7163_v0  ;;  %v3431_v18 = vmul.f32 1.442695, %v3418_v35 }
 0xe91   :  { %v3294_v54 = vmul.f32 0.3275911, %v3285_v28  ;;  %5205 = vrcp.f32 %v3302_v59  ;;  %v3411_v8 = vsub.f32 0.0, %v3285_v28 }
 0xe92   :  { %v3369_v26 = vadd.f32 -0.28449672, %v3360_v39  ;;  %v3352_v30 = vadd.f32 1.4214138, %v3343_v52  ;;  %v3335_v41 = vadd.f32 -1.4531521, %v3326_v11  ;;  %5207 = vpow2.f32 %v3425_v5 }
 0xe93   :  { %v7168_v22 = vpop.eup %5199  ;;  %v3303_v45 = vadd.f32 1.0, %v3294_v54  ;;  %v3419_v39 = vmul.f32 %v3410_v44, %v3284_v43  ;;  %v3420_v52 = vmul.f32 %v3411_v8, %v3285_v28 }
 0xe94   :  { %v3378_v31 = vmul.f32 %v7141_v63, %v3369_v26  ;;  %v3327_v27 = vmul.f32 1.0614054, %v7168_v22  ;;  %v3361_v38 = vmul.f32 %v7151_v49, %v3352_v30  ;;  %v3344_v19 = vmul.f32 %v7163_v0, %v3335_v41 }
 0xe95   :  { %5209 = vrcp.f32 %v3303_v45  ;;  %v3433_v45 = vmul.f32 1.442695, %v3419_v39 }
 0xe96   :  { %v3387_v20 = vadd.f32 0.2548296, %v3378_v31  ;;  %v3336_v14 = vadd.f32 -1.4531521, %v3327_v27  ;;  %v3370_v13 = vadd.f32 -0.28449672, %v3361_v38  ;;  %5211 = vpow2.f32 %v3427_v42 }
 0xe97   :  { %v7174_v12 = vpop.eup %5201  ;;  %v3353_v58 = vadd.f32 1.4214138, %v3344_v19  ;;  %5213 = vpow2.f32 %v3429_v21  ;;  %v3435_v19 = vmul.f32 1.442695, %v3420_v52 }
 0xe98   :  { %v3396_v15 = vmul.f32 %v7141_v63, %v3387_v20  ;;  %v3345_v56 = vmul.f32 %v7168_v22, %v3336_v14  ;;  %v3328_v46 = vmul.f32 1.0614054, %v7174_v12  ;;  %v5204_v2 = vpop.eup %5203  ;;  %v3379_v4 = vmul.f32 %v7151_v49, %v3370_v13 }
 0xe99   :  { %v3362_v5 = vmul.f32 %v7163_v0, %v3353_v58  ;;  %5215 = vpow2.f32 %v3431_v18 }
 0xe9a   :  { %v3441_v10 = vmul.f32 %v5204_v2, %v3396_v15  ;;  %v3354_v59 = vadd.f32 1.4214138, %v3345_v56  ;;  %v3337_v54 = vadd.f32 -1.4531521, %v3328_v46  ;;  %v3388_v63 = vadd.f32 0.2548296, %v3379_v4 }
 0xe9b   :  { %v3371_v11 = vadd.f32 -0.28449672, %v3362_v5  ;;  %v7183_v26 = vpop.eup %5205  ;;  %5217 = vpow2.f32 %v3433_v45 }
 0xe9c   :  { %v3450_v1 = vsub.f32 1.0, %v3441_v10  ;;  %v3363_v33 = vmul.f32 %v7168_v22, %v3354_v59  ;;  %v3346_v43 = vmul.f32 %v7174_v12, %v3337_v54  ;;  %v3397_v30 = vmul.f32 %v7151_v49, %v3388_v63  ;;  %v5208_v42 = vpop.eup %5207 }
 0xe9d   :  { %v3380_v41 = vmul.f32 %v7163_v0, %v3371_v11  ;;  %v3329_v31 = vmul.f32 1.0614054, %v7183_v26  ;;  %5219 = vpow2.f32 %v3435_v19 }
 0xe9e   :  { %v3468_v28 = vsub.f32 0.0, %v3450_v1  ;;  %v3372_v27 = vadd.f32 -0.28449672, %v3363_v33  ;;  %v3355_v44 = vadd.f32 1.4214138, %v3346_v43  ;;  %v3442_v20 = vmul.f32 %v5208_v42, %v3397_v30 }
 0xe9f   :  { %v7191_v38 = vpop.eup %5209  ;;  %v3389_v21 = vadd.f32 0.2548296, %v3380_v41  ;;  %v3338_v35 = vadd.f32 -1.4531521, %v3329_v31 }
 0xea0   :  { %v3477_v14 = vsel %vm3459_vm8, %v3450_v1, %v3468_v28  ;;  %v3381_v49 = vmul.f32 %v7168_v22, %v3372_v27  ;;  %v3364_v8 = vmul.f32 %v7174_v12, %v3355_v44  ;;  %v3330_v13 = vmul.f32 1.0614054, %v7191_v38  ;;  %v5212_v2 = vpop.eup %5211 }
 0xea1   :  { %v3486_v58 = vadd.f32 1.0, %v3477_v14  ;;  %v3451_v15 = vsub.f32 1.0, %v3442_v20  ;;  %v3398_v56 = vmul.f32 %v7163_v0, %v3389_v21  ;;  %v3347_v46 = vmul.f32 %v7183_v26, %v3338_v35  ;;  %v5214_v11 = vpop.eup %5213 }
 0xea2   :  { %v3390_v39 = vadd.f32 0.2548296, %v3381_v49  ;;  %v3373_v4 = vadd.f32 -0.28449672, %v3364_v8  ;;  %v3339_v5 = vadd.f32 -1.4531521, %v3330_v13 }
 0xea3   :  { %v3495_v10 = vmul.f32 %v3486_v58, %v3261_v36  ;;  %v3469_v18 = vsub.f32 0.0, %v3451_v15  ;;  %v3443_v55 = vmul.f32 %v5212_v2, %v3398_v56  ;;  %v3356_v59 = vadd.f32 1.4214138, %v3347_v46  ;;  %v5216_v42 = vpop.eup %5215 }
 0xea4   :  { %v3399_v54 = vmul.f32 %v7168_v22, %v3390_v39  ;;  %v3382_v52 = vmul.f32 %v7174_v12, %v3373_v4  ;;  %v3348_v63 = vmul.f32 %v7191_v38, %v3339_v5  ;;  %v3262_v0 = vmul.f32 0.5, %v7115_v57 }
 0xea5   :  { %4652 = vmatmul.mubr.f32.vlgmr.msra.gmra.mrb[124].mxu0 %v3495_v10  ;;  %v3478_v1 = vsel %vm3460_vm9, %v3451_v15, %v3469_v18  ;;  %v3452_v33 = vsub.f32 1.0, %v3443_v55  ;;  %v3365_v36 = vmul.f32 %v7183_v26, %v3356_v59  ;;  %v3264_v15 = vmul.f32 0.5, %v7128_v37  ;;  %v5218_v10 = vpop.eup %5217 }
 0xea6   :  { %4654 = vmatprep.mubr.msk.f32.mxu0 %vm5249_vm2, %v7340_v48  ;;  %v3487_v43 = vadd.f32 1.0, %v3478_v1  ;;  %v3444_v45 = vmul.f32 %v5214_v11, %v3399_v54  ;;  %v3391_v22 = vadd.f32 0.2548296, %v3382_v52  ;;  %v3357_v30 = vadd.f32 1.4214138, %v3348_v63 }
 0xea7   :  { %v3252_v41 = vpop.f32.mrb[124].mxu1  ;;  %v3470_v31 = vsub.f32 0.0, %v3452_v33  ;;  %v3374_v57 = vadd.f32 -0.28449672, %v3365_v36  ;;  %v5220_v11 = vpop.eup %5219 }
 0xea8   :  { %v7211_v17 = vadd.f32 %v7105_v32, %v3252_v41  ;;  %v4615_v28 = vpop.f32.mrb[125].mxu1  ;;  %v3496_v27 = vmul.f32 %v3487_v43, %v3262_v0  ;;  %v3453_v44 = vsub.f32 1.0, %v3444_v45  ;;  %v3400_v20 = vmul.f32 %v7174_v12, %v3391_v22 }
 0xea9   :  { %v3479_v21 = vsel %vm3461_vm10, %v3452_v33, %v3470_v31  ;;  %v3383_v35 = vmul.f32 %v7183_v26, %v3374_v57  ;;  %v3366_v14 = vmul.f32 %v7191_v38, %v3357_v30  ;;  %v3265_v43 = vmul.f32 0.5, %v7136_v61 }
 0xeaa   :  { %v7218_v19 = vmul.f32 0.70710677, %v7211_v17  ;;  %4655 = vmatmul.mubr.f32.gmra.mrb[126].mxu0 %v3496_v27  ;;  %v3488_v49 = vadd.f32 1.0, %v3479_v21  ;;  %v3471_v8 = vsub.f32 0.0, %v3453_v44  ;;  %v3445_v13 = vmul.f32 %v5216_v42, %v3400_v20 }
 0xeab   :  { %4657 = vmatprep.mubr.msk.f32.mxu0 %vm5249_vm2, %v7340_v48  ;;  %v3392_v12 = vadd.f32 0.2548296, %v3383_v35  ;;  %v3375_v58 = vadd.f32 -0.28449672, %v3366_v14  ;;  %v3266_v31 = vmul.f32 0.5, %v7146_v16  ;;  %v3267_v20 = vmul.f32 0.5, %v7154_v6 }
 0xeac   :  { %v3286_v56 = vand.u32 2147483647, %v7218_v19  ;;  %v3497_v46 = vmul.f32 %v3488_v49, %v3263_v47  ;;  %v3480_v24 = vsel %vm3462_vm11, %v3453_v44, %v3471_v8  ;;  %v3454_v39 = vsub.f32 1.0, %v3445_v13 }
 0xead   :  { %v3489_v2 = vadd.f32 1.0, %v3480_v24  ;;  %v3401_v4 = vmul.f32 %v7183_v26, %v3392_v12  ;;  %v3384_v5 = vmul.f32 %v7191_v38, %v3375_v58  ;;  %vm3466_vm15 = vcmp.ge.f32.partialorder %v7218_v19, 0.0 }
 0xeae   :  { %v3295_v53 = vmul.f32 0.3275911, %v3286_v56  ;;  %4658 = vmatmul.mubr.f32.gmra.mrb[128].mxu0 %v3497_v46  ;;  %v3472_v59 = vsub.f32 0.0, %v3454_v39  ;;  %v3412_v61 = vsub.f32 0.0, %v3286_v56 }
 0xeaf   :  { %v3257_v18 = vpop.f32.mrb[126].mxu1  ;;  %4660 = vmatprep.mubr.msk.f32.mxu0 %vm5249_vm2, %v7340_v48  ;;  %v3498_v55 = vmul.f32 %v3489_v2, %v3264_v15  ;;  %v3446_v37 = vmul.f32 %v5218_v10, %v3401_v4  ;;  %v3393_v54 = vadd.f32 0.2548296, %v3384_v5 }
 0xeb0   :  { %v3304_v52 = vadd.f32 1.0, %v3295_v53  ;;  %v7231_v63 = vadd.f32 %v7105_v32, %v3257_v18  ;;  %v4618_v26 = vpop.f32.mrb[127].mxu1  ;;  %v3481_v0 = vsel %vm3463_vm12, %v3454_v39, %v3472_v59  ;;  %v3421_v16 = vmul.f32 %v3412_v61, %v3286_v56 }
 0xeb1   :  { %v3455_v1 = vsub.f32 1.0, %v3446_v37  ;;  %v3402_v33 = vmul.f32 %v7191_v38, %v3393_v54  ;;  %v3490_v51 = vadd.f32 1.0, %v3481_v0 }
 0xeb2   :  { %5221 = vrcp.f32 %v3304_v52  ;;  %v7235_v36 = vmul.f32 0.70710677, %v7231_v63  ;;  %4661 = vmatmul.mubr.f32.gmra.mrb[130].mxu0 %v3498_v55  ;;  %v3437_v49 = vmul.f32 1.442695, %v3421_v16 }
 0xeb3   :  { %4663 = vmatprep.mubr.msk.f32.mxu0 %vm5249_vm2, %v7340_v48  ;;  %v3473_v45 = vsub.f32 0.0, %v3455_v1  ;;  %v3447_v32 = vmul.f32 %v5220_v11, %v3402_v33  ;;  %v3499_v30 = vmul.f32 %v3490_v51, %v3265_v43  ;;  %v3268_v43 = vmul.f32 0.5, %v7211_v17  ;;  %v3837_v17 = vld [vmem:[%s7319_s14] ss:$0 sm:$0xff] }
 0xeb4   :  { %v3287_v22 = vand.u32 2147483647, %v7235_v36  ;;  %vm3467_vm3 = vcmp.ge.f32.partialorder %v7235_v36, 0.0 }
 0xeb5   :  { %v3482_v41 = vsel %vm3464_vm13, %v3455_v1, %v3473_v45  ;;  %v3456_v38 = vsub.f32 1.0, %v3447_v32 }
 0xeb6   :  { %v3296_v57 = vmul.f32 0.3275911, %v3287_v22  ;;  %v3491_v42 = vadd.f32 1.0, %v3482_v41  ;;  %4664 = vmatmul.mubr.f32.gmra.mrb[132].mxu0 %v3499_v30  ;;  %v3413_v8 = vsub.f32 0.0, %v3287_v22 }
 0xeb7   :  { %v3474_v28 = vsub.f32 0.0, %v3456_v38  ;;  %4666 = vmatprep.mubr.msk.f32.mxu0 %vm5249_vm2, %v7340_v48 }
 0xeb8   :  { %v3305_v27 = vadd.f32 1.0, %v3296_v57  ;;  %v3500_v44 = vmul.f32 %v3491_v42, %v3266_v31  ;;  %v3422_v58 = vmul.f32 %v3413_v8, %v3287_v22 }
 0xeb9   :  { %v3483_v40 = vsel %vm3465_vm14, %v3456_v38, %v3474_v28  ;;  %v3269_v38 = vmul.f32 0.5, %v7231_v63 }
 0xeba   :  { %5223 = vrcp.f32 %v3305_v27  ;;  %v3492_v21 = vadd.f32 1.0, %v3483_v40  ;;  %4667 = vmatmul.mubr.f32.gmra.mrb[134].mxu0 %v3500_v44  ;;  %v3439_v2 = vmul.f32 1.442695, %v3422_v58 }
 0xebb   :  { %4669 = vmatprep.mubr.msk.f32.mxu0 %vm5249_vm2, %v7340_v48  ;;  %5225 = vpow2.f32 %v3437_v49 }
 0xebc   :  { %v5222_v35 = vpop.eup %5221  ;;  %v3501_v14 = vmul.f32 %v3492_v21, %v3267_v20  ;;  %5227 = vpow2.f32 %v3439_v2 }
 0xebd   :  { %v3331_v47 = vmul.f32 1.0614054, %v5222_v35 }
 0xebe   :  { %4670 = vmatmul.mubr.f32.gmra.mrb[136].mxu0 %v3501_v14 }
 0xebf   :  { %v3340_v60 = vadd.f32 -1.4531521, %v3331_v47  ;;  %4672 = vmatprep.mubr.msk.f32.mxu0 %vm5249_vm2, %v7340_v48 }
 0xec1   :  { %v3349_v13 = vmul.f32 %v5222_v35, %v3340_v60 }
 0xec3   :  { %v3358_v12 = vadd.f32 1.4214138, %v3349_v13 }
 0xec4   :  { %v5224_v6 = vpop.eup %5223 }
 0xec5   :  { %v3367_v15 = vmul.f32 %v5222_v35, %v3358_v12  ;;  %v3332_v46 = vmul.f32 1.0614054, %v5224_v6  ;;  %v5226_v55 = vpop.eup %5225 }
 0xec6   :  { %v5228_v33 = vpop.eup %5227 }
 0xec7   :  { %v3376_v56 = vadd.f32 -0.28449672, %v3367_v15  ;;  %v3341_v24 = vadd.f32 -1.4531521, %v3332_v46 }
 0xec9   :  { %v3385_v39 = vmul.f32 %v5222_v35, %v3376_v56  ;;  %v3350_v4 = vmul.f32 %v5224_v6, %v3341_v24 }
 0xecb   :  { %v3394_v5 = vadd.f32 0.2548296, %v3385_v39  ;;  %v3359_v10 = vadd.f32 1.4214138, %v3350_v4 }
 0xecd   :  { %v3403_v53 = vmul.f32 %v5222_v35, %v3394_v5  ;;  %v3368_v18 = vmul.f32 %v5224_v6, %v3359_v10 }
 0xecf   :  { %v3448_v59 = vmul.f32 %v5226_v55, %v3403_v53  ;;  %v3377_v37 = vadd.f32 -0.28449672, %v3368_v18 }
 0xed1   :  { %v3457_v54 = vsub.f32 1.0, %v3448_v59  ;;  %v3386_v52 = vmul.f32 %v5224_v6, %v3377_v37 }
 0xed3   :  { %v3475_v26 = vsub.f32 0.0, %v3457_v54  ;;  %v3395_v11 = vadd.f32 0.2548296, %v3386_v52 }
 0xed5   :  { %v3484_v0 = vsel %vm3466_vm15, %v3457_v54, %v3475_v26  ;;  %v3404_v1 = vmul.f32 %v5224_v6, %v3395_v11 }
 0xed6   :  { %v3493_v51 = vadd.f32 1.0, %v3484_v0 }
 0xed7   :  { %v3449_v45 = vmul.f32 %v5228_v33, %v3404_v1 }
 0xed8   :  { %v3502_v32 = vmul.f32 %v3493_v51, %v3268_v43 }
 0xed9   :  { %v3458_v22 = vsub.f32 1.0, %v3449_v45 }
 0xeda   :  { %4673 = vmatmul.mubr.f32.gmra.mrb[138].mxu0 %v3502_v32 }
 0xedb   :  { %4675 = vmatprep.mubr.msk.f32.mxu0 %vm5249_vm2, %v7340_v48  ;;  %v3476_v30 = vsub.f32 0.0, %v3458_v22 }
 0xedd   :  { %v3485_v41 = vsel %vm3467_vm3, %v3458_v22, %v3476_v30 }
 0xede   :  { %v3494_v19 = vadd.f32 1.0, %v3485_v41 }
 0xee0   :  { %v3503_v31 = vmul.f32 %v3494_v19, %v3269_v38 }
 0xee2   :  { %4676 = vmatmul.mubr.f32.gmra.mrb[140].mxu0 %v3503_v31 }
 0xf78   :  { %v3586_v57 = vpop.f32.mrb[124].mxu0 }
 0xf79   :  { %v3630_v42 = vadd.f32 %v3586_v57, %v6852_v34  ;;  %v4653_v28 = vpop.f32.mrb[125].mxu0 }
 0xf7b   :  { %v3646_v61 = vadd.f32 %v3837_v17, %v3630_v42 }
 0xf7d   :  { %3655 = vst.msk [vmem:[%s7320_s15] sm:$0xff] %vm175_vm0, %v3646_v61  ;;  %v3591_v48 = vpop.f32.mrb[126].mxu0 }
 0xf7e   :  { %v3631_v63 = vadd.f32 %v3591_v48, %v6861_v7  ;;  %v4656_v36 = vpop.f32.mrb[127].mxu0 }
 0xf80   :  { %v3647_v27 = vadd.f32 %v3837_v17, %v3631_v63 }
 0xf81   :  { %v3596_v44 = vpop.f32.mrb[128].mxu0 }
 0xf82   :  { %3656 = vst.msk [vmem:[%s7320_s15 + $0x8] sm:$0xff] %vm175_vm0, %v3647_v27  ;;  %v3632_v34 = vadd.f32 %v3596_v44, %v6870_v29  ;;  %v4659_v40 = vpop.f32.mrb[129].mxu0 }
 0xf84   :  { %v3648_v20 = vadd.f32 %v3837_v17, %v3632_v34 }
 0xf85   :  { %v3601_v21 = vpop.f32.mrb[130].mxu0 }
 0xf86   :  { %3657 = vst.msk [vmem:[%s7320_s15 + $0x10] sm:$0xff] %vm175_vm0, %v3648_v20  ;;  %v3633_v7 = vadd.f32 %v3601_v21, %v6879_v25  ;;  %v4662_v35 = vpop.f32.mrb[131].mxu0 }
 0xf88   :  { %v3649_v16 = vadd.f32 %v3837_v17, %v3633_v7 }
 0xf89   :  { %v3606_v14 = vpop.f32.mrb[132].mxu0 }
 0xf8a   :  { %3658 = vst.msk [vmem:[%s7320_s15 + $0x18] sm:$0xff] %vm175_vm0, %v3649_v16  ;;  %v3634_v29 = vadd.f32 %v3606_v14, %v6888_v23  ;;  %v4665_v47 = vpop.f32.mrb[133].mxu0 }
 0xf8c   :  { %v3650_v60 = vadd.f32 %v3837_v17, %v3634_v29 }
 0xf8d   :  { %v3611_v49 = vpop.f32.mrb[134].mxu0 }
 0xf8e   :  { %3659 = vst.msk [vmem:[%s7320_s15 + $0x20] sm:$0xff] %vm175_vm0, %v3650_v60  ;;  %v3635_v25 = vadd.f32 %v3611_v49, %v6897_v3  ;;  %v4668_v8 = vpop.f32.mrb[135].mxu0 }
 0xf90   :  { %v3651_v13 = vadd.f32 %v3837_v17, %v3635_v25 }
 0xf91   :  { %v3616_v12 = vpop.f32.mrb[136].mxu0 }
 0xf92   :  { %3660 = vst.msk [vmem:[%s7320_s15 + $0x28] sm:$0xff] %vm175_vm0, %v3651_v13  ;;  %v3636_v23 = vadd.f32 %v3616_v12, %v6906_v50  ;;  %v4671_v6 = vpop.f32.mrb[137].mxu0 }
 0xf94   :  { %v3652_v58 = vadd.f32 %v3837_v17, %v3636_v23 }
 0xf96   :  { %3661 = vst.msk [vmem:[%s7320_s15 + $0x30] sm:$0xff] %vm175_vm0, %v3652_v58 }
 0xfad   :  { %v3621_v15 = vpop.f32.mrb[138].mxu0 }
 0xfae   :  { %v3637_v3 = vadd.f32 %v3621_v15, %v6915_v62  ;;  %v4674_v46 = vpop.f32.mrb[139].mxu0 }
 0xfb0   :  { %v3653_v56 = vadd.f32 %v3837_v17, %v3637_v3 }
 0xfb2   :  { %3662 = vst.msk [vmem:[%s7320_s15 + $0x38] sm:$0xff] %vm175_vm0, %v3653_v56 }
 0xfb5   :  { %v3626_v24 = vpop.f32.mrb[140].mxu0 }
 0xfb6   :  { %v3638_v50 = vadd.f32 %v3626_v24, %v6924_v9  ;;  %v4677_v2 = vpop.f32.mrb[141].mxu0 }
 0xfb8   :  { %v3654_v39 = vadd.f32 %v3837_v17, %v3638_v50 }
 0xfba   :  { %3663 = vst.msk [vmem:[%s7320_s15 + $0x40] sm:$0xf] %vm200_vm1, %v3654_v39 }

</bundles_post_ra>
